<compile_context>
chip_gen: v6e
topology: v6e:2x2x1
jax: 0.10.0
libtpu: 0.0.40
codegen_flags: <defaults>
</compile_context>

<pallas_src>
import functools

import jax
import jax.numpy as jnp
from jax.experimental import pallas as pl
from jax.experimental.pallas import tpu as pltpu

BN_EPS = 1e-5
LANE = 128
PADL = 128          # left margin: keeps all 9 tap windows in-bounds, 128-aligned


# ----------------------------- geometry helpers -----------------------------


def make_geom(n, h, w):
    hp, wp = h + 2, w + 2                      # zero-padded spatial extent
    hpwp = hp * wp
    npix_raw = n * hpwp                        # tightly packed padded images
    npix = ((npix_raw + LANE - 1) // LANE) * LANE   # lane-aligned pixel region
    lw = PADL + npix + LANE                    # right margin 128 >= wp+1
    assert wp + 1 <= LANE
    return dict(n=n, h=h, w=w, hp=hp, wp=wp, hpwp=hpwp,
                npix_raw=npix_raw, npix=npix, lw=lw)


def make_mask(geom):
    """(1, npix) f32: 1.0 at real pixels, 0.0 on pad ring / alignment tail."""
    m = jnp.zeros((geom["hp"], geom["wp"]), jnp.float32)
    m = m.at[1:geom["h"] + 1, 1:geom["w"] + 1].set(1.0)
    m = jnp.tile(m.reshape(1, geom["hpwp"]), (1, geom["n"]))
    return jnp.pad(m, ((0, 0), (0, geom["npix"] - geom["npix_raw"])))


def to_internal(x_nchw, cpad, geom):
    """NCHW -> (Cpad, Lw) bf16, batch folded into lanes, zero ring/margins."""
    n, c, _, _ = x_nchw.shape
    xp = jnp.pad(x_nchw.astype(jnp.float32),
                 ((0, 0), (0, cpad - c), (1, 1), (1, 1)))       # (n,cpad,hp,wp)
    xf = xp.reshape(n, cpad, geom["hpwp"]).transpose(1, 0, 2)
    xf = xf.reshape(cpad, geom["npix_raw"])
    xf = jnp.pad(xf, ((0, 0), (PADL, geom["lw"] - PADL - geom["npix_raw"])))
    return xf.astype(jnp.bfloat16)                              # (cpad, lw)


def from_internal(out_int, geom):
    """(Co, npix) internal layout -> NCHW f32."""
    co = out_int.shape[0]
    core = out_int[:, :geom["npix_raw"]]
    core = core.reshape(co, geom["n"], geom["hp"], geom["wp"])
    core = core[:, :, 1:geom["h"] + 1, 1:geom["w"] + 1]
    return jnp.transpose(core, (1, 0, 2, 3))                    # (n, co, h, w)


# ------------------------------ fused Pallas kernel --------------------------


def _resnet_kernel(x_ref, w_ref, g_ref, b_ref, m_ref, out_ref, act_ref,
                   *, wp, npix, inv_count):
    # Static lane offsets of the 9 conv taps (kh, kw) relative to a pixel.
    offs = [(kh - 1) * wp + (kw - 1) for kh in range(3) for kw in range(3)]
    mask = m_ref[...]                                    # (1, npix) f32

    act_ref[...] = jnp.zeros_like(act_ref)               # zero margins/ring once

    def stack_taps(xb):
        """(Cpad, Lw) bf16 -> (9*Cpad, npix) bf16: 9 lane-shifted windows on K."""
        return jnp.concatenate(
            [xb[:, PADL + d:PADL + d + npix] for d in offs], axis=0)

    def conv_bn_relu(xk, li):
        """Conv2d(3x3,p1) + BatchNorm2d(train, global stats) + ReLU, one layer.

        One stacked-K MXU matmul; conv bias folded out (BN mean cancels it).
        Returns (Co, npix) f32 with the pad ring / tail re-zeroed.
        """
        acc = jnp.dot(w_ref[li], xk, preferred_element_type=jnp.float32)
        am = acc * mask                                  # exclude ring/tail
        mean = jnp.sum(am, axis=1, keepdims=True) * inv_count
        msq = jnp.sum(am * acc, axis=1, keepdims=True) * inv_count
        var = jnp.maximum(msq - mean * mean, 0.0)        # biased batch variance
        scale = g_ref[li] * jax.lax.rsqrt(var + BN_EPS)  # EUP rsqrt
        shift = b_ref[li] - mean * scale
        return jnp.maximum(acc * scale + shift, 0.0) * mask

    def commit(y):
        """Store a (Co, npix) activation as bf16; return full-width (Co, Lw)."""
        act_ref[:, PADL:PADL + npix] = y.astype(jnp.bfloat16)   # aligned store
        return act_ref[...]

    xk_in = stack_taps(x_ref[...])                       # shared by both stems
    out = conv_bn_relu(xk_in, 0)                         # self.Conv
    xsk = conv_bn_relu(xk_in, 1)                         # self.Conv_x

    li = 2
    for _ in range(4):                                   # blk1..blk4 (identity skip)
        mid = conv_bn_relu(stack_taps(commit(out)), li)
        li += 1
        y = conv_bn_relu(stack_taps(commit(mid)), li)
        li += 1
        out = jnp.maximum(y + out, 0.0)                  # Relu(Conv(x) + x)

    top = jnp.maximum(xsk + out, 0.0)                    # Relu(x + out)
    out_ref[...] = conv_bn_relu(stack_taps(commit(top)), 10)   # self.out


# ------------------------------ JAX wrapper -----------------------------------


@jax.jit
def resnet_forward(x_nchw, w_all, g_all, b_all):
    n, _, h, w = x_nchw.shape
    co = w_all.shape[1]
    cpad = w_all.shape[2] // 9
    geom = make_geom(n, h, w)

    x_int = to_internal(x_nchw, cpad, geom)              # (cpad, lw) bf16
    mask = make_mask(geom)                               # (1, npix) f32
    inv_count = 1.0 / float(n * h * w)

    out_int = pl.pallas_call(
        functools.partial(_resnet_kernel, wp=geom["wp"], npix=geom["npix"],
                          inv_count=inv_count),
        out_shape=jax.ShapeDtypeStruct((co, geom["npix"]), jnp.float32),
        scratch_shapes=[pltpu.VMEM((cpad, geom["lw"]), jnp.bfloat16)],
        compiler_params=pltpu.CompilerParams(vmem_limit_bytes=32 * 1024 * 1024),
    )(x_int, w_all, g_all, b_all, mask)

    return from_internal(out_int, geom)                  # NCHW f32


# -------------------------------- parameters ----------------------------------


def _conv_bn_params(key, ci, co):
    k1, k2 = jax.random.split(key)
    return {
        "w": jax.random.normal(k1, (co, ci, 3, 3), jnp.float32) * 0.1,
        # bias kept for structure fidelity but folded out (BN-train cancels it)
        "b": jax.random.normal(k2, (co,), jnp.float32) * 0.1,
        "gamma": jnp.ones((co,), jnp.float32),
        "beta": jnp.zeros((co,), jnp.float32),
    }


def init_resnet_params(key, in_channel, out_channel):
    keys = jax.random.split(key, 11)
    params = {
        "conv": _conv_bn_params(keys[0], in_channel, out_channel),
        "conv_x": _conv_bn_params(keys[1], in_channel, out_channel),
        "out": _conv_bn_params(keys[2], out_channel, out_channel),
    }
    for i in range(4):
        params[f"blk{i + 1}"] = {
            "c1": _conv_bn_params(keys[3 + 2 * i], out_channel, out_channel),
            "c2": _conv_bn_params(keys[4 + 2 * i], out_channel, out_channel),
        }
    return params


def prepare_params(params, in_channel, out_channel):
    """One-time weight preprocessing: (Co,Ci,3,3) f32 -> stacked (11,Co,9*Cpad) bf16.

    Row layout of each (Co, 9*Cpad) weight matches the in-kernel tap stacking:
    row index = (kh*3 + kw) * Cpad + ci.  Input channels padded to Cpad with
    zeros for the two stems (Ci=in_channel < Cpad).
    """
    assert in_channel <= out_channel
    cpad = out_channel

    def prep_w(p):
        w = p["w"]
        ci = w.shape[1]
        wpad = jnp.pad(w, ((0, 0), (0, cpad - ci), (0, 0), (0, 0)))
        return jnp.transpose(wpad, (0, 2, 3, 1)).reshape(out_channel, 9 * cpad)

    layers = [params["conv"], params["conv_x"]]
    for i in range(1, 5):
        layers += [params[f"blk{i}"]["c1"], params[f"blk{i}"]["c2"]]
    layers.append(params["out"])

    w_all = jnp.stack([prep_w(p) for p in layers]).astype(jnp.bfloat16)
    g_all = jnp.stack([p["gamma"].reshape(out_channel, 1) for p in layers])
    b_all = jnp.stack([p["beta"].reshape(out_channel, 1) for p in layers])
    return w_all, g_all.astype(jnp.float32), b_all.astype(jnp.float32)


# ----------------------------------- main --------------------------------------


if __name__ == "__main__":
    key = jax.random.PRNGKey(0)
    k_x, k_p = jax.random.split(key)

    batch, in_channel, out_channel, spatial = 2, 4, 16, 16
    x = jax.random.normal(k_x, (batch, in_channel, spatial, spatial), jnp.float32)

    params = init_resnet_params(k_p, in_channel, out_channel)
    w_all, g_all, b_all = prepare_params(params, in_channel, out_channel)

    y = resnet_forward(x, w_all, g_all, b_all)
    jax.block_until_ready(y)

    assert y.shape == (batch, out_channel, spatial, spatial), y.shape
    assert bool(jnp.all(jnp.isfinite(y)))
    print("KERNEL_OK")
</pallas_src>

<mosaic_0001>
module attributes {stable_mosaic.version = 11 : i64} {
  func.func @_resnet_kernel(%arg0: memref<16x1024xbf16, #tpu.memory_space<vmem>>, %arg1: memref<11x16x144xbf16, #tpu.memory_space<vmem>>, %arg2: memref<11x16x1xf32, #tpu.memory_space<vmem>>, %arg3: memref<11x16x1xf32, #tpu.memory_space<vmem>>, %arg4: memref<1x768xf32, #tpu.memory_space<vmem>>, %arg5: memref<16x768xf32, #tpu.memory_space<vmem>>, %arg6: memref<16x1024xbf16, #tpu.memory_space<vmem>>) attributes {dimension_semantics = [], scalar_prefetch = 0 : i64, scratch_operands = 1 : i64, tpu.core_type = #tpu.core_type<tc>} {
    %c0 = arith.constant 0 : index
    %c0_0 = arith.constant 0 : index
    %0 = vector.load %arg4[%c0, %c0_0] : memref<1x768xf32, #tpu.memory_space<vmem>>, vector<1x768xf32>
    %cst = arith.constant 0.000000e+00 : bf16
    %1 = vector.broadcast %cst : bf16 to vector<16x1024xbf16>
    %c0_1 = arith.constant 0 : index
    %c0_2 = arith.constant 0 : index
    %2 = vector.load %arg6[%c0_1, %c0_2] : memref<16x1024xbf16, #tpu.memory_space<vmem>>, vector<16x1024xbf16>
    tpu.vector_store %arg6[%c0_1, %c0_2], %1 {strides = array<i32>} : memref<16x1024xbf16, #tpu.memory_space<vmem>>, vector<16x1024xbf16>,
    %c0_3 = arith.constant 0 : index
    %c0_4 = arith.constant 0 : index
    %3 = vector.load %arg0[%c0_3, %c0_4] : memref<16x1024xbf16, #tpu.memory_space<vmem>>, vector<16x1024xbf16>
    %4 = vector.extract_strided_slice %3 {offsets = [0, 109], sizes = [16, 768], strides = [1, 1]} : vector<16x1024xbf16> to vector<16x768xbf16>
    %5 = vector.extract_strided_slice %3 {offsets = [0, 110], sizes = [16, 768], strides = [1, 1]} : vector<16x1024xbf16> to vector<16x768xbf16>
    %6 = vector.extract_strided_slice %3 {offsets = [0, 111], sizes = [16, 768], strides = [1, 1]} : vector<16x1024xbf16> to vector<16x768xbf16>
    %7 = vector.extract_strided_slice %3 {offsets = [0, 127], sizes = [16, 768], strides = [1, 1]} : vector<16x1024xbf16> to vector<16x768xbf16>
    %8 = vector.extract_strided_slice %3 {offsets = [0, 128], sizes = [16, 768], strides = [1, 1]} : vector<16x1024xbf16> to vector<16x768xbf16>
    %9 = vector.extract_strided_slice %3 {offsets = [0, 129], sizes = [16, 768], strides = [1, 1]} : vector<16x1024xbf16> to vector<16x768xbf16>
    %10 = vector.extract_strided_slice %3 {offsets = [0, 145], sizes = [16, 768], strides = [1, 1]} : vector<16x1024xbf16> to vector<16x768xbf16>
    %11 = vector.extract_strided_slice %3 {offsets = [0, 146], sizes = [16, 768], strides = [1, 1]} : vector<16x1024xbf16> to vector<16x768xbf16>
    %12 = vector.extract_strided_slice %3 {offsets = [0, 147], sizes = [16, 768], strides = [1, 1]} : vector<16x1024xbf16> to vector<16x768xbf16>
    %13 = tpu.concatenate %4, %5, %6, %7, %8, %9, %10, %11, %12 in 0 : vector<16x768xbf16>, vector<16x768xbf16>, vector<16x768xbf16>, vector<16x768xbf16>, vector<16x768xbf16>, vector<16x768xbf16>, vector<16x768xbf16>, vector<16x768xbf16>, vector<16x768xbf16> -> vector<144x768xbf16>
    %c0_5 = arith.constant 0 : index
    %c0_6 = arith.constant 0 : index
    %c0_7 = arith.constant 0 : index
    %14 = vector.load %arg1[%c0_5, %c0_6, %c0_7] : memref<11x16x144xbf16, #tpu.memory_space<vmem>>, vector<1x16x144xbf16>
    %15 = vector.shape_cast %14 : vector<1x16x144xbf16> to vector<16x144xbf16>
    %cst_8 = arith.constant dense<0.000000e+00> : vector<16x768xf32>
    %16 = tpu.matmul %15, %13, %cst_8 {dimension_numbers = #tpu.dot_dimension_numbers<[1], [0], [0], [1], [0, 0, 1, 1], [], []>} : vector<16x144xbf16>, vector<144x768xbf16>, vector<16x768xf32> -> vector<16x768xf32>
    %17 = vector.broadcast %0 : vector<1x768xf32> to vector<16x768xf32>
    %18 = arith.mulf %16, %17 : vector<16x768xf32>
    %cst_9 = arith.constant dense<0.000000e+00> : vector<16xf32>
    %19 = vector.multi_reduction <add>, %18, %cst_9 [1] : vector<16x768xf32> to vector<16xf32>
    %20 = vector.shape_cast %19 : vector<16xf32> to vector<16x1xf32>
    %cst_10 = arith.constant 0.001953125 : f32
    %21 = vector.broadcast %cst_10 : f32 to vector<16x1xf32>
    %22 = arith.mulf %20, %21 : vector<16x1xf32>
    %23 = arith.mulf %18, %16 : vector<16x768xf32>
    %cst_11 = arith.constant dense<0.000000e+00> : vector<16xf32>
    %24 = vector.multi_reduction <add>, %23, %cst_11 [1] : vector<16x768xf32> to vector<16xf32>
    %25 = vector.shape_cast %24 : vector<16xf32> to vector<16x1xf32>
    %cst_12 = arith.constant 0.001953125 : f32
    %26 = vector.broadcast %cst_12 : f32 to vector<16x1xf32>
    %27 = arith.mulf %25, %26 : vector<16x1xf32>
    %28 = arith.mulf %22, %22 : vector<16x1xf32>
    %29 = arith.subf %27, %28 : vector<16x1xf32>
    %cst_13 = arith.constant 0.000000e+00 : f32
    %30 = vector.broadcast %cst_13 : f32 to vector<16x1xf32>
    %31 = arith.maximumf %29, %30 : vector<16x1xf32>
    %c0_14 = arith.constant 0 : index
    %c0_15 = arith.constant 0 : index
    %c0_16 = arith.constant 0 : index
    %32 = vector.load %arg2[%c0_14, %c0_15, %c0_16] : memref<11x16x1xf32, #tpu.memory_space<vmem>>, vector<1x16x1xf32>
    %33 = vector.shape_cast %32 : vector<1x16x1xf32> to vector<16x1xf32>
    %cst_17 = arith.constant 9.99999974E-6 : f32
    %34 = vector.broadcast %cst_17 : f32 to vector<16x1xf32>
    %35 = arith.addf %31, %34 : vector<16x1xf32>
    %36 = math.rsqrt %35 : vector<16x1xf32>
    %37 = arith.mulf %33, %36 : vector<16x1xf32>
    %c0_18 = arith.constant 0 : index
    %c0_19 = arith.constant 0 : index
    %c0_20 = arith.constant 0 : index
    %38 = vector.load %arg3[%c0_18, %c0_19, %c0_20] : memref<11x16x1xf32, #tpu.memory_space<vmem>>, vector<1x16x1xf32>
    %39 = vector.shape_cast %38 : vector<1x16x1xf32> to vector<16x1xf32>
    %40 = arith.mulf %22, %37 : vector<16x1xf32>
    %41 = arith.subf %39, %40 : vector<16x1xf32>
    %42 = vector.broadcast %37 : vector<16x1xf32> to vector<16x768xf32>
    %43 = arith.mulf %16, %42 : vector<16x768xf32>
    %44 = vector.broadcast %41 : vector<16x1xf32> to vector<16x768xf32>
    %45 = arith.addf %43, %44 : vector<16x768xf32>
    %cst_21 = arith.constant 0.000000e+00 : f32
    %46 = vector.broadcast %cst_21 : f32 to vector<16x768xf32>
    %47 = arith.maximumf %45, %46 : vector<16x768xf32>
    %48 = vector.broadcast %0 : vector<1x768xf32> to vector<16x768xf32>
    %49 = arith.mulf %47, %48 : vector<16x768xf32>
    %c1 = arith.constant 1 : index
    %c0_22 = arith.constant 0 : index
    %c0_23 = arith.constant 0 : index
    %50 = vector.load %arg1[%c1, %c0_22, %c0_23] : memref<11x16x144xbf16, #tpu.memory_space<vmem>>, vector<1x16x144xbf16>
    %51 = vector.shape_cast %50 : vector<1x16x144xbf16> to vector<16x144xbf16>
    %cst_24 = arith.constant dense<0.000000e+00> : vector<16x768xf32>
    %52 = tpu.matmul %51, %13, %cst_24 {dimension_numbers = #tpu.dot_dimension_numbers<[1], [0], [0], [1], [0, 0, 1, 1], [], []>} : vector<16x144xbf16>, vector<144x768xbf16>, vector<16x768xf32> -> vector<16x768xf32>
    %53 = vector.broadcast %0 : vector<1x768xf32> to vector<16x768xf32>
    %54 = arith.mulf %52, %53 : vector<16x768xf32>
    %cst_25 = arith.constant dense<0.000000e+00> : vector<16xf32>
    %55 = vector.multi_reduction <add>, %54, %cst_25 [1] : vector<16x768xf32> to vector<16xf32>
    %56 = vector.shape_cast %55 : vector<16xf32> to vector<16x1xf32>
    %cst_26 = arith.constant 0.001953125 : f32
    %57 = vector.broadcast %cst_26 : f32 to vector<16x1xf32>
    %58 = arith.mulf %56, %57 : vector<16x1xf32>
    %59 = arith.mulf %54, %52 : vector<16x768xf32>
    %cst_27 = arith.constant dense<0.000000e+00> : vector<16xf32>
    %60 = vector.multi_reduction <add>, %59, %cst_27 [1] : vector<16x768xf32> to vector<16xf32>
    %61 = vector.shape_cast %60 : vector<16xf32> to vector<16x1xf32>
    %cst_28 = arith.constant 0.001953125 : f32
    %62 = vector.broadcast %cst_28 : f32 to vector<16x1xf32>
    %63 = arith.mulf %61, %62 : vector<16x1xf32>
    %64 = arith.mulf %58, %58 : vector<16x1xf32>
    %65 = arith.subf %63, %64 : vector<16x1xf32>
    %cst_29 = arith.constant 0.000000e+00 : f32
    %66 = vector.broadcast %cst_29 : f32 to vector<16x1xf32>
    %67 = arith.maximumf %65, %66 : vector<16x1xf32>
    %c1_30 = arith.constant 1 : index
    %c0_31 = arith.constant 0 : index
    %c0_32 = arith.constant 0 : index
    %68 = vector.load %arg2[%c1_30, %c0_31, %c0_32] : memref<11x16x1xf32, #tpu.memory_space<vmem>>, vector<1x16x1xf32>
    %69 = vector.shape_cast %68 : vector<1x16x1xf32> to vector<16x1xf32>
    %cst_33 = arith.constant 9.99999974E-6 : f32
    %70 = vector.broadcast %cst_33 : f32 to vector<16x1xf32>
    %71 = arith.addf %67, %70 : vector<16x1xf32>
    %72 = math.rsqrt %71 : vector<16x1xf32>
    %73 = arith.mulf %69, %72 : vector<16x1xf32>
    %c1_34 = arith.constant 1 : index
    %c0_35 = arith.constant 0 : index
    %c0_36 = arith.constant 0 : index
    %74 = vector.load %arg3[%c1_34, %c0_35, %c0_36] : memref<11x16x1xf32, #tpu.memory_space<vmem>>, vector<1x16x1xf32>
    %75 = vector.shape_cast %74 : vector<1x16x1xf32> to vector<16x1xf32>
    %76 = arith.mulf %58, %73 : vector<16x1xf32>
    %77 = arith.subf %75, %76 : vector<16x1xf32>
    %78 = vector.broadcast %73 : vector<16x1xf32> to vector<16x768xf32>
    %79 = arith.mulf %52, %78 : vector<16x768xf32>
    %80 = vector.broadcast %77 : vector<16x1xf32> to vector<16x768xf32>
    %81 = arith.addf %79, %80 : vector<16x768xf32>
    %cst_37 = arith.constant 0.000000e+00 : f32
    %82 = vector.broadcast %cst_37 : f32 to vector<16x768xf32>
    %83 = arith.maximumf %81, %82 : vector<16x768xf32>
    %84 = vector.broadcast %0 : vector<1x768xf32> to vector<16x768xf32>
    %85 = arith.mulf %83, %84 : vector<16x768xf32>
    %86 = arith.truncf %49 : vector<16x768xf32> to vector<16x768xbf16>
    %c0_38 = arith.constant 0 : index
    %c128 = arith.constant 128 : index
    %87 = vector.load %arg6[%c0_38, %c128] : memref<16x1024xbf16, #tpu.memory_space<vmem>>, vector<16x768xbf16>
    tpu.vector_store %arg6[%c0_38, %c128], %86 {strides = array<i32>} : memref<16x1024xbf16, #tpu.memory_space<vmem>>, vector<16x768xbf16>,
    %c0_39 = arith.constant 0 : index
    %c0_40 = arith.constant 0 : index
    %88 = vector.load %arg6[%c0_39, %c0_40] : memref<16x1024xbf16, #tpu.memory_space<vmem>>, vector<16x1024xbf16>
    %89 = vector.extract_strided_slice %88 {offsets = [0, 109], sizes = [16, 768], strides = [1, 1]} : vector<16x1024xbf16> to vector<16x768xbf16>
    %90 = vector.extract_strided_slice %88 {offsets = [0, 110], sizes = [16, 768], strides = [1, 1]} : vector<16x1024xbf16> to vector<16x768xbf16>
    %91 = vector.extract_strided_slice %88 {offsets = [0, 111], sizes = [16, 768], strides = [1, 1]} : vector<16x1024xbf16> to vector<16x768xbf16>
    %92 = vector.extract_strided_slice %88 {offsets = [0, 127], sizes = [16, 768], strides = [1, 1]} : vector<16x1024xbf16> to vector<16x768xbf16>
    %93 = vector.extract_strided_slice %88 {offsets = [0, 128], sizes = [16, 768], strides = [1, 1]} : vector<16x1024xbf16> to vector<16x768xbf16>
    %94 = vector.extract_strided_slice %88 {offsets = [0, 129], sizes = [16, 768], strides = [1, 1]} : vector<16x1024xbf16> to vector<16x768xbf16>
    %95 = vector.extract_strided_slice %88 {offsets = [0, 145], sizes = [16, 768], strides = [1, 1]} : vector<16x1024xbf16> to vector<16x768xbf16>
    %96 = vector.extract_strided_slice %88 {offsets = [0, 146], sizes = [16, 768], strides = [1, 1]} : vector<16x1024xbf16> to vector<16x768xbf16>
    %97 = vector.extract_strided_slice %88 {offsets = [0, 147], sizes = [16, 768], strides = [1, 1]} : vector<16x1024xbf16> to vector<16x768xbf16>
    %98 = tpu.concatenate %89, %90, %91, %92, %93, %94, %95, %96, %97 in 0 : vector<16x768xbf16>, vector<16x768xbf16>, vector<16x768xbf16>, vector<16x768xbf16>, vector<16x768xbf16>, vector<16x768xbf16>, vector<16x768xbf16>, vector<16x768xbf16>, vector<16x768xbf16> -> vector<144x768xbf16>
    %c2 = arith.constant 2 : index
    %c0_41 = arith.constant 0 : index
    %c0_42 = arith.constant 0 : index
    %99 = vector.load %arg1[%c2, %c0_41, %c0_42] : memref<11x16x144xbf16, #tpu.memory_space<vmem>>, vector<1x16x144xbf16>
    %100 = vector.shape_cast %99 : vector<1x16x144xbf16> to vector<16x144xbf16>
    %cst_43 = arith.constant dense<0.000000e+00> : vector<16x768xf32>
    %101 = tpu.matmul %100, %98, %cst_43 {dimension_numbers = #tpu.dot_dimension_numbers<[1], [0], [0], [1], [0, 0, 1, 1], [], []>} : vector<16x144xbf16>, vector<144x768xbf16>, vector<16x768xf32> -> vector<16x768xf32>
    %102 = vector.broadcast %0 : vector<1x768xf32> to vector<16x768xf32>
    %103 = arith.mulf %101, %102 : vector<16x768xf32>
    %cst_44 = arith.constant dense<0.000000e+00> : vector<16xf32>
    %104 = vector.multi_reduction <add>, %103, %cst_44 [1] : vector<16x768xf32> to vector<16xf32>
    %105 = vector.shape_cast %104 : vector<16xf32> to vector<16x1xf32>
    %cst_45 = arith.constant 0.001953125 : f32
    %106 = vector.broadcast %cst_45 : f32 to vector<16x1xf32>
    %107 = arith.mulf %105, %106 : vector<16x1xf32>
    %108 = arith.mulf %103, %101 : vector<16x768xf32>
    %cst_46 = arith.constant dense<0.000000e+00> : vector<16xf32>
    %109 = vector.multi_reduction <add>, %108, %cst_46 [1] : vector<16x768xf32> to vector<16xf32>
    %110 = vector.shape_cast %109 : vector<16xf32> to vector<16x1xf32>
    %cst_47 = arith.constant 0.001953125 : f32
    %111 = vector.broadcast %cst_47 : f32 to vector<16x1xf32>
    %112 = arith.mulf %110, %111 : vector<16x1xf32>
    %113 = arith.mulf %107, %107 : vector<16x1xf32>
    %114 = arith.subf %112, %113 : vector<16x1xf32>
    %cst_48 = arith.constant 0.000000e+00 : f32
    %115 = vector.broadcast %cst_48 : f32 to vector<16x1xf32>
    %116 = arith.maximumf %114, %115 : vector<16x1xf32>
    %c2_49 = arith.constant 2 : index
    %c0_50 = arith.constant 0 : index
    %c0_51 = arith.constant 0 : index
    %117 = vector.load %arg2[%c2_49, %c0_50, %c0_51] : memref<11x16x1xf32, #tpu.memory_space<vmem>>, vector<1x16x1xf32>
    %118 = vector.shape_cast %117 : vector<1x16x1xf32> to vector<16x1xf32>
    %cst_52 = arith.constant 9.99999974E-6 : f32
    %119 = vector.broadcast %cst_52 : f32 to vector<16x1xf32>
    %120 = arith.addf %116, %119 : vector<16x1xf32>
    %121 = math.rsqrt %120 : vector<16x1xf32>
    %122 = arith.mulf %118, %121 : vector<16x1xf32>
    %c2_53 = arith.constant 2 : index
    %c0_54 = arith.constant 0 : index
    %c0_55 = arith.constant 0 : index
    %123 = vector.load %arg3[%c2_53, %c0_54, %c0_55] : memref<11x16x1xf32, #tpu.memory_space<vmem>>, vector<1x16x1xf32>
    %124 = vector.shape_cast %123 : vector<1x16x1xf32> to vector<16x1xf32>
    %125 = arith.mulf %107, %122 : vector<16x1xf32>
    %126 = arith.subf %124, %125 : vector<16x1xf32>
    %127 = vector.broadcast %122 : vector<16x1xf32> to vector<16x768xf32>
    %128 = arith.mulf %101, %127 : vector<16x768xf32>
    %129 = vector.broadcast %126 : vector<16x1xf32> to vector<16x768xf32>
    %130 = arith.addf %128, %129 : vector<16x768xf32>
    %cst_56 = arith.constant 0.000000e+00 : f32
    %131 = vector.broadcast %cst_56 : f32 to vector<16x768xf32>
    %132 = arith.maximumf %130, %131 : vector<16x768xf32>
    %133 = vector.broadcast %0 : vector<1x768xf32> to vector<16x768xf32>
    %134 = arith.mulf %132, %133 : vector<16x768xf32>
    %135 = arith.truncf %134 : vector<16x768xf32> to vector<16x768xbf16>
    %c0_57 = arith.constant 0 : index
    %c128_58 = arith.constant 128 : index
    %136 = vector.load %arg6[%c0_57, %c128_58] : memref<16x1024xbf16, #tpu.memory_space<vmem>>, vector<16x768xbf16>
    tpu.vector_store %arg6[%c0_57, %c128_58], %135 {strides = array<i32>} : memref<16x1024xbf16, #tpu.memory_space<vmem>>, vector<16x768xbf16>,
    %c0_59 = arith.constant 0 : index
    %c0_60 = arith.constant 0 : index
    %137 = vector.load %arg6[%c0_59, %c0_60] : memref<16x1024xbf16, #tpu.memory_space<vmem>>, vector<16x1024xbf16>
    %138 = vector.extract_strided_slice %137 {offsets = [0, 109], sizes = [16, 768], strides = [1, 1]} : vector<16x1024xbf16> to vector<16x768xbf16>
    %139 = vector.extract_strided_slice %137 {offsets = [0, 110], sizes = [16, 768], strides = [1, 1]} : vector<16x1024xbf16> to vector<16x768xbf16>
    %140 = vector.extract_strided_slice %137 {offsets = [0, 111], sizes = [16, 768], strides = [1, 1]} : vector<16x1024xbf16> to vector<16x768xbf16>
    %141 = vector.extract_strided_slice %137 {offsets = [0, 127], sizes = [16, 768], strides = [1, 1]} : vector<16x1024xbf16> to vector<16x768xbf16>
    %142 = vector.extract_strided_slice %137 {offsets = [0, 128], sizes = [16, 768], strides = [1, 1]} : vector<16x1024xbf16> to vector<16x768xbf16>
    %143 = vector.extract_strided_slice %137 {offsets = [0, 129], sizes = [16, 768], strides = [1, 1]} : vector<16x1024xbf16> to vector<16x768xbf16>
    %144 = vector.extract_strided_slice %137 {offsets = [0, 145], sizes = [16, 768], strides = [1, 1]} : vector<16x1024xbf16> to vector<16x768xbf16>
    %145 = vector.extract_strided_slice %137 {offsets = [0, 146], sizes = [16, 768], strides = [1, 1]} : vector<16x1024xbf16> to vector<16x768xbf16>
    %146 = vector.extract_strided_slice %137 {offsets = [0, 147], sizes = [16, 768], strides = [1, 1]} : vector<16x1024xbf16> to vector<16x768xbf16>
    %147 = tpu.concatenate %138, %139, %140, %141, %142, %143, %144, %145, %146 in 0 : vector<16x768xbf16>, vector<16x768xbf16>, vector<16x768xbf16>, vector<16x768xbf16>, vector<16x768xbf16>, vector<16x768xbf16>, vector<16x768xbf16>, vector<16x768xbf16>, vector<16x768xbf16> -> vector<144x768xbf16>
    %c3 = arith.constant 3 : index
    %c0_61 = arith.constant 0 : index
    %c0_62 = arith.constant 0 : index
    %148 = vector.load %arg1[%c3, %c0_61, %c0_62] : memref<11x16x144xbf16, #tpu.memory_space<vmem>>, vector<1x16x144xbf16>
    %149 = vector.shape_cast %148 : vector<1x16x144xbf16> to vector<16x144xbf16>
    %cst_63 = arith.constant dense<0.000000e+00> : vector<16x768xf32>
    %150 = tpu.matmul %149, %147, %cst_63 {dimension_numbers = #tpu.dot_dimension_numbers<[1], [0], [0], [1], [0, 0, 1, 1], [], []>} : vector<16x144xbf16>, vector<144x768xbf16>, vector<16x768xf32> -> vector<16x768xf32>
    %151 = vector.broadcast %0 : vector<1x768xf32> to vector<16x768xf32>
    %152 = arith.mulf %150, %151 : vector<16x768xf32>
    %cst_64 = arith.constant dense<0.000000e+00> : vector<16xf32>
    %153 = vector.multi_reduction <add>, %152, %cst_64 [1] : vector<16x768xf32> to vector<16xf32>
    %154 = vector.shape_cast %153 : vector<16xf32> to vector<16x1xf32>
    %cst_65 = arith.constant 0.001953125 : f32
    %155 = vector.broadcast %cst_65 : f32 to vector<16x1xf32>
    %156 = arith.mulf %154, %155 : vector<16x1xf32>
    %157 = arith.mulf %152, %150 : vector<16x768xf32>
    %cst_66 = arith.constant dense<0.000000e+00> : vector<16xf32>
    %158 = vector.multi_reduction <add>, %157, %cst_66 [1] : vector<16x768xf32> to vector<16xf32>
    %159 = vector.shape_cast %158 : vector<16xf32> to vector<16x1xf32>
    %cst_67 = arith.constant 0.001953125 : f32
    %160 = vector.broadcast %cst_67 : f32 to vector<16x1xf32>
    %161 = arith.mulf %159, %160 : vector<16x1xf32>
    %162 = arith.mulf %156, %156 : vector<16x1xf32>
    %163 = arith.subf %161, %162 : vector<16x1xf32>
    %cst_68 = arith.constant 0.000000e+00 : f32
    %164 = vector.broadcast %cst_68 : f32 to vector<16x1xf32>
    %165 = arith.maximumf %163, %164 : vector<16x1xf32>
    %c3_69 = arith.constant 3 : index
    %c0_70 = arith.constant 0 : index
    %c0_71 = arith.constant 0 : index
    %166 = vector.load %arg2[%c3_69, %c0_70, %c0_71] : memref<11x16x1xf32, #tpu.memory_space<vmem>>, vector<1x16x1xf32>
    %167 = vector.shape_cast %166 : vector<1x16x1xf32> to vector<16x1xf32>
    %cst_72 = arith.constant 9.99999974E-6 : f32
    %168 = vector.broadcast %cst_72 : f32 to vector<16x1xf32>
    %169 = arith.addf %165, %168 : vector<16x1xf32>
    %170 = math.rsqrt %169 : vector<16x1xf32>
    %171 = arith.mulf %167, %170 : vector<16x1xf32>
    %c3_73 = arith.constant 3 : index
    %c0_74 = arith.constant 0 : index
    %c0_75 = arith.constant 0 : index
    %172 = vector.load %arg3[%c3_73, %c0_74, %c0_75] : memref<11x16x1xf32, #tpu.memory_space<vmem>>, vector<1x16x1xf32>
    %173 = vector.shape_cast %172 : vector<1x16x1xf32> to vector<16x1xf32>
    %174 = arith.mulf %156, %171 : vector<16x1xf32>
    %175 = arith.subf %173, %174 : vector<16x1xf32>
    %176 = vector.broadcast %171 : vector<16x1xf32> to vector<16x768xf32>
    %177 = arith.mulf %150, %176 : vector<16x768xf32>
    %178 = vector.broadcast %175 : vector<16x1xf32> to vector<16x768xf32>
    %179 = arith.addf %177, %178 : vector<16x768xf32>
    %cst_76 = arith.constant 0.000000e+00 : f32
    %180 = vector.broadcast %cst_76 : f32 to vector<16x768xf32>
    %181 = arith.maximumf %179, %180 : vector<16x768xf32>
    %182 = vector.broadcast %0 : vector<1x768xf32> to vector<16x768xf32>
    %183 = arith.mulf %181, %182 : vector<16x768xf32>
    %184 = arith.addf %183, %49 : vector<16x768xf32>
    %cst_77 = arith.constant 0.000000e+00 : f32
    %185 = vector.broadcast %cst_77 : f32 to vector<16x768xf32>
    %186 = arith.maximumf %184, %185 : vector<16x768xf32>
    %187 = arith.truncf %186 : vector<16x768xf32> to vector<16x768xbf16>
    %c0_78 = arith.constant 0 : index
    %c128_79 = arith.constant 128 : index
    %188 = vector.load %arg6[%c0_78, %c128_79] : memref<16x1024xbf16, #tpu.memory_space<vmem>>, vector<16x768xbf16>
    tpu.vector_store %arg6[%c0_78, %c128_79], %187 {strides = array<i32>} : memref<16x1024xbf16, #tpu.memory_space<vmem>>, vector<16x768xbf16>,
    %c0_80 = arith.constant 0 : index
    %c0_81 = arith.constant 0 : index
    %189 = vector.load %arg6[%c0_80, %c0_81] : memref<16x1024xbf16, #tpu.memory_space<vmem>>, vector<16x1024xbf16>
    %190 = vector.extract_strided_slice %189 {offsets = [0, 109], sizes = [16, 768], strides = [1, 1]} : vector<16x1024xbf16> to vector<16x768xbf16>
    %191 = vector.extract_strided_slice %189 {offsets = [0, 110], sizes = [16, 768], strides = [1, 1]} : vector<16x1024xbf16> to vector<16x768xbf16>
    %192 = vector.extract_strided_slice %189 {offsets = [0, 111], sizes = [16, 768], strides = [1, 1]} : vector<16x1024xbf16> to vector<16x768xbf16>
    %193 = vector.extract_strided_slice %189 {offsets = [0, 127], sizes = [16, 768], strides = [1, 1]} : vector<16x1024xbf16> to vector<16x768xbf16>
    %194 = vector.extract_strided_slice %189 {offsets = [0, 128], sizes = [16, 768], strides = [1, 1]} : vector<16x1024xbf16> to vector<16x768xbf16>
    %195 = vector.extract_strided_slice %189 {offsets = [0, 129], sizes = [16, 768], strides = [1, 1]} : vector<16x1024xbf16> to vector<16x768xbf16>
    %196 = vector.extract_strided_slice %189 {offsets = [0, 145], sizes = [16, 768], strides = [1, 1]} : vector<16x1024xbf16> to vector<16x768xbf16>
    %197 = vector.extract_strided_slice %189 {offsets = [0, 146], sizes = [16, 768], strides = [1, 1]} : vector<16x1024xbf16> to vector<16x768xbf16>
    %198 = vector.extract_strided_slice %189 {offsets = [0, 147], sizes = [16, 768], strides = [1, 1]} : vector<16x1024xbf16> to vector<16x768xbf16>
    %199 = tpu.concatenate %190, %191, %192, %193, %194, %195, %196, %197, %198 in 0 : vector<16x768xbf16>, vector<16x768xbf16>, vector<16x768xbf16>, vector<16x768xbf16>, vector<16x768xbf16>, vector<16x768xbf16>, vector<16x768xbf16>, vector<16x768xbf16>, vector<16x768xbf16> -> vector<144x768xbf16>
    %c4 = arith.constant 4 : index
    %c0_82 = arith.constant 0 : index
    %c0_83 = arith.constant 0 : index
    %200 = vector.load %arg1[%c4, %c0_82, %c0_83] : memref<11x16x144xbf16, #tpu.memory_space<vmem>>, vector<1x16x144xbf16>
    %201 = vector.shape_cast %200 : vector<1x16x144xbf16> to vector<16x144xbf16>
    %cst_84 = arith.constant dense<0.000000e+00> : vector<16x768xf32>
    %202 = tpu.matmul %201, %199, %cst_84 {dimension_numbers = #tpu.dot_dimension_numbers<[1], [0], [0], [1], [0, 0, 1, 1], [], []>} : vector<16x144xbf16>, vector<144x768xbf16>, vector<16x768xf32> -> vector<16x768xf32>
    %203 = vector.broadcast %0 : vector<1x768xf32> to vector<16x768xf32>
    %204 = arith.mulf %202, %203 : vector<16x768xf32>
    %cst_85 = arith.constant dense<0.000000e+00> : vector<16xf32>
    %205 = vector.multi_reduction <add>, %204, %cst_85 [1] : vector<16x768xf32> to vector<16xf32>
    %206 = vector.shape_cast %205 : vector<16xf32> to vector<16x1xf32>
    %cst_86 = arith.constant 0.001953125 : f32
    %207 = vector.broadcast %cst_86 : f32 to vector<16x1xf32>
    %208 = arith.mulf %206, %207 : vector<16x1xf32>
    %209 = arith.mulf %204, %202 : vector<16x768xf32>
    %cst_87 = arith.constant dense<0.000000e+00> : vector<16xf32>
    %210 = vector.multi_reduction <add>, %209, %cst_87 [1] : vector<16x768xf32> to vector<16xf32>
    %211 = vector.shape_cast %210 : vector<16xf32> to vector<16x1xf32>
    %cst_88 = arith.constant 0.001953125 : f32
    %212 = vector.broadcast %cst_88 : f32 to vector<16x1xf32>
    %213 = arith.mulf %211, %212 : vector<16x1xf32>
    %214 = arith.mulf %208, %208 : vector<16x1xf32>
    %215 = arith.subf %213, %214 : vector<16x1xf32>
    %cst_89 = arith.constant 0.000000e+00 : f32
    %216 = vector.broadcast %cst_89 : f32 to vector<16x1xf32>
    %217 = arith.maximumf %215, %216 : vector<16x1xf32>
    %c4_90 = arith.constant 4 : index
    %c0_91 = arith.constant 0 : index
    %c0_92 = arith.constant 0 : index
    %218 = vector.load %arg2[%c4_90, %c0_91, %c0_92] : memref<11x16x1xf32, #tpu.memory_space<vmem>>, vector<1x16x1xf32>
    %219 = vector.shape_cast %218 : vector<1x16x1xf32> to vector<16x1xf32>
    %cst_93 = arith.constant 9.99999974E-6 : f32
    %220 = vector.broadcast %cst_93 : f32 to vector<16x1xf32>
    %221 = arith.addf %217, %220 : vector<16x1xf32>
    %222 = math.rsqrt %221 : vector<16x1xf32>
    %223 = arith.mulf %219, %222 : vector<16x1xf32>
    %c4_94 = arith.constant 4 : index
    %c0_95 = arith.constant 0 : index
    %c0_96 = arith.constant 0 : index
    %224 = vector.load %arg3[%c4_94, %c0_95, %c0_96] : memref<11x16x1xf32, #tpu.memory_space<vmem>>, vector<1x16x1xf32>
    %225 = vector.shape_cast %224 : vector<1x16x1xf32> to vector<16x1xf32>
    %226 = arith.mulf %208, %223 : vector<16x1xf32>
    %227 = arith.subf %225, %226 : vector<16x1xf32>
    %228 = vector.broadcast %223 : vector<16x1xf32> to vector<16x768xf32>
    %229 = arith.mulf %202, %228 : vector<16x768xf32>
    %230 = vector.broadcast %227 : vector<16x1xf32> to vector<16x768xf32>
    %231 = arith.addf %229, %230 : vector<16x768xf32>
    %cst_97 = arith.constant 0.000000e+00 : f32
    %232 = vector.broadcast %cst_97 : f32 to vector<16x768xf32>
    %233 = arith.maximumf %231, %232 : vector<16x768xf32>
    %234 = vector.broadcast %0 : vector<1x768xf32> to vector<16x768xf32>
    %235 = arith.mulf %233, %234 : vector<16x768xf32>
    %236 = arith.truncf %235 : vector<16x768xf32> to vector<16x768xbf16>
    %c0_98 = arith.constant 0 : index
    %c128_99 = arith.constant 128 : index
    %237 = vector.load %arg6[%c0_98, %c128_99] : memref<16x1024xbf16, #tpu.memory_space<vmem>>, vector<16x768xbf16>
    tpu.vector_store %arg6[%c0_98, %c128_99], %236 {strides = array<i32>} : memref<16x1024xbf16, #tpu.memory_space<vmem>>, vector<16x768xbf16>,
    %c0_100 = arith.constant 0 : index
    %c0_101 = arith.constant 0 : index
    %238 = vector.load %arg6[%c0_100, %c0_101] : memref<16x1024xbf16, #tpu.memory_space<vmem>>, vector<16x1024xbf16>
    %239 = vector.extract_strided_slice %238 {offsets = [0, 109], sizes = [16, 768], strides = [1, 1]} : vector<16x1024xbf16> to vector<16x768xbf16>
    %240 = vector.extract_strided_slice %238 {offsets = [0, 110], sizes = [16, 768], strides = [1, 1]} : vector<16x1024xbf16> to vector<16x768xbf16>
    %241 = vector.extract_strided_slice %238 {offsets = [0, 111], sizes = [16, 768], strides = [1, 1]} : vector<16x1024xbf16> to vector<16x768xbf16>
    %242 = vector.extract_strided_slice %238 {offsets = [0, 127], sizes = [16, 768], strides = [1, 1]} : vector<16x1024xbf16> to vector<16x768xbf16>
    %243 = vector.extract_strided_slice %238 {offsets = [0, 128], sizes = [16, 768], strides = [1, 1]} : vector<16x1024xbf16> to vector<16x768xbf16>
    %244 = vector.extract_strided_slice %238 {offsets = [0, 129], sizes = [16, 768], strides = [1, 1]} : vector<16x1024xbf16> to vector<16x768xbf16>
    %245 = vector.extract_strided_slice %238 {offsets = [0, 145], sizes = [16, 768], strides = [1, 1]} : vector<16x1024xbf16> to vector<16x768xbf16>
    %246 = vector.extract_strided_slice %238 {offsets = [0, 146], sizes = [16, 768], strides = [1, 1]} : vector<16x1024xbf16> to vector<16x768xbf16>
    %247 = vector.extract_strided_slice %238 {offsets = [0, 147], sizes = [16, 768], strides = [1, 1]} : vector<16x1024xbf16> to vector<16x768xbf16>
    %248 = tpu.concatenate %239, %240, %241, %242, %243, %244, %245, %246, %247 in 0 : vector<16x768xbf16>, vector<16x768xbf16>, vector<16x768xbf16>, vector<16x768xbf16>, vector<16x768xbf16>, vector<16x768xbf16>, vector<16x768xbf16>, vector<16x768xbf16>, vector<16x768xbf16> -> vector<144x768xbf16>
    %c5 = arith.constant 5 : index
    %c0_102 = arith.constant 0 : index
    %c0_103 = arith.constant 0 : index
    %249 = vector.load %arg1[%c5, %c0_102, %c0_103] : memref<11x16x144xbf16, #tpu.memory_space<vmem>>, vector<1x16x144xbf16>
    %250 = vector.shape_cast %249 : vector<1x16x144xbf16> to vector<16x144xbf16>
    %cst_104 = arith.constant dense<0.000000e+00> : vector<16x768xf32>
    %251 = tpu.matmul %250, %248, %cst_104 {dimension_numbers = #tpu.dot_dimension_numbers<[1], [0], [0], [1], [0, 0, 1, 1], [], []>} : vector<16x144xbf16>, vector<144x768xbf16>, vector<16x768xf32> -> vector<16x768xf32>
    %252 = vector.broadcast %0 : vector<1x768xf32> to vector<16x768xf32>
    %253 = arith.mulf %251, %252 : vector<16x768xf32>
    %cst_105 = arith.constant dense<0.000000e+00> : vector<16xf32>
    %254 = vector.multi_reduction <add>, %253, %cst_105 [1] : vector<16x768xf32> to vector<16xf32>
    %255 = vector.shape_cast %254 : vector<16xf32> to vector<16x1xf32>
    %cst_106 = arith.constant 0.001953125 : f32
    %256 = vector.broadcast %cst_106 : f32 to vector<16x1xf32>
    %257 = arith.mulf %255, %256 : vector<16x1xf32>
    %258 = arith.mulf %253, %251 : vector<16x768xf32>
    %cst_107 = arith.constant dense<0.000000e+00> : vector<16xf32>
    %259 = vector.multi_reduction <add>, %258, %cst_107 [1] : vector<16x768xf32> to vector<16xf32>
    %260 = vector.shape_cast %259 : vector<16xf32> to vector<16x1xf32>
    %cst_108 = arith.constant 0.001953125 : f32
    %261 = vector.broadcast %cst_108 : f32 to vector<16x1xf32>
    %262 = arith.mulf %260, %261 : vector<16x1xf32>
    %263 = arith.mulf %257, %257 : vector<16x1xf32>
    %264 = arith.subf %262, %263 : vector<16x1xf32>
    %cst_109 = arith.constant 0.000000e+00 : f32
    %265 = vector.broadcast %cst_109 : f32 to vector<16x1xf32>
    %266 = arith.maximumf %264, %265 : vector<16x1xf32>
    %c5_110 = arith.constant 5 : index
    %c0_111 = arith.constant 0 : index
    %c0_112 = arith.constant 0 : index
    %267 = vector.load %arg2[%c5_110, %c0_111, %c0_112] : memref<11x16x1xf32, #tpu.memory_space<vmem>>, vector<1x16x1xf32>
    %268 = vector.shape_cast %267 : vector<1x16x1xf32> to vector<16x1xf32>
    %cst_113 = arith.constant 9.99999974E-6 : f32
    %269 = vector.broadcast %cst_113 : f32 to vector<16x1xf32>
    %270 = arith.addf %266, %269 : vector<16x1xf32>
    %271 = math.rsqrt %270 : vector<16x1xf32>
    %272 = arith.mulf %268, %271 : vector<16x1xf32>
    %c5_114 = arith.constant 5 : index
    %c0_115 = arith.constant 0 : index
    %c0_116 = arith.constant 0 : index
    %273 = vector.load %arg3[%c5_114, %c0_115, %c0_116] : memref<11x16x1xf32, #tpu.memory_space<vmem>>, vector<1x16x1xf32>
    %274 = vector.shape_cast %273 : vector<1x16x1xf32> to vector<16x1xf32>
    %275 = arith.mulf %257, %272 : vector<16x1xf32>
    %276 = arith.subf %274, %275 : vector<16x1xf32>
    %277 = vector.broadcast %272 : vector<16x1xf32> to vector<16x768xf32>
    %278 = arith.mulf %251, %277 : vector<16x768xf32>
    %279 = vector.broadcast %276 : vector<16x1xf32> to vector<16x768xf32>
    %280 = arith.addf %278, %279 : vector<16x768xf32>
    %cst_117 = arith.constant 0.000000e+00 : f32
    %281 = vector.broadcast %cst_117 : f32 to vector<16x768xf32>
    %282 = arith.maximumf %280, %281 : vector<16x768xf32>
    %283 = vector.broadcast %0 : vector<1x768xf32> to vector<16x768xf32>
    %284 = arith.mulf %282, %283 : vector<16x768xf32>
    %285 = arith.addf %284, %186 : vector<16x768xf32>
    %cst_118 = arith.constant 0.000000e+00 : f32
    %286 = vector.broadcast %cst_118 : f32 to vector<16x768xf32>
    %287 = arith.maximumf %285, %286 : vector<16x768xf32>
    %288 = arith.truncf %287 : vector<16x768xf32> to vector<16x768xbf16>
    %c0_119 = arith.constant 0 : index
    %c128_120 = arith.constant 128 : index
    %289 = vector.load %arg6[%c0_119, %c128_120] : memref<16x1024xbf16, #tpu.memory_space<vmem>>, vector<16x768xbf16>
    tpu.vector_store %arg6[%c0_119, %c128_120], %288 {strides = array<i32>} : memref<16x1024xbf16, #tpu.memory_space<vmem>>, vector<16x768xbf16>,
    %c0_121 = arith.constant 0 : index
    %c0_122 = arith.constant 0 : index
    %290 = vector.load %arg6[%c0_121, %c0_122] : memref<16x1024xbf16, #tpu.memory_space<vmem>>, vector<16x1024xbf16>
    %291 = vector.extract_strided_slice %290 {offsets = [0, 109], sizes = [16, 768], strides = [1, 1]} : vector<16x1024xbf16> to vector<16x768xbf16>
    %292 = vector.extract_strided_slice %290 {offsets = [0, 110], sizes = [16, 768], strides = [1, 1]} : vector<16x1024xbf16> to vector<16x768xbf16>
    %293 = vector.extract_strided_slice %290 {offsets = [0, 111], sizes = [16, 768], strides = [1, 1]} : vector<16x1024xbf16> to vector<16x768xbf16>
    %294 = vector.extract_strided_slice %290 {offsets = [0, 127], sizes = [16, 768], strides = [1, 1]} : vector<16x1024xbf16> to vector<16x768xbf16>
    %295 = vector.extract_strided_slice %290 {offsets = [0, 128], sizes = [16, 768], strides = [1, 1]} : vector<16x1024xbf16> to vector<16x768xbf16>
    %296 = vector.extract_strided_slice %290 {offsets = [0, 129], sizes = [16, 768], strides = [1, 1]} : vector<16x1024xbf16> to vector<16x768xbf16>
    %297 = vector.extract_strided_slice %290 {offsets = [0, 145], sizes = [16, 768], strides = [1, 1]} : vector<16x1024xbf16> to vector<16x768xbf16>
    %298 = vector.extract_strided_slice %290 {offsets = [0, 146], sizes = [16, 768], strides = [1, 1]} : vector<16x1024xbf16> to vector<16x768xbf16>
    %299 = vector.extract_strided_slice %290 {offsets = [0, 147], sizes = [16, 768], strides = [1, 1]} : vector<16x1024xbf16> to vector<16x768xbf16>
    %300 = tpu.concatenate %291, %292, %293, %294, %295, %296, %297, %298, %299 in 0 : vector<16x768xbf16>, vector<16x768xbf16>, vector<16x768xbf16>, vector<16x768xbf16>, vector<16x768xbf16>, vector<16x768xbf16>, vector<16x768xbf16>, vector<16x768xbf16>, vector<16x768xbf16> -> vector<144x768xbf16>
    %c6 = arith.constant 6 : index
    %c0_123 = arith.constant 0 : index
    %c0_124 = arith.constant 0 : index
    %301 = vector.load %arg1[%c6, %c0_123, %c0_124] : memref<11x16x144xbf16, #tpu.memory_space<vmem>>, vector<1x16x144xbf16>
    %302 = vector.shape_cast %301 : vector<1x16x144xbf16> to vector<16x144xbf16>
    %cst_125 = arith.constant dense<0.000000e+00> : vector<16x768xf32>
    %303 = tpu.matmul %302, %300, %cst_125 {dimension_numbers = #tpu.dot_dimension_numbers<[1], [0], [0], [1], [0, 0, 1, 1], [], []>} : vector<16x144xbf16>, vector<144x768xbf16>, vector<16x768xf32> -> vector<16x768xf32>
    %304 = vector.broadcast %0 : vector<1x768xf32> to vector<16x768xf32>
    %305 = arith.mulf %303, %304 : vector<16x768xf32>
    %cst_126 = arith.constant dense<0.000000e+00> : vector<16xf32>
    %306 = vector.multi_reduction <add>, %305, %cst_126 [1] : vector<16x768xf32> to vector<16xf32>
    %307 = vector.shape_cast %306 : vector<16xf32> to vector<16x1xf32>
    %cst_127 = arith.constant 0.001953125 : f32
    %308 = vector.broadcast %cst_127 : f32 to vector<16x1xf32>
    %309 = arith.mulf %307, %308 : vector<16x1xf32>
    %310 = arith.mulf %305, %303 : vector<16x768xf32>
    %cst_128 = arith.constant dense<0.000000e+00> : vector<16xf32>
    %311 = vector.multi_reduction <add>, %310, %cst_128 [1] : vector<16x768xf32> to vector<16xf32>
    %312 = vector.shape_cast %311 : vector<16xf32> to vector<16x1xf32>
    %cst_129 = arith.constant 0.001953125 : f32
    %313 = vector.broadcast %cst_129 : f32 to vector<16x1xf32>
    %314 = arith.mulf %312, %313 : vector<16x1xf32>
    %315 = arith.mulf %309, %309 : vector<16x1xf32>
    %316 = arith.subf %314, %315 : vector<16x1xf32>
    %cst_130 = arith.constant 0.000000e+00 : f32
    %317 = vector.broadcast %cst_130 : f32 to vector<16x1xf32>
    %318 = arith.maximumf %316, %317 : vector<16x1xf32>
    %c6_131 = arith.constant 6 : index
    %c0_132 = arith.constant 0 : index
    %c0_133 = arith.constant 0 : index
    %319 = vector.load %arg2[%c6_131, %c0_132, %c0_133] : memref<11x16x1xf32, #tpu.memory_space<vmem>>, vector<1x16x1xf32>
    %320 = vector.shape_cast %319 : vector<1x16x1xf32> to vector<16x1xf32>
    %cst_134 = arith.constant 9.99999974E-6 : f32
    %321 = vector.broadcast %cst_134 : f32 to vector<16x1xf32>
    %322 = arith.addf %318, %321 : vector<16x1xf32>
    %323 = math.rsqrt %322 : vector<16x1xf32>
    %324 = arith.mulf %320, %323 : vector<16x1xf32>
    %c6_135 = arith.constant 6 : index
    %c0_136 = arith.constant 0 : index
    %c0_137 = arith.constant 0 : index
    %325 = vector.load %arg3[%c6_135, %c0_136, %c0_137] : memref<11x16x1xf32, #tpu.memory_space<vmem>>, vector<1x16x1xf32>
    %326 = vector.shape_cast %325 : vector<1x16x1xf32> to vector<16x1xf32>
    %327 = arith.mulf %309, %324 : vector<16x1xf32>
    %328 = arith.subf %326, %327 : vector<16x1xf32>
    %329 = vector.broadcast %324 : vector<16x1xf32> to vector<16x768xf32>
    %330 = arith.mulf %303, %329 : vector<16x768xf32>
    %331 = vector.broadcast %328 : vector<16x1xf32> to vector<16x768xf32>
    %332 = arith.addf %330, %331 : vector<16x768xf32>
    %cst_138 = arith.constant 0.000000e+00 : f32
    %333 = vector.broadcast %cst_138 : f32 to vector<16x768xf32>
    %334 = arith.maximumf %332, %333 : vector<16x768xf32>
    %335 = vector.broadcast %0 : vector<1x768xf32> to vector<16x768xf32>
    %336 = arith.mulf %334, %335 : vector<16x768xf32>
    %337 = arith.truncf %336 : vector<16x768xf32> to vector<16x768xbf16>
    %c0_139 = arith.constant 0 : index
    %c128_140 = arith.constant 128 : index
    %338 = vector.load %arg6[%c0_139, %c128_140] : memref<16x1024xbf16, #tpu.memory_space<vmem>>, vector<16x768xbf16>
    tpu.vector_store %arg6[%c0_139, %c128_140], %337 {strides = array<i32>} : memref<16x1024xbf16, #tpu.memory_space<vmem>>, vector<16x768xbf16>,
    %c0_141 = arith.constant 0 : index
    %c0_142 = arith.constant 0 : index
    %339 = vector.load %arg6[%c0_141, %c0_142] : memref<16x1024xbf16, #tpu.memory_space<vmem>>, vector<16x1024xbf16>
    %340 = vector.extract_strided_slice %339 {offsets = [0, 109], sizes = [16, 768], strides = [1, 1]} : vector<16x1024xbf16> to vector<16x768xbf16>
    %341 = vector.extract_strided_slice %339 {offsets = [0, 110], sizes = [16, 768], strides = [1, 1]} : vector<16x1024xbf16> to vector<16x768xbf16>
    %342 = vector.extract_strided_slice %339 {offsets = [0, 111], sizes = [16, 768], strides = [1, 1]} : vector<16x1024xbf16> to vector<16x768xbf16>
    %343 = vector.extract_strided_slice %339 {offsets = [0, 127], sizes = [16, 768], strides = [1, 1]} : vector<16x1024xbf16> to vector<16x768xbf16>
    %344 = vector.extract_strided_slice %339 {offsets = [0, 128], sizes = [16, 768], strides = [1, 1]} : vector<16x1024xbf16> to vector<16x768xbf16>
    %345 = vector.extract_strided_slice %339 {offsets = [0, 129], sizes = [16, 768], strides = [1, 1]} : vector<16x1024xbf16> to vector<16x768xbf16>
    %346 = vector.extract_strided_slice %339 {offsets = [0, 145], sizes = [16, 768], strides = [1, 1]} : vector<16x1024xbf16> to vector<16x768xbf16>
    %347 = vector.extract_strided_slice %339 {offsets = [0, 146], sizes = [16, 768], strides = [1, 1]} : vector<16x1024xbf16> to vector<16x768xbf16>
    %348 = vector.extract_strided_slice %339 {offsets = [0, 147], sizes = [16, 768], strides = [1, 1]} : vector<16x1024xbf16> to vector<16x768xbf16>
    %349 = tpu.concatenate %340, %341, %342, %343, %344, %345, %346, %347, %348 in 0 : vector<16x768xbf16>, vector<16x768xbf16>, vector<16x768xbf16>, vector<16x768xbf16>, vector<16x768xbf16>, vector<16x768xbf16>, vector<16x768xbf16>, vector<16x768xbf16>, vector<16x768xbf16> -> vector<144x768xbf16>
    %c7 = arith.constant 7 : index
    %c0_143 = arith.constant 0 : index
    %c0_144 = arith.constant 0 : index
    %350 = vector.load %arg1[%c7, %c0_143, %c0_144] : memref<11x16x144xbf16, #tpu.memory_space<vmem>>, vector<1x16x144xbf16>
    %351 = vector.shape_cast %350 : vector<1x16x144xbf16> to vector<16x144xbf16>
    %cst_145 = arith.constant dense<0.000000e+00> : vector<16x768xf32>
    %352 = tpu.matmul %351, %349, %cst_145 {dimension_numbers = #tpu.dot_dimension_numbers<[1], [0], [0], [1], [0, 0, 1, 1], [], []>} : vector<16x144xbf16>, vector<144x768xbf16>, vector<16x768xf32> -> vector<16x768xf32>
    %353 = vector.broadcast %0 : vector<1x768xf32> to vector<16x768xf32>
    %354 = arith.mulf %352, %353 : vector<16x768xf32>
    %cst_146 = arith.constant dense<0.000000e+00> : vector<16xf32>
    %355 = vector.multi_reduction <add>, %354, %cst_146 [1] : vector<16x768xf32> to vector<16xf32>
    %356 = vector.shape_cast %355 : vector<16xf32> to vector<16x1xf32>
    %cst_147 = arith.constant 0.001953125 : f32
    %357 = vector.broadcast %cst_147 : f32 to vector<16x1xf32>
    %358 = arith.mulf %356, %357 : vector<16x1xf32>
    %359 = arith.mulf %354, %352 : vector<16x768xf32>
    %cst_148 = arith.constant dense<0.000000e+00> : vector<16xf32>
    %360 = vector.multi_reduction <add>, %359, %cst_148 [1] : vector<16x768xf32> to vector<16xf32>
    %361 = vector.shape_cast %360 : vector<16xf32> to vector<16x1xf32>
    %cst_149 = arith.constant 0.001953125 : f32
    %362 = vector.broadcast %cst_149 : f32 to vector<16x1xf32>
    %363 = arith.mulf %361, %362 : vector<16x1xf32>
    %364 = arith.mulf %358, %358 : vector<16x1xf32>
    %365 = arith.subf %363, %364 : vector<16x1xf32>
    %cst_150 = arith.constant 0.000000e+00 : f32
    %366 = vector.broadcast %cst_150 : f32 to vector<16x1xf32>
    %367 = arith.maximumf %365, %366 : vector<16x1xf32>
    %c7_151 = arith.constant 7 : index
    %c0_152 = arith.constant 0 : index
    %c0_153 = arith.constant 0 : index
    %368 = vector.load %arg2[%c7_151, %c0_152, %c0_153] : memref<11x16x1xf32, #tpu.memory_space<vmem>>, vector<1x16x1xf32>
    %369 = vector.shape_cast %368 : vector<1x16x1xf32> to vector<16x1xf32>
    %cst_154 = arith.constant 9.99999974E-6 : f32
    %370 = vector.broadcast %cst_154 : f32 to vector<16x1xf32>
    %371 = arith.addf %367, %370 : vector<16x1xf32>
    %372 = math.rsqrt %371 : vector<16x1xf32>
    %373 = arith.mulf %369, %372 : vector<16x1xf32>
    %c7_155 = arith.constant 7 : index
    %c0_156 = arith.constant 0 : index
    %c0_157 = arith.constant 0 : index
    %374 = vector.load %arg3[%c7_155, %c0_156, %c0_157] : memref<11x16x1xf32, #tpu.memory_space<vmem>>, vector<1x16x1xf32>
    %375 = vector.shape_cast %374 : vector<1x16x1xf32> to vector<16x1xf32>
    %376 = arith.mulf %358, %373 : vector<16x1xf32>
    %377 = arith.subf %375, %376 : vector<16x1xf32>
    %378 = vector.broadcast %373 : vector<16x1xf32> to vector<16x768xf32>
    %379 = arith.mulf %352, %378 : vector<16x768xf32>
    %380 = vector.broadcast %377 : vector<16x1xf32> to vector<16x768xf32>
    %381 = arith.addf %379, %380 : vector<16x768xf32>
    %cst_158 = arith.constant 0.000000e+00 : f32
    %382 = vector.broadcast %cst_158 : f32 to vector<16x768xf32>
    %383 = arith.maximumf %381, %382 : vector<16x768xf32>
    %384 = vector.broadcast %0 : vector<1x768xf32> to vector<16x768xf32>
    %385 = arith.mulf %383, %384 : vector<16x768xf32>
    %386 = arith.addf %385, %287 : vector<16x768xf32>
    %cst_159 = arith.constant 0.000000e+00 : f32
    %387 = vector.broadcast %cst_159 : f32 to vector<16x768xf32>
    %388 = arith.maximumf %386, %387 : vector<16x768xf32>
    %389 = arith.truncf %388 : vector<16x768xf32> to vector<16x768xbf16>
    %c0_160 = arith.constant 0 : index
    %c128_161 = arith.constant 128 : index
    %390 = vector.load %arg6[%c0_160, %c128_161] : memref<16x1024xbf16, #tpu.memory_space<vmem>>, vector<16x768xbf16>
    tpu.vector_store %arg6[%c0_160, %c128_161], %389 {strides = array<i32>} : memref<16x1024xbf16, #tpu.memory_space<vmem>>, vector<16x768xbf16>,
    %c0_162 = arith.constant 0 : index
    %c0_163 = arith.constant 0 : index
    %391 = vector.load %arg6[%c0_162, %c0_163] : memref<16x1024xbf16, #tpu.memory_space<vmem>>, vector<16x1024xbf16>
    %392 = vector.extract_strided_slice %391 {offsets = [0, 109], sizes = [16, 768], strides = [1, 1]} : vector<16x1024xbf16> to vector<16x768xbf16>
    %393 = vector.extract_strided_slice %391 {offsets = [0, 110], sizes = [16, 768], strides = [1, 1]} : vector<16x1024xbf16> to vector<16x768xbf16>
    %394 = vector.extract_strided_slice %391 {offsets = [0, 111], sizes = [16, 768], strides = [1, 1]} : vector<16x1024xbf16> to vector<16x768xbf16>
    %395 = vector.extract_strided_slice %391 {offsets = [0, 127], sizes = [16, 768], strides = [1, 1]} : vector<16x1024xbf16> to vector<16x768xbf16>
    %396 = vector.extract_strided_slice %391 {offsets = [0, 128], sizes = [16, 768], strides = [1, 1]} : vector<16x1024xbf16> to vector<16x768xbf16>
    %397 = vector.extract_strided_slice %391 {offsets = [0, 129], sizes = [16, 768], strides = [1, 1]} : vector<16x1024xbf16> to vector<16x768xbf16>
    %398 = vector.extract_strided_slice %391 {offsets = [0, 145], sizes = [16, 768], strides = [1, 1]} : vector<16x1024xbf16> to vector<16x768xbf16>
    %399 = vector.extract_strided_slice %391 {offsets = [0, 146], sizes = [16, 768], strides = [1, 1]} : vector<16x1024xbf16> to vector<16x768xbf16>
    %400 = vector.extract_strided_slice %391 {offsets = [0, 147], sizes = [16, 768], strides = [1, 1]} : vector<16x1024xbf16> to vector<16x768xbf16>
    %401 = tpu.concatenate %392, %393, %394, %395, %396, %397, %398, %399, %400 in 0 : vector<16x768xbf16>, vector<16x768xbf16>, vector<16x768xbf16>, vector<16x768xbf16>, vector<16x768xbf16>, vector<16x768xbf16>, vector<16x768xbf16>, vector<16x768xbf16>, vector<16x768xbf16> -> vector<144x768xbf16>
    %c8 = arith.constant 8 : index
    %c0_164 = arith.constant 0 : index
    %c0_165 = arith.constant 0 : index
    %402 = vector.load %arg1[%c8, %c0_164, %c0_165] : memref<11x16x144xbf16, #tpu.memory_space<vmem>>, vector<1x16x144xbf16>
    %403 = vector.shape_cast %402 : vector<1x16x144xbf16> to vector<16x144xbf16>
    %cst_166 = arith.constant dense<0.000000e+00> : vector<16x768xf32>
    %404 = tpu.matmul %403, %401, %cst_166 {dimension_numbers = #tpu.dot_dimension_numbers<[1], [0], [0], [1], [0, 0, 1, 1], [], []>} : vector<16x144xbf16>, vector<144x768xbf16>, vector<16x768xf32> -> vector<16x768xf32>
    %405 = vector.broadcast %0 : vector<1x768xf32> to vector<16x768xf32>
    %406 = arith.mulf %404, %405 : vector<16x768xf32>
    %cst_167 = arith.constant dense<0.000000e+00> : vector<16xf32>
    %407 = vector.multi_reduction <add>, %406, %cst_167 [1] : vector<16x768xf32> to vector<16xf32>
    %408 = vector.shape_cast %407 : vector<16xf32> to vector<16x1xf32>
    %cst_168 = arith.constant 0.001953125 : f32
    %409 = vector.broadcast %cst_168 : f32 to vector<16x1xf32>
    %410 = arith.mulf %408, %409 : vector<16x1xf32>
    %411 = arith.mulf %406, %404 : vector<16x768xf32>
    %cst_169 = arith.constant dense<0.000000e+00> : vector<16xf32>
    %412 = vector.multi_reduction <add>, %411, %cst_169 [1] : vector<16x768xf32> to vector<16xf32>
    %413 = vector.shape_cast %412 : vector<16xf32> to vector<16x1xf32>
    %cst_170 = arith.constant 0.001953125 : f32
    %414 = vector.broadcast %cst_170 : f32 to vector<16x1xf32>
    %415 = arith.mulf %413, %414 : vector<16x1xf32>
    %416 = arith.mulf %410, %410 : vector<16x1xf32>
    %417 = arith.subf %415, %416 : vector<16x1xf32>
    %cst_171 = arith.constant 0.000000e+00 : f32
    %418 = vector.broadcast %cst_171 : f32 to vector<16x1xf32>
    %419 = arith.maximumf %417, %418 : vector<16x1xf32>
    %c8_172 = arith.constant 8 : index
    %c0_173 = arith.constant 0 : index
    %c0_174 = arith.constant 0 : index
    %420 = vector.load %arg2[%c8_172, %c0_173, %c0_174] : memref<11x16x1xf32, #tpu.memory_space<vmem>>, vector<1x16x1xf32>
    %421 = vector.shape_cast %420 : vector<1x16x1xf32> to vector<16x1xf32>
    %cst_175 = arith.constant 9.99999974E-6 : f32
    %422 = vector.broadcast %cst_175 : f32 to vector<16x1xf32>
    %423 = arith.addf %419, %422 : vector<16x1xf32>
    %424 = math.rsqrt %423 : vector<16x1xf32>
    %425 = arith.mulf %421, %424 : vector<16x1xf32>
    %c8_176 = arith.constant 8 : index
    %c0_177 = arith.constant 0 : index
    %c0_178 = arith.constant 0 : index
    %426 = vector.load %arg3[%c8_176, %c0_177, %c0_178] : memref<11x16x1xf32, #tpu.memory_space<vmem>>, vector<1x16x1xf32>
    %427 = vector.shape_cast %426 : vector<1x16x1xf32> to vector<16x1xf32>
    %428 = arith.mulf %410, %425 : vector<16x1xf32>
    %429 = arith.subf %427, %428 : vector<16x1xf32>
    %430 = vector.broadcast %425 : vector<16x1xf32> to vector<16x768xf32>
    %431 = arith.mulf %404, %430 : vector<16x768xf32>
    %432 = vector.broadcast %429 : vector<16x1xf32> to vector<16x768xf32>
    %433 = arith.addf %431, %432 : vector<16x768xf32>
    %cst_179 = arith.constant 0.000000e+00 : f32
    %434 = vector.broadcast %cst_179 : f32 to vector<16x768xf32>
    %435 = arith.maximumf %433, %434 : vector<16x768xf32>
    %436 = vector.broadcast %0 : vector<1x768xf32> to vector<16x768xf32>
    %437 = arith.mulf %435, %436 : vector<16x768xf32>
    %438 = arith.truncf %437 : vector<16x768xf32> to vector<16x768xbf16>
    %c0_180 = arith.constant 0 : index
    %c128_181 = arith.constant 128 : index
    %439 = vector.load %arg6[%c0_180, %c128_181] : memref<16x1024xbf16, #tpu.memory_space<vmem>>, vector<16x768xbf16>
    tpu.vector_store %arg6[%c0_180, %c128_181], %438 {strides = array<i32>} : memref<16x1024xbf16, #tpu.memory_space<vmem>>, vector<16x768xbf16>,
    %c0_182 = arith.constant 0 : index
    %c0_183 = arith.constant 0 : index
    %440 = vector.load %arg6[%c0_182, %c0_183] : memref<16x1024xbf16, #tpu.memory_space<vmem>>, vector<16x1024xbf16>
    %441 = vector.extract_strided_slice %440 {offsets = [0, 109], sizes = [16, 768], strides = [1, 1]} : vector<16x1024xbf16> to vector<16x768xbf16>
    %442 = vector.extract_strided_slice %440 {offsets = [0, 110], sizes = [16, 768], strides = [1, 1]} : vector<16x1024xbf16> to vector<16x768xbf16>
    %443 = vector.extract_strided_slice %440 {offsets = [0, 111], sizes = [16, 768], strides = [1, 1]} : vector<16x1024xbf16> to vector<16x768xbf16>
    %444 = vector.extract_strided_slice %440 {offsets = [0, 127], sizes = [16, 768], strides = [1, 1]} : vector<16x1024xbf16> to vector<16x768xbf16>
    %445 = vector.extract_strided_slice %440 {offsets = [0, 128], sizes = [16, 768], strides = [1, 1]} : vector<16x1024xbf16> to vector<16x768xbf16>
    %446 = vector.extract_strided_slice %440 {offsets = [0, 129], sizes = [16, 768], strides = [1, 1]} : vector<16x1024xbf16> to vector<16x768xbf16>
    %447 = vector.extract_strided_slice %440 {offsets = [0, 145], sizes = [16, 768], strides = [1, 1]} : vector<16x1024xbf16> to vector<16x768xbf16>
    %448 = vector.extract_strided_slice %440 {offsets = [0, 146], sizes = [16, 768], strides = [1, 1]} : vector<16x1024xbf16> to vector<16x768xbf16>
    %449 = vector.extract_strided_slice %440 {offsets = [0, 147], sizes = [16, 768], strides = [1, 1]} : vector<16x1024xbf16> to vector<16x768xbf16>
    %450 = tpu.concatenate %441, %442, %443, %444, %445, %446, %447, %448, %449 in 0 : vector<16x768xbf16>, vector<16x768xbf16>, vector<16x768xbf16>, vector<16x768xbf16>, vector<16x768xbf16>, vector<16x768xbf16>, vector<16x768xbf16>, vector<16x768xbf16>, vector<16x768xbf16> -> vector<144x768xbf16>
    %c9 = arith.constant 9 : index
    %c0_184 = arith.constant 0 : index
    %c0_185 = arith.constant 0 : index
    %451 = vector.load %arg1[%c9, %c0_184, %c0_185] : memref<11x16x144xbf16, #tpu.memory_space<vmem>>, vector<1x16x144xbf16>
    %452 = vector.shape_cast %451 : vector<1x16x144xbf16> to vector<16x144xbf16>
    %cst_186 = arith.constant dense<0.000000e+00> : vector<16x768xf32>
    %453 = tpu.matmul %452, %450, %cst_186 {dimension_numbers = #tpu.dot_dimension_numbers<[1], [0], [0], [1], [0, 0, 1, 1], [], []>} : vector<16x144xbf16>, vector<144x768xbf16>, vector<16x768xf32> -> vector<16x768xf32>
    %454 = vector.broadcast %0 : vector<1x768xf32> to vector<16x768xf32>
    %455 = arith.mulf %453, %454 : vector<16x768xf32>
    %cst_187 = arith.constant dense<0.000000e+00> : vector<16xf32>
    %456 = vector.multi_reduction <add>, %455, %cst_187 [1] : vector<16x768xf32> to vector<16xf32>
    %457 = vector.shape_cast %456 : vector<16xf32> to vector<16x1xf32>
    %cst_188 = arith.constant 0.001953125 : f32
    %458 = vector.broadcast %cst_188 : f32 to vector<16x1xf32>
    %459 = arith.mulf %457, %458 : vector<16x1xf32>
    %460 = arith.mulf %455, %453 : vector<16x768xf32>
    %cst_189 = arith.constant dense<0.000000e+00> : vector<16xf32>
    %461 = vector.multi_reduction <add>, %460, %cst_189 [1] : vector<16x768xf32> to vector<16xf32>
    %462 = vector.shape_cast %461 : vector<16xf32> to vector<16x1xf32>
    %cst_190 = arith.constant 0.001953125 : f32
    %463 = vector.broadcast %cst_190 : f32 to vector<16x1xf32>
    %464 = arith.mulf %462, %463 : vector<16x1xf32>
    %465 = arith.mulf %459, %459 : vector<16x1xf32>
    %466 = arith.subf %464, %465 : vector<16x1xf32>
    %cst_191 = arith.constant 0.000000e+00 : f32
    %467 = vector.broadcast %cst_191 : f32 to vector<16x1xf32>
    %468 = arith.maximumf %466, %467 : vector<16x1xf32>
    %c9_192 = arith.constant 9 : index
    %c0_193 = arith.constant 0 : index
    %c0_194 = arith.constant 0 : index
    %469 = vector.load %arg2[%c9_192, %c0_193, %c0_194] : memref<11x16x1xf32, #tpu.memory_space<vmem>>, vector<1x16x1xf32>
    %470 = vector.shape_cast %469 : vector<1x16x1xf32> to vector<16x1xf32>
    %cst_195 = arith.constant 9.99999974E-6 : f32
    %471 = vector.broadcast %cst_195 : f32 to vector<16x1xf32>
    %472 = arith.addf %468, %471 : vector<16x1xf32>
    %473 = math.rsqrt %472 : vector<16x1xf32>
    %474 = arith.mulf %470, %473 : vector<16x1xf32>
    %c9_196 = arith.constant 9 : index
    %c0_197 = arith.constant 0 : index
    %c0_198 = arith.constant 0 : index
    %475 = vector.load %arg3[%c9_196, %c0_197, %c0_198] : memref<11x16x1xf32, #tpu.memory_space<vmem>>, vector<1x16x1xf32>
    %476 = vector.shape_cast %475 : vector<1x16x1xf32> to vector<16x1xf32>
    %477 = arith.mulf %459, %474 : vector<16x1xf32>
    %478 = arith.subf %476, %477 : vector<16x1xf32>
    %479 = vector.broadcast %474 : vector<16x1xf32> to vector<16x768xf32>
    %480 = arith.mulf %453, %479 : vector<16x768xf32>
    %481 = vector.broadcast %478 : vector<16x1xf32> to vector<16x768xf32>
    %482 = arith.addf %480, %481 : vector<16x768xf32>
    %cst_199 = arith.constant 0.000000e+00 : f32
    %483 = vector.broadcast %cst_199 : f32 to vector<16x768xf32>
    %484 = arith.maximumf %482, %483 : vector<16x768xf32>
    %485 = vector.broadcast %0 : vector<1x768xf32> to vector<16x768xf32>
    %486 = arith.mulf %484, %485 : vector<16x768xf32>
    %487 = arith.addf %486, %388 : vector<16x768xf32>
    %cst_200 = arith.constant 0.000000e+00 : f32
    %488 = vector.broadcast %cst_200 : f32 to vector<16x768xf32>
    %489 = arith.maximumf %487, %488 : vector<16x768xf32>
    %490 = arith.addf %85, %489 : vector<16x768xf32>
    %cst_201 = arith.constant 0.000000e+00 : f32
    %491 = vector.broadcast %cst_201 : f32 to vector<16x768xf32>
    %492 = arith.maximumf %490, %491 : vector<16x768xf32>
    %493 = arith.truncf %492 : vector<16x768xf32> to vector<16x768xbf16>
    %c0_202 = arith.constant 0 : index
    %c128_203 = arith.constant 128 : index
    %494 = vector.load %arg6[%c0_202, %c128_203] : memref<16x1024xbf16, #tpu.memory_space<vmem>>, vector<16x768xbf16>
    tpu.vector_store %arg6[%c0_202, %c128_203], %493 {strides = array<i32>} : memref<16x1024xbf16, #tpu.memory_space<vmem>>, vector<16x768xbf16>,
    %c0_204 = arith.constant 0 : index
    %c0_205 = arith.constant 0 : index
    %495 = vector.load %arg6[%c0_204, %c0_205] : memref<16x1024xbf16, #tpu.memory_space<vmem>>, vector<16x1024xbf16>
    %496 = vector.extract_strided_slice %495 {offsets = [0, 109], sizes = [16, 768], strides = [1, 1]} : vector<16x1024xbf16> to vector<16x768xbf16>
    %497 = vector.extract_strided_slice %495 {offsets = [0, 110], sizes = [16, 768], strides = [1, 1]} : vector<16x1024xbf16> to vector<16x768xbf16>
    %498 = vector.extract_strided_slice %495 {offsets = [0, 111], sizes = [16, 768], strides = [1, 1]} : vector<16x1024xbf16> to vector<16x768xbf16>
    %499 = vector.extract_strided_slice %495 {offsets = [0, 127], sizes = [16, 768], strides = [1, 1]} : vector<16x1024xbf16> to vector<16x768xbf16>
    %500 = vector.extract_strided_slice %495 {offsets = [0, 128], sizes = [16, 768], strides = [1, 1]} : vector<16x1024xbf16> to vector<16x768xbf16>
    %501 = vector.extract_strided_slice %495 {offsets = [0, 129], sizes = [16, 768], strides = [1, 1]} : vector<16x1024xbf16> to vector<16x768xbf16>
    %502 = vector.extract_strided_slice %495 {offsets = [0, 145], sizes = [16, 768], strides = [1, 1]} : vector<16x1024xbf16> to vector<16x768xbf16>
    %503 = vector.extract_strided_slice %495 {offsets = [0, 146], sizes = [16, 768], strides = [1, 1]} : vector<16x1024xbf16> to vector<16x768xbf16>
    %504 = vector.extract_strided_slice %495 {offsets = [0, 147], sizes = [16, 768], strides = [1, 1]} : vector<16x1024xbf16> to vector<16x768xbf16>
    %505 = tpu.concatenate %496, %497, %498, %499, %500, %501, %502, %503, %504 in 0 : vector<16x768xbf16>, vector<16x768xbf16>, vector<16x768xbf16>, vector<16x768xbf16>, vector<16x768xbf16>, vector<16x768xbf16>, vector<16x768xbf16>, vector<16x768xbf16>, vector<16x768xbf16> -> vector<144x768xbf16>
    %c10 = arith.constant 10 : index
    %c0_206 = arith.constant 0 : index
    %c0_207 = arith.constant 0 : index
    %506 = vector.load %arg1[%c10, %c0_206, %c0_207] : memref<11x16x144xbf16, #tpu.memory_space<vmem>>, vector<1x16x144xbf16>
    %507 = vector.shape_cast %506 : vector<1x16x144xbf16> to vector<16x144xbf16>
    %cst_208 = arith.constant dense<0.000000e+00> : vector<16x768xf32>
    %508 = tpu.matmul %507, %505, %cst_208 {dimension_numbers = #tpu.dot_dimension_numbers<[1], [0], [0], [1], [0, 0, 1, 1], [], []>} : vector<16x144xbf16>, vector<144x768xbf16>, vector<16x768xf32> -> vector<16x768xf32>
    %509 = vector.broadcast %0 : vector<1x768xf32> to vector<16x768xf32>
    %510 = arith.mulf %508, %509 : vector<16x768xf32>
    %cst_209 = arith.constant dense<0.000000e+00> : vector<16xf32>
    %511 = vector.multi_reduction <add>, %510, %cst_209 [1] : vector<16x768xf32> to vector<16xf32>
    %512 = vector.shape_cast %511 : vector<16xf32> to vector<16x1xf32>
    %cst_210 = arith.constant 0.001953125 : f32
    %513 = vector.broadcast %cst_210 : f32 to vector<16x1xf32>
    %514 = arith.mulf %512, %513 : vector<16x1xf32>
    %515 = arith.mulf %510, %508 : vector<16x768xf32>
    %cst_211 = arith.constant dense<0.000000e+00> : vector<16xf32>
    %516 = vector.multi_reduction <add>, %515, %cst_211 [1] : vector<16x768xf32> to vector<16xf32>
    %517 = vector.shape_cast %516 : vector<16xf32> to vector<16x1xf32>
    %cst_212 = arith.constant 0.001953125 : f32
    %518 = vector.broadcast %cst_212 : f32 to vector<16x1xf32>
    %519 = arith.mulf %517, %518 : vector<16x1xf32>
    %520 = arith.mulf %514, %514 : vector<16x1xf32>
    %521 = arith.subf %519, %520 : vector<16x1xf32>
    %cst_213 = arith.constant 0.000000e+00 : f32
    %522 = vector.broadcast %cst_213 : f32 to vector<16x1xf32>
    %523 = arith.maximumf %521, %522 : vector<16x1xf32>
    %c10_214 = arith.constant 10 : index
    %c0_215 = arith.constant 0 : index
    %c0_216 = arith.constant 0 : index
    %524 = vector.load %arg2[%c10_214, %c0_215, %c0_216] : memref<11x16x1xf32, #tpu.memory_space<vmem>>, vector<1x16x1xf32>
    %525 = vector.shape_cast %524 : vector<1x16x1xf32> to vector<16x1xf32>
    %cst_217 = arith.constant 9.99999974E-6 : f32
    %526 = vector.broadcast %cst_217 : f32 to vector<16x1xf32>
    %527 = arith.addf %523, %526 : vector<16x1xf32>
    %528 = math.rsqrt %527 : vector<16x1xf32>
    %529 = arith.mulf %525, %528 : vector<16x1xf32>
    %c10_218 = arith.constant 10 : index
    %c0_219 = arith.constant 0 : index
    %c0_220 = arith.constant 0 : index
    %530 = vector.load %arg3[%c10_218, %c0_219, %c0_220] : memref<11x16x1xf32, #tpu.memory_space<vmem>>, vector<1x16x1xf32>
    %531 = vector.shape_cast %530 : vector<1x16x1xf32> to vector<16x1xf32>
    %532 = arith.mulf %514, %529 : vector<16x1xf32>
    %533 = arith.subf %531, %532 : vector<16x1xf32>
    %534 = vector.broadcast %529 : vector<16x1xf32> to vector<16x768xf32>
    %535 = arith.mulf %508, %534 : vector<16x768xf32>
    %536 = vector.broadcast %533 : vector<16x1xf32> to vector<16x768xf32>
    %537 = arith.addf %535, %536 : vector<16x768xf32>
    %cst_221 = arith.constant 0.000000e+00 : f32
    %538 = vector.broadcast %cst_221 : f32 to vector<16x768xf32>
    %539 = arith.maximumf %537, %538 : vector<16x768xf32>
    %540 = vector.broadcast %0 : vector<1x768xf32> to vector<16x768xf32>
    %541 = arith.mulf %539, %540 : vector<16x768xf32>
    %c0_222 = arith.constant 0 : index
    %c0_223 = arith.constant 0 : index
    %542 = vector.load %arg5[%c0_222, %c0_223] : memref<16x768xf32, #tpu.memory_space<vmem>>, vector<16x768xf32>
    tpu.vector_store %arg5[%c0_222, %c0_223], %541 {strides = array<i32>} : memref<16x768xf32, #tpu.memory_space<vmem>>, vector<16x768xf32>,
    return
  }
}

</mosaic_0001>

<bundles_post_ra>
// kernel: resnet_forward.1
= control target key start
LH: loop header
LB: loop body
LE: loop exit
PB: predicated region body
PF: predicated region fallthrough
CT: control target
= control target key end

     0   :  { %s8474_s26 = smov 91   ;;  %s8475_s27 = smov 92   ;;  %vm207_vm0 = vcmask 744448   ;;  %vm186_vm1 = vcmask 752640   ;;  %vm165_vm2 = vcmask 883712   ;;  %vm142_vm3 = vcmask 891904   ;;  %s15062_s0 = inlined_call_operand.vmem [shape: bf16[16,1024], index: 0, kind: input, shape index: {}]   ;;  %s15063_s1 = inlined_call_operand.vmem [shape: bf16[11,16,144], index: 1, kind: input, shape index: {}]   ;;  %s15064_s4 = inlined_call_operand.vmem [shape: f32[1,768], index: 4, kind: input, shape index: {}]   ;;  %s15065_s2 = inlined_call_operand.vmem [shape: f32[11,16,1], index: 2, kind: input, shape index: {}]   ;;  %s15066_s3 = inlined_call_operand.vmem [shape: f32[11,16,1], index: 3, kind: input, shape index: {}]   ;;  %s15067_s5 = inlined_call_operand.vmem [shape: f32[16,768], index: 5, kind: output, shape index: {}]  }
   0x1   :  { %v31_v0 = vld [vmem:[%s15062_s0 + $0x8] sm:$0xff]  ;;  %v30_v2 = vld [vmem:[%s15062_s0] sm:$0xff]  ;;  %s8476_s28 = smov 108   ;;  %s8477_s29 = smov 109   ;;  %v32_v8 = vld [vmem:[%s15062_s0 + $0x10] sm:$0xff]  ;;  %vm123_vm4 = vcmask 900096  }
   0x2   :  { %v35_v1 = vld [vmem:[%s15062_s0 + $0x28] sm:$0xff]  ;;  %v34_v4 = vld [vmem:[%s15062_s0 + $0x20] sm:$0xff]  ;;  %s8478_s30 = smov 110   ;;  %s8479_s6 = smov 126   ;;  %v36_v9 = vld [vmem:[%s15062_s0 + $0x30] sm:$0xff]  ;;  %vm102_vm5 = vcmask 1031168  }
   0x3   :  { %v8523_v3 = vcombine.high %v31_v0, %v35_v1  ;;  %v8528_v5 = vcombine.high %v30_v2, %v34_v4  ;;  %v8534_v6 = vcombine.low %v31_v0, %v35_v1  ;;  %v8558_v7 = vcombine.low %v30_v2, %v34_v4  ;;  %s8480_s7 = smov 127   ;;  %s8481_s12 = smov 90   ;;  %v33_v12 = vld [vmem:[%s15062_s0 + $0x18] sm:$0xff]  ;;  %v8733_v2 = vld [vmem:[%s15063_s1 + $0x4] ss:$8 sps:$4 sm:$0xff]  }
   0x4   :  { %v8586_v10 = vcombine.high %v32_v8, %v36_v9  ;;  %v8590_v11 = vcombine.low %v32_v8, %v36_v9  ;;  %v37_v13 = vld [vmem:[%s15062_s0 + $0x38] sm:$0xff]  ;;  %s8482_s0 = smov 19   ;;  %vm81_vm6 = vcmask 1039360   ;;  %vm228_vm7 = vcmask 736256  }
   0x5   :  { %197 = vrot.lane.b32.xlu1 %v8523_v3, %s8474_s26  ;;  %193 = vrot.lane.b32.xlu0 %v8528_v5, %s8474_s26  ;;  %v8608_v14 = vcombine.low %v33_v12, %v37_v13  ;;  %v8089_v15 = vcombine.high %v33_v12, %v37_v13  ;;  %vm481_vm8 = vcmask 130048   ;;  %vm372_vm9 = vcmask 154624  }
   0x6   :  { %8092 = vmatprep.mubr.msk.bf16.mxu0 %vm481_vm8, %v8733_v2  ;;  %8093 = vmatprep.mubr.msk.bf16.mxu1 %vm481_vm8, %v8733_v2 }
   0x9   :  { %172 = vrot.lane.b32.xlu1 %v8528_v5, %s8475_s27  ;;  %195 = vrot.lane.b32.xlu0 %v8534_v6, %s8474_s26 }
   0xd   :  { %176 = vrot.lane.b32.xlu1 %v8523_v3, %s8475_s27  ;;  %174 = vrot.lane.b32.xlu0 %v8534_v6, %s8475_s27 }
  0x11   :  { %153 = vrot.lane.b32.xlu1 %v8534_v6, %s8476_s28  ;;  %151 = vrot.lane.b32.xlu0 %v8528_v5, %s8476_s28 }
  0x15   :  { %130 = vrot.lane.b32.xlu1 %v8528_v5, %s8477_s29  ;;  %155 = vrot.lane.b32.xlu0 %v8523_v3, %s8476_s28 }
  0x19   :  { %134 = vrot.lane.b32.xlu1 %v8523_v3, %s8477_s29  ;;  %132 = vrot.lane.b32.xlu0 %v8534_v6, %s8477_s29 }
  0x1d   :  { %113 = vrot.lane.b32.xlu1 %v8534_v6, %s8478_s30  ;;  %111 = vrot.lane.b32.xlu0 %v8528_v5, %s8478_s30 }
  0x21   :  { %109 = vrot.lane.b32.xlu1 %v8558_v7, %s8478_s30  ;;  %115 = vrot.lane.b32.xlu0 %v8523_v3, %s8478_s30 }
  0x25   :  { %92 = vrot.lane.b32.xlu1 %v8534_v6, %s8479_s6  ;;  %90 = vrot.lane.b32.xlu0 %v8528_v5, %s8479_s6 }
  0x29   :  { %88 = vrot.lane.b32.xlu1 %v8558_v7, %s8479_s6  ;;  %94 = vrot.lane.b32.xlu0 %v8523_v3, %s8479_s6 }
  0x2d   :  { %71 = vrot.lane.b32.xlu1 %v8534_v6, %s8480_s7  ;;  %69 = vrot.lane.b32.xlu0 %v8528_v5, %s8480_s7 }
  0x31   :  { %67 = vrot.lane.b32.xlu1 %v8558_v7, %s8480_s7  ;;  %73 = vrot.lane.b32.xlu0 %v8523_v3, %s8480_s7 }
  0x35   :  { %201 = vrot.lane.b32.xlu1 %v8586_v10, %s8474_s26  ;;  %199 = vrot.lane.b32.xlu0 %v8590_v11, %s8474_s26 }
  0x39   :  { %216 = vrot.lane.b32.xlu1 %v8534_v6, %s8481_s12  ;;  %214 = vrot.lane.b32.xlu0 %v8528_v5, %s8481_s12 }
  0x3d   :  { %178 = vrot.lane.b32.xlu1 %v8590_v11, %s8475_s27  ;;  %218 = vrot.lane.b32.xlu0 %v8523_v3, %s8481_s12 }
  0x41   :  { %203 = vrot.lane.b32.xlu1 %v8608_v14, %s8474_s26  ;;  %180 = vrot.lane.b32.xlu0 %v8586_v10, %s8475_s27 }
  0x45   :  { %157 = vrot.lane.b32.xlu1 %v8590_v11, %s8476_s28  ;;  %205 = vrot.lane.b32.xlu0 %v8089_v15, %s8474_s26 }
  0x49   :  { %182 = vrot.lane.b32.xlu1 %v8608_v14, %s8475_s27  ;;  %159 = vrot.lane.b32.xlu0 %v8586_v10, %s8476_s28 }
  0x4d   :  { %136 = vrot.lane.b32.xlu1 %v8590_v11, %s8477_s29  ;;  %184 = vrot.lane.b32.xlu0 %v8089_v15, %s8475_s27 }
  0x51   :  { %161 = vrot.lane.b32.xlu1 %v8608_v14, %s8476_s28  ;;  %138 = vrot.lane.b32.xlu0 %v8586_v10, %s8477_s29 }
  0x55   :  { %117 = vrot.lane.b32.xlu1 %v8590_v11, %s8478_s30  ;;  %163 = vrot.lane.b32.xlu0 %v8089_v15, %s8476_s28 }
  0x59   :  { %140 = vrot.lane.b32.xlu1 %v8608_v14, %s8477_s29  ;;  %119 = vrot.lane.b32.xlu0 %v8586_v10, %s8478_s30 }
  0x5d   :  { %98 = vrot.lane.b32.xlu1 %v8586_v10, %s8479_s6  ;;  %96 = vrot.lane.b32.xlu0 %v8590_v11, %s8479_s6 }
  0x61   :  { %75 = vrot.lane.b32.xlu1 %v8590_v11, %s8480_s7  ;;  %121 = vrot.lane.b32.xlu0 %v8608_v14, %s8478_s30 }
  0x65   :  { %100 = vrot.lane.b32.xlu1 %v8608_v14, %s8479_s6  ;;  %77 = vrot.lane.b32.xlu0 %v8586_v10, %s8480_s7 }
  0x69   :  { %222 = vrot.lane.b32.xlu1 %v8586_v10, %s8481_s12  ;;  %79 = vrot.lane.b32.xlu0 %v8608_v14, %s8480_s7 }
  0x6d   :  { %224 = vrot.lane.b32.xlu1 %v8608_v14, %s8481_s12  ;;  %220 = vrot.lane.b32.xlu0 %v8590_v11, %s8481_s12 }
  0x77   :  { %v8657_v16 = vpop.permute.xlu1 %197  ;;  %v194_v17 = vpop.permute.xlu0 %193 }
  0x78   :  { %344 = vrot.lane.b32.xlu1 %v194_v17, %s8482_s0 }
  0x7b   :  { %v173_v18 = vpop.permute.xlu1 %172  ;;  %v196_v19 = vpop.permute.xlu0 %195 }
  0x7c   :  { %330 = vrot.lane.b32.xlu0 %v173_v18, %s8482_s0  ;;  %v209_v20 = vsel %vm207_vm0, %v196_v19, %v8657_v16  ;;  %v208_v22 = vsel %vm207_vm0, %v194_v17, %v196_v19 }
  0x7d   :  { %348 = vrot.lane.b32.xlu1 %v209_v20, %s8482_s0 }
  0x7f   :  { %v8664_v21 = vpop.permute.xlu1 %176  ;;  %v175_v23 = vpop.permute.xlu0 %174 }
  0x80   :  { %346 = vrot.lane.b32.xlu0 %v208_v22, %s8482_s0  ;;  %v188_v24 = vsel %vm186_vm1, %v175_v23, %v8664_v21  ;;  %v187_v26 = vsel %vm186_vm1, %v173_v18, %v175_v23 }
  0x81   :  { %334 = vrot.lane.b32.xlu1 %v188_v24, %s8482_s0 }
  0x83   :  { %v154_v25 = vpop.permute.xlu1 %153  ;;  %v152_v27 = vpop.permute.xlu0 %151 }
  0x84   :  { %332 = vrot.lane.b32.xlu0 %v187_v26, %s8482_s0  ;;  %v166_v28 = vsel %vm165_vm2, %v152_v27, %v154_v25 }
  0x85   :  { %318 = vrot.lane.b32.xlu1 %v166_v28, %s8482_s0 }
  0x87   :  { %v131_v29 = vpop.permute.xlu1 %130  ;;  %v8675_v30 = vpop.permute.xlu0 %155 }
  0x88   :  { %v167_v31 = vsel %vm165_vm2, %v154_v25, %v8675_v30 }
  0x89   :  { %320 = vrot.lane.b32.xlu0 %v167_v31, %s8482_s0  ;;  %316 = vrot.lane.b32.xlu1 %v152_v27, %s8482_s0 }
  0x8b   :  { %v8681_v32 = vpop.permute.xlu1 %134  ;;  %v133_v33 = vpop.permute.xlu0 %132 }
  0x8c   :  { %v144_v34 = vsel %vm142_vm3, %v133_v33, %v8681_v32  ;;  %v143_v36 = vsel %vm142_vm3, %v131_v29, %v133_v33 }
  0x8d   :  { %226 = vrot.lane.b32.xlu0 %v8089_v15, %s8481_s12  ;;  %306 = vrot.lane.b32.xlu1 %v144_v34, %s8482_s0 }
  0x8f   :  { %v114_v35 = vpop.permute.xlu1 %113  ;;  %v112_v37 = vpop.permute.xlu0 %111 }
  0x90   :  { %v125_v38 = vsel %vm123_vm4, %v112_v37, %v114_v35 }
  0x91   :  { %304 = vrot.lane.b32.xlu0 %v143_v36, %s8482_s0  ;;  %290 = vrot.lane.b32.xlu1 %v125_v38, %s8482_s0 }
  0x93   :  { %v110_v39 = vpop.permute.xlu1 %109  ;;  %v8691_v40 = vpop.permute.xlu0 %115 }
  0x94   :  { %v124_v41 = vsel %vm123_vm4, %v110_v39, %v112_v37  ;;  %v126_v43 = vsel %vm123_vm4, %v114_v35, %v8691_v40 }
  0x95   :  { %302 = vrot.lane.b32.xlu0 %v131_v29, %s8482_s0  ;;  %288 = vrot.lane.b32.xlu1 %v124_v41, %s8482_s0 }
  0x97   :  { %v93_v42 = vpop.permute.xlu1 %92  ;;  %v91_v44 = vpop.permute.xlu0 %90 }
  0x98   :  { %v104_v46 = vsel %vm102_vm5, %v91_v44, %v93_v42 }
  0x99   :  { %292 = vrot.lane.b32.xlu0 %v126_v43, %s8482_s0 }
  0x9b   :  { %v89_v45 = vpop.permute.xlu1 %88  ;;  %v8700_v47 = vpop.permute.xlu0 %94 }
  0x9c   :  { %v105_v48 = vsel %vm102_vm5, %v93_v42, %v8700_v47  ;;  %v103_v50 = vsel %vm102_vm5, %v89_v45, %v91_v44 }
  0x9d   :  { %278 = vrot.lane.b32.xlu1 %v105_v48, %s8482_s0  ;;  %276 = vrot.lane.b32.xlu0 %v104_v46, %s8482_s0 }
  0x9f   :  { %v72_v49 = vpop.permute.xlu1 %71  ;;  %v70_v51 = vpop.permute.xlu0 %69 }
  0xa0   :  { %v83_v52 = vsel %vm81_vm6, %v70_v51, %v72_v49 }
  0xa1   :  { %274 = vrot.lane.b32.xlu0 %v103_v50, %s8482_s0  ;;  %262 = vrot.lane.b32.xlu1 %v83_v52, %s8482_s0 }
  0xa3   :  { %v68_v53 = vpop.permute.xlu1 %67  ;;  %v8710_v54 = vpop.permute.xlu0 %73 }
  0xa4   :  { %v82_v55 = vsel %vm81_vm6, %v68_v53, %v70_v51  ;;  %v84_v56 = vsel %vm81_vm6, %v72_v49, %v8710_v54 }
  0xa5   :  { %264 = vrot.lane.b32.xlu0 %v84_v56, %s8482_s0  ;;  %260 = vrot.lane.b32.xlu1 %v82_v55, %s8482_s0 }
  0xa7   :  { %v202_v57 = vpop.permute.xlu1 %201  ;;  %v200_v58 = vpop.permute.xlu0 %199 }
  0xa8   :  { %v210_v61 = vsel %vm207_vm0, %v8657_v16, %v200_v58  ;;  %v211_v63 = vsel %vm207_vm0, %v200_v58, %v202_v57 }
  0xa9   :  { %248 = vrot.lane.b32.xlu0 %v8528_v5, %s8482_s0  ;;  %250 = vrot.lane.b32.xlu1 %v8534_v6, %s8482_s0 }
  0xab   :  { %v217_v59 = vpop.permute.xlu1 %216  ;;  %v215_v60 = vpop.permute.xlu0 %214 }
  0xac   :  { %v229_v0 = vsel %vm228_vm7, %v215_v60, %v217_v59 }
  0xad   :  { %246 = vrot.lane.b32.xlu0 %v8558_v7, %s8482_s0  ;;  %350 = vrot.lane.b32.xlu1 %v210_v61, %s8482_s0 }
  0xaf   :  { %v179_v62 = vpop.permute.xlu1 %178  ;;  %v8728_v1 = vpop.permute.xlu0 %218 }
  0xb0   :  { %v230_v5 = vsel %vm228_vm7, %v217_v59, %v8728_v1  ;;  %v189_v12 = vsel %vm186_vm1, %v8664_v21, %v179_v62 }
  0xb1   :  { %352 = vrot.lane.b32.xlu0 %v211_v63, %s8482_s0  ;;  %360 = vrot.lane.b32.xlu1 %v229_v0, %s8482_s0 }
  0xb3   :  { %v204_v4 = vpop.permute.xlu1 %203  ;;  %v181_v6 = vpop.permute.xlu0 %180 }
  0xb4   :  { %v190_v8 = vsel %vm186_vm1, %v179_v62, %v181_v6  ;;  %v212_v17 = vsel %vm207_vm0, %v202_v57, %v204_v4 }
  0xb5   :  { %362 = vrot.lane.b32.xlu0 %v230_v5, %s8482_s0  ;;  %358 = vrot.lane.b32.xlu1 %v215_v60, %s8482_s0 }
  0xb7   :  { %v158_v7 = vpop.permute.xlu1 %157  ;;  %v206_v9 = vpop.permute.xlu0 %205 }
  0xb8   :  { %v213_v15 = vsel %vm207_vm0, %v204_v4, %v206_v9  ;;  %v168_v21 = vsel %vm165_vm2, %v8675_v30, %v158_v7 }
  0xb9   :  { %338 = vrot.lane.b32.xlu1 %v190_v8, %s8482_s0  ;;  %336 = vrot.lane.b32.xlu0 %v189_v12, %s8482_s0 }
  0xbb   :  { %v183_v13 = vpop.permute.xlu1 %182  ;;  %v160_v16 = vpop.permute.xlu0 %159 }
  0xbc   :  { %v169_v19 = vsel %vm165_vm2, %v158_v7, %v160_v16  ;;  %v191_v25 = vsel %vm186_vm1, %v181_v6, %v183_v13 }
  0xbd   :  { %356 = vrot.lane.b32.xlu1 %v213_v15, %s8482_s0  ;;  %354 = vrot.lane.b32.xlu0 %v212_v17, %s8482_s0 }
  0xbf   :  { %v137_v18 = vpop.permute.xlu1 %136  ;;  %v185_v20 = vpop.permute.xlu0 %184 }
  0xc0   :  { %v192_v23 = vsel %vm186_vm1, %v183_v13, %v185_v20  ;;  %v145_v29 = vsel %vm142_vm3, %v8681_v32, %v137_v18 }
  0xc1   :  { %324 = vrot.lane.b32.xlu1 %v169_v19, %s8482_s0  ;;  %322 = vrot.lane.b32.xlu0 %v168_v21, %s8482_s0 }
  0xc3   :  { %v162_v22 = vpop.permute.xlu1 %161  ;;  %v139_v24 = vpop.permute.xlu0 %138 }
  0xc4   :  { %v146_v27 = vsel %vm142_vm3, %v137_v18, %v139_v24  ;;  %v170_v34 = vsel %vm165_vm2, %v160_v16, %v162_v22 }
  0xc5   :  { %342 = vrot.lane.b32.xlu1 %v192_v23, %s8482_s0  ;;  %340 = vrot.lane.b32.xlu0 %v191_v25, %s8482_s0 }
  0xc7   :  { %v118_v26 = vpop.permute.xlu1 %117  ;;  %v164_v28 = vpop.permute.xlu0 %163 }
  0xc8   :  { %v171_v31 = vsel %vm165_vm2, %v162_v22, %v164_v28  ;;  %v127_v32 = vsel %vm123_vm4, %v8691_v40, %v118_v26 }
  0xc9   :  { %310 = vrot.lane.b32.xlu1 %v146_v27, %s8482_s0  ;;  %308 = vrot.lane.b32.xlu0 %v145_v29, %s8482_s0 }
  0xcb   :  { %v141_v30 = vpop.permute.xlu1 %140  ;;  %v120_v33 = vpop.permute.xlu0 %119 }
  0xcc   :  { %v128_v36 = vsel %vm123_vm4, %v118_v26, %v120_v33  ;;  %v147_v39 = vsel %vm142_vm3, %v139_v24, %v141_v30 }
  0xcd   :  { %328 = vrot.lane.b32.xlu1 %v171_v31, %s8482_s0  ;;  %326 = vrot.lane.b32.xlu0 %v170_v34, %s8482_s0 }
  0xcf   :  { %v99_v35 = vpop.permute.xlu1 %98  ;;  %v97_v37 = vpop.permute.xlu0 %96 }
  0xd0   :  { %v107_v41 = vsel %vm102_vm5, %v97_v37, %v99_v35  ;;  %v106_v43 = vsel %vm102_vm5, %v8700_v47, %v97_v37 }
  0xd1   :  { %296 = vrot.lane.b32.xlu1 %v128_v36, %s8482_s0  ;;  %294 = vrot.lane.b32.xlu0 %v127_v32, %s8482_s0 }
  0xd3   :  { %v76_v38 = vpop.permute.xlu1 %75  ;;  %v122_v42 = vpop.permute.xlu0 %121 }
  0xd4   :  { %v129_v40 = vsel %vm123_vm4, %v120_v33, %v122_v42  ;;  %v85_v49 = vsel %vm81_vm6, %v8710_v54, %v76_v38 }
  0xd5   :  { %312 = vrot.lane.b32.xlu0 %v147_v39, %s8482_s0  ;;  %314 = vrot.lane.b32.xlu1 %v141_v30, %s8482_s0 }
  0xd7   :  { %v101_v44 = vpop.permute.xlu1 %100  ;;  %v78_v45 = vpop.permute.xlu0 %77 }
  0xd8   :  { %v86_v46 = vsel %vm81_vm6, %v76_v38, %v78_v45  ;;  %v108_v50 = vsel %vm102_vm5, %v99_v35, %v101_v44 }
  0xd9   :  { %280 = vrot.lane.b32.xlu0 %v106_v43, %s8482_s0  ;;  %282 = vrot.lane.b32.xlu1 %v107_v41, %s8482_s0 }
  0xdb   :  { %v223_v48 = vpop.permute.xlu1 %222  ;;  %v80_v47 = vpop.permute.xlu0 %79 }
  0xdc   :  { %v87_v54 = vsel %vm81_vm6, %v78_v45, %v80_v47  ;;  %v8926_v45 = vld [vmem:[%s15063_s1] ss:$8 sps:$4 sm:$0xff]  }
  0xdd   :  { %298 = vrot.lane.b32.xlu0 %v129_v40, %s8482_s0  ;;  %300 = vrot.lane.b32.xlu1 %v122_v42, %s8482_s0 }
  0xdf   :  { %v225_v51 = vpop.permute.xlu1 %224  ;;  %v221_v52 = vpop.permute.xlu0 %220 }
  0xe0   :  { %v231_v59 = vsel %vm228_vm7, %v8728_v1, %v221_v52  ;;  %v233_v63 = vsel %vm228_vm7, %v223_v48, %v225_v51 }
  0xe1   :  { %268 = vrot.lane.b32.xlu1 %v86_v46, %s8482_s0  ;;  %266 = vrot.lane.b32.xlu0 %v85_v49, %s8482_s0 }
  0xe5   :  { %284 = vrot.lane.b32.xlu0 %v108_v50, %s8482_s0  ;;  %286 = vrot.lane.b32.xlu1 %v101_v44, %s8482_s0 }
  0xe9   :  { %252 = vrot.lane.b32.xlu0 %v8523_v3, %s8482_s0  ;;  %254 = vrot.lane.b32.xlu1 %v8590_v11, %s8482_s0 }
  0xea   :  { %v345_v53 = vpop.permute.xlu1 %344 }
  0xed   :  { %270 = vrot.lane.b32.xlu0 %v87_v54, %s8482_s0  ;;  %272 = vrot.lane.b32.xlu1 %v80_v47, %s8482_s0 }
  0xee   :  { %v331_v55 = vpop.permute.xlu0 %330 }
  0xef   :  { %v8803_v56 = vpop.permute.xlu1 %348 }
  0xf1   :  { %256 = vrot.lane.b32.xlu0 %v8586_v10, %s8482_s0  ;;  %258 = vrot.lane.b32.xlu1 %v8608_v14, %s8482_s0  ;;  %v232_v10 = vsel %vm228_vm7, %v221_v52, %v223_v48 }
  0xf2   :  { %v347_v3 = vpop.permute.xlu0 %346 }
  0xf3   :  { %v8811_v11 = vsel %vm372_vm9, %v347_v3, %v8803_v56  ;;  %v8814_v57 = vsel %vm372_vm9, %v345_v53, %v347_v3  ;;  %v8816_v58 = vpop.permute.xlu1 %334 }
  0xf4   :  { %485 = vmatprep.subr.bf16.mxu0 %v8811_v11 }
  0xf5   :  { %486 = vmatpush1.bf16.msra.mxu0 %v8814_v57  ;;  %364 = vrot.lane.b32.xlu0 %v231_v59, %s8482_s0 }
  0xf6   :  { %366 = vrot.lane.b32.xlu1 %v232_v10, %s8482_s0  ;;  %v333_v14 = vpop.permute.xlu0 %332 }
  0xf7   :  { %v8827_v60 = vsel %vm372_vm9, %v333_v14, %v8816_v58  ;;  %v8830_v61 = vsel %vm372_vm9, %v331_v55, %v333_v14  ;;  %v319_v62 = vpop.permute.xlu1 %318 }
  0xf8   :  { %487 = vmatprep.subr.bf16.mxu0 %v8827_v60 }
  0xf9   :  { %488 = vmatpush1.bf16.msra.mxu0 %v8830_v61  ;;  %368 = vrot.lane.b32.xlu0 %v233_v63, %s8482_s0 }
  0xfb   :  { %v8836_v0 = vpop.permute.xlu0 %320  ;;  %v317_v1 = vpop.permute.xlu1 %316 }
  0xfc   :  { %v8840_v4 = vsel %vm372_vm9, %v319_v62, %v8836_v0  ;;  %v8843_v5 = vsel %vm372_vm9, %v317_v1, %v319_v62 }
  0xfd   :  { %489 = vmatprep.subr.bf16.mxu0 %v8840_v4 }
  0xfe   :  { %490 = vmatpush1.bf16.msra.mxu0 %v8843_v5 }
  0xff   :  { %v227_v6 = vpop.permute.xlu0 %226  ;;  %v8847_v7 = vpop.permute.xlu1 %306 }
 0x100   :  { %v234_v8 = vsel %vm228_vm7, %v225_v51, %v227_v6 }
 0x101   :  { %370 = vrot.lane.b32.xlu1 %v234_v8, %s8482_s0 }
 0x103   :  { %v305_v9 = vpop.permute.xlu0 %304  ;;  %v291_v12 = vpop.permute.xlu1 %290 }
 0x104   :  { %v8853_v13 = vsel %vm372_vm9, %v305_v9, %v8847_v7 }
 0x105   :  { %491 = vmatprep.subr.bf16.mxu0 %v8853_v13 }
 0x107   :  { %v303_v15 = vpop.permute.xlu0 %302  ;;  %v289_v17 = vpop.permute.xlu1 %288 }
 0x108   :  { %v8857_v16 = vsel %vm372_vm9, %v303_v15, %v305_v9  ;;  %v8863_v19 = vsel %vm372_vm9, %v289_v17, %v291_v12 }
 0x109   :  { %492 = vmatpush1.bf16.msra.mxu0 %v8857_v16 }
 0x10b   :  { %v8860_v18 = vpop.permute.xlu0 %292 }
 0x10c   :  { %v8867_v20 = vsel %vm372_vm9, %v291_v12, %v8860_v18 }
 0x10d   :  { %493 = vmatprep.subr.bf16.mxu0 %v8867_v20 }
 0x10e   :  { %494 = vmatpush1.bf16.msra.mxu0 %v8863_v19 }
 0x10f   :  { %v277_v21 = vpop.permute.xlu0 %276  ;;  %v8871_v22 = vpop.permute.xlu1 %278 }
 0x110   :  { %v8875_v23 = vsel %vm372_vm9, %v277_v21, %v8871_v22 }
 0x111   :  { %495 = vmatprep.subr.bf16.mxu0 %v8875_v23 }
 0x113   :  { %v275_v24 = vpop.permute.xlu0 %274  ;;  %v263_v25 = vpop.permute.xlu1 %262 }
 0x114   :  { %v8879_v26 = vsel %vm372_vm9, %v275_v24, %v277_v21 }
 0x115   :  { %496 = vmatpush1.bf16.msra.mxu0 %v8879_v26 }
 0x117   :  { %v8882_v27 = vpop.permute.xlu0 %264  ;;  %v261_v28 = vpop.permute.xlu1 %260 }
 0x118   :  { %v8886_v29 = vsel %vm372_vm9, %v263_v25, %v8882_v27  ;;  %v8889_v30 = vsel %vm372_vm9, %v261_v28, %v263_v25 }
 0x119   :  { %497 = vmatprep.subr.bf16.mxu0 %v8886_v29 }
 0x11a   :  { %498 = vmatpush1.bf16.msra.mxu0 %v8889_v30 }
 0x11b   :  { %v249_v31 = vpop.permute.xlu0 %248  ;;  %v8893_v33 = vpop.permute.xlu1 %250 }
 0x11c   :  { %v8897_v34 = vsel %vm372_vm9, %v249_v31, %v8893_v33 }
 0x11d   :  { %499 = vmatprep.subr.bf16.mxu0 %v8897_v34 }
 0x11f   :  { %v247_v35 = vpop.permute.xlu0 %246  ;;  %v351_v36 = vpop.permute.xlu1 %350 }
 0x120   :  { %v8901_v32 = vsel %vm372_vm9, %v247_v35, %v249_v31  ;;  %v8910_v41 = vsel %vm372_vm9, %v8803_v56, %v351_v36 }
 0x121   :  { %500 = vmatpush1.bf16.msra.mxu0 %v8901_v32 }
 0x123   :  { %v353_v37 = vpop.permute.xlu0 %352  ;;  %v361_v38 = vpop.permute.xlu1 %360 }
 0x124   :  { %v8905_v39 = vsel %vm372_vm9, %v351_v36, %v353_v37 }
 0x125   :  { %528 = vmatprep.subr.bf16.mxu1 %v8905_v39 }
 0x126   :  { %529 = vmatpush1.bf16.msra.mxu1 %v8910_v41 }
 0x127   :  { %v8913_v42 = vpop.permute.xlu0 %362  ;;  %v359_v43 = vpop.permute.xlu1 %358 }
 0x128   :  { %v8917_v44 = vsel %vm372_vm9, %v361_v38, %v8913_v42  ;;  %v8920_v40 = vsel %vm372_vm9, %v359_v43, %v361_v38 }
 0x129   :  { %515 = vmatprep.subr.bf16.mxu0 %v8917_v44 }
 0x12a   :  { %516 = vmatpush2.bf16.msra.mxu0 %v8920_v40 }
 0x12b   :  { %v337_v46 = vpop.permute.xlu0 %336  ;;  %v339_v48 = vpop.permute.xlu1 %338 }
 0x12c   :  { %v8930_v49 = vsel %vm372_vm9, %v337_v46, %v339_v48  ;;  %v8934_v47 = vsel %vm372_vm9, %v8816_v58, %v337_v46 }
 0x12d   :  { %530 = vmatprep.subr.bf16.mxu1 %v8930_v49  ;;  %518 = vmatmul.mubr.bf16.vlgmr.msra.gmra.mxu0 %v8926_v45 }
 0x12e   :  { %531 = vmatpush1.bf16.msra.mxu1 %v8934_v47  ;;  %8094 = vmatprep.mubr.msk.bf16.mxu0 %vm481_vm8, %v8733_v2 }
 0x12f   :  { %v355_v50 = vpop.permute.xlu0 %354  ;;  %v357_v51 = vpop.permute.xlu1 %356 }
 0x130   :  { %v8942_v52 = vsel %vm372_vm9, %v355_v50, %v357_v51  ;;  %v8945_v53 = vsel %vm372_vm9, %v353_v37, %v355_v50 }
 0x131   :  { %571 = vmatprep.subr.bf16.mxu0 %v8942_v52 }
 0x132   :  { %572 = vmatpush1.bf16.msra.mxu0 %v8945_v53 }
 0x133   :  { %v323_v54 = vpop.permute.xlu0 %322  ;;  %v325_v55 = vpop.permute.xlu1 %324 }
 0x134   :  { %v8950_v56 = vsel %vm372_vm9, %v323_v54, %v325_v55  ;;  %v8954_v2 = vsel %vm372_vm9, %v8836_v0, %v323_v54 }
 0x135   :  { %532 = vmatprep.subr.bf16.mxu1 %v8950_v56 }
 0x136   :  { %533 = vmatpush1.bf16.msra.mxu1 %v8954_v2 }
 0x137   :  { %v341_v3 = vpop.permute.xlu0 %340  ;;  %v343_v58 = vpop.permute.xlu1 %342 }
 0x138   :  { %v8959_v59 = vsel %vm372_vm9, %v341_v3, %v343_v58  ;;  %v8962_v10 = vsel %vm372_vm9, %v339_v48, %v341_v3 }
 0x139   :  { %573 = vmatprep.subr.bf16.mxu0 %v8959_v59 }
 0x13a   :  { %574 = vmatpush1.bf16.msra.mxu0 %v8962_v10 }
 0x13b   :  { %v309_v14 = vpop.permute.xlu0 %308  ;;  %v311_v62 = vpop.permute.xlu1 %310 }
 0x13c   :  { %v8967_v63 = vsel %vm372_vm9, %v309_v14, %v311_v62  ;;  %v8971_v0 = vsel %vm372_vm9, %v8847_v7, %v309_v14 }
 0x13d   :  { %534 = vmatprep.subr.bf16.mxu1 %v8967_v63 }
 0x13e   :  { %535 = vmatpush1.bf16.msra.mxu1 %v8971_v0 }
 0x13f   :  { %v327_v1 = vpop.permute.xlu0 %326  ;;  %v329_v6 = vpop.permute.xlu1 %328 }
 0x140   :  { %v8976_v8 = vsel %vm372_vm9, %v327_v1, %v329_v6  ;;  %v8979_v9 = vsel %vm372_vm9, %v325_v55, %v327_v1 }
 0x141   :  { %575 = vmatprep.subr.bf16.mxu0 %v8976_v8 }
 0x142   :  { %576 = vmatpush1.bf16.msra.mxu0 %v8979_v9 }
 0x143   :  { %v295_v12 = vpop.permute.xlu0 %294  ;;  %v297_v15 = vpop.permute.xlu1 %296 }
 0x144   :  { %v8984_v7 = vsel %vm372_vm9, %v295_v12, %v297_v15  ;;  %v8988_v17 = vsel %vm372_vm9, %v8860_v18, %v295_v12 }
 0x145   :  { %536 = vmatprep.subr.bf16.mxu1 %v8984_v7 }
 0x146   :  { %537 = vmatpush1.bf16.msra.mxu1 %v8988_v17 }
 0x147   :  { %v313_v21 = vpop.permute.xlu0 %312  ;;  %v315_v24 = vpop.permute.xlu1 %314 }
 0x148   :  { %v8993_v25 = vsel %vm372_vm9, %v313_v21, %v315_v24  ;;  %v8996_v28 = vsel %vm372_vm9, %v311_v62, %v313_v21 }
 0x149   :  { %577 = vmatprep.subr.bf16.mxu0 %v8993_v25 }
 0x14a   :  { %578 = vmatpush1.bf16.msra.mxu0 %v8996_v28 }
 0x14b   :  { %v281_v31 = vpop.permute.xlu0 %280  ;;  %v283_v35 = vpop.permute.xlu1 %282 }
 0x14c   :  { %v9001_v18 = vsel %vm372_vm9, %v281_v31, %v283_v35  ;;  %v9005_v36 = vsel %vm372_vm9, %v8871_v22, %v281_v31 }
 0x14d   :  { %538 = vmatprep.subr.bf16.mxu1 %v9001_v18 }
 0x14e   :  { %539 = vmatpush1.bf16.msra.mxu1 %v9005_v36 }
 0x14f   :  { %v299_v37 = vpop.permute.xlu0 %298  ;;  %v301_v38 = vpop.permute.xlu1 %300 }
 0x150   :  { %v9010_v43 = vsel %vm372_vm9, %v299_v37, %v301_v38  ;;  %v9013_v46 = vsel %vm372_vm9, %v297_v15, %v299_v37 }
 0x151   :  { %579 = vmatprep.subr.bf16.mxu0 %v9010_v43 }
 0x152   :  { %580 = vmatpush1.bf16.msra.mxu0 %v9013_v46 }
 0x153   :  { %v267_v48 = vpop.permute.xlu0 %266  ;;  %v269_v50 = vpop.permute.xlu1 %268 }
 0x154   :  { %v9018_v22 = vsel %vm372_vm9, %v267_v48, %v269_v50  ;;  %v9022_v51 = vsel %vm372_vm9, %v8882_v27, %v267_v48 }
 0x155   :  { %540 = vmatprep.subr.bf16.mxu1 %v9018_v22 }
 0x156   :  { %541 = vmatpush1.bf16.msra.mxu1 %v9022_v51 }
 0x157   :  { %v285_v54 = vpop.permute.xlu0 %284  ;;  %v287_v55 = vpop.permute.xlu1 %286 }
 0x158   :  { %v9027_v3 = vsel %vm372_vm9, %v285_v54, %v287_v55  ;;  %v9030_v58 = vsel %vm372_vm9, %v283_v35, %v285_v54  ;;  %v8400_v54 = vld [vmem:[%s15063_s1 + $0x14] ss:$8 sps:$4 sm:$0xff]  }
 0x159   :  { %581 = vmatprep.subr.bf16.mxu0 %v9027_v3 }
 0x15a   :  { %582 = vmatpush1.bf16.msra.mxu0 %v9030_v58 }
 0x15b   :  { %v253_v14 = vpop.permute.xlu0 %252  ;;  %v255_v62 = vpop.permute.xlu1 %254 }
 0x15c   :  { %v9035_v27 = vsel %vm372_vm9, %v253_v14, %v255_v62  ;;  %v9039_v1 = vsel %vm372_vm9, %v8893_v33, %v253_v14 }
 0x15d   :  { %542 = vmatprep.subr.bf16.mxu1 %v9035_v27 }
 0x15e   :  { %543 = vmatpush1.bf16.msra.mxu1 %v9039_v1 }
 0x15f   :  { %v271_v6 = vpop.permute.xlu0 %270  ;;  %v273_v12 = vpop.permute.xlu1 %272 }
 0x160   :  { %v9044_v15 = vsel %vm372_vm9, %v271_v6, %v273_v12  ;;  %v9047_v21 = vsel %vm372_vm9, %v269_v50, %v271_v6 }
 0x161   :  { %583 = vmatprep.subr.bf16.mxu0 %v9044_v15 }
 0x162   :  { %584 = vmatpush1.bf16.msra.mxu0 %v9047_v21 }
 0x163   :  { %v257_v24 = vpop.permute.xlu0 %256  ;;  %v259_v31 = vpop.permute.xlu1 %258 }
 0x164   :  { %v9052_v33 = vsel %vm372_vm9, %v257_v24, %v259_v31  ;;  %v9055_v35 = vsel %vm372_vm9, %v255_v62, %v257_v24 }
 0x165   :  { %585 = vmatprep.subr.bf16.mxu0 %v9052_v33 }
 0x166   :  { %586 = vmatpush1.bf16.msra.mxu0 %v9055_v35 }
 0x167   :  { %v365_v37 = vpop.permute.xlu0 %364 }
 0x168   :  { %v367_v38 = vpop.permute.xlu1 %366  ;;  %v423_v50 = vsel %vm372_vm9, %v8913_v42, %v365_v37 }
 0x169   :  { %v424_v48 = vsel %vm372_vm9, %v365_v37, %v367_v38 }
 0x16a   :  { %558 = vmatprep.subr.bf16.mxu1 %v424_v48 }
 0x16b   :  { %559 = vmatpush2.bf16.msra.mxu1 %v423_v50  ;;  %v369_v55 = vpop.permute.xlu0 %368 }
 0x16c   :  { %804 = vmatprep.subr.bf16.mxu1 %v8811_v11  ;;  %v425_v62 = vsel %vm372_vm9, %v367_v38, %v369_v55  ;;  %v8402_v11 = vld [vmem:[%s15063_s1 + $0x10] ss:$8 sps:$4 sm:$0xff]  }
 0x16e   :  { %561 = vmatmul.mubr.bf16.vlgmr.msra.gmra.mxu1 %v8926_v45 }
 0x16f   :  { %805 = vmatpush1.bf16.msra.mxu1 %v8814_v57  ;;  %8099 = vmatprep.mubr.msk.bf16.mxu1 %vm481_vm8, %v8400_v54  ;;  %v615_v57 = vlaneseq }
 0x170   :  { %806 = vmatprep.subr.bf16.mxu1 %v8827_v60 }
 0x171   :  { %v616_v60 = vshrl.u32 %v615_v57, 7 }
 0x173   :  { %807 = vmatpush1.bf16.msra.mxu1 %v8830_v61  ;;  %v371_v42 = vpop.permute.xlu1 %370 }
 0x174   :  { %808 = vmatprep.subr.bf16.mxu1 %v8840_v4  ;;  %v426_v14 = vsel %vm372_vm9, %v369_v55, %v371_v42  ;;  %v617_v4 = vsub.s32 0, %v616_v60 }
 0x175   :  { %601 = vmatprep.subr.bf16.mxu0 %v426_v14 }
 0x176   :  { %602 = vmatpush2.bf16.msra.mxu0 %v425_v62 }
 0x177   :  { %809 = vmatpush1.bf16.msra.mxu1 %v8843_v5  ;;  %847 = vmatprep.subr.bf16.mxu0 %v8905_v39  ;;  %v621_v5 = vsub.s32 1, %v616_v60 }
 0x178   :  { %810 = vmatprep.subr.bf16.mxu1 %v8853_v13  ;;  %v21_v13 = vld [vmem:[%s15064_s4] sm:$0x3f] }
 0x179   :  { %604 = vmatmul.mubr.bf16.vlgmr.msra.gmra.mxu0 %v8926_v45 }
 0x17a   :  { %848 = vmatpush1.bf16.msra.mxu0 %v8910_v41  ;;  %8100 = vmatprep.mubr.msk.bf16.mxu0 %vm481_vm8, %v8400_v54 }
 0x17b   :  { %811 = vmatpush1.bf16.msra.mxu1 %v8857_v16  ;;  %849 = vmatprep.subr.bf16.mxu0 %v8930_v49 }
 0x17c   :  { %812 = vmatprep.subr.bf16.mxu1 %v8867_v20  ;;  %v9132_v20 = vrot.slane %v21_v13, %v617_v4 }
 0x17e   :  { %850 = vmatpush1.bf16.msra.mxu0 %v8934_v47 }
 0x17f   :  { %813 = vmatpush1.bf16.msra.mxu1 %v8863_v19  ;;  %851 = vmatprep.subr.bf16.mxu0 %v8950_v56  ;;  %v625_v19 = vsub.s32 2, %v616_v60 }
 0x180   :  { %814 = vmatprep.subr.bf16.mxu1 %v8875_v23  ;;  %v9134_v23 = vrot.slane %v21_v13, %v621_v5 }
 0x182   :  { %852 = vmatpush1.bf16.msra.mxu0 %v8954_v2  ;;  %v633_v2 = vsub.s32 4, %v616_v60 }
 0x183   :  { %815 = vmatpush1.bf16.msra.mxu1 %v8879_v26  ;;  %853 = vmatprep.subr.bf16.mxu0 %v8967_v63 }
 0x184   :  { %816 = vmatprep.subr.bf16.mxu1 %v8886_v29  ;;  %v9138_v29 = vrot.slane %v21_v13, %v625_v19 }
 0x186   :  { %854 = vmatpush1.bf16.msra.mxu0 %v8971_v0 }
 0x187   :  { %817 = vmatpush1.bf16.msra.mxu1 %v8889_v30  ;;  %855 = vmatprep.subr.bf16.mxu0 %v8984_v7  ;;  %v629_v30 = vsub.s32 3, %v616_v60 }
 0x188   :  { %818 = vmatprep.subr.bf16.mxu1 %v8897_v34 }
 0x189   :  { %v9152_v45 = vrot.slane %v21_v13, %v629_v30 }
 0x18a   :  { %856 = vmatpush1.bf16.msra.mxu0 %v8988_v17 }
 0x18b   :  { %819 = vmatpush1.bf16.msra.mxu1 %v8901_v32  ;;  %857 = vmatprep.subr.bf16.mxu0 %v9001_v18  ;;  %v9171_v18 = vrot.slane %v21_v13, %v633_v2 }
 0x18c   :  { %834 = vmatprep.subr.bf16.mxu1 %v8917_v44 }
 0x18e   :  { %858 = vmatpush1.bf16.msra.mxu0 %v9005_v36 }
 0x18f   :  { %835 = vmatpush2.bf16.msra.mxu1 %v8920_v40  ;;  %859 = vmatprep.subr.bf16.mxu0 %v9018_v22 }
 0x190   :  { %890 = vmatprep.subr.bf16.mxu1 %v8942_v52 }
 0x192   :  { %837 = vmatmul.mubr.bf16.vlgmr.msra.gmra.mxu1 %v8402_v11  ;;  %860 = vmatpush1.bf16.msra.mxu0 %v9022_v51 }
 0x193   :  { %891 = vmatpush1.bf16.msra.mxu1 %v8945_v53  ;;  %861 = vmatprep.subr.bf16.mxu0 %v9035_v27 }
 0x194   :  { %892 = vmatprep.subr.bf16.mxu1 %v8959_v59  ;;  %8101 = vmatprep.mubr.msk.bf16.mxu1 %vm481_vm8, %v8400_v54 }
 0x196   :  { %862 = vmatpush1.bf16.msra.mxu0 %v9039_v1 }
 0x197   :  { %893 = vmatpush1.bf16.msra.mxu1 %v8962_v10  ;;  %877 = vmatprep.subr.bf16.mxu0 %v424_v48 }
 0x198   :  { %894 = vmatprep.subr.bf16.mxu1 %v8976_v8  ;;  %v637_v8 = vsub.s32 5, %v616_v60 }
 0x19a   :  { %878 = vmatpush2.bf16.msra.mxu0 %v423_v50 }
 0x19b   :  { %895 = vmatpush1.bf16.msra.mxu1 %v8979_v9 }
 0x19c   :  { %896 = vmatprep.subr.bf16.mxu1 %v8993_v25 }
 0x19d   :  { %880 = vmatmul.mubr.bf16.vlgmr.msra.gmra.mxu0 %v8402_v11 }
 0x19f   :  { %897 = vmatpush1.bf16.msra.mxu1 %v8996_v28 }
 0x1a0   :  { %898 = vmatprep.subr.bf16.mxu1 %v9010_v43 }
 0x1a3   :  { %899 = vmatpush1.bf16.msra.mxu1 %v9013_v46 }
 0x1a4   :  { %900 = vmatprep.subr.bf16.mxu1 %v9027_v3  ;;  %v9177_v3 = vrot.slane %v21_v13, %v637_v8 }
 0x1a7   :  { %901 = vmatpush1.bf16.msra.mxu1 %v9030_v58 }
 0x1a8   :  { %902 = vmatprep.subr.bf16.mxu1 %v9044_v15 }
 0x1ab   :  { %903 = vmatpush1.bf16.msra.mxu1 %v9047_v21 }
 0x1ac   :  { %904 = vmatprep.subr.bf16.mxu1 %v9052_v33 }
 0x1af   :  { %905 = vmatpush1.bf16.msra.mxu1 %v9055_v35 }
 0x1b0   :  { %920 = vmatprep.subr.bf16.mxu1 %v426_v14 }
 0x1b3   :  { %921 = vmatpush2.bf16.msra.mxu1 %v425_v62 }
 0x1b6   :  { %923 = vmatmul.mubr.bf16.vlgmr.msra.gmra.mxu1 %v8402_v11 }
 0x1ed   :  { %v9125_v61 = vpop.f32.mrf.mxu0 }
 0x1ee   :  { %v645_v34 = vmul.f32 %v9132_v20, %v9125_v61 }
 0x1ef   :  { %v9130_v16 = vpop.f32.mrf.mxu0 }
 0x1f0   :  { %v646_v32 = vmul.f32 %v9134_v23, %v9130_v16  ;;  %v673_v49 = vmul.f32 %v645_v34, %v9125_v61 }
 0x1f1   :  { %v9136_v26 = vpop.f32.mrf.mxu0 }
 0x1f2   :  { %v674_v47 = vmul.f32 %v646_v32, %v9130_v16  ;;  %v651_v52 = vmul.f32 %v9132_v20, %v9136_v26  ;;  %v657_v0 = vadd.f32 %v646_v32, %v645_v34  ;;  %v8483_v34 = vmov 0  }
 0x1f3   :  { %v9146_v41 = vpop.f32.mrf.mxu0  ;;  %8395 = vset.pattern.permute.xlu1 %v8483_v34  ;;  %22 = vst [vmem:[#allocation2] sm:$0xff] %v8483_v34  ;;  %23 = vst [vmem:[#allocation2 + $0x8] sm:$0xff] %v8483_v34  ;;  %8396 = vset.pattern.permute.xlu0 %v8483_v34 }
 0x1f4   :  { %v652_v53 = vmul.f32 %v9134_v23, %v9146_v41  ;;  %v685_v9 = vadd.f32 %v674_v47, %v673_v49  ;;  %v679_v7 = vmul.f32 %v651_v52, %v9136_v26  ;;  %24 = vst [vmem:[#allocation2 + $0x10] sm:$0xff] %v8483_v34  ;;  %25 = vst [vmem:[#allocation2 + $0x18] sm:$0xff] %v8483_v34 }
 0x1f5   :  { %26 = vst [vmem:[#allocation2 + $0x20] sm:$0xff] %v8483_v34  ;;  %27 = vst [vmem:[#allocation2 + $0x28] sm:$0xff] %v8483_v34 }
 0x1f6   :  { %v680_v17 = vmul.f32 %v652_v53, %v9146_v41  ;;  %v664_v36 = vadd.f32 %v652_v53, %v651_v52  ;;  %28 = vst [vmem:[#allocation2 + $0x30] sm:$0xff] %v8483_v34  ;;  %29 = vst [vmem:[#allocation2 + $0x38] sm:$0xff] %v8483_v34 }
 0x1f8   :  { %v692_v58 = vadd.f32 %v680_v17, %v679_v7 }
 0x22e   :  { %v9144_v39 = vpop.f32.mrf.mxu1 }
 0x22f   :  { %v647_v44 = vmul.f32 %v9138_v29, %v9144_v39 }
 0x230   :  { %v9150_v40 = vpop.f32.mrf.mxu1 }
 0x231   :  { %v675_v59 = vmul.f32 %v647_v44, %v9144_v39  ;;  %v648_v10 = vmul.f32 %v9152_v45, %v9150_v40  ;;  %v658_v28 = vadd.f32 %v657_v0, %v647_v44 }
 0x232   :  { %v9160_v56 = vpop.f32.mrf.mxu1 }
 0x233   :  { %v653_v63 = vmul.f32 %v9138_v29, %v9160_v56  ;;  %v686_v43 = vadd.f32 %v685_v9, %v675_v59  ;;  %v676_v46 = vmul.f32 %v648_v10, %v9150_v40  ;;  %v659_v6 = vadd.f32 %v658_v28, %v648_v10 }
 0x234   :  { %v9169_v25 = vpop.f32.mrf.mxu1 }
 0x235   :  { %v681_v22 = vmul.f32 %v653_v63, %v9160_v56  ;;  %v654_v51 = vmul.f32 %v9152_v45, %v9169_v25  ;;  %v665_v27 = vadd.f32 %v664_v36, %v653_v63  ;;  %v687_v15 = vadd.f32 %v686_v43, %v676_v46  ;;  %v707_v36 = vld [vmem:[%s15065_s2] sm:$0xff] }
 0x237   :  { %v693_v21 = vadd.f32 %v692_v58, %v681_v22  ;;  %v682_v31 = vmul.f32 %v654_v51, %v9169_v25  ;;  %v666_v38 = vadd.f32 %v665_v27, %v654_v51  ;;  %v715_v22 = vld [vmem:[%s15066_s3] sm:$0xff]  ;;  %v708_v51 = vld [vmem:[%s15065_s2 + $0x8] sm:$0xff] }
 0x239   :  { %v9179_v1 = vpop.f32.mrf.mxu0  ;;  %v694_v62 = vadd.f32 %v693_v21, %v682_v31 }
 0x23a   :  { %v649_v12 = vmul.f32 %v9171_v18, %v9179_v1 }
 0x23b   :  { %v9183_v24 = vpop.f32.mrf.mxu0 }
 0x23c   :  { %v660_v33 = vadd.f32 %v659_v6, %v649_v12  ;;  %v677_v35 = vmul.f32 %v649_v12, %v9179_v1  ;;  %v650_v37 = vmul.f32 %v9177_v3, %v9183_v24 }
 0x23d   :  { %v9189_v48 = vpop.f32.mrf.mxu0 }
 0x23e   :  { %v688_v50 = vadd.f32 %v687_v15, %v677_v35  ;;  %v678_v54 = vmul.f32 %v650_v37, %v9183_v24  ;;  %v655_v55 = vmul.f32 %v9171_v18, %v9189_v48  ;;  %v661_v42 = vadd.f32 %v660_v33, %v650_v37  ;;  %v716_v15 = vld [vmem:[%s15066_s3 + $0x8] sm:$0xff] }
 0x23f   :  { %v9194_v14 = vpop.f32.mrf.mxu0 }
 0x240   :  { %v667_v11 = vadd.f32 %v666_v38, %v655_v55  ;;  %v683_v57 = vmul.f32 %v655_v55, %v9189_v48  ;;  %v656_v60 = vmul.f32 %v9177_v3, %v9194_v14  ;;  %662 = vadd.xlane.f32.xlu0 %v661_v42  ;;  %v689_v13 = vadd.f32 %v688_v50, %v678_v54 }
 0x242   :  { %v695_v4 = vadd.f32 %v694_v62, %v683_v57  ;;  %v684_v5 = vmul.f32 %v656_v60, %v9194_v14  ;;  %v668_v19 = vadd.f32 %v667_v11, %v656_v60 }
 0x244   :  { %690 = vadd.xlane.f32.xlu0 %v689_v13  ;;  %669 = vadd.xlane.f32.xlu1 %v668_v19  ;;  %v696_v30 = vadd.f32 %v695_v4, %v684_v5 }
 0x248   :  { %697 = vadd.xlane.f32.xlu0 %v696_v30 }
 0x2c9   :  { %v663_v32 = vpop.xlane.xlu0 %662 }
 0x2ca   :  { %v671_v44 = vmul.f32 0.001953125, %v663_v32 }
 0x2cc   :  { %v701_v52 = vmul.f32 %v671_v44, %v671_v44 }
 0x2cd   :  { %v691_v49 = vpop.xlane.xlu0 %690  ;;  %v670_v47 = vpop.xlane.xlu1 %669 }
 0x2ce   :  { %v699_v53 = vmul.f32 0.001953125, %v691_v49  ;;  %v672_v2 = vmul.f32 0.001953125, %v670_v47 }
 0x2d0   :  { %v703_v59 = vsub.f32 %v699_v53, %v701_v52  ;;  %v702_v0 = vmul.f32 %v672_v2, %v672_v2 }
 0x2d1   :  { %v698_v10 = vpop.xlane.xlu0 %697 }
 0x2d2   :  { %v705_v63 = vmax.f32 %v703_v59, 0.0  ;;  %v700_v8 = vmul.f32 0.001953125, %v698_v10 }
 0x2d4   :  { %v709_v9 = vadd.f32 1e-05, %v705_v63  ;;  %v704_v7 = vsub.f32 %v700_v8, %v702_v0 }
 0x2d6   :  { %8430 = vrsqrt.f32 %v709_v9  ;;  %v706_v17 = vmax.f32 %v704_v7, 0.0 }
 0x2d8   :  { %v710_v28 = vadd.f32 1e-05, %v706_v17 }
 0x2da   :  { %8432 = vrsqrt.f32 %v710_v28 }
 0x2e3   :  { %v8431_v43 = vpop.eup %8430 }
 0x2e4   :  { %v713_v46 = vmul.f32 %v8431_v43, %v707_v36 }
 0x2e6   :  { %723 = vperm.xlu1 %8395, %v713_v46   ;;  %v717_v58 = vmul.f32 %v713_v46, %v671_v44 }
 0x2e7   :  { %v8433_v27 = vpop.eup %8432 }
 0x2e8   :  { %v719_v6 = vsub.f32 %v715_v22, %v717_v58  ;;  %v714_v12 = vmul.f32 %v8433_v27, %v708_v51 }
 0x2ea   :  { %745 = vperm.xlu1 %8395, %v719_v6   ;;  %728 = vperm.xlu0 %8396, %v714_v12   ;;  %v718_v21 = vmul.f32 %v714_v12, %v672_v2 }
 0x2ec   :  { %v720_v31 = vsub.f32 %v716_v15, %v718_v21 }
 0x2ee   :  { %750 = vperm.xlu1 %8395, %v720_v31  }
 0x361   :  { %v724_v33 = vpop.permute.xlu1 %723 }
 0x362   :  { %v731_v35 = vmul.f32 %v724_v33, %v9125_v61  ;;  %v732_v37 = vmul.f32 %v724_v33, %v9130_v16  ;;  %v733_v38 = vmul.f32 %v724_v33, %v9144_v39  ;;  %v734_v50 = vmul.f32 %v724_v33, %v9150_v40 }
 0x363   :  { %v735_v42 = vmul.f32 %v724_v33, %v9179_v1  ;;  %v736_v62 = vmul.f32 %v724_v33, %v9183_v24 }
 0x365   :  { %v729_v54 = vpop.permute.xlu0 %728  ;;  %v746_v55 = vpop.permute.xlu1 %745 }
 0x366   :  { %v737_v11 = vmul.f32 %v729_v54, %v9136_v26  ;;  %v738_v57 = vmul.f32 %v729_v54, %v9146_v41  ;;  %v739_v60 = vmul.f32 %v729_v54, %v9160_v56  ;;  %v740_v61 = vmul.f32 %v729_v54, %v9169_v25 }
 0x367   :  { %v753_v4 = vadd.f32 %v746_v55, %v731_v35  ;;  %v754_v16 = vadd.f32 %v746_v55, %v732_v37  ;;  %v755_v5 = vadd.f32 %v746_v55, %v733_v38  ;;  %v756_v39 = vadd.f32 %v746_v55, %v734_v50 }
 0x368   :  { %v757_v13 = vadd.f32 %v746_v55, %v735_v42  ;;  %v758_v40 = vadd.f32 %v746_v55, %v736_v62  ;;  %v741_v19 = vmul.f32 %v729_v54, %v9189_v48  ;;  %v742_v1 = vmul.f32 %v729_v54, %v9194_v14 }
 0x369   :  { %v765_v30 = vmax.f32 %v753_v4, 0.0  ;;  %v766_v24 = vmax.f32 %v754_v16, 0.0  ;;  %v751_v34 = vpop.permute.xlu1 %750  ;;  %v767_v26 = vmax.f32 %v755_v5, 0.0  ;;  %v768_v32 = vmax.f32 %v756_v39, 0.0 }
 0x36a   :  { %v769_v41 = vmax.f32 %v757_v13, 0.0  ;;  %v770_v44 = vmax.f32 %v758_v40, 0.0  ;;  %v759_v49 = vadd.f32 %v751_v34, %v737_v11  ;;  %v760_v47 = vadd.f32 %v751_v34, %v738_v57 }
 0x36b   :  { %v9225_v56 = vmul.f32 %v765_v30, %v9132_v20  ;;  %v9228_v25 = vmul.f32 %v766_v24, %v9134_v23  ;;  %v9231_v52 = vmul.f32 %v767_v26, %v9138_v29  ;;  %v9234_v48 = vmul.f32 %v768_v32, %v9152_v45 }
 0x36c   :  { %v9237_v14 = vmul.f32 %v769_v41, %v9171_v18  ;;  %v9240_v53 = vmul.f32 %v770_v44, %v9177_v3  ;;  %v761_v59 = vadd.f32 %v751_v34, %v739_v60  ;;  %v762_v10 = vadd.f32 %v751_v34, %v740_v61 }
 0x36d   :  { %v8331_v2 = vpack.c.bf16 %v9228_v25, %v9225_v56  ;;  %v763_v63 = vadd.f32 %v751_v34, %v741_v19  ;;  %v8332_v0 = vpack.c.bf16 %v9234_v48, %v9231_v52  ;;  %v764_v9 = vadd.f32 %v751_v34, %v742_v1 }
 0x36e   :  { %v8333_v8 = vpack.c.bf16 %v9240_v53, %v9237_v14  ;;  %v771_v7 = vmax.f32 %v759_v49, 0.0  ;;  %v772_v17 = vmax.f32 %v760_v47, 0.0  ;;  %v773_v28 = vmax.f32 %v761_v59, 0.0 }
 0x36f   :  { %1115 = vst [vmem:[#allocation2 + $0x4] sm:$0xff] %v8331_v2  ;;  %v774_v36 = vmax.f32 %v762_v10, 0.0  ;;  %v775_v43 = vmax.f32 %v763_v63, 0.0  ;;  %1116 = vst [vmem:[#allocation2 + $0xc] sm:$0xff] %v8332_v0  ;;  %v776_v46 = vmax.f32 %v764_v9, 0.0 }
 0x370   :  { %1117 = vst [vmem:[#allocation2 + $0x14] sm:$0xff] %v8333_v8  ;;  %v9249_v22 = vmul.f32 %v771_v7, %v9132_v20  ;;  %v9252_v51 = vmul.f32 %v772_v17, %v9134_v23  ;;  %v9255_v58 = vmul.f32 %v773_v28, %v9138_v29 }
 0x371   :  { %v9258_v27 = vmul.f32 %v774_v36, %v9152_v45  ;;  %v9261_v6 = vmul.f32 %v775_v43, %v9171_v18  ;;  %v9264_v12 = vmul.f32 %v776_v46, %v9177_v3 }
 0x372   :  { %v8334_v15 = vpack.c.bf16 %v9252_v51, %v9249_v22 }
 0x373   :  { %15126 = vst [vmem:[#allocation3_spill] sm:$0xff] %v9264_v12  ;;  %v8335_v21 = vpack.c.bf16 %v9258_v27, %v9255_v58  ;;  %v8336_v31 = vpack.c.bf16 %v9264_v12, %v9261_v6 }
 0x374   :  { %1118 = vst [vmem:[#allocation2 + $0x24] sm:$0xff] %v8334_v15 }
 0x375   :  { %1119 = vst [vmem:[#allocation2 + $0x2c] sm:$0xff] %v8335_v21  ;;  %1120 = vst [vmem:[#allocation2 + $0x34] sm:$0xff] %v8336_v31 }
 0x376   :  { %v1121_v33 = vld [vmem:[#allocation2] sm:$0xff]  ;;  %v1122_v50 = vld [vmem:[#allocation2 + $0x8] sm:$0xff] }
 0x377   :  { %v1123_v62 = vld [vmem:[#allocation2 + $0x10] sm:$0xff]  ;;  %v1124_v4 = vld [vmem:[#allocation2 + $0x18] sm:$0xff] }
 0x37b   :  { %v1125_v35 = vld [vmem:[#allocation2 + $0x20] sm:$0xff] }
 0x37c   :  { %v9272_v37 = vcombine.high %v1121_v33, %v1125_v35  ;;  %v1126_v38 = vld [vmem:[#allocation2 + $0x28] sm:$0xff]  ;;  %v1127_v42 = vld [vmem:[#allocation2 + $0x30] sm:$0xff]  ;;  %v8112_v57 = vcombine.low %v1121_v33, %v1125_v35  ;;  %v1128_v61 = vld [vmem:[#allocation2 + $0x38] sm:$0xff] }
 0x37d   :  { %v8115_v54 = vcombine.high %v1122_v50, %v1126_v38  ;;  %v9278_v55 = vcombine.low %v1122_v50, %v1126_v38  ;;  %v8116_v11 = vcombine.low %v1123_v62, %v1127_v42  ;;  %v8117_v60 = vcombine.high %v1123_v62, %v1127_v42 }
 0x37e   :  { %1238 = vrot.lane.b32.xlu0 %v9272_v37, %s8476_s28  ;;  %1278 = vrot.lane.b32.xlu1 %v9272_v37, %s8474_s26  ;;  %v8119_v16 = vcombine.high %v1124_v4, %v1128_v61  ;;  %v9328_v5 = vcombine.low %v1124_v4, %v1128_v61 }
 0x382   :  { %1242 = vrot.lane.b32.xlu0 %v8115_v54, %s8476_s28  ;;  %1280 = vrot.lane.b32.xlu1 %v9278_v55, %s8474_s26 }
 0x386   :  { %1220 = vrot.lane.b32.xlu0 %v9278_v55, %s8477_s29  ;;  %1282 = vrot.lane.b32.xlu1 %v8115_v54, %s8474_s26 }
 0x38a   :  { %1200 = vrot.lane.b32.xlu0 %v9272_v37, %s8478_s30  ;;  %1258 = vrot.lane.b32.xlu1 %v9272_v37, %s8475_s27 }
 0x38e   :  { %1204 = vrot.lane.b32.xlu0 %v8115_v54, %s8478_s30  ;;  %1260 = vrot.lane.b32.xlu1 %v9278_v55, %s8475_s27 }
 0x392   :  { %1180 = vrot.lane.b32.xlu0 %v9272_v37, %s8479_s6  ;;  %1262 = vrot.lane.b32.xlu1 %v8115_v54, %s8475_s27 }
 0x396   :  { %1184 = vrot.lane.b32.xlu0 %v8115_v54, %s8479_s6  ;;  %1240 = vrot.lane.b32.xlu1 %v9278_v55, %s8476_s28 }
 0x39a   :  { %1160 = vrot.lane.b32.xlu0 %v9272_v37, %s8480_s7  ;;  %1218 = vrot.lane.b32.xlu1 %v9272_v37, %s8477_s29 }
 0x39e   :  { %1164 = vrot.lane.b32.xlu0 %v8115_v54, %s8480_s7  ;;  %1222 = vrot.lane.b32.xlu1 %v8115_v54, %s8477_s29 }
 0x3a2   :  { %1284 = vrot.lane.b32.xlu0 %v8116_v11, %s8474_s26  ;;  %1202 = vrot.lane.b32.xlu1 %v9278_v55, %s8478_s30 }
 0x3a6   :  { %1298 = vrot.lane.b32.xlu0 %v9272_v37, %s8481_s12  ;;  %1198 = vrot.lane.b32.xlu1 %v8112_v57, %s8478_s30 }
 0x3aa   :  { %1302 = vrot.lane.b32.xlu0 %v8115_v54, %s8481_s12  ;;  %1182 = vrot.lane.b32.xlu1 %v9278_v55, %s8479_s6 }
 0x3ae   :  { %1266 = vrot.lane.b32.xlu0 %v8117_v60, %s8475_s27  ;;  %1178 = vrot.lane.b32.xlu1 %v8112_v57, %s8479_s6 }
 0x3b2   :  { %1290 = vrot.lane.b32.xlu0 %v8119_v16, %s8474_s26  ;;  %1162 = vrot.lane.b32.xlu1 %v9278_v55, %s8480_s7 }
 0x3b6   :  { %1246 = vrot.lane.b32.xlu0 %v8117_v60, %s8476_s28  ;;  %1158 = vrot.lane.b32.xlu1 %v8112_v57, %s8480_s7 }
 0x3ba   :  { %1270 = vrot.lane.b32.xlu0 %v8119_v16, %s8475_s27  ;;  %1286 = vrot.lane.b32.xlu1 %v8117_v60, %s8474_s26 }
 0x3be   :  { %1226 = vrot.lane.b32.xlu0 %v8117_v60, %s8477_s29  ;;  %1300 = vrot.lane.b32.xlu1 %v9278_v55, %s8481_s12 }
 0x3c2   :  { %1250 = vrot.lane.b32.xlu0 %v8119_v16, %s8476_s28  ;;  %1264 = vrot.lane.b32.xlu1 %v8116_v11, %s8475_s27 }
 0x3c6   :  { %1208 = vrot.lane.b32.xlu0 %v8117_v60, %s8478_s30  ;;  %1288 = vrot.lane.b32.xlu1 %v9328_v5, %s8474_s26 }
 0x3ca   :  { %1186 = vrot.lane.b32.xlu0 %v8116_v11, %s8479_s6  ;;  %1244 = vrot.lane.b32.xlu1 %v8116_v11, %s8476_s28 }
 0x3ce   :  { %1210 = vrot.lane.b32.xlu0 %v9328_v5, %s8478_s30  ;;  %1268 = vrot.lane.b32.xlu1 %v9328_v5, %s8475_s27 }
 0x3d2   :  { %1168 = vrot.lane.b32.xlu0 %v8117_v60, %s8480_s7  ;;  %1224 = vrot.lane.b32.xlu1 %v8116_v11, %s8477_s29 }
 0x3d6   :  { %1170 = vrot.lane.b32.xlu0 %v9328_v5, %s8480_s7  ;;  %1248 = vrot.lane.b32.xlu1 %v9328_v5, %s8476_s28 }
 0x3da   :  { %1304 = vrot.lane.b32.xlu0 %v8116_v11, %s8481_s12  ;;  %1206 = vrot.lane.b32.xlu1 %v8116_v11, %s8478_s30 }
 0x3de   :  { %1310 = vrot.lane.b32.xlu0 %v8119_v16, %s8481_s12  ;;  %1228 = vrot.lane.b32.xlu1 %v9328_v5, %s8477_s29 }
 0x3e2   :  { %1332 = vrot.lane.b32.xlu0 %v9272_v37, %s8482_s0  ;;  %1188 = vrot.lane.b32.xlu1 %v8117_v60, %s8479_s6 }
 0x3e6   :  { %1330 = vrot.lane.b32.xlu0 %v8112_v57, %s8482_s0  ;;  %1166 = vrot.lane.b32.xlu1 %v8116_v11, %s8480_s7 }
 0x3ea   :  { %1336 = vrot.lane.b32.xlu0 %v8115_v54, %s8482_s0  ;;  %1190 = vrot.lane.b32.xlu1 %v9328_v5, %s8479_s6 }
 0x3ee   :  { %1340 = vrot.lane.b32.xlu0 %v8117_v60, %s8482_s0  ;;  %1306 = vrot.lane.b32.xlu1 %v8117_v60, %s8481_s12 }
 0x3f0   :  { %v9360_v39 = vpop.permute.xlu0 %1238  ;;  %v1279_v13 = vpop.permute.xlu1 %1278 }
 0x3f2   :  { %1308 = vrot.lane.b32.xlu1 %v9328_v5, %s8481_s12 }
 0x3f4   :  { %v9364_v40 = vpop.permute.xlu0 %1242  ;;  %v9366_v19 = vpop.permute.xlu1 %1280 }
 0x3f5   :  { %v1292_v0 = vsel %vm207_vm0, %v1279_v13, %v9366_v19 }
 0x3f6   :  { %1334 = vrot.lane.b32.xlu1 %v9278_v55, %s8482_s0 }
 0x3f8   :  { %v9370_v1 = vpop.permute.xlu0 %1220  ;;  %v9372_v30 = vpop.permute.xlu1 %1282 }
 0x3fa   :  { %1338 = vrot.lane.b32.xlu1 %v8116_v11, %s8482_s0 }
 0x3fc   :  { %v9375_v24 = vpop.permute.xlu0 %1200  ;;  %v1259_v34 = vpop.permute.xlu1 %1258 }
 0x3fd   :  { %1414 = vrot.lane.b32.xlu0 %v1259_v34, %s8482_s0 }
 0x3fe   :  { %1428 = vrot.lane.b32.xlu1 %v1279_v13, %s8482_s0 }
 0x400   :  { %v9379_v26 = vpop.permute.xlu0 %1204  ;;  %v9381_v32 = vpop.permute.xlu1 %1260 }
 0x401   :  { %v1272_v7 = vsel %vm186_vm1, %v1259_v34, %v9381_v32 }
 0x402   :  { %1400 = vrot.lane.b32.xlu1 %v9360_v39, %s8482_s0 }
 0x404   :  { %v1181_v41 = vpop.permute.xlu0 %1180  ;;  %v9385_v44 = vpop.permute.xlu1 %1262 }
 0x408   :  { %v9387_v49 = vpop.permute.xlu0 %1184  ;;  %v9389_v47 = vpop.permute.xlu1 %1240 }
 0x409   :  { %v1253_v36 = vsel %vm165_vm2, %v9389_v47, %v9364_v40 }
 0x40c   :  { %v9391_v2 = vpop.permute.xlu0 %1160  ;;  %v1219_v59 = vpop.permute.xlu1 %1218 }
 0x40d   :  { %1386 = vrot.lane.b32.xlu0 %v1219_v59, %s8482_s0  ;;  %v1230_v46 = vsel %vm142_vm3, %v1219_v59, %v9370_v1 }
 0x410   :  { %v9394_v10 = vpop.permute.xlu0 %1164  ;;  %v9396_v63 = vpop.permute.xlu1 %1222 }
 0x411   :  { %1430 = vrot.lane.b32.xlu0 %v1292_v0, %s8482_s0 }
 0x414   :  { %v9401_v8 = vpop.permute.xlu0 %1284  ;;  %v9403_v9 = vpop.permute.xlu1 %1202 }
 0x415   :  { %1416 = vrot.lane.b32.xlu0 %v1272_v7, %s8482_s0  ;;  %v1214_v31 = vsel %vm123_vm4, %v9403_v9, %v9379_v26 }
 0x418   :  { %v9408_v17 = vpop.permute.xlu0 %1298  ;;  %v9410_v28 = vpop.permute.xlu1 %1198 }
 0x419   :  { %1404 = vrot.lane.b32.xlu0 %v1253_v36, %s8482_s0  ;;  %1442 = vrot.lane.b32.xlu1 %v9408_v17, %s8482_s0 }
 0x41c   :  { %v9418_v43 = vpop.permute.xlu1 %1182  ;;  %v9423_v15 = vpop.permute.xlu0 %1302 }
 0x41d   :  { %1388 = vrot.lane.b32.xlu0 %v1230_v46, %s8482_s0  ;;  %v1193_v37 = vsel %vm102_vm5, %v1181_v41, %v9418_v43 }
 0x420   :  { %v1179_v21 = vpop.permute.xlu1 %1178  ;;  %v9429_v33 = vpop.permute.xlu0 %1266 }
 0x421   :  { %1376 = vrot.lane.b32.xlu0 %v1214_v31, %s8482_s0  ;;  %v1192_v38 = vsel %vm102_vm5, %v1179_v21, %v1181_v41 }
 0x424   :  { %v9431_v35 = vpop.permute.xlu1 %1162  ;;  %v9440_v54 = vpop.permute.xlu0 %1290 }
 0x425   :  { %1360 = vrot.lane.b32.xlu0 %v1193_v37, %s8482_s0  ;;  %v1174_v42 = vsel %vm81_vm6, %v9431_v35, %v9394_v10 }
 0x428   :  { %v9437_v50 = vpop.permute.xlu1 %1158  ;;  %v9446_v62 = vpop.permute.xlu0 %1246 }
 0x429   :  { %1358 = vrot.lane.b32.xlu0 %v1192_v38, %s8482_s0 }
 0x42c   :  { %v1287_v55 = vpop.permute.xlu1 %1286  ;;  %v9459_v4 = vpop.permute.xlu0 %1270 }
 0x42d   :  { %1348 = vrot.lane.b32.xlu0 %v1174_v42, %s8482_s0  ;;  %v1295_v57 = vsel %vm207_vm0, %v9401_v8, %v1287_v55 }
 0x430   :  { %v9448_v11 = vpop.permute.xlu1 %1300  ;;  %v9467_v34 = vpop.permute.xlu0 %1226 }
 0x431   :  { %1436 = vrot.lane.b32.xlu0 %v1295_v57, %s8482_s0  ;;  %v1313_v61 = vsel %vm228_vm7, %v9448_v11, %v9423_v15 }
 0x434   :  { %v9453_v60 = vpop.permute.xlu1 %1264  ;;  %v9480_v36 = vpop.permute.xlu0 %1250 }
 0x435   :  { %1446 = vrot.lane.b32.xlu0 %v1313_v61, %s8482_s0  ;;  %v1274_v13 = vsel %vm186_vm1, %v9385_v44, %v9453_v60 }
 0x438   :  { %v9461_v16 = vpop.permute.xlu1 %1288  ;;  %v9488_v31 = vpop.permute.xlu0 %1208 }
 0x439   :  { %1420 = vrot.lane.b32.xlu0 %v1274_v13, %s8482_s0  ;;  %v1296_v59 = vsel %vm207_vm0, %v1287_v55, %v9461_v16 }
 0x43c   :  { %v9469_v41 = vpop.permute.xlu1 %1244  ;;  %v9502_v42 = vpop.permute.xlu0 %1186 }
 0x43d   :  { %1438 = vrot.lane.b32.xlu0 %v1296_v59, %s8482_s0  ;;  %v1254_v7 = vsel %vm165_vm2, %v9364_v40, %v9469_v41 }
 0x440   :  { %v9474_v0 = vpop.permute.xlu1 %1268  ;;  %v1211_v13 = vpop.permute.xlu0 %1210 }
 0x441   :  { %1406 = vrot.lane.b32.xlu0 %v1254_v7, %s8482_s0  ;;  %v1276_v21 = vsel %vm186_vm1, %v9429_v33, %v9474_v0 }
 0x444   :  { %v9482_v46 = vpop.permute.xlu1 %1224 }
 0x445   :  { %1424 = vrot.lane.b32.xlu0 %v1276_v21, %s8482_s0  ;;  %v1232_v40 = vsel %vm142_vm3, %v9396_v63, %v9482_v46 }
 0x448   :  { %v9490_v37 = vpop.permute.xlu1 %1248 }
 0x449   :  { %1392 = vrot.lane.b32.xlu0 %v1232_v40, %s8482_s0  ;;  %v1256_v55 = vsel %vm165_vm2, %v9446_v62, %v9490_v37  ;;  %v9521_v40 = vpop.permute.xlu0 %1168 }
 0x44c   :  { %v9496_v38 = vpop.permute.xlu1 %1206 }
 0x44d   :  { %1410 = vrot.lane.b32.xlu0 %v1256_v55, %s8482_s0  ;;  %v1215_v61 = vsel %vm123_vm4, %v9379_v26, %v9496_v38  ;;  %v1195_v26 = vsel %vm102_vm5, %v9387_v49, %v9502_v42 }
 0x450   :  { %v1229_v57 = vpop.permute.xlu1 %1228 }
 0x451   :  { %1378 = vrot.lane.b32.xlu0 %v1215_v61, %s8482_s0  ;;  %1398 = vrot.lane.b32.xlu1 %v1229_v57, %s8482_s0  ;;  %v1234_v7 = vsel %vm142_vm3, %v9467_v34, %v1229_v57  ;;  %v1217_v61 = vsel %vm123_vm4, %v9488_v31, %v1211_v13  ;;  %v1171_v57 = vpop.permute.xlu0 %1170 }
 0x454   :  { %v9509_v59 = vpop.permute.xlu1 %1188 }
 0x455   :  { %1396 = vrot.lane.b32.xlu0 %v1234_v7, %s8482_s0  ;;  %1384 = vrot.lane.b32.xlu1 %v1211_v13, %s8482_s0  ;;  %v1293_v13 = vsel %vm207_vm0, %v9366_v19, %v9372_v30  ;;  %v9546_v12 = vpop.permute.xlu0 %1304 }
 0x456   :  { %v1314_v19 = vsel %vm228_vm7, %v9423_v15, %v9546_v12 }
 0x458   :  { %v9515_v21 = vpop.permute.xlu1 %1166 }
 0x459   :  { %1364 = vrot.lane.b32.xlu0 %v1195_v26, %s8482_s0  ;;  %v1175_v7 = vsel %vm81_vm6, %v9394_v10, %v9515_v21  ;;  %v1177_v10 = vsel %vm81_vm6, %v9521_v40, %v1171_v57  ;;  %v1311_v15 = vpop.permute.xlu0 %1310 }
 0x45c   :  { %v1191_v55 = vpop.permute.xlu1 %1190 }
 0x45d   :  { %1382 = vrot.lane.b32.xlu0 %v1217_v61, %s8482_s0  ;;  %1370 = vrot.lane.b32.xlu1 %v1191_v55, %s8482_s0  ;;  %v1197_v26 = vsel %vm102_vm5, %v9509_v59, %v1191_v55  ;;  %v1252_v55 = vsel %vm165_vm2, %v9360_v39, %v9389_v47  ;;  %v1213_v39 = vsel %vm123_vm4, %v9375_v24, %v9403_v9 }
 0x45e   :  { %v1212_v47 = vsel %vm123_vm4, %v9410_v28, %v9375_v24  ;;  %v1173_v9 = vsel %vm81_vm6, %v9391_v2, %v9431_v35  ;;  %v1172_v24 = vsel %vm81_vm6, %v9437_v50, %v9391_v2  ;;  %v1312_v35 = vsel %vm228_vm7, %v9408_v17, %v9448_v11 }
 0x45f   :  { %v1297_v50 = vsel %vm207_vm0, %v9461_v16, %v9440_v54  ;;  %v1255_v17 = vsel %vm165_vm2, %v9469_v41, %v9446_v62  ;;  %v1233_v54 = vsel %vm142_vm3, %v9482_v46, %v9467_v34  ;;  %v1257_v62 = vsel %vm165_vm2, %v9490_v37, %v9480_v36 }
 0x460   :  { %v9539_v61 = vpop.permute.xlu1 %1306  ;;  %v1196_v34 = vsel %vm102_vm5, %v9502_v42, %v9509_v59  ;;  %v1176_v36 = vsel %vm81_vm6, %v9515_v21, %v9521_v40 }
 0x461   :  { %1350 = vrot.lane.b32.xlu0 %v1175_v7, %s8482_s0  ;;  %1356 = vrot.lane.b32.xlu1 %v1171_v57, %s8482_s0  ;;  %v1273_v7 = vsel %vm186_vm1, %v9381_v32, %v9385_v44  ;;  %v1231_v32 = vsel %vm142_vm3, %v9370_v1, %v9396_v63  ;;  %v1194_v1 = vsel %vm102_vm5, %v9418_v43, %v9387_v49  ;;  %v9577_v63 = vpop.permute.xlu0 %1332  ;;  %v9592_v49 = vld [vmem:[%s15063_s1 + $0x24] ss:$8 sps:$4 sm:$0xff]  }
 0x462   :  { %v1294_v43 = vsel %vm207_vm0, %v9372_v30, %v9401_v8  ;;  %8124 = vmatprep.mubr.msk.bf16.mxu0 %vm481_vm8, %v9592_v49  ;;  %8125 = vmatprep.mubr.msk.bf16.mxu1 %vm481_vm8, %v9592_v49  ;;  %v1275_v30 = vsel %vm186_vm1, %v9453_v60, %v9429_v33  ;;  %v1277_v33 = vsel %vm186_vm1, %v9474_v0, %v9459_v4 }
 0x463   :  { %v1216_v4 = vsel %vm123_vm4, %v9496_v38, %v9488_v31  ;;  %v1315_v42 = vsel %vm228_vm7, %v9546_v12, %v9539_v61 }
 0x465   :  { %1368 = vrot.lane.b32.xlu0 %v1197_v26, %s8482_s0  ;;  %1432 = vrot.lane.b32.xlu1 %v1293_v13, %s8482_s0  ;;  %v1309_v26 = vpop.permute.xlu1 %1308  ;;  %v9586_v28 = vpop.permute.xlu0 %1330 }
 0x466   :  { %v1316_v44 = vsel %vm228_vm7, %v9539_v61, %v1309_v26  ;;  %v1317_v59 = vsel %vm228_vm7, %v1309_v26, %v1311_v15 }
 0x469   :  { %1354 = vrot.lane.b32.xlu0 %v1177_v10, %s8482_s0  ;;  %1418 = vrot.lane.b32.xlu1 %v1273_v7, %s8482_s0  ;;  %v9602_v2 = vpop.permute.xlu0 %1336  ;;  %v9638_v41 = vpop.permute.xlu1 %1334 }
 0x46d   :  { %1448 = vrot.lane.b32.xlu0 %v1314_v19, %s8482_s0  ;;  %1402 = vrot.lane.b32.xlu1 %v1252_v55, %s8482_s0  ;;  %v9611_v8 = vpop.permute.xlu0 %1340  ;;  %v9649_v46 = vpop.permute.xlu1 %1338 }
 0x471   :  { %1390 = vrot.lane.b32.xlu1 %v1231_v32, %s8482_s0  ;;  %1452 = vrot.lane.b32.xlu0 %v1316_v44, %s8482_s0  ;;  %v1415_v57 = vpop.permute.xlu0 %1414  ;;  %v1429_v31 = vpop.permute.xlu1 %1428 }
 0x475   :  { %1374 = vrot.lane.b32.xlu1 %v1213_v39, %s8482_s0  ;;  %v1401_v21 = vpop.permute.xlu1 %1400 }
 0x479   :  { %1372 = vrot.lane.b32.xlu1 %v1212_v47, %s8482_s0 }
 0x47d   :  { %1362 = vrot.lane.b32.xlu1 %v1194_v1, %s8482_s0 }
 0x47f   :  { %v1387_v11 = vpop.permute.xlu0 %1386 }
 0x481   :  { %1346 = vrot.lane.b32.xlu1 %v1173_v9, %s8482_s0 }
 0x483   :  { %v1431_v60 = vpop.permute.xlu0 %1430 }
 0x484   :  { %v1498_v39 = vsel %vm372_vm9, %v1429_v31, %v1431_v60 }
 0x485   :  { %1344 = vrot.lane.b32.xlu1 %v1172_v24, %s8482_s0 }
 0x487   :  { %v1417_v16 = vpop.permute.xlu0 %1416 }
 0x488   :  { %v1492_v9 = vsel %vm372_vm9, %v1415_v57, %v1417_v16 }
 0x489   :  { %1434 = vrot.lane.b32.xlu1 %v1294_v43, %s8482_s0 }
 0x48b   :  { %v9640_v0 = vpop.permute.xlu0 %1404  ;;  %v9662_v13 = vpop.permute.xlu1 %1442 }
 0x48d   :  { %1444 = vrot.lane.b32.xlu1 %v1312_v35, %s8482_s0 }
 0x48f   :  { %v1389_v37 = vpop.permute.xlu0 %1388 }
 0x491   :  { %1422 = vrot.lane.b32.xlu1 %v1275_v30, %s8482_s0 }
 0x493   :  { %v9654_v38 = vpop.permute.xlu0 %1376 }
 0x495   :  { %1440 = vrot.lane.b32.xlu1 %v1297_v50, %s8482_s0 }
 0x497   :  { %v1361_v40 = vpop.permute.xlu0 %1360 }
 0x499   :  { %1408 = vrot.lane.b32.xlu1 %v1255_v17, %s8482_s0 }
 0x49b   :  { %v1359_v10 = vpop.permute.xlu0 %1358 }
 0x49c   :  { %v1468_v31 = vsel %vm372_vm9, %v1359_v10, %v1361_v40 }
 0x49d   :  { %1426 = vrot.lane.b32.xlu1 %v1277_v33, %s8482_s0  ;;  %v1480_v33 = vsel %vm372_vm9, %v1387_v11, %v1389_v37 }
 0x4a1   :  { %1394 = vrot.lane.b32.xlu1 %v1233_v54, %s8482_s0 }
 0x4a5   :  { %1412 = vrot.lane.b32.xlu1 %v1257_v62, %s8482_s0 }
 0x4a9   :  { %1380 = vrot.lane.b32.xlu1 %v1216_v4, %s8482_s0 }
 0x4ad   :  { %1366 = vrot.lane.b32.xlu1 %v1196_v34, %s8482_s0 }
 0x4b1   :  { %1352 = vrot.lane.b32.xlu1 %v1176_v36, %s8482_s0 }
 0x4b5   :  { %1342 = vrot.lane.b32.xlu1 %v9328_v5, %s8482_s0  ;;  %v9666_v5 = vpop.permute.xlu0 %1348 }
 0x4b9   :  { %1450 = vrot.lane.b32.xlu1 %v1315_v42, %s8482_s0  ;;  %v9670_v55 = vpop.permute.xlu0 %1436 }
 0x4bd   :  { %1454 = vrot.lane.b32.xlu1 %v1317_v59, %s8482_s0  ;;  %v9676_v26 = vpop.permute.xlu0 %1446 }
 0x4c1   :  { %v1421_v47 = vpop.permute.xlu0 %1420 }
 0x4c3   :  { %v9664_v7 = vpop.permute.xlu1 %1398 }
 0x4c5   :  { %v1439_v30 = vpop.permute.xlu0 %1438 }
 0x4c7   :  { %v9668_v19 = vpop.permute.xlu1 %1384 }
 0x4c9   :  { %v1407_v57 = vpop.permute.xlu0 %1406 }
 0x4cd   :  { %v1425_v4 = vpop.permute.xlu0 %1424 }
 0x4cf   :  { %v9672_v12 = vpop.permute.xlu1 %1370 }
 0x4d1   :  { %v1393_v11 = vpop.permute.xlu0 %1392 }
 0x4d3   :  { %v9674_v61 = vpop.permute.xlu1 %1356 }
 0x4d7   :  { %v1433_v32 = vpop.permute.xlu1 %1432 }
 0x4d8   :  { %v1499_v44 = vsel %vm372_vm9, %v1431_v60, %v1433_v32 }
 0x4d9   :  { %1567 = vmatprep.subr.bf16.mxu0 %v1499_v44  ;;  %v1411_v44 = vpop.permute.xlu0 %1410 }
 0x4da   :  { %1568 = vmatpush1.bf16.msra.mxu0 %v1498_v39  ;;  %v1457_v39 = vsel %vm372_vm9, %v9577_v63, %v9638_v41 }
 0x4db   :  { %v1419_v15 = vpop.permute.xlu1 %1418 }
 0x4dc   :  { %v1493_v1 = vsel %vm372_vm9, %v1417_v16, %v1419_v15 }
 0x4dd   :  { %1569 = vmatprep.subr.bf16.mxu0 %v1493_v1 }
 0x4de   :  { %1570 = vmatpush1.bf16.msra.mxu0 %v1492_v9 }
 0x4df   :  { %v1403_v24 = vpop.permute.xlu1 %1402 }
 0x4e0   :  { %v1487_v43 = vsel %vm372_vm9, %v1403_v24, %v9640_v0  ;;  %v1486_v35 = vsel %vm372_vm9, %v1401_v21, %v1403_v24  ;;  %v1379_v24 = vpop.permute.xlu0 %1378 }
 0x4e1   :  { %1571 = vmatprep.subr.bf16.mxu0 %v1487_v43 }
 0x4e2   :  { %1572 = vmatpush1.bf16.msra.mxu0 %v1486_v35 }
 0x4e3   :  { %v9685_v50 = vpop.permute.xlu1 %1390 }
 0x4e4   :  { %v1481_v17 = vsel %vm372_vm9, %v1389_v37, %v9685_v50 }
 0x4e5   :  { %1573 = vmatprep.subr.bf16.mxu0 %v1481_v17 }
 0x4e6   :  { %1574 = vmatpush1.bf16.msra.mxu0 %v1480_v33  ;;  %v1397_v33 = vpop.permute.xlu0 %1396 }
 0x4e7   :  { %v1375_v60 = vpop.permute.xlu1 %1374 }
 0x4e8   :  { %v1475_v54 = vsel %vm372_vm9, %v1375_v60, %v9654_v38 }
 0x4e9   :  { %1575 = vmatprep.subr.bf16.mxu0 %v1475_v54 }
 0x4eb   :  { %v1373_v62 = vpop.permute.xlu1 %1372 }
 0x4ec   :  { %v1474_v16 = vsel %vm372_vm9, %v1373_v62, %v1375_v60  ;;  %v1494_v60 = vsel %vm372_vm9, %v1419_v15, %v1421_v47  ;;  %v1502_v62 = vsel %vm372_vm9, %v9670_v55, %v1439_v30 }
 0x4ed   :  { %1576 = vmatpush1.bf16.msra.mxu0 %v1474_v16  ;;  %v1365_v16 = vpop.permute.xlu0 %1364 }
 0x4ef   :  { %v9693_v34 = vpop.permute.xlu1 %1362 }
 0x4f0   :  { %v1469_v36 = vsel %vm372_vm9, %v1361_v40, %v9693_v34  ;;  %v1456_v40 = vsel %vm372_vm9, %v9586_v28, %v9577_v63  ;;  %v9717_v63 = vld [vmem:[%s15063_s1 + $0x20] ss:$8 sps:$4 sm:$0xff]  }
 0x4f1   :  { %1577 = vmatprep.subr.bf16.mxu0 %v1469_v36 }
 0x4f2   :  { %1578 = vmatpush1.bf16.msra.mxu0 %v1468_v31 }
 0x4f3   :  { %v1347_v37 = vpop.permute.xlu1 %1346 }
 0x4f4   :  { %v1463_v42 = vsel %vm372_vm9, %v1347_v37, %v9666_v5 }
 0x4f5   :  { %1579 = vmatprep.subr.bf16.mxu0 %v1463_v42 }
 0x4f7   :  { %v1345_v59 = vpop.permute.xlu1 %1344 }
 0x4f8   :  { %v1462_v21 = vsel %vm372_vm9, %v1345_v59, %v1347_v37  ;;  %v1383_v37 = vpop.permute.xlu0 %1382 }
 0x4f9   :  { %1580 = vmatpush1.bf16.msra.mxu0 %v1462_v21 }
 0x4fa   :  { %1581 = vmatprep.subr.bf16.mxu0 %v1457_v39 }
 0x4fb   :  { %v1435_v1 = vpop.permute.xlu1 %1434 }
 0x4fc   :  { %v1501_v10 = vsel %vm372_vm9, %v1435_v1, %v9670_v55  ;;  %v1500_v9 = vsel %vm372_vm9, %v1433_v32, %v1435_v1  ;;  %v1351_v21 = vpop.permute.xlu0 %1350 }
 0x4fd   :  { %1582 = vmatpush1.bf16.msra.mxu0 %v1456_v40  ;;  %1610 = vmatprep.subr.bf16.mxu1 %v1501_v10 }
 0x4fe   :  { %1611 = vmatpush1.bf16.msra.mxu1 %v1500_v9 }
 0x4ff   :  { %v1445_v43 = vpop.permute.xlu1 %1444 }
 0x500   :  { %v1505_v35 = vsel %vm372_vm9, %v1445_v43, %v9676_v26  ;;  %v1504_v17 = vsel %vm372_vm9, %v9662_v13, %v1445_v43  ;;  %v1369_v10 = vpop.permute.xlu0 %1368  ;;  %v1470_v43 = vsel %vm372_vm9, %v9693_v34, %v1365_v16  ;;  %v1459_v34 = vsel %vm372_vm9, %v9602_v2, %v9649_v46 }
 0x501   :  { %1597 = vmatprep.subr.bf16.mxu0 %v1505_v35 }
 0x502   :  { %1598 = vmatpush2.bf16.msra.mxu0 %v1504_v17 }
 0x503   :  { %v1423_v28 = vpop.permute.xlu1 %1422 }
 0x504   :  { %v1495_v32 = vsel %vm372_vm9, %v1421_v47, %v1423_v28  ;;  %v1488_v47 = vsel %vm372_vm9, %v9640_v0, %v1407_v57  ;;  %v1496_v42 = vsel %vm372_vm9, %v1423_v28, %v1425_v4  ;;  %v1464_v28 = vsel %vm372_vm9, %v9666_v5, %v1351_v21 }
 0x505   :  { %1612 = vmatprep.subr.bf16.mxu1 %v1495_v32  ;;  %1600 = vmatmul.mubr.bf16.vlgmr.msra.gmra.mxu0 %v9717_v63 }
 0x506   :  { %1613 = vmatpush1.bf16.msra.mxu1 %v1494_v60  ;;  %8126 = vmatprep.mubr.msk.bf16.mxu0 %vm481_vm8, %v9592_v49 }
 0x507   :  { %v1441_v13 = vpop.permute.xlu1 %1440 }
 0x508   :  { %v1503_v54 = vsel %vm372_vm9, %v1439_v30, %v1441_v13  ;;  %v1482_v30 = vsel %vm372_vm9, %v9685_v50, %v1393_v11  ;;  %v1476_v50 = vsel %vm372_vm9, %v9654_v38, %v1379_v24  ;;  %v1473_v38 = vsel %vm372_vm9, %v1369_v10, %v9672_v12 }
 0x509   :  { %1653 = vmatprep.subr.bf16.mxu0 %v1503_v54  ;;  %v1458_v13 = vsel %vm372_vm9, %v9638_v41, %v9602_v2 }
 0x50a   :  { %1654 = vmatpush1.bf16.msra.mxu0 %v1502_v62 }
 0x50b   :  { %v1409_v36 = vpop.permute.xlu1 %1408 }
 0x50c   :  { %v1489_v31 = vsel %vm372_vm9, %v1407_v57, %v1409_v36  ;;  %v1490_v57 = vsel %vm372_vm9, %v1409_v36, %v1411_v44  ;;  %v1460_v36 = vsel %vm372_vm9, %v9649_v46, %v9611_v8 }
 0x50d   :  { %1614 = vmatprep.subr.bf16.mxu1 %v1489_v31 }
 0x50e   :  { %1615 = vmatpush1.bf16.msra.mxu1 %v1488_v47 }
 0x50f   :  { %v1427_v15 = vpop.permute.xlu1 %1426 }
 0x510   :  { %v1497_v49 = vsel %vm372_vm9, %v1425_v4, %v1427_v15  ;;  %v1485_v4 = vsel %vm372_vm9, %v1397_v33, %v9664_v7  ;;  %v9776_v15 = vpop.f32.mrf.mxu0 }
 0x511   :  { %1655 = vmatprep.subr.bf16.mxu0 %v1497_v49  ;;  %15127 = vst [vmem:[#allocation4_spill] sm:$0xff] %v9776_v15 }
 0x512   :  { %1656 = vmatpush1.bf16.msra.mxu0 %v1496_v42  ;;  %v9780_v49 = vpop.f32.mrf.mxu0 }
 0x513   :  { %v1395_v59 = vpop.permute.xlu1 %1394  ;;  %15129 = vst [vmem:[#allocation6_spill] sm:$0xff] %v9780_v49 }
 0x514   :  { %v1483_v55 = vsel %vm372_vm9, %v1393_v11, %v1395_v59  ;;  %v1484_v11 = vsel %vm372_vm9, %v1395_v59, %v1397_v33  ;;  %v9784_v46 = vpop.f32.mrf.mxu0 }
 0x515   :  { %1616 = vmatprep.subr.bf16.mxu1 %v1483_v55  ;;  %15131 = vst [vmem:[#allocation8_spill] sm:$0xff] %v9784_v46 }
 0x516   :  { %1617 = vmatpush1.bf16.msra.mxu1 %v1482_v30  ;;  %v9788_v42 = vpop.f32.mrf.mxu0 }
 0x517   :  { %v1413_v39 = vpop.permute.xlu1 %1412  ;;  %15133 = vst [vmem:[#allocation10_spill] sm:$0xff] %v9788_v42 }
 0x518   :  { %v1491_v0 = vsel %vm372_vm9, %v1411_v44, %v1413_v39  ;;  %v1479_v44 = vsel %vm372_vm9, %v1383_v37, %v9668_v19 }
 0x519   :  { %1657 = vmatprep.subr.bf16.mxu0 %v1491_v0 }
 0x51a   :  { %1658 = vmatpush1.bf16.msra.mxu0 %v1490_v57 }
 0x51b   :  { %1659 = vmatprep.subr.bf16.mxu0 %v1485_v4  ;;  %v1381_v1 = vpop.permute.xlu1 %1380 }
 0x51c   :  { %v1477_v40 = vsel %vm372_vm9, %v1379_v24, %v1381_v1  ;;  %v1478_v35 = vsel %vm372_vm9, %v1381_v1, %v1383_v37  ;;  %v1355_v24 = vpop.permute.xlu0 %1354 }
 0x51d   :  { %1618 = vmatprep.subr.bf16.mxu1 %v1477_v40  ;;  %v1467_v12 = vsel %vm372_vm9, %v1355_v24, %v9674_v61 }
 0x51e   :  { %1619 = vmatpush1.bf16.msra.mxu1 %v1476_v50  ;;  %1660 = vmatpush1.bf16.msra.mxu0 %v1484_v11 }
 0x51f   :  { %1661 = vmatprep.subr.bf16.mxu0 %v1479_v44  ;;  %v1367_v9 = vpop.permute.xlu1 %1366 }
 0x520   :  { %v1471_v7 = vsel %vm372_vm9, %v1365_v16, %v1367_v9  ;;  %v1472_v32 = vsel %vm372_vm9, %v1367_v9, %v1369_v10  ;;  %v1449_v60 = vpop.permute.xlu0 %1448 }
 0x521   :  { %1620 = vmatprep.subr.bf16.mxu1 %v1471_v7  ;;  %v1506_v61 = vsel %vm372_vm9, %v9676_v26, %v1449_v60  ;;  %v9778_v26 = vpop.f32.mrf.mxu1 }
 0x522   :  { %1621 = vmatpush1.bf16.msra.mxu1 %v1470_v43  ;;  %1662 = vmatpush1.bf16.msra.mxu0 %v1478_v35  ;;  %15128 = vst [vmem:[#allocation5_spill] sm:$0xff] %v9778_v26 }
 0x523   :  { %1663 = vmatprep.subr.bf16.mxu0 %v1473_v38  ;;  %v1353_v17 = vpop.permute.xlu1 %1352 }
 0x524   :  { %v1465_v19 = vsel %vm372_vm9, %v1351_v21, %v1353_v17  ;;  %v1466_v5 = vsel %vm372_vm9, %v1353_v17, %v1355_v24  ;;  %v1453_v2 = vpop.permute.xlu0 %1452 }
 0x525   :  { %1622 = vmatprep.subr.bf16.mxu1 %v1465_v19 }
 0x526   :  { %1623 = vmatpush1.bf16.msra.mxu1 %v1464_v28  ;;  %1664 = vmatpush1.bf16.msra.mxu0 %v1472_v32 }
 0x527   :  { %1624 = vmatprep.subr.bf16.mxu1 %v1459_v34  ;;  %1665 = vmatprep.subr.bf16.mxu0 %v1467_v12  ;;  %v1343_v33 = vpop.permute.xlu1 %1342 }
 0x528   :  { %v1461_v54 = vsel %vm372_vm9, %v9611_v8, %v1343_v33  ;;  %v9782_v8 = vpop.f32.mrf.mxu1 }
 0x529   :  { %15130 = vst [vmem:[#allocation7_spill] sm:$0xff] %v9782_v8 }
 0x52a   :  { %1625 = vmatpush1.bf16.msra.mxu1 %v1458_v13  ;;  %1666 = vmatpush1.bf16.msra.mxu0 %v1466_v5  ;;  %v9786_v37 = vpop.f32.mrf.mxu1 }
 0x52b   :  { %1667 = vmatprep.subr.bf16.mxu0 %v1461_v54  ;;  %v1451_v62 = vpop.permute.xlu1 %1450  ;;  %15132 = vst [vmem:[#allocation9_spill] sm:$0xff] %v9786_v37 }
 0x52c   :  { %v1507_v16 = vsel %vm372_vm9, %v1449_v60, %v1451_v62  ;;  %v1508_v47 = vsel %vm372_vm9, %v1451_v62, %v1453_v2  ;;  %v9790_v59 = vpop.f32.mrf.mxu1 }
 0x52d   :  { %1640 = vmatprep.subr.bf16.mxu1 %v1507_v16  ;;  %15134 = vst [vmem:[#allocation11_spill] sm:$0xff] %v9790_v59 }
 0x52e   :  { %1641 = vmatpush2.bf16.msra.mxu1 %v1506_v61  ;;  %1668 = vmatpush1.bf16.msra.mxu0 %v1460_v36  ;;  %v9794_v30 = vpop.f32.mrf.mxu1 }
 0x52f   :  { %v1455_v41 = vpop.permute.xlu1 %1454  ;;  %15135 = vst [vmem:[#allocation12_spill] sm:$0xff] %v9794_v30 }
 0x530   :  { %v1509_v31 = vsel %vm372_vm9, %v1453_v2, %v1455_v41  ;;  %v9798_v21 = vpop.f32.mrf.mxu1 }
 0x531   :  { %1643 = vmatmul.mubr.bf16.vlgmr.msra.gmra.mxu1 %v9717_v63  ;;  %1683 = vmatprep.subr.bf16.mxu0 %v1509_v31  ;;  %15136 = vst [vmem:[#allocation13_spill] sm:$0xff] %v9798_v21 }
 0x532   :  { %1684 = vmatpush2.bf16.msra.mxu0 %v1508_v47  ;;  %v9802_v0 = vpop.f32.mrf.mxu1 }
 0x533   :  { %15137 = vst [vmem:[#allocation14_spill] sm:$0xff] %v9802_v0 }
 0x534   :  { %v9810_v40 = vpop.f32.mrf.mxu1 }
 0x535   :  { %1686 = vmatmul.mubr.bf16.vlgmr.msra.gmra.mxu0 %v9717_v63  ;;  %15138 = vst [vmem:[#allocation15_spill] sm:$0xff] %v9810_v40 }
 0x5c5   :  { %v9792_v55 = vpop.f32.mrf.mxu0 }
 0x5c6   :  { %v1696_v57 = vmul.f32 %v9792_v55, %v9132_v20 }
 0x5c7   :  { %v9796_v63 = vpop.f32.mrf.mxu0 }
 0x5c8   :  { %v1697_v4 = vmul.f32 %v9796_v63, %v9134_v23  ;;  %v1724_v11 = vmul.f32 %v1696_v57, %v9792_v55 }
 0x5c9   :  { %v9800_v39 = vpop.f32.mrf.mxu0 }
 0x5ca   :  { %v1702_v10 = vmul.f32 %v9800_v39, %v9132_v20  ;;  %v1725_v44 = vmul.f32 %v1697_v4, %v9796_v63  ;;  %v1708_v7 = vadd.f32 %v1697_v4, %v1696_v57 }
 0x5cb   :  { %v9808_v1 = vpop.f32.mrf.mxu0 }
 0x5cc   :  { %v1703_v50 = vmul.f32 %v9808_v1, %v9134_v23  ;;  %v1730_v35 = vmul.f32 %v1702_v10, %v9800_v39  ;;  %v1736_v17 = vadd.f32 %v1725_v44, %v1724_v11 }
 0x5ce   :  { %v1731_v38 = vmul.f32 %v1703_v50, %v9808_v1  ;;  %v1715_v34 = vadd.f32 %v1703_v50, %v1702_v10 }
 0x5d0   :  { %v1743_v62 = vadd.f32 %v1731_v38, %v1730_v35 }
 0x5f1   :  { %v9818_v9 = vpop.f32.mrf.mxu1 }
 0x5f2   :  { %v1698_v43 = vmul.f32 %v9818_v9, %v9138_v29 }
 0x5f3   :  { %v9824_v24 = vpop.f32.mrf.mxu1 }
 0x5f4   :  { %v1709_v19 = vadd.f32 %v1708_v7, %v1698_v43  ;;  %v1726_v28 = vmul.f32 %v1698_v43, %v9818_v9  ;;  %v1699_v32 = vmul.f32 %v9824_v24, %v9152_v45 }
 0x5f5   :  { %v9829_v12 = vpop.f32.mrf.mxu1  ;;  %v9831_v33 = vpop.f32.mrf.mxu0 }
 0x5f6   :  { %v1737_v60 = vadd.f32 %v1736_v17, %v1726_v28  ;;  %v1710_v13 = vadd.f32 %v1709_v19, %v1699_v32  ;;  %v1727_v5 = vmul.f32 %v1699_v32, %v9824_v24  ;;  %v1704_v54 = vmul.f32 %v9829_v12, %v9138_v29 }
 0x5f7   :  { %v1700_v16 = vmul.f32 %v9831_v33, %v9171_v18  ;;  %v9838_v61 = vpop.f32.mrf.mxu1  ;;  %v9840_v36 = vpop.f32.mrf.mxu0 }
 0x5f8   :  { %v1738_v2 = vadd.f32 %v1737_v60, %v1727_v5  ;;  %v1716_v41 = vadd.f32 %v1715_v34, %v1704_v54  ;;  %v1732_v31 = vmul.f32 %v1704_v54, %v9829_v12  ;;  %v1705_v47 = vmul.f32 %v9838_v61, %v9152_v45 }
 0x5f9   :  { %v1711_v57 = vadd.f32 %v1710_v13, %v1700_v16  ;;  %v1728_v4 = vmul.f32 %v1700_v16, %v9831_v33  ;;  %v1701_v10 = vmul.f32 %v9840_v36, %v9177_v3  ;;  %v9848_v50 = vpop.f32.mrf.mxu0 }
 0x5fa   :  { %v1744_v11 = vadd.f32 %v1743_v62, %v1732_v31  ;;  %v1717_v44 = vadd.f32 %v1716_v41, %v1705_v47  ;;  %v1733_v7 = vmul.f32 %v1705_v47, %v9838_v61  ;;  %v1706_v43 = vmul.f32 %v9848_v50, %v9171_v18 }
 0x5fb   :  { %v1739_v35 = vadd.f32 %v1738_v2, %v1728_v4  ;;  %v1729_v38 = vmul.f32 %v1701_v10, %v9840_v36  ;;  %v9854_v17 = vpop.f32.mrf.mxu0  ;;  %v1712_v19 = vadd.f32 %v1711_v57, %v1701_v10 }
 0x5fc   :  { %v1745_v28 = vadd.f32 %v1744_v11, %v1733_v7  ;;  %v1718_v32 = vadd.f32 %v1717_v44, %v1706_v43  ;;  %v1734_v34 = vmul.f32 %v1706_v43, %v9848_v50  ;;  %v1707_v60 = vmul.f32 %v9854_v17, %v9177_v3 }
 0x5fd   :  { %1713 = vadd.xlane.f32.xlu0 %v1712_v19  ;;  %v1740_v62 = vadd.f32 %v1739_v35, %v1729_v38 }
 0x5fe   :  { %v1719_v13 = vadd.f32 %v1718_v32, %v1707_v60  ;;  %v1746_v5 = vadd.f32 %v1745_v28, %v1734_v34  ;;  %v1735_v54 = vmul.f32 %v1707_v60, %v9854_v17  ;;  %v8127_v34 = vld [vmem:[%s15065_s2 + $0x20] sm:$0xff] }
 0x600   :  { %1720 = vadd.xlane.f32.xlu1 %v1719_v13  ;;  %v1747_v16 = vadd.f32 %v1746_v5, %v1735_v54  ;;  %v8129_v5 = vld [vmem:[%s15066_s3 + $0x20] sm:$0xff]  ;;  %v8128_v54 = vld [vmem:[%s15065_s2 + $0x28] sm:$0xff] }
 0x601   :  { %1741 = vadd.xlane.f32.xlu0 %v1740_v62 }
 0x605   :  { %1748 = vadd.xlane.f32.xlu0 %v1747_v16 }
 0x686   :  { %v1714_v2 = vpop.xlane.xlu0 %1713 }
 0x687   :  { %v1722_v41 = vmul.f32 0.001953125, %v1714_v2 }
 0x689   :  { %v1721_v31 = vpop.xlane.xlu1 %1720  ;;  %v1752_v57 = vmul.f32 %v1722_v41, %v1722_v41 }
 0x68a   :  { %v1742_v47 = vpop.xlane.xlu0 %1741  ;;  %v1723_v10 = vmul.f32 0.001953125, %v1721_v31 }
 0x68b   :  { %v1750_v4 = vmul.f32 0.001953125, %v1742_v47  ;;  %v8130_v47 = vld [vmem:[%s15066_s3 + $0x28] sm:$0xff] }
 0x68c   :  { %v1753_v43 = vmul.f32 %v1723_v10, %v1723_v10 }
 0x68d   :  { %v1754_v11 = vsub.f32 %v1750_v4, %v1752_v57 }
 0x68e   :  { %v1749_v44 = vpop.xlane.xlu0 %1748 }
 0x68f   :  { %v1756_v7 = vmax.f32 %v1754_v11, 0.0  ;;  %v1751_v19 = vmul.f32 0.001953125, %v1749_v44 }
 0x691   :  { %v1761_v28 = vadd.f32 1e-05, %v1756_v7  ;;  %v1755_v32 = vsub.f32 %v1751_v19, %v1753_v43 }
 0x693   :  { %8434 = vrsqrt.f32 %v1761_v28  ;;  %v1757_v35 = vmax.f32 %v1755_v32, 0.0 }
 0x695   :  { %v1762_v38 = vadd.f32 1e-05, %v1757_v35 }
 0x697   :  { %8436 = vrsqrt.f32 %v1762_v38 }
 0x6a0   :  { %v8435_v60 = vpop.eup %8434 }
 0x6a1   :  { %v1765_v13 = vmul.f32 %v8435_v60, %v8127_v34 }
 0x6a3   :  { %1776 = vperm.xlu1 %8395, %v1765_v13   ;;  %v1770_v62 = vmul.f32 %v1765_v13, %v1722_v41 }
 0x6a4   :  { %v8437_v16 = vpop.eup %8436 }
 0x6a5   :  { %v1772_v2 = vsub.f32 %v8129_v5, %v1770_v62  ;;  %v1766_v31 = vmul.f32 %v8437_v16, %v8128_v54 }
 0x6a7   :  { %1798 = vperm.xlu1 %8395, %v1772_v2   ;;  %1781 = vperm.xlu0 %8396, %v1766_v31   ;;  %v1771_v57 = vmul.f32 %v1766_v31, %v1723_v10 }
 0x6a9   :  { %v1773_v4 = vsub.f32 %v8130_v47, %v1771_v57 }
 0x6ab   :  { %1803 = vperm.xlu1 %8395, %v1773_v4  }
 0x71e   :  { %v1777_v11 = vpop.permute.xlu1 %1776 }
 0x71f   :  { %v1784_v44 = vmul.f32 %v1777_v11, %v9792_v55  ;;  %v1785_v7 = vmul.f32 %v1777_v11, %v9796_v63  ;;  %v1786_v43 = vmul.f32 %v1777_v11, %v9818_v9  ;;  %v1787_v41 = vmul.f32 %v1777_v11, %v9824_v24 }
 0x720   :  { %v1788_v32 = vmul.f32 %v1777_v11, %v9831_v33  ;;  %v1789_v35 = vmul.f32 %v1777_v11, %v9840_v36 }
 0x722   :  { %v1782_v19 = vpop.permute.xlu0 %1781  ;;  %v1799_v28 = vpop.permute.xlu1 %1798 }
 0x723   :  { %v1790_v38 = vmul.f32 %v1782_v19, %v9800_v39  ;;  %v1791_v10 = vmul.f32 %v1782_v19, %v9808_v1  ;;  %v1792_v34 = vmul.f32 %v1782_v19, %v9829_v12  ;;  %v1793_v55 = vmul.f32 %v1782_v19, %v9838_v61 }
 0x724   :  { %v1806_v60 = vadd.f32 %v1799_v28, %v1784_v44  ;;  %v1807_v63 = vadd.f32 %v1799_v28, %v1785_v7  ;;  %v1808_v13 = vadd.f32 %v1799_v28, %v1786_v43  ;;  %v1809_v9 = vadd.f32 %v1799_v28, %v1787_v41 }
 0x725   :  { %v1810_v5 = vadd.f32 %v1799_v28, %v1788_v32  ;;  %v1811_v24 = vadd.f32 %v1799_v28, %v1789_v35  ;;  %v1794_v54 = vmul.f32 %v1782_v19, %v9848_v50  ;;  %v1795_v33 = vmul.f32 %v1782_v19, %v9854_v17 }
 0x726   :  { %v1818_v62 = vmax.f32 %v1806_v60, 0.0  ;;  %v1819_v36 = vmax.f32 %v1807_v63, 0.0  ;;  %v1804_v16 = vpop.permute.xlu1 %1803  ;;  %v1820_v39 = vmax.f32 %v1808_v13, 0.0  ;;  %v1821_v2 = vmax.f32 %v1809_v9, 0.0 }
 0x727   :  { %v1822_v1 = vmax.f32 %v1810_v5, 0.0  ;;  %v1823_v31 = vmax.f32 %v1811_v24, 0.0  ;;  %v1812_v47 = vadd.f32 %v1804_v16, %v1790_v38  ;;  %v1813_v57 = vadd.f32 %v1804_v16, %v1791_v10 }
 0x728   :  { %v1830_v12 = vmul.f32 %v1818_v62, %v9132_v20  ;;  %v1831_v61 = vmul.f32 %v1819_v36, %v9134_v23  ;;  %v1832_v4 = vmul.f32 %v1820_v39, %v9138_v29  ;;  %v1833_v11 = vmul.f32 %v1821_v2, %v9152_v45 }
 0x729   :  { %v1834_v50 = vmul.f32 %v1822_v1, %v9171_v18  ;;  %v1835_v17 = vmul.f32 %v1823_v31, %v9177_v3  ;;  %v1814_v7 = vadd.f32 %v1804_v16, %v1792_v34  ;;  %v1815_v43 = vadd.f32 %v1804_v16, %v1793_v55 }
 0x72a   :  { %v8337_v44 = vpack.c.bf16 %v1831_v61, %v1830_v12  ;;  %v1816_v41 = vadd.f32 %v1804_v16, %v1794_v54  ;;  %v8338_v19 = vpack.c.bf16 %v1833_v11, %v1832_v4  ;;  %v1817_v32 = vadd.f32 %v1804_v16, %v1795_v33 }
 0x72b   :  { %v8339_v28 = vpack.c.bf16 %v1835_v17, %v1834_v50  ;;  %v1824_v35 = vmax.f32 %v1812_v47, 0.0  ;;  %v1825_v60 = vmax.f32 %v1813_v57, 0.0  ;;  %v1826_v38 = vmax.f32 %v1814_v7, 0.0 }
 0x72c   :  { %1878 = vst [vmem:[#allocation2 + $0x4] sm:$0xff] %v8337_v44  ;;  %v1827_v10 = vmax.f32 %v1815_v43, 0.0  ;;  %v1828_v63 = vmax.f32 %v1816_v41, 0.0  ;;  %1879 = vst [vmem:[#allocation2 + $0xc] sm:$0xff] %v8338_v19  ;;  %v1829_v13 = vmax.f32 %v1817_v32, 0.0 }
 0x72d   :  { %1880 = vst [vmem:[#allocation2 + $0x14] sm:$0xff] %v8339_v28  ;;  %v1836_v9 = vmul.f32 %v1824_v35, %v9132_v20  ;;  %v1837_v5 = vmul.f32 %v1825_v60, %v9134_v23  ;;  %v1838_v34 = vmul.f32 %v1826_v38, %v9138_v29 }
 0x72e   :  { %v1839_v55 = vmul.f32 %v1827_v10, %v9152_v45  ;;  %v1840_v24 = vmul.f32 %v1828_v63, %v9171_v18  ;;  %v1841_v54 = vmul.f32 %v1829_v13, %v9177_v3 }
 0x72f   :  { %v8340_v33 = vpack.c.bf16 %v1837_v5, %v1836_v9 }
 0x730   :  { %v8341_v62 = vpack.c.bf16 %v1839_v55, %v1838_v34  ;;  %v8342_v36 = vpack.c.bf16 %v1841_v54, %v1840_v24 }
 0x731   :  { %1881 = vst [vmem:[#allocation2 + $0x24] sm:$0xff] %v8340_v33 }
 0x732   :  { %1882 = vst [vmem:[#allocation2 + $0x2c] sm:$0xff] %v8341_v62  ;;  %1883 = vst [vmem:[#allocation2 + $0x34] sm:$0xff] %v8342_v36 }
 0x733   :  { %v1884_v16 = vld [vmem:[#allocation2] sm:$0xff]  ;;  %v1885_v39 = vld [vmem:[#allocation2 + $0x8] sm:$0xff] }
 0x734   :  { %v1886_v4 = vld [vmem:[#allocation2 + $0x10] sm:$0xff]  ;;  %v1887_v44 = vld [vmem:[#allocation2 + $0x18] sm:$0xff] }
 0x738   :  { %v1888_v2 = vld [vmem:[#allocation2 + $0x20] sm:$0xff] }
 0x739   :  { %v1889_v1 = vld [vmem:[#allocation2 + $0x28] sm:$0xff]  ;;  %v9898_v12 = vcombine.high %v1884_v16, %v1888_v2  ;;  %v8137_v47 = vcombine.low %v1884_v16, %v1888_v2  ;;  %v1890_v57 = vld [vmem:[#allocation2 + $0x30] sm:$0xff]  ;;  %v1891_v17 = vld [vmem:[#allocation2 + $0x38] sm:$0xff] }
 0x73a   :  { %v9896_v31 = vcombine.low %v1885_v39, %v1889_v1  ;;  %v9904_v61 = vcombine.high %v1885_v39, %v1889_v1  ;;  %v8141_v11 = vcombine.low %v1886_v4, %v1890_v57  ;;  %v8142_v50 = vcombine.high %v1886_v4, %v1890_v57 }
 0x73b   :  { %2041 = vrot.lane.b32.xlu0 %v9898_v12, %s8474_s26  ;;  %v9956_v7 = vcombine.low %v1887_v44, %v1891_v17  ;;  %v8144_v43 = vcombine.high %v1887_v44, %v1891_v17 }
 0x73c   :  { %2043 = vrot.lane.b32.xlu1 %v9896_v31, %s8474_s26 }
 0x73f   :  { %2045 = vrot.lane.b32.xlu0 %v9904_v61, %s8474_s26 }
 0x740   :  { %2021 = vrot.lane.b32.xlu1 %v9898_v12, %s8475_s27 }
 0x743   :  { %2023 = vrot.lane.b32.xlu0 %v9896_v31, %s8475_s27 }
 0x744   :  { %2025 = vrot.lane.b32.xlu1 %v9904_v61, %s8475_s27 }
 0x747   :  { %2001 = vrot.lane.b32.xlu0 %v9898_v12, %s8476_s28 }
 0x748   :  { %2003 = vrot.lane.b32.xlu1 %v9896_v31, %s8476_s28 }
 0x74b   :  { %2005 = vrot.lane.b32.xlu0 %v9904_v61, %s8476_s28 }
 0x74c   :  { %1981 = vrot.lane.b32.xlu1 %v9898_v12, %s8477_s29 }
 0x74f   :  { %1983 = vrot.lane.b32.xlu0 %v9896_v31, %s8477_s29 }
 0x750   :  { %1985 = vrot.lane.b32.xlu1 %v9904_v61, %s8477_s29 }
 0x753   :  { %1963 = vrot.lane.b32.xlu0 %v9898_v12, %s8478_s30 }
 0x754   :  { %1965 = vrot.lane.b32.xlu1 %v9896_v31, %s8478_s30 }
 0x757   :  { %1967 = vrot.lane.b32.xlu0 %v9904_v61, %s8478_s30 }
 0x758   :  { %1961 = vrot.lane.b32.xlu1 %v8137_v47, %s8478_s30 }
 0x75b   :  { %1943 = vrot.lane.b32.xlu0 %v9898_v12, %s8479_s6 }
 0x75c   :  { %1945 = vrot.lane.b32.xlu1 %v9896_v31, %s8479_s6 }
 0x75f   :  { %1947 = vrot.lane.b32.xlu0 %v9904_v61, %s8479_s6 }
 0x760   :  { %1941 = vrot.lane.b32.xlu1 %v8137_v47, %s8479_s6 }
 0x763   :  { %1923 = vrot.lane.b32.xlu0 %v9898_v12, %s8480_s7 }
 0x764   :  { %1925 = vrot.lane.b32.xlu1 %v9896_v31, %s8480_s7 }
 0x767   :  { %1927 = vrot.lane.b32.xlu0 %v9904_v61, %s8480_s7 }
 0x768   :  { %1921 = vrot.lane.b32.xlu1 %v8137_v47, %s8480_s7 }
 0x76b   :  { %2047 = vrot.lane.b32.xlu0 %v8141_v11, %s8474_s26 }
 0x76c   :  { %2049 = vrot.lane.b32.xlu1 %v8142_v50, %s8474_s26 }
 0x76f   :  { %2061 = vrot.lane.b32.xlu0 %v9898_v12, %s8481_s12 }
 0x770   :  { %2063 = vrot.lane.b32.xlu1 %v9896_v31, %s8481_s12 }
 0x773   :  { %2065 = vrot.lane.b32.xlu0 %v9904_v61, %s8481_s12 }
 0x774   :  { %2027 = vrot.lane.b32.xlu1 %v8141_v11, %s8475_s27 }
 0x777   :  { %2029 = vrot.lane.b32.xlu0 %v8142_v50, %s8475_s27 }
 0x778   :  { %2051 = vrot.lane.b32.xlu1 %v9956_v7, %s8474_s26 }
 0x77b   :  { %2053 = vrot.lane.b32.xlu0 %v8144_v43, %s8474_s26 }
 0x77c   :  { %2007 = vrot.lane.b32.xlu1 %v8141_v11, %s8476_s28 }
 0x77f   :  { %2009 = vrot.lane.b32.xlu0 %v8142_v50, %s8476_s28 }
 0x780   :  { %2031 = vrot.lane.b32.xlu1 %v9956_v7, %s8475_s27 }
 0x783   :  { %2033 = vrot.lane.b32.xlu0 %v8144_v43, %s8475_s27 }
 0x784   :  { %1987 = vrot.lane.b32.xlu1 %v8141_v11, %s8477_s29 }
 0x787   :  { %1989 = vrot.lane.b32.xlu0 %v8142_v50, %s8477_s29 }
 0x788   :  { %2011 = vrot.lane.b32.xlu1 %v9956_v7, %s8476_s28 }
 0x78b   :  { %2013 = vrot.lane.b32.xlu0 %v8144_v43, %s8476_s28 }
 0x78c   :  { %1969 = vrot.lane.b32.xlu1 %v8141_v11, %s8478_s30 }
 0x78f   :  { %1971 = vrot.lane.b32.xlu0 %v8142_v50, %s8478_s30 }
 0x790   :  { %1991 = vrot.lane.b32.xlu1 %v9956_v7, %s8477_s29 }
 0x793   :  { %1949 = vrot.lane.b32.xlu0 %v8141_v11, %s8479_s6 }
 0x794   :  { %1951 = vrot.lane.b32.xlu1 %v8142_v50, %s8479_s6 }
 0x797   :  { %1973 = vrot.lane.b32.xlu0 %v9956_v7, %s8478_s30 }
 0x798   :  { %1929 = vrot.lane.b32.xlu1 %v8141_v11, %s8480_s7 }
 0x79b   :  { %1931 = vrot.lane.b32.xlu0 %v8142_v50, %s8480_s7 }
 0x79c   :  { %1953 = vrot.lane.b32.xlu1 %v9956_v7, %s8479_s6 }
 0x79f   :  { %1933 = vrot.lane.b32.xlu0 %v9956_v7, %s8480_s7 }
 0x7a0   :  { %2069 = vrot.lane.b32.xlu1 %v8142_v50, %s8481_s12 }
 0x7a3   :  { %2067 = vrot.lane.b32.xlu0 %v8141_v11, %s8481_s12 }
 0x7a4   :  { %2071 = vrot.lane.b32.xlu1 %v9956_v7, %s8481_s12 }
 0x7a7   :  { %2073 = vrot.lane.b32.xlu0 %v8144_v43, %s8481_s12 }
 0x7a8   :  { %2097 = vrot.lane.b32.xlu1 %v9896_v31, %s8482_s0 }
 0x7ab   :  { %2095 = vrot.lane.b32.xlu0 %v9898_v12, %s8482_s0 }
 0x7ac   :  { %2101 = vrot.lane.b32.xlu1 %v8141_v11, %s8482_s0 }
 0x7ad   :  { %v2042_v19 = vpop.permute.xlu0 %2041 }
 0x7ae   :  { %v9996_v41 = vpop.permute.xlu1 %2043 }
 0x7af   :  { %2093 = vrot.lane.b32.xlu0 %v8137_v47, %s8482_s0  ;;  %v2055_v34 = vsel %vm207_vm0, %v2042_v19, %v9996_v41 }
 0x7b0   :  { %2191 = vrot.lane.b32.xlu1 %v2042_v19, %s8482_s0 }
 0x7b1   :  { %v10000_v32 = vpop.permute.xlu0 %2045 }
 0x7b2   :  { %v2022_v28 = vpop.permute.xlu1 %2021 }
 0x7b3   :  { %2099 = vrot.lane.b32.xlu0 %v9904_v61, %s8482_s0 }
 0x7b5   :  { %v10006_v60 = vpop.permute.xlu0 %2023 }
 0x7b6   :  { %v10004_v35 = vpop.permute.xlu1 %2025  ;;  %v2035_v54 = vsel %vm186_vm1, %v2022_v28, %v10006_v60 }
 0x7b7   :  { %2103 = vrot.lane.b32.xlu0 %v8142_v50, %s8482_s0  ;;  %v2036_v26 = vsel %vm186_vm1, %v10006_v60, %v10004_v35 }
 0x7b9   :  { %v10011_v10 = vpop.permute.xlu0 %2001 }
 0x7ba   :  { %v10009_v38 = vpop.permute.xlu1 %2003  ;;  %2163 = vrot.lane.b32.xlu1 %v10011_v10, %s8482_s0 }
 0x7bb   :  { %2177 = vrot.lane.b32.xlu0 %v2022_v28, %s8482_s0 }
 0x7bd   :  { %v2006_v13 = vpop.permute.xlu0 %2005 }
 0x7be   :  { %v1982_v63 = vpop.permute.xlu1 %1981  ;;  %v2016_v36 = vsel %vm165_vm2, %v10009_v38, %v2006_v13 }
 0x7bf   :  { %2149 = vrot.lane.b32.xlu0 %v1982_v63, %s8482_s0 }
 0x7c1   :  { %v10019_v5 = vpop.permute.xlu0 %1983 }
 0x7c2   :  { %v10017_v9 = vpop.permute.xlu1 %1985  ;;  %v1993_v2 = vsel %vm142_vm3, %v1982_v63, %v10019_v5 }
 0x7c3   :  { %2193 = vrot.lane.b32.xlu0 %v2055_v34, %s8482_s0 }
 0x7c5   :  { %v10026_v24 = vpop.permute.xlu0 %1963 }
 0x7c6   :  { %v10024_v55 = vpop.permute.xlu1 %1965 }
 0x7c7   :  { %2179 = vrot.lane.b32.xlu0 %v2035_v54, %s8482_s0  ;;  %v1976_v60 = vsel %vm123_vm4, %v10026_v24, %v10024_v55 }
 0x7c9   :  { %v1968_v33 = vpop.permute.xlu0 %1967 }
 0x7ca   :  { %v10031_v62 = vpop.permute.xlu1 %1961  ;;  %v1977_v12 = vsel %vm123_vm4, %v10024_v55, %v1968_v33 }
 0x7cb   :  { %2167 = vrot.lane.b32.xlu0 %v2016_v36, %s8482_s0 }
 0x7cd   :  { %v1944_v16 = vpop.permute.xlu0 %1943 }
 0x7ce   :  { %v10036_v39 = vpop.permute.xlu1 %1945 }
 0x7cf   :  { %2151 = vrot.lane.b32.xlu0 %v1993_v2, %s8482_s0  ;;  %v1956_v57 = vsel %vm102_vm5, %v1944_v16, %v10036_v39 }
 0x7d1   :  { %v10041_v1 = vpop.permute.xlu0 %1947 }
 0x7d2   :  { %v1942_v31 = vpop.permute.xlu1 %1941 }
 0x7d3   :  { %2139 = vrot.lane.b32.xlu0 %v1977_v12, %s8482_s0  ;;  %v1955_v50 = vsel %vm102_vm5, %v1942_v31, %v1944_v16 }
 0x7d5   :  { %v10046_v61 = vpop.permute.xlu0 %1923 }
 0x7d6   :  { %v10048_v47 = vpop.permute.xlu1 %1925 }
 0x7d7   :  { %2123 = vrot.lane.b32.xlu0 %v1956_v57, %s8482_s0  ;;  %v1936_v55 = vsel %vm81_vm6, %v10046_v61, %v10048_v47 }
 0x7d9   :  { %v10053_v4 = vpop.permute.xlu0 %1927 }
 0x7da   :  { %v10055_v11 = vpop.permute.xlu1 %1921  ;;  %v1937_v43 = vsel %vm81_vm6, %v10048_v47, %v10053_v4 }
 0x7db   :  { %2121 = vrot.lane.b32.xlu0 %v1955_v50, %s8482_s0 }
 0x7dd   :  { %v10059_v17 = vpop.permute.xlu0 %2047 }
 0x7de   :  { %v2050_v44 = vpop.permute.xlu1 %2049 }
 0x7df   :  { %2111 = vrot.lane.b32.xlu0 %v1937_v43, %s8482_s0  ;;  %v2058_v63 = vsel %vm207_vm0, %v10059_v17, %v2050_v44 }
 0x7e1   :  { %v10065_v19 = vpop.permute.xlu0 %2061 }
 0x7e2   :  { %v10067_v28 = vpop.permute.xlu1 %2063  ;;  %2205 = vrot.lane.b32.xlu1 %v10065_v19, %s8482_s0 }
 0x7e3   :  { %2199 = vrot.lane.b32.xlu0 %v2058_v63, %s8482_s0 }
 0x7e5   :  { %v10074_v34 = vpop.permute.xlu0 %2065 }
 0x7e6   :  { %v10076_v54 = vpop.permute.xlu1 %2027  ;;  %v2076_v36 = vsel %vm228_vm7, %v10067_v28, %v10074_v34 }
 0x7e7   :  { %2209 = vrot.lane.b32.xlu0 %v2076_v36, %s8482_s0  ;;  %v2037_v31 = vsel %vm186_vm1, %v10004_v35, %v10076_v54 }
 0x7e9   :  { %v10082_v16 = vpop.permute.xlu0 %2029 }
 0x7ea   :  { %v10084_v2 = vpop.permute.xlu1 %2051 }
 0x7eb   :  { %2183 = vrot.lane.b32.xlu0 %v2037_v31, %s8482_s0  ;;  %v2059_v50 = vsel %vm207_vm0, %v2050_v44, %v10084_v2 }
 0x7ed   :  { %v10090_v12 = vpop.permute.xlu0 %2053 }
 0x7ee   :  { %v10092_v57 = vpop.permute.xlu1 %2007 }
 0x7ef   :  { %2201 = vrot.lane.b32.xlu0 %v2059_v50, %s8482_s0  ;;  %v2017_v36 = vsel %vm165_vm2, %v2006_v13, %v10092_v57 }
 0x7f1   :  { %v10097_v43 = vpop.permute.xlu0 %2009 }
 0x7f2   :  { %v10099_v63 = vpop.permute.xlu1 %2031 }
 0x7f3   :  { %2169 = vrot.lane.b32.xlu0 %v2017_v36, %s8482_s0  ;;  %v2039_v0 = vsel %vm186_vm1, %v10082_v16, %v10099_v63 }
 0x7f5   :  { %v10104_v40 = vpop.permute.xlu0 %2033 }
 0x7f6   :  { %v10106_v31 = vpop.permute.xlu1 %1987 }
 0x7f7   :  { %2187 = vrot.lane.b32.xlu0 %v2039_v0, %s8482_s0  ;;  %v1995_v13 = vsel %vm142_vm3, %v10017_v9, %v10106_v31 }
 0x7f9   :  { %v10112_v44 = vpop.permute.xlu0 %1989 }
 0x7fa   :  { %v10114_v50 = vpop.permute.xlu1 %2011 }
 0x7fb   :  { %2155 = vrot.lane.b32.xlu0 %v1995_v13, %s8482_s0  ;;  %v2019_v30 = vsel %vm165_vm2, %v10097_v43, %v10114_v50 }
 0x7fd   :  { %v10120_v36 = vpop.permute.xlu0 %2013 }
 0x7fe   :  { %v10122_v21 = vpop.permute.xlu1 %1969 }
 0x7ff   :  { %2173 = vrot.lane.b32.xlu0 %v2019_v30, %s8482_s0  ;;  %v1978_v46 = vsel %vm123_vm4, %v1968_v33, %v10122_v21 }
 0x801   :  { %v10128_v0 = vpop.permute.xlu0 %1971 }
 0x802   :  { %v1992_v42 = vpop.permute.xlu1 %1991 }
 0x803   :  { %2161 = vrot.lane.b32.xlu1 %v1992_v42, %s8482_s0  ;;  %2141 = vrot.lane.b32.xlu0 %v1978_v46, %s8482_s0  ;;  %v1997_v37 = vsel %vm142_vm3, %v10112_v44, %v1992_v42 }
 0x805   :  { %v10134_v13 = vpop.permute.xlu0 %1949 }
 0x806   :  { %v10136_v59 = vpop.permute.xlu1 %1951  ;;  %v1958_v33 = vsel %vm102_vm5, %v10041_v1, %v10134_v13 }
 0x807   :  { %2159 = vrot.lane.b32.xlu0 %v1997_v37, %s8482_s0 }
 0x809   :  { %v1974_v30 = vpop.permute.xlu0 %1973 }
 0x80a   :  { %v10141_v49 = vpop.permute.xlu1 %1929  ;;  %2147 = vrot.lane.b32.xlu1 %v1974_v30, %s8482_s0  ;;  %v1980_v42 = vsel %vm123_vm4, %v10128_v0, %v1974_v30 }
 0x80b   :  { %2127 = vrot.lane.b32.xlu0 %v1958_v33, %s8482_s0  ;;  %v1938_v8 = vsel %vm81_vm6, %v10053_v4, %v10141_v49  ;;  %v2056_v33 = vsel %vm207_vm0, %v9996_v41, %v10000_v32 }
 0x80d   :  { %v10148_v46 = vpop.permute.xlu0 %1931 }
 0x80e   :  { %v1954_v15 = vpop.permute.xlu1 %1953 }
 0x80f   :  { %2133 = vrot.lane.b32.xlu1 %v1954_v15, %s8482_s0  ;;  %2145 = vrot.lane.b32.xlu0 %v1980_v42, %s8482_s0  ;;  %v1960_v30 = vsel %vm102_vm5, %v10136_v59, %v1954_v15  ;;  %v2015_v15 = vsel %vm165_vm2, %v10011_v10, %v10009_v38  ;;  %v1975_v10 = vsel %vm123_vm4, %v10031_v62, %v10026_v24 }
 0x810   :  { %v1935_v24 = vsel %vm81_vm6, %v10055_v11, %v10046_v61  ;;  %v2075_v61 = vsel %vm228_vm7, %v10065_v19, %v10067_v28  ;;  %v2018_v19 = vsel %vm165_vm2, %v10092_v57, %v10097_v43 }
 0x811   :  { %v1934_v37 = vpop.permute.xlu0 %1933 }
 0x812   :  { %v10166_v42 = vpop.permute.xlu1 %2069 }
 0x813   :  { %2119 = vrot.lane.b32.xlu1 %v1934_v37, %s8482_s0  ;;  %2113 = vrot.lane.b32.xlu0 %v1938_v8, %s8482_s0  ;;  %v1940_v8 = vsel %vm81_vm6, %v10148_v46, %v1934_v37 }
 0x815   :  { %v2068_v4 = vpop.permute.xlu0 %2067 }
 0x816   :  { %v2077_v41 = vsel %vm228_vm7, %v10074_v34, %v2068_v4 }
 0x817   :  { %2195 = vrot.lane.b32.xlu1 %v2056_v33, %s8482_s0  ;;  %2131 = vrot.lane.b32.xlu0 %v1960_v30, %s8482_s0  ;;  %v2072_v33 = vpop.permute.xlu1 %2071 }
 0x818   :  { %v2079_v35 = vsel %vm228_vm7, %v10166_v42, %v2072_v33 }
 0x819   :  { %v2074_v38 = vpop.permute.xlu0 %2073 }
 0x81b   :  { %2181 = vrot.lane.b32.xlu1 %v2036_v26, %s8482_s0  ;;  %2117 = vrot.lane.b32.xlu0 %v1940_v8, %s8482_s0  ;;  %v1994_v26 = vsel %vm142_vm3, %v10019_v5, %v10017_v9  ;;  %v1957_v5 = vsel %vm102_vm5, %v10036_v39, %v10041_v1  ;;  %v10218_v39 = vld [vmem:[%s15063_s1 + $0x34] ss:$8 sps:$4 sm:$0xff]   ;;  %v2057_v1 = vsel %vm207_vm0, %v10000_v32, %v10059_v17 }
 0x81c   :  { %8149 = vmatprep.mubr.msk.bf16.mxu1 %vm481_vm8, %v10218_v39  ;;  %8150 = vmatprep.mubr.msk.bf16.mxu0 %vm481_vm8, %v10218_v39  ;;  %v2038_v32 = vsel %vm186_vm1, %v10076_v54, %v10082_v16  ;;  %v2060_v17 = vsel %vm207_vm0, %v10084_v2, %v10090_v12  ;;  %v2040_v54 = vsel %vm186_vm1, %v10099_v63, %v10104_v40 }
 0x81d   :  { %v10197_v9 = vpop.permute.xlu0 %2095  ;;  %v1996_v2 = vsel %vm142_vm3, %v10106_v31, %v10112_v44  ;;  %v2020_v12 = vsel %vm165_vm2, %v10114_v50, %v10120_v36  ;;  %v1979_v40 = vsel %vm123_vm4, %v10122_v21, %v10128_v0  ;;  %v1959_v63 = vsel %vm102_vm5, %v10134_v13, %v10136_v59  ;;  %v10268_v31 = vpop.permute.xlu1 %2097 }
 0x81e   :  { %v1939_v44 = vsel %vm81_vm6, %v10141_v49, %v10148_v46  ;;  %v2078_v59 = vsel %vm228_vm7, %v2068_v4, %v10166_v42  ;;  %v2080_v13 = vsel %vm228_vm7, %v2072_v33, %v2074_v38 }
 0x81f   :  { %2165 = vrot.lane.b32.xlu1 %v2015_v15, %s8482_s0  ;;  %2211 = vrot.lane.b32.xlu0 %v2077_v41, %s8482_s0 }
 0x821   :  { %v10206_v34 = vpop.permute.xlu0 %2093  ;;  %v10274_v21 = vpop.permute.xlu1 %2101 }
 0x823   :  { %2153 = vrot.lane.b32.xlu1 %v1994_v26, %s8482_s0  ;;  %2215 = vrot.lane.b32.xlu0 %v2079_v35, %s8482_s0 }
 0x825   :  { %v10213_v62 = vpop.permute.xlu0 %2099  ;;  %v2192_v0 = vpop.permute.xlu1 %2191 }
 0x827   :  { %2137 = vrot.lane.b32.xlu1 %v1976_v60, %s8482_s0 }
 0x829   :  { %v10231_v47 = vpop.permute.xlu0 %2103 }
 0x82b   :  { %2135 = vrot.lane.b32.xlu1 %v1975_v10, %s8482_s0 }
 0x82c   :  { %v2164_v49 = vpop.permute.xlu1 %2163 }
 0x82d   :  { %v2178_v11 = vpop.permute.xlu0 %2177 }
 0x82f   :  { %2125 = vrot.lane.b32.xlu1 %v1957_v5, %s8482_s0 }
 0x831   :  { %v2150_v28 = vpop.permute.xlu0 %2149 }
 0x833   :  { %2109 = vrot.lane.b32.xlu1 %v1936_v55, %s8482_s0 }
 0x835   :  { %v2194_v16 = vpop.permute.xlu0 %2193 }
 0x836   :  { %v2261_v60 = vsel %vm372_vm9, %v2192_v0, %v2194_v16 }
 0x837   :  { %2107 = vrot.lane.b32.xlu1 %v1935_v24, %s8482_s0 }
 0x839   :  { %v2180_v57 = vpop.permute.xlu0 %2179 }
 0x83a   :  { %v2255_v55 = vsel %vm372_vm9, %v2178_v11, %v2180_v57 }
 0x83b   :  { %2197 = vrot.lane.b32.xlu1 %v2057_v1, %s8482_s0 }
 0x83d   :  { %v10262_v43 = vpop.permute.xlu0 %2167 }
 0x83f   :  { %2207 = vrot.lane.b32.xlu1 %v2075_v61, %s8482_s0 }
 0x841   :  { %v2152_v50 = vpop.permute.xlu0 %2151 }
 0x843   :  { %2185 = vrot.lane.b32.xlu1 %v2038_v32, %s8482_s0 }
 0x845   :  { %v10278_v36 = vpop.permute.xlu0 %2139 }
 0x847   :  { %2203 = vrot.lane.b32.xlu1 %v2060_v17, %s8482_s0 }
 0x849   :  { %v2124_v37 = vpop.permute.xlu0 %2123 }
 0x84b   :  { %2171 = vrot.lane.b32.xlu1 %v2018_v19, %s8482_s0 }
 0x84d   :  { %v2122_v46 = vpop.permute.xlu0 %2121 }
 0x84f   :  { %2189 = vrot.lane.b32.xlu1 %v2040_v54, %s8482_s0  ;;  %v2243_v54 = vsel %vm372_vm9, %v2150_v28, %v2152_v50 }
 0x853   :  { %2157 = vrot.lane.b32.xlu1 %v1996_v2, %s8482_s0 }
 0x854   :  { %v10285_v30 = vpop.permute.xlu1 %2205 }
 0x857   :  { %2175 = vrot.lane.b32.xlu1 %v2020_v12, %s8482_s0 }
 0x85b   :  { %2143 = vrot.lane.b32.xlu1 %v1979_v40, %s8482_s0 }
 0x85f   :  { %2129 = vrot.lane.b32.xlu1 %v1959_v63, %s8482_s0 }
 0x863   :  { %2115 = vrot.lane.b32.xlu1 %v1939_v44, %s8482_s0 }
 0x867   :  { %2105 = vrot.lane.b32.xlu1 %v9956_v7, %s8482_s0  ;;  %v10289_v7 = vpop.permute.xlu0 %2111 }
 0x86b   :  { %2213 = vrot.lane.b32.xlu1 %v2078_v59, %s8482_s0  ;;  %v10293_v41 = vpop.permute.xlu0 %2199  ;;  %v2231_v59 = vsel %vm372_vm9, %v2122_v46, %v2124_v37 }
 0x86f   :  { %2217 = vrot.lane.b32.xlu1 %v2080_v13, %s8482_s0  ;;  %v10299_v33 = vpop.permute.xlu0 %2209 }
 0x873   :  { %v2184_v38 = vpop.permute.xlu0 %2183 }
 0x875   :  { %v10287_v8 = vpop.permute.xlu1 %2161 }
 0x877   :  { %v2202_v32 = vpop.permute.xlu0 %2201 }
 0x87b   :  { %v2170_v11 = vpop.permute.xlu0 %2169 }
 0x87c   :  { %v10291_v15 = vpop.permute.xlu1 %2147 }
 0x87f   :  { %v2188_v40 = vpop.permute.xlu0 %2187 }
 0x881   :  { %v10295_v42 = vpop.permute.xlu1 %2133 }
 0x883   :  { %v2156_v28 = vpop.permute.xlu0 %2155 }
 0x885   :  { %v10297_v4 = vpop.permute.xlu1 %2119 }
 0x889   :  { %v2196_v26 = vpop.permute.xlu1 %2195 }
 0x88a   :  { %v2262_v35 = vsel %vm372_vm9, %v2194_v16, %v2196_v26 }
 0x88b   :  { %2330 = vmatprep.subr.bf16.mxu1 %v2262_v35  ;;  %v2174_v35 = vpop.permute.xlu0 %2173 }
 0x88c   :  { %2331 = vmatpush1.bf16.msra.mxu1 %v2261_v60  ;;  %v2220_v60 = vsel %vm372_vm9, %v10197_v9, %v10268_v31 }
 0x88d   :  { %v2182_v10 = vpop.permute.xlu1 %2181 }
 0x88e   :  { %v2256_v5 = vsel %vm372_vm9, %v2180_v57, %v2182_v10 }
 0x88f   :  { %2332 = vmatprep.subr.bf16.mxu1 %v2256_v5 }
 0x890   :  { %2333 = vmatpush1.bf16.msra.mxu1 %v2255_v55 }
 0x891   :  { %v2166_v24 = vpop.permute.xlu1 %2165 }
 0x892   :  { %v2250_v1 = vsel %vm372_vm9, %v2166_v24, %v10262_v43  ;;  %v2249_v61 = vsel %vm372_vm9, %v2164_v49, %v2166_v24  ;;  %v2142_v24 = vpop.permute.xlu0 %2141 }
 0x893   :  { %2334 = vmatprep.subr.bf16.mxu1 %v2250_v1 }
 0x894   :  { %2335 = vmatpush1.bf16.msra.mxu1 %v2249_v61 }
 0x895   :  { %v10308_v17 = vpop.permute.xlu1 %2153 }
 0x896   :  { %v2244_v19 = vsel %vm372_vm9, %v2152_v50, %v10308_v17 }
 0x897   :  { %2336 = vmatprep.subr.bf16.mxu1 %v2244_v19 }
 0x898   :  { %2337 = vmatpush1.bf16.msra.mxu1 %v2243_v54  ;;  %v2160_v54 = vpop.permute.xlu0 %2159 }
 0x899   :  { %v2138_v16 = vpop.permute.xlu1 %2137 }
 0x89a   :  { %v2238_v2 = vsel %vm372_vm9, %v2138_v16, %v10278_v36 }
 0x89b   :  { %2338 = vmatprep.subr.bf16.mxu1 %v2238_v2 }
 0x89d   :  { %v2136_v12 = vpop.permute.xlu1 %2135 }
 0x89e   :  { %v2237_v57 = vsel %vm372_vm9, %v2136_v12, %v2138_v16  ;;  %v2257_v16 = vsel %vm372_vm9, %v2182_v10, %v2184_v38  ;;  %v2265_v12 = vsel %vm372_vm9, %v10293_v41, %v2202_v32 }
 0x89f   :  { %2339 = vmatpush1.bf16.msra.mxu1 %v2237_v57  ;;  %v2128_v57 = vpop.permute.xlu0 %2127 }
 0x8a1   :  { %v10316_v63 = vpop.permute.xlu1 %2125 }
 0x8a2   :  { %v2232_v44 = vsel %vm372_vm9, %v2124_v37, %v10316_v63  ;;  %v2219_v37 = vsel %vm372_vm9, %v10206_v34, %v10197_v9  ;;  %v10340_v9 = vld [vmem:[%s15063_s1 + $0x30] ss:$8 sps:$4 sm:$0xff]  }
 0x8a3   :  { %2340 = vmatprep.subr.bf16.mxu1 %v2232_v44 }
 0x8a4   :  { %2341 = vmatpush1.bf16.msra.mxu1 %v2231_v59 }
 0x8a5   :  { %v2110_v50 = vpop.permute.xlu1 %2109 }
 0x8a6   :  { %v2226_v0 = vsel %vm372_vm9, %v2110_v50, %v10289_v7 }
 0x8a7   :  { %2342 = vmatprep.subr.bf16.mxu1 %v2226_v0 }
 0x8a9   :  { %v2108_v13 = vpop.permute.xlu1 %2107 }
 0x8aa   :  { %v2225_v49 = vsel %vm372_vm9, %v2108_v13, %v2110_v50  ;;  %v2146_v50 = vpop.permute.xlu0 %2145 }
 0x8ab   :  { %2343 = vmatpush1.bf16.msra.mxu1 %v2225_v49 }
 0x8ac   :  { %2344 = vmatprep.subr.bf16.mxu1 %v2220_v60 }
 0x8ad   :  { %v2198_v5 = vpop.permute.xlu1 %2197 }
 0x8ae   :  { %v2264_v46 = vsel %vm372_vm9, %v2198_v5, %v10293_v41  ;;  %v2263_v55 = vsel %vm372_vm9, %v2196_v26, %v2198_v5  ;;  %v2114_v49 = vpop.permute.xlu0 %2113 }
 0x8af   :  { %2345 = vmatpush1.bf16.msra.mxu1 %v2219_v37  ;;  %2373 = vmatprep.subr.bf16.mxu0 %v2264_v46 }
 0x8b0   :  { %2374 = vmatpush1.bf16.msra.mxu0 %v2263_v55 }
 0x8b1   :  { %v2208_v1 = vpop.permute.xlu1 %2207 }
 0x8b2   :  { %v2268_v61 = vsel %vm372_vm9, %v2208_v1, %v10299_v33  ;;  %v2267_v19 = vsel %vm372_vm9, %v10285_v30, %v2208_v1  ;;  %v2132_v46 = vpop.permute.xlu0 %2131  ;;  %v2233_v1 = vsel %vm372_vm9, %v10316_v63, %v2128_v57  ;;  %v2222_v63 = vsel %vm372_vm9, %v10213_v62, %v10274_v21 }
 0x8b3   :  { %2360 = vmatprep.subr.bf16.mxu1 %v2268_v61 }
 0x8b4   :  { %2361 = vmatpush2.bf16.msra.mxu1 %v2267_v19 }
 0x8b5   :  { %v2186_v34 = vpop.permute.xlu1 %2185 }
 0x8b6   :  { %v2258_v26 = vsel %vm372_vm9, %v2184_v38, %v2186_v34  ;;  %v2251_v38 = vsel %vm372_vm9, %v10262_v43, %v2170_v11  ;;  %v2259_v0 = vsel %vm372_vm9, %v2186_v34, %v2188_v40  ;;  %v2227_v34 = vsel %vm372_vm9, %v10289_v7, %v2114_v49 }
 0x8b7   :  { %2375 = vmatprep.subr.bf16.mxu0 %v2258_v26  ;;  %2363 = vmatmul.mubr.bf16.vlgmr.msra.gmra.mxu1 %v10340_v9 }
 0x8b8   :  { %2376 = vmatpush1.bf16.msra.mxu0 %v2257_v16  ;;  %8151 = vmatprep.mubr.msk.bf16.mxu1 %vm481_vm8, %v10218_v39 }
 0x8b9   :  { %v2204_v30 = vpop.permute.xlu1 %2203 }
 0x8ba   :  { %v2266_v2 = vsel %vm372_vm9, %v2202_v32, %v2204_v30  ;;  %v2245_v32 = vsel %vm372_vm9, %v10308_v17, %v2156_v28  ;;  %v2239_v17 = vsel %vm372_vm9, %v10278_v36, %v2142_v24  ;;  %v2236_v36 = vsel %vm372_vm9, %v2132_v46, %v10295_v42 }
 0x8bb   :  { %2416 = vmatprep.subr.bf16.mxu1 %v2266_v2  ;;  %v2221_v30 = vsel %vm372_vm9, %v10268_v31, %v10213_v62 }
 0x8bc   :  { %2417 = vmatpush1.bf16.msra.mxu1 %v2265_v12 }
 0x8bd   :  { %v2172_v44 = vpop.permute.xlu1 %2171 }
 0x8be   :  { %v2252_v59 = vsel %vm372_vm9, %v2170_v11, %v2172_v44  ;;  %v2253_v11 = vsel %vm372_vm9, %v2172_v44, %v2174_v35  ;;  %v2223_v44 = vsel %vm372_vm9, %v10274_v21, %v10231_v47 }
 0x8bf   :  { %2377 = vmatprep.subr.bf16.mxu0 %v2252_v59 }
 0x8c0   :  { %2378 = vmatpush1.bf16.msra.mxu0 %v2251_v38 }
 0x8c1   :  { %v2190_v10 = vpop.permute.xlu1 %2189 }
 0x8c2   :  { %v2260_v39 = vsel %vm372_vm9, %v2188_v40, %v2190_v10  ;;  %v2248_v40 = vsel %vm372_vm9, %v2160_v54, %v10287_v8 }
 0x8c3   :  { %2418 = vmatprep.subr.bf16.mxu1 %v2260_v39 }
 0x8c4   :  { %2419 = vmatpush1.bf16.msra.mxu1 %v2259_v0 }
 0x8c5   :  { %v2158_v13 = vpop.permute.xlu1 %2157 }
 0x8c6   :  { %v2246_v41 = vsel %vm372_vm9, %v2156_v28, %v2158_v13  ;;  %v2247_v28 = vsel %vm372_vm9, %v2158_v13, %v2160_v54 }
 0x8c7   :  { %2379 = vmatprep.subr.bf16.mxu0 %v2246_v41 }
 0x8c8   :  { %2380 = vmatpush1.bf16.msra.mxu0 %v2245_v32 }
 0x8c9   :  { %v2176_v60 = vpop.permute.xlu1 %2175 }
 0x8ca   :  { %v2254_v43 = vsel %vm372_vm9, %v2174_v35, %v2176_v60  ;;  %v2242_v35 = vsel %vm372_vm9, %v2146_v50, %v10291_v15 }
 0x8cb   :  { %2420 = vmatprep.subr.bf16.mxu1 %v2254_v43 }
 0x8cc   :  { %2421 = vmatpush1.bf16.msra.mxu1 %v2253_v11 }
 0x8cd   :  { %2422 = vmatprep.subr.bf16.mxu1 %v2248_v40  ;;  %v2144_v5 = vpop.permute.xlu1 %2143 }
 0x8ce   :  { %v2240_v37 = vsel %vm372_vm9, %v2142_v24, %v2144_v5  ;;  %v2241_v61 = vsel %vm372_vm9, %v2144_v5, %v2146_v50  ;;  %v2118_v24 = vpop.permute.xlu0 %2117 }
 0x8cf   :  { %2381 = vmatprep.subr.bf16.mxu0 %v2240_v37  ;;  %v2230_v42 = vsel %vm372_vm9, %v2118_v24, %v10297_v4 }
 0x8d0   :  { %2382 = vmatpush1.bf16.msra.mxu0 %v2239_v17  ;;  %2423 = vmatpush1.bf16.msra.mxu1 %v2247_v28 }
 0x8d1   :  { %2424 = vmatprep.subr.bf16.mxu1 %v2242_v35  ;;  %v2130_v55 = vpop.permute.xlu1 %2129 }
 0x8d2   :  { %v2234_v8 = vsel %vm372_vm9, %v2128_v57, %v2130_v55  ;;  %v2235_v26 = vsel %vm372_vm9, %v2130_v55, %v2132_v46  ;;  %v2212_v16 = vpop.permute.xlu0 %2211 }
 0x8d3   :  { %2383 = vmatprep.subr.bf16.mxu0 %v2234_v8  ;;  %v2269_v4 = vsel %vm372_vm9, %v10299_v33, %v2212_v16 }
 0x8d4   :  { %2384 = vmatpush1.bf16.msra.mxu0 %v2233_v1  ;;  %2425 = vmatpush1.bf16.msra.mxu1 %v2241_v61 }
 0x8d5   :  { %2426 = vmatprep.subr.bf16.mxu1 %v2236_v36  ;;  %v2116_v19 = vpop.permute.xlu1 %2115 }
 0x8d6   :  { %v2228_v15 = vsel %vm372_vm9, %v2114_v49, %v2116_v19  ;;  %v2229_v7 = vsel %vm372_vm9, %v2116_v19, %v2118_v24  ;;  %v2216_v62 = vpop.permute.xlu0 %2215 }
 0x8d7   :  { %2385 = vmatprep.subr.bf16.mxu0 %v2228_v15 }
 0x8d8   :  { %2386 = vmatpush1.bf16.msra.mxu0 %v2227_v34  ;;  %2427 = vmatpush1.bf16.msra.mxu1 %v2235_v26 }
 0x8d9   :  { %2387 = vmatprep.subr.bf16.mxu0 %v2222_v63  ;;  %2428 = vmatprep.subr.bf16.mxu1 %v2230_v42  ;;  %v2106_v54 = vpop.permute.xlu1 %2105 }
 0x8da   :  { %v2224_v2 = vsel %vm372_vm9, %v10231_v47, %v2106_v54 }
 0x8dc   :  { %2388 = vmatpush1.bf16.msra.mxu0 %v2221_v30  ;;  %2429 = vmatpush1.bf16.msra.mxu1 %v2229_v7 }
 0x8dd   :  { %2430 = vmatprep.subr.bf16.mxu1 %v2224_v2  ;;  %v2214_v12 = vpop.permute.xlu1 %2213 }
 0x8de   :  { %v2270_v57 = vsel %vm372_vm9, %v2212_v16, %v2214_v12  ;;  %v2271_v38 = vsel %vm372_vm9, %v2214_v12, %v2216_v62 }
 0x8df   :  { %2403 = vmatprep.subr.bf16.mxu0 %v2270_v57 }
 0x8e0   :  { %2404 = vmatpush2.bf16.msra.mxu0 %v2269_v4  ;;  %2431 = vmatpush1.bf16.msra.mxu1 %v2223_v44 }
 0x8e1   :  { %v2218_v31 = vpop.permute.xlu1 %2217 }
 0x8e2   :  { %v2272_v59 = vsel %vm372_vm9, %v2216_v62, %v2218_v31 }
 0x8e3   :  { %2406 = vmatmul.mubr.bf16.vlgmr.msra.gmra.mxu0 %v10340_v9  ;;  %2446 = vmatprep.subr.bf16.mxu1 %v2272_v59 }
 0x8e4   :  { %2447 = vmatpush2.bf16.msra.mxu1 %v2271_v38 }
 0x8e7   :  { %2449 = vmatmul.mubr.bf16.vlgmr.msra.gmra.mxu1 %v10340_v9 }
 0x977   :  { %v10399_v10 = vpop.f32.mrf.mxu1 }
 0x978   :  { %v2459_v47 = vmul.f32 %v10399_v10, %v9132_v20 }
 0x979   :  { %v10401_v33 = vpop.f32.mrf.mxu1 }
 0x97a   :  { %v2460_v21 = vmul.f32 %v10401_v33, %v9134_v23  ;;  %v2487_v13 = vmul.f32 %v2459_v47, %v10399_v10 }
 0x97b   :  { %v10403_v39 = vpop.f32.mrf.mxu1 }
 0x97c   :  { %v2465_v0 = vmul.f32 %v10403_v39, %v9132_v20  ;;  %v2488_v41 = vmul.f32 %v2460_v21, %v10401_v33  ;;  %v2471_v49 = vadd.f32 %v2460_v21, %v2459_v47 }
 0x97d   :  { %v10409_v50 = vpop.f32.mrf.mxu1 }
 0x97e   :  { %v2466_v9 = vmul.f32 %v10409_v50, %v9134_v23  ;;  %v2493_v43 = vmul.f32 %v2465_v0, %v10403_v39  ;;  %v2499_v5 = vadd.f32 %v2488_v41, %v2487_v13 }
 0x980   :  { %v2494_v11 = vmul.f32 %v2466_v9, %v10409_v50  ;;  %v2478_v28 = vadd.f32 %v2466_v9, %v2465_v0 }
 0x982   :  { %v2506_v24 = vadd.f32 %v2494_v11, %v2493_v43 }
 0x9a3   :  { %v10417_v32 = vpop.f32.mrf.mxu0 }
 0x9a4   :  { %v2461_v60 = vmul.f32 %v10417_v32, %v9138_v29 }
 0x9a5   :  { %v10423_v40 = vpop.f32.mrf.mxu0 }
 0x9a6   :  { %v2472_v37 = vadd.f32 %v2471_v49, %v2461_v60  ;;  %v2489_v46 = vmul.f32 %v2461_v60, %v10417_v32  ;;  %v2462_v17 = vmul.f32 %v10423_v40, %v9152_v45 }
 0x9a7   :  { %v10428_v35 = vpop.f32.mrf.mxu0  ;;  %v10430_v55 = vpop.f32.mrf.mxu1 }
 0x9a8   :  { %v2500_v8 = vadd.f32 %v2499_v5, %v2489_v46  ;;  %v2473_v1 = vadd.f32 %v2472_v37, %v2462_v17  ;;  %v2490_v61 = vmul.f32 %v2462_v17, %v10423_v40  ;;  %v2467_v36 = vmul.f32 %v10428_v35, %v9138_v29 }
 0x9a9   :  { %v2463_v19 = vmul.f32 %v10430_v55, %v9171_v18  ;;  %v10437_v15 = vpop.f32.mrf.mxu0  ;;  %v10439_v34 = vpop.f32.mrf.mxu1 }
 0x9aa   :  { %v2501_v26 = vadd.f32 %v2500_v8, %v2490_v61  ;;  %v2479_v63 = vadd.f32 %v2478_v28, %v2467_v36  ;;  %v2495_v42 = vmul.f32 %v2467_v36, %v10428_v35  ;;  %v2468_v54 = vmul.f32 %v10437_v15, %v9152_v45 }
 0x9ab   :  { %v2474_v16 = vadd.f32 %v2473_v1, %v2463_v19  ;;  %v2491_v30 = vmul.f32 %v2463_v19, %v10430_v55  ;;  %v2464_v7 = vmul.f32 %v10439_v34, %v9177_v3  ;;  %v10447_v2 = vpop.f32.mrf.mxu1 }
 0x9ac   :  { %v2507_v12 = vadd.f32 %v2506_v24, %v2495_v42  ;;  %v2480_v57 = vadd.f32 %v2479_v63, %v2468_v54  ;;  %v2496_v4 = vmul.f32 %v2468_v54, %v10437_v15  ;;  %v2469_v44 = vmul.f32 %v10447_v2, %v9171_v18 }
 0x9ad   :  { %v2502_v62 = vadd.f32 %v2501_v26, %v2491_v30  ;;  %v2492_v31 = vmul.f32 %v2464_v7, %v10439_v34  ;;  %v10453_v59 = vpop.f32.mrf.mxu1  ;;  %v2475_v38 = vadd.f32 %v2474_v16, %v2464_v7  ;;  %v8152_v16 = vld [vmem:[%s15065_s2 + $0x30] sm:$0xff] }
 0x9ae   :  { %v2508_v47 = vadd.f32 %v2507_v12, %v2496_v4  ;;  %v2481_v21 = vadd.f32 %v2480_v57, %v2469_v44  ;;  %v2497_v0 = vmul.f32 %v2469_v44, %v10447_v2  ;;  %v2470_v9 = vmul.f32 %v10453_v59, %v9177_v3  ;;  %v8154_v12 = vld [vmem:[%s15066_s3 + $0x30] sm:$0xff]  ;;  %v8153_v57 = vld [vmem:[%s15065_s2 + $0x38] sm:$0xff] }
 0x9af   :  { %2476 = vadd.xlane.f32.xlu0 %v2475_v38  ;;  %v2503_v60 = vadd.f32 %v2502_v62, %v2492_v31  ;;  %v8155_v38 = vld [vmem:[%s15066_s3 + $0x38] sm:$0xff] }
 0x9b0   :  { %v2482_v13 = vadd.f32 %v2481_v21, %v2470_v9  ;;  %v2509_v41 = vadd.f32 %v2508_v47, %v2497_v0  ;;  %v2498_v49 = vmul.f32 %v2470_v9, %v10453_v59 }
 0x9b2   :  { %2483 = vadd.xlane.f32.xlu1 %v2482_v13  ;;  %v2510_v43 = vadd.f32 %v2509_v41, %v2498_v49 }
 0x9b3   :  { %2504 = vadd.xlane.f32.xlu0 %v2503_v60 }
 0x9b7   :  { %2511 = vadd.xlane.f32.xlu0 %v2510_v43 }
 0xa38   :  { %v2477_v11 = vpop.xlane.xlu0 %2476 }
 0xa39   :  { %v2485_v5 = vmul.f32 0.001953125, %v2477_v11 }
 0xa3b   :  { %v2484_v37 = vpop.xlane.xlu1 %2483  ;;  %v2515_v17 = vmul.f32 %v2485_v5, %v2485_v5 }
 0xa3c   :  { %v2505_v46 = vpop.xlane.xlu0 %2504  ;;  %v2486_v8 = vmul.f32 0.001953125, %v2484_v37 }
 0xa3d   :  { %v2513_v28 = vmul.f32 0.001953125, %v2505_v46 }
 0xa3e   :  { %v2516_v24 = vmul.f32 %v2486_v8, %v2486_v8 }
 0xa3f   :  { %v2517_v1 = vsub.f32 %v2513_v28, %v2515_v17 }
 0xa40   :  { %v2512_v61 = vpop.xlane.xlu0 %2511 }
 0xa41   :  { %v2519_v36 = vmax.f32 %v2517_v1, 0.0  ;;  %v2514_v19 = vmul.f32 0.001953125, %v2512_v61 }
 0xa43   :  { %v2524_v26 = vadd.f32 1e-05, %v2519_v36  ;;  %v2518_v63 = vsub.f32 %v2514_v19, %v2516_v24 }
 0xa45   :  { %8438 = vrsqrt.f32 %v2524_v26  ;;  %v2520_v42 = vmax.f32 %v2518_v63, 0.0 }
 0xa47   :  { %v2525_v54 = vadd.f32 1e-05, %v2520_v42 }
 0xa49   :  { %8440 = vrsqrt.f32 %v2525_v54 }
 0xa52   :  { %v8439_v30 = vpop.eup %8438 }
 0xa53   :  { %v2528_v7 = vmul.f32 %v8439_v30, %v8152_v16 }
 0xa55   :  { %2539 = vperm.xlu1 %8395, %v2528_v7   ;;  %v2533_v4 = vmul.f32 %v2528_v7, %v2485_v5 }
 0xa56   :  { %v8441_v44 = vpop.eup %8440 }
 0xa57   :  { %v2535_v62 = vsub.f32 %v8154_v12, %v2533_v4  ;;  %v2529_v31 = vmul.f32 %v8441_v44, %v8153_v57 }
 0xa59   :  { %2561 = vperm.xlu1 %8395, %v2535_v62   ;;  %2544 = vperm.xlu0 %8396, %v2529_v31   ;;  %v2534_v47 = vmul.f32 %v2529_v31, %v2486_v8 }
 0xa5b   :  { %v2536_v21 = vsub.f32 %v8155_v38, %v2534_v47 }
 0xa5d   :  { %2566 = vperm.xlu1 %8395, %v2536_v21  }
 0xad0   :  { %v2540_v0 = vpop.permute.xlu1 %2539 }
 0xad1   :  { %v2547_v9 = vmul.f32 %v2540_v0, %v10399_v10  ;;  %v2548_v13 = vmul.f32 %v2540_v0, %v10401_v33  ;;  %v2549_v41 = vmul.f32 %v2540_v0, %v10417_v32  ;;  %v2550_v49 = vmul.f32 %v2540_v0, %v10423_v40 }
 0xad2   :  { %v2551_v11 = vmul.f32 %v2540_v0, %v10430_v55  ;;  %v2552_v5 = vmul.f32 %v2540_v0, %v10439_v34 }
 0xad4   :  { %v2545_v60 = vpop.permute.xlu0 %2544  ;;  %v2562_v43 = vpop.permute.xlu1 %2561 }
 0xad5   :  { %v2553_v37 = vmul.f32 %v2545_v60, %v10403_v39  ;;  %v2554_v46 = vmul.f32 %v2545_v60, %v10409_v50  ;;  %v2555_v17 = vmul.f32 %v2545_v60, %v10428_v35  ;;  %v2556_v10 = vmul.f32 %v2545_v60, %v10437_v15 }
 0xad6   :  { %v2569_v28 = vadd.f32 %v2562_v43, %v2547_v9  ;;  %v2570_v33 = vadd.f32 %v2562_v43, %v2548_v13  ;;  %v2571_v8 = vadd.f32 %v2562_v43, %v2549_v41  ;;  %v2572_v32 = vadd.f32 %v2562_v43, %v2550_v49 }
 0xad7   :  { %v2573_v1 = vadd.f32 %v2562_v43, %v2551_v11  ;;  %v2574_v40 = vadd.f32 %v2562_v43, %v2552_v5  ;;  %v2557_v61 = vmul.f32 %v2545_v60, %v10447_v2  ;;  %v2558_v55 = vmul.f32 %v2545_v60, %v10453_v59 }
 0xad8   :  { %v2581_v36 = vmax.f32 %v2569_v28, 0.0  ;;  %v2582_v34 = vmax.f32 %v2570_v33, 0.0  ;;  %v2567_v24 = vpop.permute.xlu1 %2566  ;;  %v2583_v39 = vmax.f32 %v2571_v8, 0.0  ;;  %v2584_v19 = vmax.f32 %v2572_v32, 0.0 }
 0xad9   :  { %v2585_v50 = vmax.f32 %v2573_v1, 0.0  ;;  %v2586_v26 = vmax.f32 %v2574_v40, 0.0  ;;  %v2575_v63 = vadd.f32 %v2567_v24, %v2553_v37  ;;  %v2576_v42 = vadd.f32 %v2567_v24, %v2554_v46 }
 0xada   :  { %v2593_v35 = vmul.f32 %v2581_v36, %v9132_v20  ;;  %v2594_v15 = vmul.f32 %v2582_v34, %v9134_v23  ;;  %v2595_v54 = vmul.f32 %v2583_v39, %v9138_v29  ;;  %v2596_v16 = vmul.f32 %v2584_v19, %v9152_v45 }
 0xadb   :  { %v2597_v2 = vmul.f32 %v2585_v50, %v9171_v18  ;;  %v2598_v59 = vmul.f32 %v2586_v26, %v9177_v3  ;;  %v2577_v12 = vadd.f32 %v2567_v24, %v2555_v17  ;;  %v2578_v57 = vadd.f32 %v2567_v24, %v2556_v10 }
 0xadc   :  { %v10490_v30 = vadd.f32 %v2593_v35, %v9225_v56  ;;  %v10493_v7 = vadd.f32 %v2594_v15, %v9228_v25  ;;  %v10496_v4 = vadd.f32 %v2595_v54, %v9231_v52  ;;  %v10499_v44 = vadd.f32 %v2596_v16, %v9234_v48 }
 0xadd   :  { %v10502_v62 = vadd.f32 %v2597_v2, %v9237_v14  ;;  %v10505_v31 = vadd.f32 %v2598_v59, %v9240_v53  ;;  %v2579_v25 = vadd.f32 %v2567_v24, %v2557_v61  ;;  %v2580_v47 = vadd.f32 %v2567_v24, %v2558_v55  ;;  %v15139_v61 = vld [vmem:[#allocation3_spill] sm:$0xff] }
 0xade   :  { %v15092_v56 = vmax.f32 %v10490_v30, 0.0  ;;  %v15091_v38 = vmax.f32 %v10493_v7, 0.0  ;;  %v15090_v21 = vmax.f32 %v10496_v4, 0.0  ;;  %v15089_v52 = vmax.f32 %v10499_v44, 0.0 }
 0xadf   :  { %v15088_v0 = vmax.f32 %v10502_v62, 0.0  ;;  %v15087_v48 = vmax.f32 %v10505_v31, 0.0  ;;  %v2587_v53 = vmax.f32 %v2575_v63, 0.0  ;;  %v2588_v9 = vmax.f32 %v2576_v42, 0.0 }
 0xae0   :  { %v8343_v14 = vpack.c.bf16 %v15091_v38, %v15092_v56  ;;  %v2589_v13 = vmax.f32 %v2577_v12, 0.0  ;;  %v8344_v41 = vpack.c.bf16 %v15089_v52, %v15090_v21  ;;  %v2590_v60 = vmax.f32 %v2578_v57, 0.0 }
 0xae1   :  { %v8345_v49 = vpack.c.bf16 %v15087_v48, %v15088_v0  ;;  %v2591_v43 = vmax.f32 %v2579_v25, 0.0  ;;  %v2592_v11 = vmax.f32 %v2580_v47, 0.0  ;;  %v2599_v5 = vmul.f32 %v2587_v53, %v9132_v20 }
 0xae2   :  { %2665 = vst [vmem:[#allocation2 + $0x4] sm:$0xff] %v8343_v14  ;;  %v2600_v37 = vmul.f32 %v2588_v9, %v9134_v23  ;;  %v2601_v46 = vmul.f32 %v2589_v13, %v9138_v29  ;;  %2666 = vst [vmem:[#allocation2 + $0xc] sm:$0xff] %v8344_v41  ;;  %v2602_v17 = vmul.f32 %v2590_v60, %v9152_v45 }
 0xae3   :  { %2667 = vst [vmem:[#allocation2 + $0x14] sm:$0xff] %v8345_v49  ;;  %v2603_v10 = vmul.f32 %v2591_v43, %v9171_v18  ;;  %v2604_v28 = vmul.f32 %v2592_v11, %v9177_v3  ;;  %v10532_v33 = vadd.f32 %v2599_v5, %v9249_v22 }
 0xae4   :  { %v10535_v8 = vadd.f32 %v2600_v37, %v9252_v51  ;;  %v10538_v32 = vadd.f32 %v2601_v46, %v9255_v58  ;;  %v10541_v1 = vadd.f32 %v2602_v17, %v9258_v27 }
 0xae5   :  { %v10544_v40 = vadd.f32 %v2603_v10, %v9261_v6  ;;  %v10547_v55 = vadd.f32 %v2604_v28, %v15139_v61  ;;  %v15086_v36 = vmax.f32 %v10532_v33, 0.0 }
 0xae6   :  { %v15085_v22 = vmax.f32 %v10535_v8, 0.0  ;;  %v15084_v34 = vmax.f32 %v10538_v32, 0.0  ;;  %v15083_v51 = vmax.f32 %v10541_v1, 0.0 }
 0xae7   :  { %15140 = vst [vmem:[#allocation3_spill] sm:$0xff] %v10547_v55  ;;  %v15082_v58 = vmax.f32 %v10544_v40, 0.0  ;;  %v15081_v24 = vmax.f32 %v10547_v55, 0.0 }
 0xae8   :  { %v8346_v27 = vpack.c.bf16 %v15085_v22, %v15086_v36  ;;  %v8347_v6 = vpack.c.bf16 %v15083_v51, %v15084_v34 }
 0xae9   :  { %v8348_v39 = vpack.c.bf16 %v15081_v24, %v15082_v58  ;;  %v2671_v19 = vld [vmem:[#allocation2] sm:$0xff]  ;;  %v2672_v26 = vld [vmem:[#allocation2 + $0x8] sm:$0xff] }
 0xaea   :  { %2668 = vst [vmem:[#allocation2 + $0x24] sm:$0xff] %v8346_v27  ;;  %2669 = vst [vmem:[#allocation2 + $0x2c] sm:$0xff] %v8347_v6  ;;  %v2673_v2 = vld [vmem:[#allocation2 + $0x10] sm:$0xff]  ;;  %v2674_v25 = vld [vmem:[#allocation2 + $0x18] sm:$0xff] }
 0xaeb   :  { %2670 = vst [vmem:[#allocation2 + $0x34] sm:$0xff] %v8348_v39 }
 0xaf1   :  { %v2675_v50 = vld [vmem:[#allocation2 + $0x20] sm:$0xff]  ;;  %v2676_v35 = vld [vmem:[#allocation2 + $0x28] sm:$0xff] }
 0xaf2   :  { %v10567_v15 = vcombine.high %v2671_v19, %v2675_v50  ;;  %v10569_v63 = vcombine.low %v2672_v26, %v2676_v35  ;;  %v10575_v42 = vcombine.high %v2672_v26, %v2676_v35  ;;  %v8162_v54 = vcombine.low %v2671_v19, %v2675_v50  ;;  %v2677_v16 = vld [vmem:[#allocation2 + $0x30] sm:$0xff]  ;;  %v2678_v57 = vld [vmem:[#allocation2 + $0x38] sm:$0xff] }
 0xaf3   :  { %v8166_v59 = vcombine.low %v2673_v2, %v2677_v16  ;;  %v8167_v12 = vcombine.high %v2673_v2, %v2677_v16  ;;  %v10627_v47 = vcombine.low %v2674_v25, %v2678_v57  ;;  %v8169_v14 = vcombine.high %v2674_v25, %v2678_v57 }
 0xaf4   :  { %2828 = vrot.lane.b32.xlu0 %v10567_v15, %s8474_s26  ;;  %2830 = vrot.lane.b32.xlu1 %v10569_v63, %s8474_s26 }
 0xaf8   :  { %2832 = vrot.lane.b32.xlu0 %v10575_v42, %s8474_s26  ;;  %2808 = vrot.lane.b32.xlu1 %v10567_v15, %s8475_s27 }
 0xafc   :  { %2810 = vrot.lane.b32.xlu0 %v10569_v63, %s8475_s27  ;;  %2812 = vrot.lane.b32.xlu1 %v10575_v42, %s8475_s27 }
 0xb00   :  { %2788 = vrot.lane.b32.xlu0 %v10567_v15, %s8476_s28  ;;  %2790 = vrot.lane.b32.xlu1 %v10569_v63, %s8476_s28 }
 0xb04   :  { %2792 = vrot.lane.b32.xlu0 %v10575_v42, %s8476_s28  ;;  %2768 = vrot.lane.b32.xlu1 %v10567_v15, %s8477_s29 }
 0xb08   :  { %2770 = vrot.lane.b32.xlu0 %v10569_v63, %s8477_s29  ;;  %2772 = vrot.lane.b32.xlu1 %v10575_v42, %s8477_s29 }
 0xb0c   :  { %2750 = vrot.lane.b32.xlu0 %v10567_v15, %s8478_s30  ;;  %2752 = vrot.lane.b32.xlu1 %v10569_v63, %s8478_s30 }
 0xb10   :  { %2754 = vrot.lane.b32.xlu0 %v10575_v42, %s8478_s30  ;;  %2748 = vrot.lane.b32.xlu1 %v8162_v54, %s8478_s30 }
 0xb14   :  { %2730 = vrot.lane.b32.xlu0 %v10567_v15, %s8479_s6  ;;  %2732 = vrot.lane.b32.xlu1 %v10569_v63, %s8479_s6 }
 0xb18   :  { %2734 = vrot.lane.b32.xlu0 %v10575_v42, %s8479_s6  ;;  %2728 = vrot.lane.b32.xlu1 %v8162_v54, %s8479_s6 }
 0xb1c   :  { %2710 = vrot.lane.b32.xlu0 %v10567_v15, %s8480_s7  ;;  %2712 = vrot.lane.b32.xlu1 %v10569_v63, %s8480_s7 }
 0xb20   :  { %2714 = vrot.lane.b32.xlu0 %v10575_v42, %s8480_s7  ;;  %2708 = vrot.lane.b32.xlu1 %v8162_v54, %s8480_s7 }
 0xb24   :  { %2834 = vrot.lane.b32.xlu0 %v8166_v59, %s8474_s26  ;;  %2836 = vrot.lane.b32.xlu1 %v8167_v12, %s8474_s26 }
 0xb28   :  { %2848 = vrot.lane.b32.xlu0 %v10567_v15, %s8481_s12  ;;  %2850 = vrot.lane.b32.xlu1 %v10569_v63, %s8481_s12 }
 0xb2c   :  { %2852 = vrot.lane.b32.xlu0 %v10575_v42, %s8481_s12  ;;  %2814 = vrot.lane.b32.xlu1 %v8166_v59, %s8475_s27 }
 0xb30   :  { %2816 = vrot.lane.b32.xlu0 %v8167_v12, %s8475_s27  ;;  %2838 = vrot.lane.b32.xlu1 %v10627_v47, %s8474_s26 }
 0xb34   :  { %2840 = vrot.lane.b32.xlu0 %v8169_v14, %s8474_s26  ;;  %2794 = vrot.lane.b32.xlu1 %v8166_v59, %s8476_s28 }
 0xb38   :  { %2796 = vrot.lane.b32.xlu0 %v8167_v12, %s8476_s28  ;;  %2818 = vrot.lane.b32.xlu1 %v10627_v47, %s8475_s27 }
 0xb3c   :  { %2820 = vrot.lane.b32.xlu0 %v8169_v14, %s8475_s27  ;;  %2774 = vrot.lane.b32.xlu1 %v8166_v59, %s8477_s29 }
 0xb40   :  { %2776 = vrot.lane.b32.xlu0 %v8167_v12, %s8477_s29  ;;  %2798 = vrot.lane.b32.xlu1 %v10627_v47, %s8476_s28 }
 0xb44   :  { %2800 = vrot.lane.b32.xlu0 %v8169_v14, %s8476_s28  ;;  %2756 = vrot.lane.b32.xlu1 %v8166_v59, %s8478_s30 }
 0xb48   :  { %2758 = vrot.lane.b32.xlu0 %v8167_v12, %s8478_s30  ;;  %2778 = vrot.lane.b32.xlu1 %v10627_v47, %s8477_s29 }
 0xb4c   :  { %2736 = vrot.lane.b32.xlu0 %v8166_v59, %s8479_s6  ;;  %2738 = vrot.lane.b32.xlu1 %v8167_v12, %s8479_s6 }
 0xb50   :  { %2760 = vrot.lane.b32.xlu0 %v10627_v47, %s8478_s30  ;;  %2716 = vrot.lane.b32.xlu1 %v8166_v59, %s8480_s7 }
 0xb54   :  { %2718 = vrot.lane.b32.xlu0 %v8167_v12, %s8480_s7  ;;  %2740 = vrot.lane.b32.xlu1 %v10627_v47, %s8479_s6 }
 0xb58   :  { %2720 = vrot.lane.b32.xlu0 %v10627_v47, %s8480_s7  ;;  %2856 = vrot.lane.b32.xlu1 %v8167_v12, %s8481_s12 }
 0xb5c   :  { %2854 = vrot.lane.b32.xlu0 %v8166_v59, %s8481_s12  ;;  %2858 = vrot.lane.b32.xlu1 %v10627_v47, %s8481_s12 }
 0xb60   :  { %2860 = vrot.lane.b32.xlu0 %v8169_v14, %s8481_s12  ;;  %2884 = vrot.lane.b32.xlu1 %v10569_v63, %s8482_s0 }
 0xb64   :  { %2882 = vrot.lane.b32.xlu0 %v10567_v15, %s8482_s0  ;;  %2888 = vrot.lane.b32.xlu1 %v8166_v59, %s8482_s0 }
 0xb66   :  { %v2829_v53 = vpop.permute.xlu0 %2828  ;;  %v10667_v9 = vpop.permute.xlu1 %2830 }
 0xb67   :  { %v2842_v10 = vsel %vm207_vm0, %v2829_v53, %v10667_v9 }
 0xb68   :  { %2880 = vrot.lane.b32.xlu0 %v8162_v54, %s8482_s0  ;;  %2978 = vrot.lane.b32.xlu1 %v2829_v53, %s8482_s0 }
 0xb6a   :  { %v10671_v13 = vpop.permute.xlu0 %2832  ;;  %v2809_v41 = vpop.permute.xlu1 %2808 }
 0xb6c   :  { %2886 = vrot.lane.b32.xlu0 %v10575_v42, %s8482_s0 }
 0xb6e   :  { %v10675_v49 = vpop.permute.xlu0 %2810  ;;  %v10677_v60 = vpop.permute.xlu1 %2812 }
 0xb6f   :  { %v2822_v27 = vsel %vm186_vm1, %v2809_v41, %v10675_v49 }
 0xb70   :  { %2890 = vrot.lane.b32.xlu0 %v8167_v12, %s8482_s0 }
 0xb72   :  { %v10680_v43 = vpop.permute.xlu0 %2788  ;;  %v10682_v11 = vpop.permute.xlu1 %2790 }
 0xb73   :  { %2950 = vrot.lane.b32.xlu1 %v10680_v43, %s8482_s0 }
 0xb74   :  { %2964 = vrot.lane.b32.xlu0 %v2809_v41, %s8482_s0 }
 0xb76   :  { %v2793_v5 = vpop.permute.xlu0 %2792  ;;  %v2769_v37 = vpop.permute.xlu1 %2768 }
 0xb77   :  { %v2803_v19 = vsel %vm165_vm2, %v10682_v11, %v2793_v5 }
 0xb78   :  { %2936 = vrot.lane.b32.xlu0 %v2769_v37, %s8482_s0 }
 0xb7a   :  { %v10688_v46 = vpop.permute.xlu0 %2770  ;;  %v10690_v17 = vpop.permute.xlu1 %2772 }
 0xb7b   :  { %v2780_v35 = vsel %vm142_vm3, %v2769_v37, %v10688_v46 }
 0xb7c   :  { %2980 = vrot.lane.b32.xlu0 %v2842_v10, %s8482_s0 }
 0xb7e   :  { %v10695_v28 = vpop.permute.xlu0 %2750  ;;  %v10697_v61 = vpop.permute.xlu1 %2752 }
 0xb80   :  { %2966 = vrot.lane.b32.xlu0 %v2822_v27, %s8482_s0 }
 0xb82   :  { %v2755_v6 = vpop.permute.xlu0 %2754  ;;  %v10702_v39 = vpop.permute.xlu1 %2748 }
 0xb83   :  { %v2764_v42 = vsel %vm123_vm4, %v10697_v61, %v2755_v6 }
 0xb84   :  { %2954 = vrot.lane.b32.xlu0 %v2803_v19, %s8482_s0 }
 0xb86   :  { %v2731_v50 = vpop.permute.xlu0 %2730  ;;  %v10707_v26 = vpop.permute.xlu1 %2732 }
 0xb87   :  { %v2743_v2 = vsel %vm102_vm5, %v2731_v50, %v10707_v26 }
 0xb88   :  { %2938 = vrot.lane.b32.xlu0 %v2780_v35, %s8482_s0 }
 0xb8a   :  { %v10712_v15 = vpop.permute.xlu0 %2734  ;;  %v2729_v63 = vpop.permute.xlu1 %2728 }
 0xb8b   :  { %v2742_v12 = vsel %vm102_vm5, %v2729_v63, %v2731_v50 }
 0xb8c   :  { %2926 = vrot.lane.b32.xlu0 %v2764_v42, %s8482_s0 }
 0xb8e   :  { %v10717_v54 = vpop.permute.xlu0 %2710  ;;  %v10719_v16 = vpop.permute.xlu1 %2712 }
 0xb90   :  { %2910 = vrot.lane.b32.xlu0 %v2743_v2, %s8482_s0 }
 0xb92   :  { %v2715_v59 = vpop.permute.xlu0 %2714  ;;  %v10725_v57 = vpop.permute.xlu1 %2708 }
 0xb93   :  { %v2724_v53 = vsel %vm81_vm6, %v10719_v16, %v2715_v59 }
 0xb94   :  { %2908 = vrot.lane.b32.xlu0 %v2742_v12, %s8482_s0 }
 0xb96   :  { %v10728_v25 = vpop.permute.xlu0 %2834  ;;  %v2837_v14 = vpop.permute.xlu1 %2836 }
 0xb97   :  { %v2845_v10 = vsel %vm207_vm0, %v10728_v25, %v2837_v14 }
 0xb98   :  { %2898 = vrot.lane.b32.xlu0 %v2724_v53, %s8482_s0 }
 0xb9a   :  { %v10733_v41 = vpop.permute.xlu0 %2848  ;;  %v10735_v37 = vpop.permute.xlu1 %2850 }
 0xb9b   :  { %2992 = vrot.lane.b32.xlu1 %v10733_v41, %s8482_s0 }
 0xb9c   :  { %2986 = vrot.lane.b32.xlu0 %v2845_v10, %s8482_s0 }
 0xb9e   :  { %v10742_v27 = vpop.permute.xlu0 %2852  ;;  %v10744_v19 = vpop.permute.xlu1 %2814 }
 0xb9f   :  { %v2863_v50 = vsel %vm228_vm7, %v10735_v37, %v10742_v27  ;;  %v2824_v42 = vsel %vm186_vm1, %v10677_v60, %v10744_v19 }
 0xba0   :  { %2996 = vrot.lane.b32.xlu0 %v2863_v50, %s8482_s0 }
 0xba2   :  { %v10750_v35 = vpop.permute.xlu0 %2816  ;;  %v10752_v63 = vpop.permute.xlu1 %2838 }
 0xba3   :  { %v2846_v53 = vsel %vm207_vm0, %v2837_v14, %v10752_v63 }
 0xba4   :  { %2970 = vrot.lane.b32.xlu0 %v2824_v42, %s8482_s0 }
 0xba6   :  { %v10758_v2 = vpop.permute.xlu0 %2840  ;;  %v10760_v12 = vpop.permute.xlu1 %2794 }
 0xba7   :  { %v2804_v24 = vsel %vm165_vm2, %v2793_v5, %v10760_v12 }
 0xba8   :  { %2988 = vrot.lane.b32.xlu0 %v2846_v53, %s8482_s0 }
 0xbaa   :  { %v10765_v10 = vpop.permute.xlu0 %2796  ;;  %v10767_v50 = vpop.permute.xlu1 %2818 }
 0xbab   :  { %v2826_v51 = vsel %vm186_vm1, %v10750_v35, %v10767_v50 }
 0xbac   :  { %2956 = vrot.lane.b32.xlu0 %v2804_v24, %s8482_s0 }
 0xbae   :  { %v10772_v58 = vpop.permute.xlu0 %2820  ;;  %v10774_v42 = vpop.permute.xlu1 %2774 }
 0xbaf   :  { %v2782_v5 = vsel %vm142_vm3, %v10690_v17, %v10774_v42 }
 0xbb0   :  { %2974 = vrot.lane.b32.xlu0 %v2826_v51, %s8482_s0 }
 0xbb2   :  { %v10780_v14 = vpop.permute.xlu0 %2776  ;;  %v10782_v53 = vpop.permute.xlu1 %2798 }
 0xbb3   :  { %v2806_v22 = vsel %vm165_vm2, %v10765_v10, %v10782_v53 }
 0xbb4   :  { %2942 = vrot.lane.b32.xlu0 %v2782_v5, %s8482_s0 }
 0xbb6   :  { %v10788_v24 = vpop.permute.xlu0 %2800  ;;  %v10790_v34 = vpop.permute.xlu1 %2756 }
 0xbb7   :  { %v2765_v48 = vsel %vm123_vm4, %v2755_v6, %v10790_v34 }
 0xbb8   :  { %2960 = vrot.lane.b32.xlu0 %v2806_v22, %s8482_s0 }
 0xbba   :  { %v10796_v51 = vpop.permute.xlu0 %2758  ;;  %v2779_v36 = vpop.permute.xlu1 %2778 }
 0xbbb   :  { %2948 = vrot.lane.b32.xlu1 %v2779_v36, %s8482_s0  ;;  %v2784_v52 = vsel %vm142_vm3, %v10780_v14, %v2779_v36 }
 0xbbc   :  { %2928 = vrot.lane.b32.xlu0 %v2765_v48, %s8482_s0 }
 0xbbe   :  { %v10802_v5 = vpop.permute.xlu0 %2736  ;;  %v10804_v0 = vpop.permute.xlu1 %2738 }
 0xbbf   :  { %v2745_v6 = vsel %vm102_vm5, %v10712_v15, %v10802_v5 }
 0xbc0   :  { %2946 = vrot.lane.b32.xlu0 %v2784_v52, %s8482_s0 }
 0xbc2   :  { %v2761_v22 = vpop.permute.xlu0 %2760  ;;  %v10809_v21 = vpop.permute.xlu1 %2716 }
 0xbc3   :  { %2934 = vrot.lane.b32.xlu1 %v2761_v22, %s8482_s0  ;;  %v2767_v56 = vsel %vm123_vm4, %v10796_v51, %v2761_v22  ;;  %v2725_v36 = vsel %vm81_vm6, %v2715_v59, %v10809_v21  ;;  %v2823_v59 = vsel %vm186_vm1, %v10675_v49, %v10677_v60  ;;  %v2781_v49 = vsel %vm142_vm3, %v10688_v46, %v10690_v17 }
 0xbc4   :  { %2914 = vrot.lane.b32.xlu0 %v2745_v6, %s8482_s0  ;;  %v2843_v6 = vsel %vm207_vm0, %v10667_v9, %v10671_v13  ;;  %v2744_v17 = vsel %vm102_vm5, %v10707_v26, %v10712_v15  ;;  %v10888_v26 = vld [vmem:[%s15063_s1 + $0x44] ss:$8 sps:$4 sm:$0xff]   ;;  %v2844_v15 = vsel %vm207_vm0, %v10671_v13, %v10728_v25  ;;  %v2825_v13 = vsel %vm186_vm1, %v10744_v19, %v10750_v35 }
 0xbc5   :  { %8174 = vmatprep.mubr.msk.bf16.mxu0 %vm481_vm8, %v10888_v26  ;;  %8175 = vmatprep.mubr.msk.bf16.mxu1 %vm481_vm8, %v10888_v26  ;;  %v2847_v25 = vsel %vm207_vm0, %v10752_v63, %v10758_v2  ;;  %v2827_v19 = vsel %vm186_vm1, %v10767_v50, %v10772_v58  ;;  %v2783_v63 = vsel %vm142_vm3, %v10774_v42, %v10780_v14 }
 0xbc6   :  { %v10816_v48 = vpop.permute.xlu0 %2718  ;;  %v2741_v38 = vpop.permute.xlu1 %2740  ;;  %v2807_v2 = vsel %vm165_vm2, %v10782_v53, %v10788_v24  ;;  %v2766_v58 = vsel %vm123_vm4, %v10790_v34, %v10796_v51  ;;  %v2746_v50 = vsel %vm102_vm5, %v10802_v5, %v10804_v0 }
 0xbc7   :  { %2920 = vrot.lane.b32.xlu1 %v2741_v38, %s8482_s0  ;;  %v2747_v55 = vsel %vm102_vm5, %v10804_v0, %v2741_v38  ;;  %v2802_v38 = vsel %vm165_vm2, %v10680_v43, %v10682_v11  ;;  %v2763_v43 = vsel %vm123_vm4, %v10695_v28, %v10697_v61  ;;  %v2723_v61 = vsel %vm81_vm6, %v10717_v54, %v10719_v16 }
 0xbc8   :  { %2932 = vrot.lane.b32.xlu0 %v2767_v56, %s8482_s0  ;;  %v2726_v14 = vsel %vm81_vm6, %v10809_v21, %v10816_v48 }
 0xbca   :  { %v2721_v52 = vpop.permute.xlu0 %2720  ;;  %v10833_v56 = vpop.permute.xlu1 %2856 }
 0xbcb   :  { %2906 = vrot.lane.b32.xlu1 %v2721_v52, %s8482_s0  ;;  %v2727_v22 = vsel %vm81_vm6, %v10816_v48, %v2721_v52 }
 0xbcc   :  { %2900 = vrot.lane.b32.xlu0 %v2725_v36, %s8482_s0 }
 0xbce   :  { %v10840_v36 = vpop.permute.xlu0 %2854  ;;  %v2859_v9 = vpop.permute.xlu1 %2858 }
 0xbcf   :  { %2982 = vrot.lane.b32.xlu1 %v2843_v6, %s8482_s0  ;;  %v2866_v60 = vsel %vm228_vm7, %v10833_v56, %v2859_v9  ;;  %v2865_v0 = vsel %vm228_vm7, %v10840_v36, %v10833_v56 }
 0xbd0   :  { %2918 = vrot.lane.b32.xlu0 %v2747_v55, %s8482_s0  ;;  %v2864_v55 = vsel %vm228_vm7, %v10742_v27, %v10840_v36  ;;  %v2762_v27 = vsel %vm123_vm4, %v10702_v39, %v10695_v28  ;;  %v2722_v28 = vsel %vm81_vm6, %v10725_v57, %v10717_v54  ;;  %v2862_v54 = vsel %vm228_vm7, %v10733_v41, %v10735_v37 }
 0xbd1   :  { %v2805_v41 = vsel %vm165_vm2, %v10760_v12, %v10765_v10 }
 0xbd2   :  { %v2861_v11 = vpop.permute.xlu0 %2860  ;;  %v10938_v42 = vpop.permute.xlu1 %2884 }
 0xbd3   :  { %2968 = vrot.lane.b32.xlu1 %v2823_v59, %s8482_s0  ;;  %v2867_v5 = vsel %vm228_vm7, %v2859_v9, %v2861_v11 }
 0xbd4   :  { %2904 = vrot.lane.b32.xlu0 %v2727_v22, %s8482_s0 }
 0xbd6   :  { %v10867_v46 = vpop.permute.xlu0 %2882  ;;  %v10944_v34 = vpop.permute.xlu1 %2888 }
 0xbd7   :  { %2952 = vrot.lane.b32.xlu1 %v2802_v38, %s8482_s0 }
 0xbd8   :  { %2998 = vrot.lane.b32.xlu0 %v2864_v55, %s8482_s0 }
 0xbda   :  { %v10876_v52 = vpop.permute.xlu0 %2880  ;;  %v2979_v51 = vpop.permute.xlu1 %2978 }
 0xbdb   :  { %2940 = vrot.lane.b32.xlu1 %v2781_v49, %s8482_s0 }
 0xbdc   :  { %3002 = vrot.lane.b32.xlu0 %v2866_v60, %s8482_s0 }
 0xbde   :  { %v10883_v39 = vpop.permute.xlu0 %2886 }
 0xbdf   :  { %2924 = vrot.lane.b32.xlu1 %v2763_v43, %s8482_s0 }
 0xbe2   :  { %v10901_v16 = vpop.permute.xlu0 %2890 }
 0xbe3   :  { %2922 = vrot.lane.b32.xlu1 %v2762_v27, %s8482_s0 }
 0xbe5   :  { %v2951_v48 = vpop.permute.xlu1 %2950 }
 0xbe6   :  { %v2965_v57 = vpop.permute.xlu0 %2964 }
 0xbe7   :  { %2912 = vrot.lane.b32.xlu1 %v2744_v17, %s8482_s0 }
 0xbea   :  { %v2937_v37 = vpop.permute.xlu0 %2936 }
 0xbeb   :  { %2896 = vrot.lane.b32.xlu1 %v2723_v61, %s8482_s0 }
 0xbee   :  { %v2981_v35 = vpop.permute.xlu0 %2980 }
 0xbef   :  { %2894 = vrot.lane.b32.xlu1 %v2722_v28, %s8482_s0  ;;  %v3048_v43 = vsel %vm372_vm9, %v2979_v51, %v2981_v35 }
 0xbf2   :  { %v2967_v12 = vpop.permute.xlu0 %2966 }
 0xbf3   :  { %2984 = vrot.lane.b32.xlu1 %v2844_v15, %s8482_s0  ;;  %v3042_v61 = vsel %vm372_vm9, %v2965_v57, %v2967_v12 }
 0xbf6   :  { %v10932_v10 = vpop.permute.xlu0 %2954 }
 0xbf7   :  { %2994 = vrot.lane.b32.xlu1 %v2862_v54, %s8482_s0 }
 0xbfa   :  { %v2939_v53 = vpop.permute.xlu0 %2938 }
 0xbfb   :  { %2972 = vrot.lane.b32.xlu1 %v2825_v13, %s8482_s0 }
 0xbfe   :  { %v10948_v24 = vpop.permute.xlu0 %2926 }
 0xbff   :  { %2990 = vrot.lane.b32.xlu1 %v2847_v25, %s8482_s0 }
 0xc02   :  { %v2911_v21 = vpop.permute.xlu0 %2910 }
 0xc03   :  { %2958 = vrot.lane.b32.xlu1 %v2805_v41, %s8482_s0 }
 0xc06   :  { %v2909_v59 = vpop.permute.xlu0 %2908 }
 0xc07   :  { %2976 = vrot.lane.b32.xlu1 %v2827_v19, %s8482_s0  ;;  %v3030_v19 = vsel %vm372_vm9, %v2937_v37, %v2939_v53 }
 0xc0b   :  { %2944 = vrot.lane.b32.xlu1 %v2783_v63, %s8482_s0 }
 0xc0d   :  { %v10956_v6 = vpop.permute.xlu1 %2992 }
 0xc0f   :  { %2962 = vrot.lane.b32.xlu1 %v2807_v2, %s8482_s0 }
 0xc13   :  { %2930 = vrot.lane.b32.xlu1 %v2766_v58, %s8482_s0 }
 0xc17   :  { %2916 = vrot.lane.b32.xlu1 %v2746_v50, %s8482_s0 }
 0xc1b   :  { %2902 = vrot.lane.b32.xlu1 %v2726_v14, %s8482_s0 }
 0xc1f   :  { %2892 = vrot.lane.b32.xlu1 %v10627_v47, %s8482_s0  ;;  %v10960_v47 = vpop.permute.xlu0 %2898 }
 0xc23   :  { %3000 = vrot.lane.b32.xlu1 %v2865_v0, %s8482_s0  ;;  %v10964_v55 = vpop.permute.xlu0 %2986  ;;  %v3018_v0 = vsel %vm372_vm9, %v2909_v59, %v2911_v21 }
 0xc27   :  { %3004 = vrot.lane.b32.xlu1 %v2867_v5, %s8482_s0  ;;  %v10970_v9 = vpop.permute.xlu0 %2996 }
 0xc2b   :  { %v2971_v11 = vpop.permute.xlu0 %2970 }
 0xc2d   :  { %v10958_v22 = vpop.permute.xlu1 %2948 }
 0xc2f   :  { %v2989_v13 = vpop.permute.xlu0 %2988 }
 0xc33   :  { %v2957_v57 = vpop.permute.xlu0 %2956 }
 0xc35   :  { %v10962_v38 = vpop.permute.xlu1 %2934 }
 0xc37   :  { %v2975_v58 = vpop.permute.xlu0 %2974 }
 0xc39   :  { %v10966_v56 = vpop.permute.xlu1 %2920 }
 0xc3b   :  { %v2943_v37 = vpop.permute.xlu0 %2942 }
 0xc3d   :  { %v10968_v36 = vpop.permute.xlu1 %2906 }
 0xc41   :  { %v2983_v49 = vpop.permute.xlu1 %2982 }
 0xc42   :  { %v3049_v60 = vsel %vm372_vm9, %v2981_v35, %v2983_v49 }
 0xc43   :  { %3117 = vmatprep.subr.bf16.mxu0 %v3049_v60  ;;  %v2961_v60 = vpop.permute.xlu0 %2960 }
 0xc44   :  { %3118 = vmatpush1.bf16.msra.mxu0 %v3048_v43  ;;  %v3007_v43 = vsel %vm372_vm9, %v10867_v46, %v10938_v42 }
 0xc45   :  { %v2969_v27 = vpop.permute.xlu1 %2968 }
 0xc46   :  { %v3043_v17 = vsel %vm372_vm9, %v2967_v12, %v2969_v27 }
 0xc47   :  { %3119 = vmatprep.subr.bf16.mxu0 %v3043_v17 }
 0xc48   :  { %3120 = vmatpush1.bf16.msra.mxu0 %v3042_v61 }
 0xc49   :  { %v2953_v28 = vpop.permute.xlu1 %2952 }
 0xc4a   :  { %v3037_v15 = vsel %vm372_vm9, %v2953_v28, %v10932_v10  ;;  %v3036_v54 = vsel %vm372_vm9, %v2951_v48, %v2953_v28  ;;  %v2929_v28 = vpop.permute.xlu0 %2928 }
 0xc4b   :  { %3121 = vmatprep.subr.bf16.mxu0 %v3037_v15 }
 0xc4c   :  { %3122 = vmatpush1.bf16.msra.mxu0 %v3036_v54 }
 0xc4d   :  { %v10979_v25 = vpop.permute.xlu1 %2940 }
 0xc4e   :  { %v3031_v41 = vsel %vm372_vm9, %v2939_v53, %v10979_v25 }
 0xc4f   :  { %3123 = vmatprep.subr.bf16.mxu0 %v3031_v41 }
 0xc50   :  { %3124 = vmatpush1.bf16.msra.mxu0 %v3030_v19  ;;  %v2947_v19 = vpop.permute.xlu0 %2946 }
 0xc51   :  { %v2925_v35 = vpop.permute.xlu1 %2924 }
 0xc52   :  { %v3025_v63 = vsel %vm372_vm9, %v2925_v35, %v10948_v24 }
 0xc53   :  { %3125 = vmatprep.subr.bf16.mxu0 %v3025_v63 }
 0xc55   :  { %v2923_v2 = vpop.permute.xlu1 %2922 }
 0xc56   :  { %v3024_v12 = vsel %vm372_vm9, %v2923_v2, %v2925_v35  ;;  %v3044_v35 = vsel %vm372_vm9, %v2969_v27, %v2971_v11  ;;  %v3052_v2 = vsel %vm372_vm9, %v10964_v55, %v2989_v13 }
 0xc57   :  { %3126 = vmatpush1.bf16.msra.mxu0 %v3024_v12  ;;  %v2915_v12 = vpop.permute.xlu0 %2914 }
 0xc59   :  { %v10987_v50 = vpop.permute.xlu1 %2912 }
 0xc5a   :  { %v3019_v14 = vsel %vm372_vm9, %v2911_v21, %v10987_v50  ;;  %v3006_v21 = vsel %vm372_vm9, %v10876_v52, %v10867_v46  ;;  %v11011_v46 = vld [vmem:[%s15063_s1 + $0x40] ss:$8 sps:$4 sm:$0xff]  }
 0xc5b   :  { %3127 = vmatprep.subr.bf16.mxu0 %v3019_v14 }
 0xc5c   :  { %3128 = vmatpush1.bf16.msra.mxu0 %v3018_v0 }
 0xc5d   :  { %v2897_v53 = vpop.permute.xlu1 %2896 }
 0xc5e   :  { %v3013_v51 = vsel %vm372_vm9, %v2897_v53, %v10960_v47 }
 0xc5f   :  { %3129 = vmatprep.subr.bf16.mxu0 %v3013_v51 }
 0xc61   :  { %v2895_v5 = vpop.permute.xlu1 %2894 }
 0xc62   :  { %v3012_v48 = vsel %vm372_vm9, %v2895_v5, %v2897_v53  ;;  %v2933_v53 = vpop.permute.xlu0 %2932 }
 0xc63   :  { %3130 = vmatpush1.bf16.msra.mxu0 %v3012_v48 }
 0xc64   :  { %3131 = vmatprep.subr.bf16.mxu0 %v3007_v43 }
 0xc65   :  { %v2985_v17 = vpop.permute.xlu1 %2984 }
 0xc66   :  { %v3051_v59 = vsel %vm372_vm9, %v2985_v17, %v10964_v55  ;;  %v3050_v61 = vsel %vm372_vm9, %v2983_v49, %v2985_v17  ;;  %v2901_v48 = vpop.permute.xlu0 %2900 }
 0xc67   :  { %3132 = vmatpush1.bf16.msra.mxu0 %v3006_v21  ;;  %3160 = vmatprep.subr.bf16.mxu1 %v3051_v59 }
 0xc68   :  { %3161 = vmatpush1.bf16.msra.mxu1 %v3050_v61 }
 0xc69   :  { %v2995_v15 = vpop.permute.xlu1 %2994 }
 0xc6a   :  { %v3055_v54 = vsel %vm372_vm9, %v2995_v15, %v10970_v9  ;;  %v3054_v41 = vsel %vm372_vm9, %v10956_v6, %v2995_v15  ;;  %v2919_v59 = vpop.permute.xlu0 %2918  ;;  %v3020_v15 = vsel %vm372_vm9, %v10987_v50, %v2915_v12  ;;  %v3009_v50 = vsel %vm372_vm9, %v10883_v39, %v10944_v34 }
 0xc6b   :  { %3147 = vmatprep.subr.bf16.mxu0 %v3055_v54 }
 0xc6c   :  { %3148 = vmatpush2.bf16.msra.mxu0 %v3054_v41 }
 0xc6d   :  { %v2973_v52 = vpop.permute.xlu1 %2972 }
 0xc6e   :  { %v3045_v49 = vsel %vm372_vm9, %v2971_v11, %v2973_v52  ;;  %v3038_v11 = vsel %vm372_vm9, %v10932_v10, %v2957_v57  ;;  %v3046_v51 = vsel %vm372_vm9, %v2973_v52, %v2975_v58  ;;  %v3014_v52 = vsel %vm372_vm9, %v10960_v47, %v2901_v48 }
 0xc6f   :  { %3162 = vmatprep.subr.bf16.mxu1 %v3045_v49  ;;  %3150 = vmatmul.mubr.bf16.vlgmr.msra.gmra.mxu0 %v11011_v46 }
 0xc70   :  { %3163 = vmatpush1.bf16.msra.mxu1 %v3044_v35  ;;  %8176 = vmatprep.mubr.msk.bf16.mxu0 %vm481_vm8, %v10888_v26 }
 0xc71   :  { %v2991_v6 = vpop.permute.xlu1 %2990 }
 0xc72   :  { %v3053_v63 = vsel %vm372_vm9, %v2989_v13, %v2991_v6  ;;  %v3032_v13 = vsel %vm372_vm9, %v10979_v25, %v2943_v37  ;;  %v3026_v25 = vsel %vm372_vm9, %v10948_v24, %v2929_v28  ;;  %v3023_v24 = vsel %vm372_vm9, %v2919_v59, %v10966_v56 }
 0xc73   :  { %3203 = vmatprep.subr.bf16.mxu0 %v3053_v63  ;;  %v3008_v6 = vsel %vm372_vm9, %v10938_v42, %v10883_v39 }
 0xc74   :  { %3204 = vmatpush1.bf16.msra.mxu0 %v3052_v2 }
 0xc75   :  { %v2959_v14 = vpop.permute.xlu1 %2958 }
 0xc76   :  { %v3039_v0 = vsel %vm372_vm9, %v2957_v57, %v2959_v14  ;;  %v3040_v57 = vsel %vm372_vm9, %v2959_v14, %v2961_v60  ;;  %v3010_v14 = vsel %vm372_vm9, %v10944_v34, %v10901_v16 }
 0xc77   :  { %3164 = vmatprep.subr.bf16.mxu1 %v3039_v0 }
 0xc78   :  { %3165 = vmatpush1.bf16.msra.mxu1 %v3038_v11 }
 0xc79   :  { %v2977_v27 = vpop.permute.xlu1 %2976 }
 0xc7a   :  { %v3047_v26 = vsel %vm372_vm9, %v2975_v58, %v2977_v27  ;;  %v3035_v58 = vsel %vm372_vm9, %v2947_v19, %v10958_v22 }
 0xc7b   :  { %3205 = vmatprep.subr.bf16.mxu0 %v3047_v26 }
 0xc7c   :  { %3206 = vmatpush1.bf16.msra.mxu0 %v3046_v51 }
 0xc7d   :  { %v2945_v5 = vpop.permute.xlu1 %2944 }
 0xc7e   :  { %v3033_v55 = vsel %vm372_vm9, %v2943_v37, %v2945_v5  ;;  %v3034_v37 = vsel %vm372_vm9, %v2945_v5, %v2947_v19 }
 0xc7f   :  { %3166 = vmatprep.subr.bf16.mxu1 %v3033_v55 }
 0xc80   :  { %3167 = vmatpush1.bf16.msra.mxu1 %v3032_v13 }
 0xc81   :  { %v2963_v43 = vpop.permute.xlu1 %2962 }
 0xc82   :  { %v3041_v10 = vsel %vm372_vm9, %v2961_v60, %v2963_v43  ;;  %v3029_v60 = vsel %vm372_vm9, %v2933_v53, %v10962_v38 }
 0xc83   :  { %3207 = vmatprep.subr.bf16.mxu0 %v3041_v10 }
 0xc84   :  { %3208 = vmatpush1.bf16.msra.mxu0 %v3040_v57 }
 0xc85   :  { %3209 = vmatprep.subr.bf16.mxu0 %v3035_v58  ;;  %v2931_v17 = vpop.permute.xlu1 %2930 }
 0xc86   :  { %v3027_v21 = vsel %vm372_vm9, %v2929_v28, %v2931_v17  ;;  %v3028_v54 = vsel %vm372_vm9, %v2931_v17, %v2933_v53  ;;  %v2905_v28 = vpop.permute.xlu0 %2904 }
 0xc87   :  { %3168 = vmatprep.subr.bf16.mxu1 %v3027_v21  ;;  %v3017_v56 = vsel %vm372_vm9, %v2905_v28, %v10968_v36 }
 0xc88   :  { %3169 = vmatpush1.bf16.msra.mxu1 %v3026_v25  ;;  %3210 = vmatpush1.bf16.msra.mxu0 %v3034_v37 }
 0xc89   :  { %3211 = vmatprep.subr.bf16.mxu0 %v3029_v60  ;;  %v2917_v61 = vpop.permute.xlu1 %2916 }
 0xc8a   :  { %v3021_v22 = vsel %vm372_vm9, %v2915_v12, %v2917_v61  ;;  %v3022_v49 = vsel %vm372_vm9, %v2917_v61, %v2919_v59  ;;  %v2999_v35 = vpop.permute.xlu0 %2998 }
 0xc8b   :  { %3170 = vmatprep.subr.bf16.mxu1 %v3021_v22  ;;  %v3056_v36 = vsel %vm372_vm9, %v10970_v9, %v2999_v35 }
 0xc8c   :  { %3171 = vmatpush1.bf16.msra.mxu1 %v3020_v15  ;;  %3212 = vmatpush1.bf16.msra.mxu0 %v3028_v54 }
 0xc8d   :  { %3213 = vmatprep.subr.bf16.mxu0 %v3023_v24  ;;  %v2903_v41 = vpop.permute.xlu1 %2902 }
 0xc8e   :  { %v3015_v38 = vsel %vm372_vm9, %v2901_v48, %v2903_v41  ;;  %v3016_v47 = vsel %vm372_vm9, %v2903_v41, %v2905_v28  ;;  %v3003_v39 = vpop.permute.xlu0 %3002 }
 0xc8f   :  { %3172 = vmatprep.subr.bf16.mxu1 %v3015_v38 }
 0xc90   :  { %3173 = vmatpush1.bf16.msra.mxu1 %v3014_v52  ;;  %3214 = vmatpush1.bf16.msra.mxu0 %v3022_v49 }
 0xc91   :  { %3174 = vmatprep.subr.bf16.mxu1 %v3009_v50  ;;  %3215 = vmatprep.subr.bf16.mxu0 %v3017_v56  ;;  %v2893_v19 = vpop.permute.xlu1 %2892 }
 0xc92   :  { %v3011_v63 = vsel %vm372_vm9, %v10901_v16, %v2893_v19 }
 0xc94   :  { %3175 = vmatpush1.bf16.msra.mxu1 %v3008_v6  ;;  %3216 = vmatpush1.bf16.msra.mxu0 %v3016_v47 }
 0xc95   :  { %3217 = vmatprep.subr.bf16.mxu0 %v3011_v63  ;;  %v3001_v2 = vpop.permute.xlu1 %3000 }
 0xc96   :  { %v3057_v12 = vsel %vm372_vm9, %v2999_v35, %v3001_v2  ;;  %v3058_v11 = vsel %vm372_vm9, %v3001_v2, %v3003_v39 }
 0xc97   :  { %3190 = vmatprep.subr.bf16.mxu1 %v3057_v12 }
 0xc98   :  { %3191 = vmatpush2.bf16.msra.mxu1 %v3056_v36  ;;  %3218 = vmatpush1.bf16.msra.mxu0 %v3010_v14 }
 0xc99   :  { %v3005_v42 = vpop.permute.xlu1 %3004 }
 0xc9a   :  { %v3059_v0 = vsel %vm372_vm9, %v3003_v39, %v3005_v42 }
 0xc9b   :  { %3193 = vmatmul.mubr.bf16.vlgmr.msra.gmra.mxu1 %v11011_v46  ;;  %3233 = vmatprep.subr.bf16.mxu0 %v3059_v0 }
 0xc9c   :  { %3234 = vmatpush2.bf16.msra.mxu0 %v3058_v11 }
 0xc9f   :  { %3236 = vmatmul.mubr.bf16.vlgmr.msra.gmra.mxu0 %v11011_v46 }
 0xd2f   :  { %v11070_v27 = vpop.f32.mrf.mxu0 }
 0xd30   :  { %v3246_v16 = vmul.f32 %v11070_v27, %v9132_v20 }
 0xd31   :  { %v11072_v9 = vpop.f32.mrf.mxu0 }
 0xd32   :  { %v3247_v34 = vmul.f32 %v11072_v9, %v9134_v23  ;;  %v3274_v5 = vmul.f32 %v3246_v16, %v11070_v27 }
 0xd33   :  { %v11074_v26 = vpop.f32.mrf.mxu0 }
 0xd34   :  { %v3252_v51 = vmul.f32 %v11074_v26, %v9132_v20  ;;  %v3275_v55 = vmul.f32 %v3247_v34, %v11072_v9  ;;  %v3258_v48 = vadd.f32 %v3247_v34, %v3246_v16 }
 0xd35   :  { %v11080_v53 = vpop.f32.mrf.mxu0 }
 0xd36   :  { %v3253_v46 = vmul.f32 %v11080_v53, %v9134_v23  ;;  %v3280_v10 = vmul.f32 %v3252_v51, %v11074_v26  ;;  %v3286_v17 = vadd.f32 %v3275_v55, %v3274_v5 }
 0xd38   :  { %v3281_v57 = vmul.f32 %v3253_v46, %v11080_v53  ;;  %v3265_v37 = vadd.f32 %v3253_v46, %v3252_v51 }
 0xd3a   :  { %v3293_v28 = vadd.f32 %v3281_v57, %v3280_v10 }
 0xd5b   :  { %v11088_v13 = vpop.f32.mrf.mxu1 }
 0xd5c   :  { %v3248_v43 = vmul.f32 %v11088_v13, %v9138_v29 }
 0xd5d   :  { %v11094_v58 = vpop.f32.mrf.mxu1 }
 0xd5e   :  { %v3259_v21 = vadd.f32 %v3258_v48, %v3248_v43  ;;  %v3276_v59 = vmul.f32 %v3248_v43, %v11088_v13  ;;  %v3249_v25 = vmul.f32 %v11094_v58, %v9152_v45 }
 0xd5f   :  { %v11099_v60 = vpop.f32.mrf.mxu1  ;;  %v11101_v61 = vpop.f32.mrf.mxu0 }
 0xd60   :  { %v3287_v22 = vadd.f32 %v3286_v17, %v3276_v59  ;;  %v3260_v15 = vadd.f32 %v3259_v21, %v3249_v25  ;;  %v3277_v54 = vmul.f32 %v3249_v25, %v11094_v58  ;;  %v3254_v24 = vmul.f32 %v11099_v60, %v9138_v29 }
 0xd61   :  { %v3250_v41 = vmul.f32 %v11101_v61, %v9171_v18  ;;  %v11108_v38 = vpop.f32.mrf.mxu1  ;;  %v11110_v52 = vpop.f32.mrf.mxu0 }
 0xd62   :  { %v3288_v49 = vadd.f32 %v3287_v22, %v3277_v54  ;;  %v3266_v50 = vadd.f32 %v3265_v37, %v3254_v24  ;;  %v3282_v56 = vmul.f32 %v3254_v24, %v11099_v60  ;;  %v3255_v19 = vmul.f32 %v11108_v38, %v9152_v45 }
 0xd63   :  { %v3261_v35 = vadd.f32 %v3260_v15, %v3250_v41  ;;  %v3278_v6 = vmul.f32 %v3250_v41, %v11101_v61  ;;  %v3251_v47 = vmul.f32 %v11110_v52, %v9177_v3  ;;  %v11118_v63 = vpop.f32.mrf.mxu0 }
 0xd64   :  { %v3294_v2 = vadd.f32 %v3293_v28, %v3282_v56  ;;  %v3267_v12 = vadd.f32 %v3266_v50, %v3255_v19  ;;  %v3283_v36 = vmul.f32 %v3255_v19, %v11108_v38  ;;  %v3256_v14 = vmul.f32 %v11118_v63, %v9171_v18 }
 0xd65   :  { %v3289_v39 = vadd.f32 %v3288_v49, %v3278_v6  ;;  %v3279_v42 = vmul.f32 %v3251_v47, %v11110_v52  ;;  %v11124_v0 = vpop.f32.mrf.mxu0  ;;  %v3262_v11 = vadd.f32 %v3261_v35, %v3251_v47  ;;  %v8177_v35 = vld [vmem:[%s15065_s2 + $0x40] sm:$0xff] }
 0xd66   :  { %v3295_v16 = vadd.f32 %v3294_v2, %v3283_v36  ;;  %v3268_v34 = vadd.f32 %v3267_v12, %v3256_v14  ;;  %v3284_v51 = vmul.f32 %v3256_v14, %v11118_v63  ;;  %v3257_v46 = vmul.f32 %v11124_v0, %v9177_v3  ;;  %v8179_v2 = vld [vmem:[%s15066_s3 + $0x40] sm:$0xff]  ;;  %v8178_v12 = vld [vmem:[%s15065_s2 + $0x48] sm:$0xff] }
 0xd67   :  { %3263 = vadd.xlane.f32.xlu0 %v3262_v11  ;;  %v3290_v43 = vadd.f32 %v3289_v39, %v3279_v42  ;;  %v8180_v11 = vld [vmem:[%s15066_s3 + $0x48] sm:$0xff] }
 0xd68   :  { %v3269_v5 = vadd.f32 %v3268_v34, %v3257_v46  ;;  %v3296_v55 = vadd.f32 %v3295_v16, %v3284_v51  ;;  %v3285_v48 = vmul.f32 %v3257_v46, %v11124_v0 }
 0xd6a   :  { %3270 = vadd.xlane.f32.xlu1 %v3269_v5  ;;  %v3297_v10 = vadd.f32 %v3296_v55, %v3285_v48 }
 0xd6b   :  { %3291 = vadd.xlane.f32.xlu0 %v3290_v43 }
 0xd6f   :  { %3298 = vadd.xlane.f32.xlu0 %v3297_v10 }
 0xdf0   :  { %v3264_v57 = vpop.xlane.xlu0 %3263 }
 0xdf1   :  { %v3272_v17 = vmul.f32 0.001953125, %v3264_v57 }
 0xdf3   :  { %v3271_v21 = vpop.xlane.xlu1 %3270  ;;  %v3302_v25 = vmul.f32 %v3272_v17, %v3272_v17 }
 0xdf4   :  { %v3292_v59 = vpop.xlane.xlu0 %3291  ;;  %v3273_v22 = vmul.f32 0.001953125, %v3271_v21 }
 0xdf5   :  { %v3300_v37 = vmul.f32 0.001953125, %v3292_v59 }
 0xdf6   :  { %v3303_v28 = vmul.f32 %v3273_v22, %v3273_v22 }
 0xdf7   :  { %v3304_v15 = vsub.f32 %v3300_v37, %v3302_v25 }
 0xdf8   :  { %v3299_v54 = vpop.xlane.xlu0 %3298 }
 0xdf9   :  { %v3306_v24 = vmax.f32 %v3304_v15, 0.0  ;;  %v3301_v41 = vmul.f32 0.001953125, %v3299_v54 }
 0xdfb   :  { %v3311_v49 = vadd.f32 1e-05, %v3306_v24  ;;  %v3305_v50 = vsub.f32 %v3301_v41, %v3303_v28 }
 0xdfd   :  { %8442 = vrsqrt.f32 %v3311_v49  ;;  %v3307_v56 = vmax.f32 %v3305_v50, 0.0 }
 0xdff   :  { %v3312_v19 = vadd.f32 1e-05, %v3307_v56 }
 0xe01   :  { %8444 = vrsqrt.f32 %v3312_v19 }
 0xe0a   :  { %v8443_v6 = vpop.eup %8442 }
 0xe0b   :  { %v3315_v47 = vmul.f32 %v8443_v6, %v8177_v35 }
 0xe0d   :  { %3326 = vperm.xlu1 %8395, %v3315_v47   ;;  %v3320_v36 = vmul.f32 %v3315_v47, %v3272_v17 }
 0xe0e   :  { %v8445_v14 = vpop.eup %8444 }
 0xe0f   :  { %v3322_v39 = vsub.f32 %v8179_v2, %v3320_v36  ;;  %v3316_v42 = vmul.f32 %v8445_v14, %v8178_v12 }
 0xe11   :  { %3348 = vperm.xlu1 %8395, %v3322_v39   ;;  %3331 = vperm.xlu0 %8396, %v3316_v42   ;;  %v3321_v16 = vmul.f32 %v3316_v42, %v3273_v22 }
 0xe13   :  { %v3323_v34 = vsub.f32 %v8180_v11, %v3321_v16 }
 0xe15   :  { %3353 = vperm.xlu1 %8395, %v3323_v34  }
 0xe88   :  { %v3327_v51 = vpop.permute.xlu1 %3326 }
 0xe89   :  { %v3334_v46 = vmul.f32 %v3327_v51, %v11070_v27  ;;  %v3335_v5 = vmul.f32 %v3327_v51, %v11072_v9  ;;  %v3336_v55 = vmul.f32 %v3327_v51, %v11088_v13  ;;  %v3337_v48 = vmul.f32 %v3327_v51, %v11094_v58 }
 0xe8a   :  { %v3338_v57 = vmul.f32 %v3327_v51, %v11101_v61  ;;  %v3339_v17 = vmul.f32 %v3327_v51, %v11110_v52 }
 0xe8c   :  { %v3332_v43 = vpop.permute.xlu0 %3331  ;;  %v3349_v10 = vpop.permute.xlu1 %3348 }
 0xe8d   :  { %v3340_v21 = vmul.f32 %v3332_v43, %v11074_v26  ;;  %v3341_v59 = vmul.f32 %v3332_v43, %v11080_v53  ;;  %v3342_v25 = vmul.f32 %v3332_v43, %v11099_v60  ;;  %v3343_v27 = vmul.f32 %v3332_v43, %v11108_v38 }
 0xe8e   :  { %v3356_v37 = vadd.f32 %v3349_v10, %v3334_v46  ;;  %v3357_v9 = vadd.f32 %v3349_v10, %v3335_v5  ;;  %v3358_v22 = vadd.f32 %v3349_v10, %v3336_v55  ;;  %v3359_v13 = vadd.f32 %v3349_v10, %v3337_v48 }
 0xe8f   :  { %v3360_v15 = vadd.f32 %v3349_v10, %v3338_v57  ;;  %v3361_v58 = vadd.f32 %v3349_v10, %v3339_v17  ;;  %v3344_v54 = vmul.f32 %v3332_v43, %v11118_v63  ;;  %v3345_v61 = vmul.f32 %v3332_v43, %v11124_v0 }
 0xe90   :  { %v3368_v24 = vmax.f32 %v3356_v37, 0.0  ;;  %v3369_v52 = vmax.f32 %v3357_v9, 0.0  ;;  %v3354_v28 = vpop.permute.xlu1 %3353  ;;  %v3370_v26 = vmax.f32 %v3358_v22, 0.0  ;;  %v3371_v41 = vmax.f32 %v3359_v13, 0.0 }
 0xe91   :  { %v3372_v53 = vmax.f32 %v3360_v15, 0.0  ;;  %v3373_v49 = vmax.f32 %v3361_v58, 0.0  ;;  %v3362_v50 = vadd.f32 %v3354_v28, %v3340_v21  ;;  %v3363_v56 = vadd.f32 %v3354_v28, %v3341_v59 }
 0xe92   :  { %v3380_v60 = vmul.f32 %v3368_v24, %v9132_v20  ;;  %v3381_v38 = vmul.f32 %v3369_v52, %v9134_v23  ;;  %v3382_v19 = vmul.f32 %v3370_v26, %v9138_v29  ;;  %v3383_v35 = vmul.f32 %v3371_v41, %v9152_v45 }
 0xe93   :  { %v3384_v63 = vmul.f32 %v3372_v53, %v9171_v18  ;;  %v3385_v0 = vmul.f32 %v3373_v49, %v9177_v3  ;;  %v3364_v47 = vadd.f32 %v3354_v28, %v3342_v25  ;;  %v3365_v2 = vadd.f32 %v3354_v28, %v3343_v27 }
 0xe94   :  { %v8349_v6 = vpack.c.bf16 %v3381_v38, %v3380_v60  ;;  %v3366_v12 = vadd.f32 %v3354_v28, %v3344_v54  ;;  %v8350_v36 = vpack.c.bf16 %v3383_v35, %v3382_v19  ;;  %v3367_v39 = vadd.f32 %v3354_v28, %v3345_v61 }
 0xe95   :  { %v8351_v14 = vpack.c.bf16 %v3385_v0, %v3384_v63  ;;  %v3374_v42 = vmax.f32 %v3362_v50, 0.0  ;;  %v3375_v11 = vmax.f32 %v3363_v56, 0.0  ;;  %v3376_v16 = vmax.f32 %v3364_v47, 0.0 }
 0xe96   :  { %3428 = vst [vmem:[#allocation2 + $0x4] sm:$0xff] %v8349_v6  ;;  %v3377_v34 = vmax.f32 %v3365_v2, 0.0  ;;  %v3378_v51 = vmax.f32 %v3366_v12, 0.0  ;;  %3429 = vst [vmem:[#allocation2 + $0xc] sm:$0xff] %v8350_v36  ;;  %v3379_v46 = vmax.f32 %v3367_v39, 0.0 }
 0xe97   :  { %3430 = vst [vmem:[#allocation2 + $0x14] sm:$0xff] %v8351_v14  ;;  %v3386_v5 = vmul.f32 %v3374_v42, %v9132_v20  ;;  %v3387_v55 = vmul.f32 %v3375_v11, %v9134_v23  ;;  %v3388_v48 = vmul.f32 %v3376_v16, %v9138_v29 }
 0xe98   :  { %v3389_v43 = vmul.f32 %v3377_v34, %v9152_v45  ;;  %v3390_v10 = vmul.f32 %v3378_v51, %v9171_v18  ;;  %v3391_v57 = vmul.f32 %v3379_v46, %v9177_v3 }
 0xe99   :  { %v8352_v17 = vpack.c.bf16 %v3387_v55, %v3386_v5 }
 0xe9a   :  { %v8353_v21 = vpack.c.bf16 %v3389_v43, %v3388_v48  ;;  %v8354_v59 = vpack.c.bf16 %v3391_v57, %v3390_v10 }
 0xe9b   :  { %3431 = vst [vmem:[#allocation2 + $0x24] sm:$0xff] %v8352_v17 }
 0xe9c   :  { %3432 = vst [vmem:[#allocation2 + $0x2c] sm:$0xff] %v8353_v21  ;;  %3433 = vst [vmem:[#allocation2 + $0x34] sm:$0xff] %v8354_v59 }
 0xe9d   :  { %v3434_v25 = vld [vmem:[#allocation2] sm:$0xff]  ;;  %v3435_v27 = vld [vmem:[#allocation2 + $0x8] sm:$0xff] }
 0xe9e   :  { %v3436_v61 = vld [vmem:[#allocation2 + $0x10] sm:$0xff]  ;;  %v3437_v26 = vld [vmem:[#allocation2 + $0x18] sm:$0xff] }
 0xea2   :  { %v3438_v9 = vld [vmem:[#allocation2 + $0x20] sm:$0xff] }
 0xea3   :  { %v3439_v37 = vld [vmem:[#allocation2 + $0x28] sm:$0xff]  ;;  %v11168_v13 = vcombine.high %v3434_v25, %v3438_v9  ;;  %v8187_v58 = vcombine.low %v3434_v25, %v3438_v9  ;;  %v3440_v54 = vld [vmem:[#allocation2 + $0x30] sm:$0xff]  ;;  %v3441_v28 = vld [vmem:[#allocation2 + $0x38] sm:$0xff] }
 0xea4   :  { %v11166_v22 = vcombine.low %v3435_v27, %v3439_v37  ;;  %v11174_v15 = vcombine.high %v3435_v27, %v3439_v37  ;;  %v8191_v24 = vcombine.low %v3436_v61, %v3440_v54  ;;  %v8192_v52 = vcombine.high %v3436_v61, %v3440_v54 }
 0xea5   :  { %3591 = vrot.lane.b32.xlu0 %v11168_v13, %s8474_s26  ;;  %v11226_v41 = vcombine.low %v3437_v26, %v3441_v28  ;;  %v8194_v53 = vcombine.high %v3437_v26, %v3441_v28 }
 0xea6   :  { %3593 = vrot.lane.b32.xlu1 %v11166_v22, %s8474_s26 }
 0xea9   :  { %3595 = vrot.lane.b32.xlu0 %v11174_v15, %s8474_s26 }
 0xeaa   :  { %3571 = vrot.lane.b32.xlu1 %v11168_v13, %s8475_s27 }
 0xead   :  { %3573 = vrot.lane.b32.xlu0 %v11166_v22, %s8475_s27 }
 0xeae   :  { %3575 = vrot.lane.b32.xlu1 %v11174_v15, %s8475_s27 }
 0xeb1   :  { %3551 = vrot.lane.b32.xlu0 %v11168_v13, %s8476_s28 }
 0xeb2   :  { %3553 = vrot.lane.b32.xlu1 %v11166_v22, %s8476_s28 }
 0xeb5   :  { %3555 = vrot.lane.b32.xlu0 %v11174_v15, %s8476_s28 }
 0xeb6   :  { %3531 = vrot.lane.b32.xlu1 %v11168_v13, %s8477_s29 }
 0xeb9   :  { %3533 = vrot.lane.b32.xlu0 %v11166_v22, %s8477_s29 }
 0xeba   :  { %3535 = vrot.lane.b32.xlu1 %v11174_v15, %s8477_s29 }
 0xebd   :  { %3513 = vrot.lane.b32.xlu0 %v11168_v13, %s8478_s30 }
 0xebe   :  { %3515 = vrot.lane.b32.xlu1 %v11166_v22, %s8478_s30 }
 0xec1   :  { %3517 = vrot.lane.b32.xlu0 %v11174_v15, %s8478_s30 }
 0xec2   :  { %3511 = vrot.lane.b32.xlu1 %v8187_v58, %s8478_s30 }
 0xec5   :  { %3493 = vrot.lane.b32.xlu0 %v11168_v13, %s8479_s6 }
 0xec6   :  { %3495 = vrot.lane.b32.xlu1 %v11166_v22, %s8479_s6 }
 0xec9   :  { %3497 = vrot.lane.b32.xlu0 %v11174_v15, %s8479_s6 }
 0xeca   :  { %3491 = vrot.lane.b32.xlu1 %v8187_v58, %s8479_s6 }
 0xecd   :  { %3473 = vrot.lane.b32.xlu0 %v11168_v13, %s8480_s7 }
 0xece   :  { %3475 = vrot.lane.b32.xlu1 %v11166_v22, %s8480_s7 }
 0xed1   :  { %3477 = vrot.lane.b32.xlu0 %v11174_v15, %s8480_s7 }
 0xed2   :  { %3471 = vrot.lane.b32.xlu1 %v8187_v58, %s8480_s7 }
 0xed5   :  { %3597 = vrot.lane.b32.xlu0 %v8191_v24, %s8474_s26 }
 0xed6   :  { %3599 = vrot.lane.b32.xlu1 %v8192_v52, %s8474_s26 }
 0xed9   :  { %3611 = vrot.lane.b32.xlu0 %v11168_v13, %s8481_s12 }
 0xeda   :  { %3613 = vrot.lane.b32.xlu1 %v11166_v22, %s8481_s12 }
 0xedd   :  { %3615 = vrot.lane.b32.xlu0 %v11174_v15, %s8481_s12 }
 0xede   :  { %3577 = vrot.lane.b32.xlu1 %v8191_v24, %s8475_s27 }
 0xee1   :  { %3579 = vrot.lane.b32.xlu0 %v8192_v52, %s8475_s27 }
 0xee2   :  { %3601 = vrot.lane.b32.xlu1 %v11226_v41, %s8474_s26 }
 0xee5   :  { %3603 = vrot.lane.b32.xlu0 %v8194_v53, %s8474_s26 }
 0xee6   :  { %3557 = vrot.lane.b32.xlu1 %v8191_v24, %s8476_s28 }
 0xee9   :  { %3559 = vrot.lane.b32.xlu0 %v8192_v52, %s8476_s28 }
 0xeea   :  { %3581 = vrot.lane.b32.xlu1 %v11226_v41, %s8475_s27 }
 0xeed   :  { %3583 = vrot.lane.b32.xlu0 %v8194_v53, %s8475_s27 }
 0xeee   :  { %3537 = vrot.lane.b32.xlu1 %v8191_v24, %s8477_s29 }
 0xef1   :  { %3539 = vrot.lane.b32.xlu0 %v8192_v52, %s8477_s29 }
 0xef2   :  { %3561 = vrot.lane.b32.xlu1 %v11226_v41, %s8476_s28 }
 0xef5   :  { %3563 = vrot.lane.b32.xlu0 %v8194_v53, %s8476_s28 }
 0xef6   :  { %3519 = vrot.lane.b32.xlu1 %v8191_v24, %s8478_s30 }
 0xef9   :  { %3521 = vrot.lane.b32.xlu0 %v8192_v52, %s8478_s30 }
 0xefa   :  { %3541 = vrot.lane.b32.xlu1 %v11226_v41, %s8477_s29 }
 0xefd   :  { %3499 = vrot.lane.b32.xlu0 %v8191_v24, %s8479_s6 }
 0xefe   :  { %3501 = vrot.lane.b32.xlu1 %v8192_v52, %s8479_s6 }
 0xf01   :  { %3523 = vrot.lane.b32.xlu0 %v11226_v41, %s8478_s30 }
 0xf02   :  { %3479 = vrot.lane.b32.xlu1 %v8191_v24, %s8480_s7 }
 0xf05   :  { %3481 = vrot.lane.b32.xlu0 %v8192_v52, %s8480_s7 }
 0xf06   :  { %3503 = vrot.lane.b32.xlu1 %v11226_v41, %s8479_s6 }
 0xf09   :  { %3483 = vrot.lane.b32.xlu0 %v11226_v41, %s8480_s7 }
 0xf0a   :  { %3619 = vrot.lane.b32.xlu1 %v8192_v52, %s8481_s12 }
 0xf0d   :  { %3617 = vrot.lane.b32.xlu0 %v8191_v24, %s8481_s12 }
 0xf0e   :  { %3621 = vrot.lane.b32.xlu1 %v11226_v41, %s8481_s12 }
 0xf11   :  { %3623 = vrot.lane.b32.xlu0 %v8194_v53, %s8481_s12 }
 0xf12   :  { %3647 = vrot.lane.b32.xlu1 %v11166_v22, %s8482_s0 }
 0xf15   :  { %3645 = vrot.lane.b32.xlu0 %v11168_v13, %s8482_s0 }
 0xf16   :  { %3651 = vrot.lane.b32.xlu1 %v8191_v24, %s8482_s0 }
 0xf17   :  { %v3592_v60 = vpop.permute.xlu0 %3591 }
 0xf18   :  { %v11266_v49 = vpop.permute.xlu1 %3593 }
 0xf19   :  { %3643 = vrot.lane.b32.xlu0 %v8187_v58, %s8482_s0  ;;  %v3605_v12 = vsel %vm207_vm0, %v3592_v60, %v11266_v49 }
 0xf1a   :  { %3741 = vrot.lane.b32.xlu1 %v3592_v60, %s8482_s0 }
 0xf1b   :  { %v11270_v50 = vpop.permute.xlu0 %3595 }
 0xf1c   :  { %v3572_v38 = vpop.permute.xlu1 %3571 }
 0xf1d   :  { %3649 = vrot.lane.b32.xlu0 %v11174_v15, %s8482_s0 }
 0xf1f   :  { %v11276_v19 = vpop.permute.xlu0 %3573 }
 0xf20   :  { %v11274_v56 = vpop.permute.xlu1 %3575  ;;  %v3585_v39 = vsel %vm186_vm1, %v3572_v38, %v11276_v19 }
 0xf21   :  { %3653 = vrot.lane.b32.xlu0 %v8192_v52, %s8482_s0 }
 0xf23   :  { %v11281_v63 = vpop.permute.xlu0 %3551 }
 0xf24   :  { %v11279_v35 = vpop.permute.xlu1 %3553  ;;  %3713 = vrot.lane.b32.xlu1 %v11281_v63, %s8482_s0 }
 0xf25   :  { %3727 = vrot.lane.b32.xlu0 %v3572_v38, %s8482_s0 }
 0xf27   :  { %v3556_v6 = vpop.permute.xlu0 %3555 }
 0xf28   :  { %v3532_v0 = vpop.permute.xlu1 %3531  ;;  %v3566_v16 = vsel %vm165_vm2, %v11279_v35, %v3556_v6 }
 0xf29   :  { %3699 = vrot.lane.b32.xlu0 %v3532_v0, %s8482_s0 }
 0xf2b   :  { %v11289_v2 = vpop.permute.xlu0 %3533 }
 0xf2c   :  { %v11287_v47 = vpop.permute.xlu1 %3535  ;;  %v3543_v46 = vsel %vm142_vm3, %v3532_v0, %v11289_v2 }
 0xf2d   :  { %3743 = vrot.lane.b32.xlu0 %v3605_v12, %s8482_s0 }
 0xf2f   :  { %v11296_v14 = vpop.permute.xlu0 %3513 }
 0xf30   :  { %v11294_v36 = vpop.permute.xlu1 %3515 }
 0xf31   :  { %3729 = vrot.lane.b32.xlu0 %v3585_v39, %s8482_s0 }
 0xf33   :  { %v3518_v42 = vpop.permute.xlu0 %3517 }
 0xf34   :  { %v11301_v11 = vpop.permute.xlu1 %3511  ;;  %v3527_v48 = vsel %vm123_vm4, %v11294_v36, %v3518_v42 }
 0xf35   :  { %3717 = vrot.lane.b32.xlu0 %v3566_v16, %s8482_s0 }
 0xf37   :  { %v3494_v34 = vpop.permute.xlu0 %3493 }
 0xf38   :  { %v11306_v51 = vpop.permute.xlu1 %3495 }
 0xf39   :  { %3701 = vrot.lane.b32.xlu0 %v3543_v46, %s8482_s0  ;;  %v3506_v57 = vsel %vm102_vm5, %v3494_v34, %v11306_v51 }
 0xf3b   :  { %v11311_v5 = vpop.permute.xlu0 %3497 }
 0xf3c   :  { %v3492_v55 = vpop.permute.xlu1 %3491 }
 0xf3d   :  { %3689 = vrot.lane.b32.xlu0 %v3527_v48, %s8482_s0  ;;  %v3505_v59 = vsel %vm102_vm5, %v3492_v55, %v3494_v34 }
 0xf3f   :  { %v11316_v43 = vpop.permute.xlu0 %3473 }
 0xf40   :  { %v11318_v10 = vpop.permute.xlu1 %3475 }
 0xf41   :  { %3673 = vrot.lane.b32.xlu0 %v3506_v57, %s8482_s0 }
 0xf43   :  { %v11323_v17 = vpop.permute.xlu0 %3477 }
 0xf44   :  { %v11325_v21 = vpop.permute.xlu1 %3471  ;;  %v3487_v37 = vsel %vm81_vm6, %v11318_v10, %v11323_v17 }
 0xf45   :  { %3671 = vrot.lane.b32.xlu0 %v3505_v59, %s8482_s0 }
 0xf47   :  { %v11329_v25 = vpop.permute.xlu0 %3597 }
 0xf48   :  { %v3600_v27 = vpop.permute.xlu1 %3599 }
 0xf49   :  { %3661 = vrot.lane.b32.xlu0 %v3487_v37, %s8482_s0  ;;  %v3608_v13 = vsel %vm207_vm0, %v11329_v25, %v3600_v27 }
 0xf4b   :  { %v11335_v9 = vpop.permute.xlu0 %3611 }
 0xf4c   :  { %v11337_v22 = vpop.permute.xlu1 %3613  ;;  %3755 = vrot.lane.b32.xlu1 %v11335_v9, %s8482_s0 }
 0xf4d   :  { %3749 = vrot.lane.b32.xlu0 %v3608_v13, %s8482_s0 }
 0xf4f   :  { %v11344_v15 = vpop.permute.xlu0 %3615 }
 0xf50   :  { %v11346_v58 = vpop.permute.xlu1 %3577  ;;  %v3626_v54 = vsel %vm228_vm7, %v11337_v22, %v11344_v15 }
 0xf51   :  { %3759 = vrot.lane.b32.xlu0 %v3626_v54, %s8482_s0  ;;  %v3587_v52 = vsel %vm186_vm1, %v11274_v56, %v11346_v58 }
 0xf53   :  { %v11352_v61 = vpop.permute.xlu0 %3579 }
 0xf54   :  { %v11354_v24 = vpop.permute.xlu1 %3601 }
 0xf55   :  { %3733 = vrot.lane.b32.xlu0 %v3587_v52, %s8482_s0  ;;  %v3609_v53 = vsel %vm207_vm0, %v3600_v27, %v11354_v24 }
 0xf57   :  { %v11360_v28 = vpop.permute.xlu0 %3603 }
 0xf58   :  { %v11362_v26 = vpop.permute.xlu1 %3557 }
 0xf59   :  { %3751 = vrot.lane.b32.xlu0 %v3609_v53, %s8482_s0  ;;  %v3567_v0 = vsel %vm165_vm2, %v3556_v6, %v11362_v26 }
 0xf5b   :  { %v11367_v60 = vpop.permute.xlu0 %3559 }
 0xf5c   :  { %v11369_v38 = vpop.permute.xlu1 %3581 }
 0xf5d   :  { %3719 = vrot.lane.b32.xlu0 %v3567_v0, %s8482_s0  ;;  %v3589_v16 = vsel %vm186_vm1, %v11352_v61, %v11369_v38 }
 0xf5f   :  { %v11374_v12 = vpop.permute.xlu0 %3583 }
 0xf60   :  { %v11376_v39 = vpop.permute.xlu1 %3537 }
 0xf61   :  { %3737 = vrot.lane.b32.xlu0 %v3589_v16, %s8482_s0  ;;  %v3545_v6 = vsel %vm142_vm3, %v11287_v47, %v11376_v39 }
 0xf63   :  { %v11382_v34 = vpop.permute.xlu0 %3539 }
 0xf64   :  { %v11384_v46 = vpop.permute.xlu1 %3561 }
 0xf65   :  { %3705 = vrot.lane.b32.xlu0 %v3545_v6, %s8482_s0  ;;  %v3569_v57 = vsel %vm165_vm2, %v11367_v60, %v11384_v46 }
 0xf67   :  { %v11390_v55 = vpop.permute.xlu0 %3563 }
 0xf68   :  { %v11392_v48 = vpop.permute.xlu1 %3519 }
 0xf69   :  { %3723 = vrot.lane.b32.xlu0 %v3569_v57, %s8482_s0  ;;  %v3528_v37 = vsel %vm123_vm4, %v3518_v42, %v11392_v48 }
 0xf6b   :  { %v11398_v59 = vpop.permute.xlu0 %3521 }
 0xf6c   :  { %v3542_v27 = vpop.permute.xlu1 %3541 }
 0xf6d   :  { %3711 = vrot.lane.b32.xlu1 %v3542_v27, %s8482_s0  ;;  %3691 = vrot.lane.b32.xlu0 %v3528_v37, %s8482_s0  ;;  %v3547_v52 = vsel %vm142_vm3, %v11382_v34, %v3542_v27 }
 0xf6f   :  { %v11404_v13 = vpop.permute.xlu0 %3499 }
 0xf70   :  { %v11406_v54 = vpop.permute.xlu1 %3501  ;;  %v3508_v42 = vsel %vm102_vm5, %v11311_v5, %v11404_v13 }
 0xf71   :  { %3709 = vrot.lane.b32.xlu0 %v3547_v52, %s8482_s0  ;;  %v3606_v52 = vsel %vm207_vm0, %v11266_v49, %v11270_v50  ;;  %v3565_v49 = vsel %vm165_vm2, %v11281_v63, %v11279_v35  ;;  %v3526_v35 = vsel %vm123_vm4, %v11296_v14, %v11294_v36  ;;  %v3486_v36 = vsel %vm81_vm6, %v11316_v43, %v11318_v10 }
 0xf73   :  { %v3524_v53 = vpop.permute.xlu0 %3523 }
 0xf74   :  { %v11411_v0 = vpop.permute.xlu1 %3479  ;;  %3697 = vrot.lane.b32.xlu1 %v3524_v53, %s8482_s0  ;;  %v3530_v57 = vsel %vm123_vm4, %v11398_v59, %v3524_v53 }
 0xf75   :  { %3677 = vrot.lane.b32.xlu0 %v3508_v42, %s8482_s0  ;;  %v3488_v37 = vsel %vm81_vm6, %v11323_v17, %v11411_v0 }
 0xf77   :  { %v11418_v16 = vpop.permute.xlu0 %3481 }
 0xf78   :  { %v3504_v6 = vpop.permute.xlu1 %3503 }
 0xf79   :  { %3683 = vrot.lane.b32.xlu1 %v3504_v6, %s8482_s0  ;;  %3695 = vrot.lane.b32.xlu0 %v3530_v57, %s8482_s0  ;;  %v3510_v53 = vsel %vm102_vm5, %v11406_v54, %v3504_v6  ;;  %v3586_v57 = vsel %vm186_vm1, %v11276_v19, %v11274_v56  ;;  %v3544_v56 = vsel %vm142_vm3, %v11289_v2, %v11287_v47 }
 0xf7a   :  { %v3507_v2 = vsel %vm102_vm5, %v11306_v51, %v11311_v5  ;;  %v11488_v51 = vld [vmem:[%s15063_s1 + $0x54] ss:$8 sps:$4 sm:$0xff]   ;;  %v3607_v5 = vsel %vm207_vm0, %v11270_v50, %v11329_v25  ;;  %v3588_v50 = vsel %vm186_vm1, %v11346_v58, %v11352_v61  ;;  %v3610_v25 = vsel %vm207_vm0, %v11354_v24, %v11360_v28 }
 0xf7b   :  { %v3484_v27 = vpop.permute.xlu0 %3483  ;;  %8199 = vmatprep.mubr.msk.bf16.mxu1 %vm481_vm8, %v11488_v51  ;;  %8200 = vmatprep.mubr.msk.bf16.mxu0 %vm481_vm8, %v11488_v51  ;;  %v3590_v58 = vsel %vm186_vm1, %v11369_v38, %v11374_v12  ;;  %v3546_v24 = vsel %vm142_vm3, %v11376_v39, %v11382_v34  ;;  %v3570_v28 = vsel %vm165_vm2, %v11384_v46, %v11390_v55 }
 0xf7c   :  { %v11436_v42 = vpop.permute.xlu1 %3619  ;;  %v3490_v17 = vsel %vm81_vm6, %v11418_v16, %v3484_v27  ;;  %v3509_v12 = vsel %vm102_vm5, %v11404_v13, %v11406_v54  ;;  %v3489_v34 = vsel %vm81_vm6, %v11411_v0, %v11418_v16 }
 0xf7d   :  { %3669 = vrot.lane.b32.xlu1 %v3484_v27, %s8482_s0  ;;  %3663 = vrot.lane.b32.xlu0 %v3488_v37, %s8482_s0 }
 0xf7f   :  { %v3618_v37 = vpop.permute.xlu0 %3617 }
 0xf80   :  { %v3627_v6 = vsel %vm228_vm7, %v11344_v15, %v3618_v37  ;;  %v3525_v15 = vsel %vm123_vm4, %v11301_v11, %v11296_v14  ;;  %v3485_v14 = vsel %vm81_vm6, %v11325_v21, %v11316_v43  ;;  %v3625_v43 = vsel %vm228_vm7, %v11335_v9, %v11337_v22 }
 0xf81   :  { %3745 = vrot.lane.b32.xlu1 %v3606_v52, %s8482_s0  ;;  %3681 = vrot.lane.b32.xlu0 %v3510_v53, %s8482_s0  ;;  %v3622_v52 = vpop.permute.xlu1 %3621  ;;  %v3568_v9 = vsel %vm165_vm2, %v11362_v26, %v11367_v60  ;;  %v3529_v60 = vsel %vm123_vm4, %v11392_v48, %v11398_v59  ;;  %v3628_v59 = vsel %vm228_vm7, %v3618_v37, %v11436_v42 }
 0xf82   :  { %v3629_v19 = vsel %vm228_vm7, %v11436_v42, %v3622_v52 }
 0xf83   :  { %v3624_v63 = vpop.permute.xlu0 %3623 }
 0xf84   :  { %v3630_v54 = vsel %vm228_vm7, %v3622_v52, %v3624_v63 }
 0xf85   :  { %3731 = vrot.lane.b32.xlu1 %v3586_v57, %s8482_s0  ;;  %3667 = vrot.lane.b32.xlu0 %v3490_v17, %s8482_s0  ;;  %v11538_v39 = vpop.permute.xlu1 %3647 }
 0xf87   :  { %v11467_v47 = vpop.permute.xlu0 %3645 }
 0xf89   :  { %3715 = vrot.lane.b32.xlu1 %v3565_v49, %s8482_s0  ;;  %3761 = vrot.lane.b32.xlu0 %v3627_v6, %s8482_s0  ;;  %v11544_v55 = vpop.permute.xlu1 %3651 }
 0xf8b   :  { %v11476_v27 = vpop.permute.xlu0 %3643 }
 0xf8d   :  { %3703 = vrot.lane.b32.xlu1 %v3544_v56, %s8482_s0  ;;  %3765 = vrot.lane.b32.xlu0 %v3629_v19, %s8482_s0  ;;  %v3742_v13 = vpop.permute.xlu1 %3741 }
 0xf8f   :  { %v11483_v11 = vpop.permute.xlu0 %3649 }
 0xf91   :  { %3687 = vrot.lane.b32.xlu1 %v3526_v35, %s8482_s0 }
 0xf93   :  { %v11501_v10 = vpop.permute.xlu0 %3653 }
 0xf95   :  { %3685 = vrot.lane.b32.xlu1 %v3525_v15, %s8482_s0 }
 0xf96   :  { %v3714_v0 = vpop.permute.xlu1 %3713 }
 0xf97   :  { %v3728_v21 = vpop.permute.xlu0 %3727 }
 0xf99   :  { %3675 = vrot.lane.b32.xlu1 %v3507_v2, %s8482_s0 }
 0xf9b   :  { %v3700_v22 = vpop.permute.xlu0 %3699 }
 0xf9d   :  { %3659 = vrot.lane.b32.xlu1 %v3486_v36, %s8482_s0 }
 0xf9f   :  { %v3744_v61 = vpop.permute.xlu0 %3743 }
 0xfa0   :  { %v3811_v35 = vsel %vm372_vm9, %v3742_v13, %v3744_v61 }
 0xfa1   :  { %3657 = vrot.lane.b32.xlu1 %v3485_v14, %s8482_s0 }
 0xfa3   :  { %v3730_v26 = vpop.permute.xlu0 %3729 }
 0xfa4   :  { %v3805_v36 = vsel %vm372_vm9, %v3728_v21, %v3730_v26 }
 0xfa5   :  { %3747 = vrot.lane.b32.xlu1 %v3607_v5, %s8482_s0 }
 0xfa7   :  { %v11532_v38 = vpop.permute.xlu0 %3717 }
 0xfa9   :  { %3757 = vrot.lane.b32.xlu1 %v3625_v43, %s8482_s0 }
 0xfab   :  { %v3702_v46 = vpop.permute.xlu0 %3701 }
 0xfad   :  { %3735 = vrot.lane.b32.xlu1 %v3588_v50, %s8482_s0 }
 0xfaf   :  { %v11548_v48 = vpop.permute.xlu0 %3689 }
 0xfb1   :  { %3753 = vrot.lane.b32.xlu1 %v3610_v25, %s8482_s0 }
 0xfb3   :  { %v3674_v53 = vpop.permute.xlu0 %3673 }
 0xfb5   :  { %3721 = vrot.lane.b32.xlu1 %v3568_v9, %s8482_s0 }
 0xfb7   :  { %v3672_v16 = vpop.permute.xlu0 %3671 }
 0xfb9   :  { %3739 = vrot.lane.b32.xlu1 %v3590_v58, %s8482_s0  ;;  %v3793_v58 = vsel %vm372_vm9, %v3700_v22, %v3702_v46 }
 0xfbd   :  { %3707 = vrot.lane.b32.xlu1 %v3546_v24, %s8482_s0 }
 0xfbe   :  { %v11555_v57 = vpop.permute.xlu1 %3755 }
 0xfc1   :  { %3725 = vrot.lane.b32.xlu1 %v3570_v28, %s8482_s0 }
 0xfc5   :  { %3693 = vrot.lane.b32.xlu1 %v3529_v60, %s8482_s0 }
 0xfc9   :  { %3679 = vrot.lane.b32.xlu1 %v3509_v12, %s8482_s0 }
 0xfcd   :  { %3665 = vrot.lane.b32.xlu1 %v3489_v34, %s8482_s0 }
 0xfd1   :  { %3655 = vrot.lane.b32.xlu1 %v11226_v41, %s8482_s0  ;;  %v11559_v41 = vpop.permute.xlu0 %3661 }
 0xfd5   :  { %3763 = vrot.lane.b32.xlu1 %v3628_v59, %s8482_s0  ;;  %v11563_v6 = vpop.permute.xlu0 %3749  ;;  %v3781_v59 = vsel %vm372_vm9, %v3672_v16, %v3674_v53 }
 0xfd9   :  { %3767 = vrot.lane.b32.xlu1 %v3630_v54, %s8482_s0  ;;  %v11569_v52 = vpop.permute.xlu0 %3759 }
 0xfdd   :  { %v3734_v63 = vpop.permute.xlu0 %3733 }
 0xfdf   :  { %v11557_v17 = vpop.permute.xlu1 %3711 }
 0xfe1   :  { %v3752_v50 = vpop.permute.xlu0 %3751 }
 0xfe5   :  { %v3720_v21 = vpop.permute.xlu0 %3719 }
 0xfe6   :  { %v11561_v49 = vpop.permute.xlu1 %3697 }
 0xfe9   :  { %v3738_v60 = vpop.permute.xlu0 %3737 }
 0xfeb   :  { %v11565_v42 = vpop.permute.xlu1 %3683 }
 0xfed   :  { %v3706_v22 = vpop.permute.xlu0 %3705 }
 0xfef   :  { %v11567_v37 = vpop.permute.xlu1 %3669 }
 0xff3   :  { %v3746_v56 = vpop.permute.xlu1 %3745 }
 0xff4   :  { %v3812_v19 = vsel %vm372_vm9, %v3744_v61, %v3746_v56 }
 0xff5   :  { %3880 = vmatprep.subr.bf16.mxu1 %v3812_v19  ;;  %v3724_v19 = vpop.permute.xlu0 %3723 }
 0xff6   :  { %3881 = vmatpush1.bf16.msra.mxu1 %v3811_v35  ;;  %v3770_v35 = vsel %vm372_vm9, %v11467_v47, %v11538_v39 }
 0xff7   :  { %v3732_v15 = vpop.permute.xlu1 %3731 }
 0xff8   :  { %v3806_v2 = vsel %vm372_vm9, %v3730_v26, %v3732_v15 }
 0xff9   :  { %3882 = vmatprep.subr.bf16.mxu1 %v3806_v2 }
 0xffa   :  { %3883 = vmatpush1.bf16.msra.mxu1 %v3805_v36 }
 0xffb   :  { %v3716_v14 = vpop.permute.xlu1 %3715 }
 0xffc   :  { %v3800_v5 = vsel %vm372_vm9, %v3716_v14, %v11532_v38  ;;  %v3799_v43 = vsel %vm372_vm9, %v3714_v0, %v3716_v14  ;;  %v3692_v14 = vpop.permute.xlu0 %3691 }
 0xffd   :  { %3884 = vmatprep.subr.bf16.mxu1 %v3800_v5 }
 0xffe   :  { %3885 = vmatpush1.bf16.msra.mxu1 %v3799_v43 }
 0xfff   :  { %v11578_v25 = vpop.permute.xlu1 %3703 }
0x1000   :  { %v3794_v9 = vsel %vm372_vm9, %v3702_v46, %v11578_v25 }
0x1001   :  { %3886 = vmatprep.subr.bf16.mxu1 %v3794_v9 }
0x1002   :  { %3887 = vmatpush1.bf16.msra.mxu1 %v3793_v58  ;;  %v3710_v58 = vpop.permute.xlu0 %3709 }
0x1003   :  { %v3688_v61 = vpop.permute.xlu1 %3687 }
0x1004   :  { %v3788_v24 = vsel %vm372_vm9, %v3688_v61, %v11548_v48 }
0x1005   :  { %3888 = vmatprep.subr.bf16.mxu1 %v3788_v24 }
0x1007   :  { %v3686_v28 = vpop.permute.xlu1 %3685 }
0x1008   :  { %v3787_v26 = vsel %vm372_vm9, %v3686_v28, %v3688_v61  ;;  %v3807_v61 = vsel %vm372_vm9, %v3732_v15, %v3734_v63  ;;  %v3815_v28 = vsel %vm372_vm9, %v11563_v6, %v3752_v50 }
0x1009   :  { %3889 = vmatpush1.bf16.msra.mxu1 %v3787_v26  ;;  %v3678_v26 = vpop.permute.xlu0 %3677 }
0x100b   :  { %v11586_v12 = vpop.permute.xlu1 %3675 }
0x100c   :  { %v3782_v34 = vsel %vm372_vm9, %v3674_v53, %v11586_v12  ;;  %v3769_v53 = vsel %vm372_vm9, %v11476_v27, %v11467_v47  ;;  %v11610_v47 = vld [vmem:[%s15063_s1 + $0x50] ss:$8 sps:$4 sm:$0xff]  }
0x100d   :  { %3890 = vmatprep.subr.bf16.mxu1 %v3782_v34 }
0x100e   :  { %3891 = vmatpush1.bf16.msra.mxu1 %v3781_v59 }
0x100f   :  { %v3660_v46 = vpop.permute.xlu1 %3659 }
0x1010   :  { %v3776_v13 = vsel %vm372_vm9, %v3660_v46, %v11559_v41 }
0x1011   :  { %3892 = vmatprep.subr.bf16.mxu1 %v3776_v13 }
0x1013   :  { %v3658_v54 = vpop.permute.xlu1 %3657 }
0x1014   :  { %v3775_v0 = vsel %vm372_vm9, %v3658_v54, %v3660_v46  ;;  %v3696_v46 = vpop.permute.xlu0 %3695 }
0x1015   :  { %3893 = vmatpush1.bf16.msra.mxu1 %v3775_v0 }
0x1016   :  { %3894 = vmatprep.subr.bf16.mxu1 %v3770_v35 }
0x1017   :  { %v3748_v2 = vpop.permute.xlu1 %3747 }
0x1018   :  { %v3814_v16 = vsel %vm372_vm9, %v3748_v2, %v11563_v6  ;;  %v3813_v36 = vsel %vm372_vm9, %v3746_v56, %v3748_v2  ;;  %v3664_v0 = vpop.permute.xlu0 %3663 }
0x1019   :  { %3895 = vmatpush1.bf16.msra.mxu1 %v3769_v53  ;;  %3923 = vmatprep.subr.bf16.mxu0 %v3814_v16 }
0x101a   :  { %3924 = vmatpush1.bf16.msra.mxu0 %v3813_v36 }
0x101b   :  { %v3758_v5 = vpop.permute.xlu1 %3757 }
0x101c   :  { %v3818_v43 = vsel %vm372_vm9, %v3758_v5, %v11569_v52  ;;  %v3817_v9 = vsel %vm372_vm9, %v11555_v57, %v3758_v5  ;;  %v3682_v16 = vpop.permute.xlu0 %3681  ;;  %v3783_v5 = vsel %vm372_vm9, %v11586_v12, %v3678_v26  ;;  %v3772_v12 = vsel %vm372_vm9, %v11483_v11, %v11544_v55 }
0x101d   :  { %3910 = vmatprep.subr.bf16.mxu1 %v3818_v43 }
0x101e   :  { %3911 = vmatpush2.bf16.msra.mxu1 %v3817_v9 }
0x101f   :  { %v3736_v27 = vpop.permute.xlu1 %3735 }
0x1020   :  { %v3808_v56 = vsel %vm372_vm9, %v3734_v63, %v3736_v27  ;;  %v3801_v63 = vsel %vm372_vm9, %v11532_v38, %v3720_v21  ;;  %v3809_v13 = vsel %vm372_vm9, %v3736_v27, %v3738_v60  ;;  %v3777_v27 = vsel %vm372_vm9, %v11559_v41, %v3664_v0 }
0x1021   :  { %3925 = vmatprep.subr.bf16.mxu0 %v3808_v56  ;;  %3913 = vmatmul.mubr.bf16.vlgmr.msra.gmra.mxu1 %v11610_v47 }
0x1022   :  { %3926 = vmatpush1.bf16.msra.mxu0 %v3807_v61  ;;  %8201 = vmatprep.mubr.msk.bf16.mxu1 %vm481_vm8, %v11488_v51 }
0x1023   :  { %v3754_v57 = vpop.permute.xlu1 %3753 }
0x1024   :  { %v3816_v24 = vsel %vm372_vm9, %v3752_v50, %v3754_v57  ;;  %v3795_v50 = vsel %vm372_vm9, %v11578_v25, %v3706_v22  ;;  %v3789_v25 = vsel %vm372_vm9, %v11548_v48, %v3692_v14  ;;  %v3786_v48 = vsel %vm372_vm9, %v3682_v16, %v11565_v42 }
0x1025   :  { %3966 = vmatprep.subr.bf16.mxu1 %v3816_v24  ;;  %v3771_v57 = vsel %vm372_vm9, %v11538_v39, %v11483_v11 }
0x1026   :  { %3967 = vmatpush1.bf16.msra.mxu1 %v3815_v28 }
0x1027   :  { %v3722_v34 = vpop.permute.xlu1 %3721 }
0x1028   :  { %v3802_v59 = vsel %vm372_vm9, %v3720_v21, %v3722_v34  ;;  %v3803_v21 = vsel %vm372_vm9, %v3722_v34, %v3724_v19  ;;  %v3773_v34 = vsel %vm372_vm9, %v11544_v55, %v11501_v10 }
0x1029   :  { %3927 = vmatprep.subr.bf16.mxu0 %v3802_v59 }
0x102a   :  { %3928 = vmatpush1.bf16.msra.mxu0 %v3801_v63 }
0x102b   :  { %v3740_v15 = vpop.permute.xlu1 %3739 }
0x102c   :  { %v3810_v51 = vsel %vm372_vm9, %v3738_v60, %v3740_v15  ;;  %v3798_v60 = vsel %vm372_vm9, %v3710_v58, %v11557_v17 }
0x102d   :  { %3968 = vmatprep.subr.bf16.mxu1 %v3810_v51 }
0x102e   :  { %3969 = vmatpush1.bf16.msra.mxu1 %v3809_v13 }
0x102f   :  { %v3708_v54 = vpop.permute.xlu1 %3707 }
0x1030   :  { %v3796_v6 = vsel %vm372_vm9, %v3706_v22, %v3708_v54  ;;  %v3797_v22 = vsel %vm372_vm9, %v3708_v54, %v3710_v58 }
0x1031   :  { %3929 = vmatprep.subr.bf16.mxu0 %v3796_v6 }
0x1032   :  { %3930 = vmatpush1.bf16.msra.mxu0 %v3795_v50 }
0x1033   :  { %v3726_v35 = vpop.permute.xlu1 %3725 }
0x1034   :  { %v3804_v38 = vsel %vm372_vm9, %v3724_v19, %v3726_v35  ;;  %v3792_v19 = vsel %vm372_vm9, %v3696_v46, %v11561_v49 }
0x1035   :  { %3970 = vmatprep.subr.bf16.mxu1 %v3804_v38 }
0x1036   :  { %3971 = vmatpush1.bf16.msra.mxu1 %v3803_v21 }
0x1037   :  { %3972 = vmatprep.subr.bf16.mxu1 %v3798_v60  ;;  %v3694_v2 = vpop.permute.xlu1 %3693 }
0x1038   :  { %v3790_v53 = vsel %vm372_vm9, %v3692_v14, %v3694_v2  ;;  %v3791_v43 = vsel %vm372_vm9, %v3694_v2, %v3696_v46  ;;  %v3668_v14 = vpop.permute.xlu0 %3667 }
0x1039   :  { %3931 = vmatprep.subr.bf16.mxu0 %v3790_v53  ;;  %v3780_v42 = vsel %vm372_vm9, %v3668_v14, %v11567_v37 }
0x103a   :  { %3932 = vmatpush1.bf16.msra.mxu0 %v3789_v25  ;;  %3973 = vmatpush1.bf16.msra.mxu1 %v3797_v22 }
0x103b   :  { %3974 = vmatprep.subr.bf16.mxu1 %v3792_v19  ;;  %v3680_v36 = vpop.permute.xlu1 %3679 }
0x103c   :  { %v3784_v17 = vsel %vm372_vm9, %v3678_v26, %v3680_v36  ;;  %v3785_v56 = vsel %vm372_vm9, %v3680_v36, %v3682_v16  ;;  %v3762_v61 = vpop.permute.xlu0 %3761 }
0x103d   :  { %3933 = vmatprep.subr.bf16.mxu0 %v3784_v17  ;;  %v3819_v37 = vsel %vm372_vm9, %v11569_v52, %v3762_v61 }
0x103e   :  { %3934 = vmatpush1.bf16.msra.mxu0 %v3783_v5  ;;  %3975 = vmatpush1.bf16.msra.mxu1 %v3791_v43 }
0x103f   :  { %3976 = vmatprep.subr.bf16.mxu1 %v3786_v48  ;;  %v3666_v9 = vpop.permute.xlu1 %3665 }
0x1040   :  { %v3778_v49 = vsel %vm372_vm9, %v3664_v0, %v3666_v9  ;;  %v3779_v41 = vsel %vm372_vm9, %v3666_v9, %v3668_v14  ;;  %v3766_v11 = vpop.permute.xlu0 %3765 }
0x1041   :  { %3935 = vmatprep.subr.bf16.mxu0 %v3778_v49 }
0x1042   :  { %3936 = vmatpush1.bf16.msra.mxu0 %v3777_v27  ;;  %3977 = vmatpush1.bf16.msra.mxu1 %v3785_v56 }
0x1043   :  { %3937 = vmatprep.subr.bf16.mxu0 %v3772_v12  ;;  %3978 = vmatprep.subr.bf16.mxu1 %v3780_v42  ;;  %v3656_v58 = vpop.permute.xlu1 %3655 }
0x1044   :  { %v3774_v24 = vsel %vm372_vm9, %v11501_v10, %v3656_v58 }
0x1046   :  { %3938 = vmatpush1.bf16.msra.mxu0 %v3771_v57  ;;  %3979 = vmatpush1.bf16.msra.mxu1 %v3779_v41 }
0x1047   :  { %3980 = vmatprep.subr.bf16.mxu1 %v3774_v24  ;;  %v3764_v28 = vpop.permute.xlu1 %3763 }
0x1048   :  { %v3820_v26 = vsel %vm372_vm9, %v3762_v61, %v3764_v28  ;;  %v3821_v63 = vsel %vm372_vm9, %v3764_v28, %v3766_v11 }
0x1049   :  { %3953 = vmatprep.subr.bf16.mxu0 %v3820_v26 }
0x104a   :  { %3954 = vmatpush2.bf16.msra.mxu0 %v3819_v37  ;;  %3981 = vmatpush1.bf16.msra.mxu1 %v3773_v34 }
0x104b   :  { %v3768_v39 = vpop.permute.xlu1 %3767 }
0x104c   :  { %v3822_v59 = vsel %vm372_vm9, %v3766_v11, %v3768_v39 }
0x104d   :  { %3956 = vmatmul.mubr.bf16.vlgmr.msra.gmra.mxu0 %v11610_v47  ;;  %3996 = vmatprep.subr.bf16.mxu1 %v3822_v59 }
0x104e   :  { %3997 = vmatpush2.bf16.msra.mxu1 %v3821_v63 }
0x1051   :  { %3999 = vmatmul.mubr.bf16.vlgmr.msra.gmra.mxu1 %v11610_v47 }
0x10e1   :  { %v11669_v15 = vpop.f32.mrf.mxu1 }
0x10e2   :  { %v4009_v10 = vmul.f32 %v11669_v15, %v9132_v20 }
0x10e3   :  { %v11671_v52 = vpop.f32.mrf.mxu1 }
0x10e4   :  { %v4010_v55 = vmul.f32 %v11671_v52, %v9134_v23  ;;  %v4037_v54 = vmul.f32 %v4009_v10, %v11669_v15 }
0x10e5   :  { %v11673_v51 = vpop.f32.mrf.mxu1 }
0x10e6   :  { %v4015_v13 = vmul.f32 %v11673_v51, %v9132_v20  ;;  %v4038_v6 = vmul.f32 %v4010_v55, %v11671_v52  ;;  %v4021_v0 = vadd.f32 %v4010_v55, %v4009_v10 }
0x10e7   :  { %v11679_v46 = vpop.f32.mrf.mxu1 }
0x10e8   :  { %v4016_v47 = vmul.f32 %v11679_v46, %v9134_v23  ;;  %v4043_v38 = vmul.f32 %v4015_v13, %v11673_v51  ;;  %v4049_v2 = vadd.f32 %v4038_v6, %v4037_v54 }
0x10ea   :  { %v4044_v21 = vmul.f32 %v4016_v47, %v11679_v46  ;;  %v4028_v22 = vadd.f32 %v4016_v47, %v4015_v13 }
0x10ec   :  { %v4056_v14 = vadd.f32 %v4044_v21, %v4043_v38 }
0x110d   :  { %v11687_v50 = vpop.f32.mrf.mxu0 }
0x110e   :  { %v4011_v35 = vmul.f32 %v11687_v50, %v9138_v29 }
0x110f   :  { %v11693_v60 = vpop.f32.mrf.mxu0 }
0x1110   :  { %v4022_v53 = vadd.f32 %v4021_v0, %v4011_v35  ;;  %v4039_v16 = vmul.f32 %v4011_v35, %v11687_v50  ;;  %v4012_v25 = vmul.f32 %v11693_v60, %v9152_v45 }
0x1111   :  { %v11698_v19 = vpop.f32.mrf.mxu0  ;;  %v11700_v36 = vpop.f32.mrf.mxu1 }
0x1112   :  { %v4050_v17 = vadd.f32 %v4049_v2, %v4039_v16  ;;  %v4023_v5 = vadd.f32 %v4022_v53, %v4012_v25  ;;  %v4040_v43 = vmul.f32 %v4012_v25, %v11693_v60  ;;  %v4017_v48 = vmul.f32 %v11698_v19, %v9138_v29 }
0x1113   :  { %v4013_v9 = vmul.f32 %v11700_v36, %v9171_v18  ;;  %v11707_v49 = vpop.f32.mrf.mxu0  ;;  %v11709_v27 = vpop.f32.mrf.mxu1 }
0x1114   :  { %v4051_v56 = vadd.f32 %v4050_v17, %v4040_v43  ;;  %v4029_v12 = vadd.f32 %v4028_v22, %v4017_v48  ;;  %v4045_v42 = vmul.f32 %v4017_v48, %v11698_v19  ;;  %v4018_v58 = vmul.f32 %v11707_v49, %v9152_v45 }
0x1115   :  { %v4024_v61 = vadd.f32 %v4023_v5, %v4013_v9  ;;  %v4041_v57 = vmul.f32 %v4013_v9, %v11700_v36  ;;  %v4014_v41 = vmul.f32 %v11709_v27, %v9177_v3  ;;  %v11717_v24 = vpop.f32.mrf.mxu1 }
0x1116   :  { %v4057_v28 = vadd.f32 %v4056_v14, %v4045_v42  ;;  %v4030_v26 = vadd.f32 %v4029_v12, %v4018_v58  ;;  %v4046_v37 = vmul.f32 %v4018_v58, %v11707_v49  ;;  %v4019_v34 = vmul.f32 %v11717_v24, %v9171_v18 }
0x1117   :  { %v4052_v11 = vadd.f32 %v4051_v56, %v4041_v57  ;;  %v4042_v39 = vmul.f32 %v4014_v41, %v11709_v27  ;;  %v11723_v59 = vpop.f32.mrf.mxu1  ;;  %v4025_v63 = vadd.f32 %v4024_v61, %v4014_v41  ;;  %v8202_v61 = vld [vmem:[%s15065_s2 + $0x50] sm:$0xff] }
0x1118   :  { %v4058_v10 = vadd.f32 %v4057_v28, %v4046_v37  ;;  %v4031_v55 = vadd.f32 %v4030_v26, %v4019_v34  ;;  %v4047_v13 = vmul.f32 %v4019_v34, %v11717_v24  ;;  %v4020_v47 = vmul.f32 %v11723_v59, %v9177_v3  ;;  %v8204_v28 = vld [vmem:[%s15066_s3 + $0x50] sm:$0xff]  ;;  %v8203_v26 = vld [vmem:[%s15065_s2 + $0x58] sm:$0xff] }
0x1119   :  { %4026 = vadd.xlane.f32.xlu0 %v4025_v63  ;;  %v4053_v35 = vadd.f32 %v4052_v11, %v4042_v39  ;;  %v8205_v63 = vld [vmem:[%s15066_s3 + $0x58] sm:$0xff] }
0x111a   :  { %v4032_v54 = vadd.f32 %v4031_v55, %v4020_v47  ;;  %v4059_v6 = vadd.f32 %v4058_v10, %v4047_v13  ;;  %v4048_v0 = vmul.f32 %v4020_v47, %v11723_v59 }
0x111c   :  { %4033 = vadd.xlane.f32.xlu1 %v4032_v54  ;;  %v4060_v38 = vadd.f32 %v4059_v6, %v4048_v0 }
0x111d   :  { %4054 = vadd.xlane.f32.xlu0 %v4053_v35 }
0x1121   :  { %4061 = vadd.xlane.f32.xlu0 %v4060_v38 }
0x11a2   :  { %v4027_v21 = vpop.xlane.xlu0 %4026 }
0x11a3   :  { %v4035_v2 = vmul.f32 0.001953125, %v4027_v21 }
0x11a5   :  { %v4034_v53 = vpop.xlane.xlu1 %4033  ;;  %v4065_v25 = vmul.f32 %v4035_v2, %v4035_v2 }
0x11a6   :  { %v4055_v16 = vpop.xlane.xlu0 %4054  ;;  %v4036_v17 = vmul.f32 0.001953125, %v4034_v53 }
0x11a7   :  { %v4063_v22 = vmul.f32 0.001953125, %v4055_v16 }
0x11a8   :  { %v4066_v14 = vmul.f32 %v4036_v17, %v4036_v17 }
0x11a9   :  { %v4067_v5 = vsub.f32 %v4063_v22, %v4065_v25 }
0x11aa   :  { %v4062_v43 = vpop.xlane.xlu0 %4061 }
0x11ab   :  { %v4069_v48 = vmax.f32 %v4067_v5, 0.0  ;;  %v4064_v9 = vmul.f32 0.001953125, %v4062_v43 }
0x11ad   :  { %v4074_v56 = vadd.f32 1e-05, %v4069_v48  ;;  %v4068_v12 = vsub.f32 %v4064_v9, %v4066_v14 }
0x11af   :  { %8446 = vrsqrt.f32 %v4074_v56  ;;  %v4070_v42 = vmax.f32 %v4068_v12, 0.0 }
0x11b1   :  { %v4075_v58 = vadd.f32 1e-05, %v4070_v42 }
0x11b3   :  { %8448 = vrsqrt.f32 %v4075_v58 }
0x11bc   :  { %v8447_v57 = vpop.eup %8446 }
0x11bd   :  { %v4078_v41 = vmul.f32 %v8447_v57, %v8202_v61  ;;  %v15141_v57 = vmax.f32 %v10490_v30, 0.0  ;;  %v15146_v30 = vmax.f32 %v10505_v31, 0.0 }
0x11bf   :  { %4089 = vperm.xlu1 %8395, %v4078_v41   ;;  %v4083_v37 = vmul.f32 %v4078_v41, %v4035_v2 }
0x11c0   :  { %v8449_v34 = vpop.eup %8448 }
0x11c1   :  { %v4085_v11 = vsub.f32 %v8204_v28, %v4083_v37  ;;  %v4079_v39 = vmul.f32 %v8449_v34, %v8203_v26  ;;  %v15142_v28 = vmax.f32 %v10493_v7, 0.0 }
0x11c3   :  { %4111 = vperm.xlu1 %8395, %v4085_v11   ;;  %4094 = vperm.xlu0 %8396, %v4079_v39   ;;  %v4084_v10 = vmul.f32 %v4079_v39, %v4036_v17  ;;  %v15143_v11 = vmax.f32 %v10496_v4, 0.0 }
0x11c5   :  { %v4086_v55 = vsub.f32 %v8205_v63, %v4084_v10  ;;  %v15144_v63 = vmax.f32 %v10499_v44, 0.0 }
0x11c7   :  { %4116 = vperm.xlu1 %8395, %v4086_v55   ;;  %v15145_v55 = vmax.f32 %v10502_v62, 0.0 }
0x123a   :  { %v4090_v13 = vpop.permute.xlu1 %4089 }
0x123b   :  { %v4097_v47 = vmul.f32 %v4090_v13, %v11669_v15  ;;  %v4098_v54 = vmul.f32 %v4090_v13, %v11671_v52  ;;  %v4099_v6 = vmul.f32 %v4090_v13, %v11687_v50  ;;  %v4100_v0 = vmul.f32 %v4090_v13, %v11693_v60 }
0x123c   :  { %v4101_v21 = vmul.f32 %v4090_v13, %v11700_v36  ;;  %v4102_v2 = vmul.f32 %v4090_v13, %v11709_v27 }
0x123e   :  { %v4095_v35 = vpop.permute.xlu0 %4094  ;;  %v4112_v38 = vpop.permute.xlu1 %4111 }
0x123f   :  { %v4103_v53 = vmul.f32 %v4095_v35, %v11673_v51  ;;  %v4104_v16 = vmul.f32 %v4095_v35, %v11679_v46  ;;  %v4105_v25 = vmul.f32 %v4095_v35, %v11698_v19  ;;  %v4106_v15 = vmul.f32 %v4095_v35, %v11707_v49 }
0x1240   :  { %v4119_v22 = vadd.f32 %v4112_v38, %v4097_v47  ;;  %v4120_v52 = vadd.f32 %v4112_v38, %v4098_v54  ;;  %v4121_v17 = vadd.f32 %v4112_v38, %v4099_v6  ;;  %v4122_v50 = vadd.f32 %v4112_v38, %v4100_v0 }
0x1241   :  { %v4123_v5 = vadd.f32 %v4112_v38, %v4101_v21  ;;  %v4124_v60 = vadd.f32 %v4112_v38, %v4102_v2  ;;  %v4107_v43 = vmul.f32 %v4095_v35, %v11717_v24  ;;  %v4108_v36 = vmul.f32 %v4095_v35, %v11723_v59 }
0x1242   :  { %v4131_v48 = vmax.f32 %v4119_v22, 0.0  ;;  %v4132_v27 = vmax.f32 %v4120_v52, 0.0  ;;  %v4117_v14 = vpop.permute.xlu1 %4116  ;;  %v4133_v51 = vmax.f32 %v4121_v17, 0.0  ;;  %v4134_v9 = vmax.f32 %v4122_v50, 0.0 }
0x1243   :  { %v4135_v46 = vmax.f32 %v4123_v5, 0.0  ;;  %v4136_v56 = vmax.f32 %v4124_v60, 0.0  ;;  %v4125_v12 = vadd.f32 %v4117_v14, %v4103_v53  ;;  %v4126_v42 = vadd.f32 %v4117_v14, %v4104_v16 }
0x1244   :  { %v4143_v19 = vmul.f32 %v4131_v48, %v9132_v20  ;;  %v4144_v49 = vmul.f32 %v4132_v27, %v9134_v23  ;;  %v4145_v58 = vmul.f32 %v4133_v51, %v9138_v29  ;;  %v4146_v61 = vmul.f32 %v4134_v9, %v9152_v45 }
0x1245   :  { %v4147_v24 = vmul.f32 %v4135_v46, %v9171_v18  ;;  %v4148_v59 = vmul.f32 %v4136_v56, %v9177_v3  ;;  %v4127_v37 = vadd.f32 %v4117_v14, %v4105_v25  ;;  %v4128_v34 = vadd.f32 %v4117_v14, %v4106_v15 }
0x1246   :  { %v11761_v41 = vadd.f32 %v4143_v19, %v15141_v57  ;;  %v11765_v26 = vadd.f32 %v4144_v49, %v15142_v28  ;;  %v11769_v39 = vadd.f32 %v4145_v58, %v15143_v11  ;;  %v11773_v10 = vadd.f32 %v4146_v61, %v15144_v63 }
0x1247   :  { %v11777_v13 = vadd.f32 %v4147_v24, %v15145_v55  ;;  %v11781_v47 = vadd.f32 %v4148_v59, %v15146_v30  ;;  %v4129_v6 = vadd.f32 %v4117_v14, %v4107_v43  ;;  %v4130_v4 = vadd.f32 %v4117_v14, %v4108_v36 }
0x1248   :  { %v15105_v7 = vmax.f32 %v11761_v41, 0.0  ;;  %v15104_v54 = vmax.f32 %v11765_v26, 0.0  ;;  %v15103_v0 = vmax.f32 %v11769_v39, 0.0  ;;  %v15102_v44 = vmax.f32 %v11773_v10, 0.0 }
0x1249   :  { %v15101_v35 = vmax.f32 %v11777_v13, 0.0  ;;  %v15100_v62 = vmax.f32 %v11781_v47, 0.0  ;;  %v4137_v38 = vmax.f32 %v4125_v12, 0.0  ;;  %v4138_v21 = vmax.f32 %v4126_v42, 0.0  ;;  %v15152_v12 = vld [vmem:[#allocation3_spill] sm:$0xff] }
0x124a   :  { %v8355_v31 = vpack.c.bf16 %v15104_v54, %v15105_v7  ;;  %v4139_v2 = vmax.f32 %v4127_v37, 0.0  ;;  %v8356_v53 = vpack.c.bf16 %v15102_v44, %v15103_v0  ;;  %v4140_v25 = vmax.f32 %v4128_v34, 0.0 }
0x124b   :  { %v8357_v16 = vpack.c.bf16 %v15100_v62, %v15101_v35  ;;  %v4141_v15 = vmax.f32 %v4129_v6, 0.0  ;;  %v4142_v22 = vmax.f32 %v4130_v4, 0.0  ;;  %v4149_v52 = vmul.f32 %v4137_v38, %v9132_v20 }
0x124c   :  { %4215 = vst [vmem:[#allocation2 + $0x4] sm:$0xff] %v8355_v31  ;;  %v4150_v17 = vmul.f32 %v4138_v21, %v9134_v23  ;;  %v4151_v50 = vmul.f32 %v4139_v2, %v9138_v29  ;;  %4216 = vst [vmem:[#allocation2 + $0xc] sm:$0xff] %v8356_v53  ;;  %v4152_v5 = vmul.f32 %v4140_v25, %v9152_v45  ;;  %v15147_v36 = vmax.f32 %v10532_v33, 0.0 }
0x124d   :  { %4217 = vst [vmem:[#allocation2 + $0x14] sm:$0xff] %v8357_v16  ;;  %v4153_v60 = vmul.f32 %v4141_v15, %v9171_v18  ;;  %v4154_v43 = vmul.f32 %v4142_v22, %v9177_v3  ;;  %v15148_v27 = vmax.f32 %v10535_v8, 0.0  ;;  %v15149_v51 = vmax.f32 %v10538_v32, 0.0 }
0x124e   :  { %v11809_v48 = vadd.f32 %v4149_v52, %v15147_v36  ;;  %v15150_v46 = vmax.f32 %v10541_v1, 0.0  ;;  %v15151_v19 = vmax.f32 %v10544_v40, 0.0  ;;  %v15153_v33 = vmax.f32 %v15152_v12, 0.0 }
0x124f   :  { %v11813_v14 = vadd.f32 %v4150_v17, %v15148_v27  ;;  %v11817_v9 = vadd.f32 %v4151_v50, %v15149_v51 }
0x1250   :  { %v11821_v56 = vadd.f32 %v4152_v5, %v15150_v46  ;;  %v11825_v49 = vadd.f32 %v4153_v60, %v15151_v19  ;;  %v11829_v42 = vadd.f32 %v4154_v43, %v15153_v33  ;;  %v15099_v8 = vmax.f32 %v11809_v48, 0.0 }
0x1251   :  { %v15098_v58 = vmax.f32 %v11813_v14, 0.0  ;;  %v15097_v32 = vmax.f32 %v11817_v9, 0.0 }
0x1252   :  { %15154 = vst [vmem:[#allocation3_spill] sm:$0xff] %v11829_v42  ;;  %v15096_v61 = vmax.f32 %v11821_v56, 0.0  ;;  %v15095_v1 = vmax.f32 %v11825_v49, 0.0  ;;  %v15094_v24 = vmax.f32 %v11829_v42, 0.0 }
0x1253   :  { %v8358_v40 = vpack.c.bf16 %v15098_v58, %v15099_v8  ;;  %v4221_v28 = vld [vmem:[#allocation2] sm:$0xff]  ;;  %v4222_v34 = vld [vmem:[#allocation2 + $0x8] sm:$0xff] }
0x1254   :  { %v8359_v59 = vpack.c.bf16 %v15096_v61, %v15097_v32  ;;  %v8360_v57 = vpack.c.bf16 %v15094_v24, %v15095_v1  ;;  %v4223_v31 = vld [vmem:[#allocation2 + $0x10] sm:$0xff]  ;;  %v4224_v53 = vld [vmem:[#allocation2 + $0x18] sm:$0xff] }
0x1255   :  { %4218 = vst [vmem:[#allocation2 + $0x24] sm:$0xff] %v8358_v40 }
0x1256   :  { %4219 = vst [vmem:[#allocation2 + $0x2c] sm:$0xff] %v8359_v59  ;;  %4220 = vst [vmem:[#allocation2 + $0x34] sm:$0xff] %v8360_v57 }
0x125c   :  { %v4225_v37 = vld [vmem:[#allocation2 + $0x20] sm:$0xff] }
0x125d   :  { %v4226_v11 = vld [vmem:[#allocation2 + $0x28] sm:$0xff]  ;;  %v11849_v63 = vcombine.high %v4221_v28, %v4225_v37  ;;  %v8212_v6 = vcombine.low %v4221_v28, %v4225_v37  ;;  %v4227_v4 = vld [vmem:[#allocation2 + $0x30] sm:$0xff]  ;;  %v4228_v2 = vld [vmem:[#allocation2 + $0x38] sm:$0xff] }
0x125e   :  { %v11851_v55 = vcombine.low %v4222_v34, %v4226_v11  ;;  %v11857_v30 = vcombine.high %v4222_v34, %v4226_v11  ;;  %v8216_v38 = vcombine.low %v4223_v31, %v4227_v4  ;;  %v8217_v21 = vcombine.high %v4223_v31, %v4227_v4 }
0x125f   :  { %4378 = vrot.lane.b32.xlu0 %v11849_v63, %s8474_s26  ;;  %v11909_v16 = vcombine.low %v4224_v53, %v4228_v2  ;;  %v8219_v25 = vcombine.high %v4224_v53, %v4228_v2 }
0x1260   :  { %4380 = vrot.lane.b32.xlu1 %v11851_v55, %s8474_s26 }
0x1263   :  { %4382 = vrot.lane.b32.xlu0 %v11857_v30, %s8474_s26 }
0x1264   :  { %4358 = vrot.lane.b32.xlu1 %v11849_v63, %s8475_s27 }
0x1267   :  { %4360 = vrot.lane.b32.xlu0 %v11851_v55, %s8475_s27 }
0x1268   :  { %4362 = vrot.lane.b32.xlu1 %v11857_v30, %s8475_s27 }
0x126b   :  { %4338 = vrot.lane.b32.xlu0 %v11849_v63, %s8476_s28 }
0x126c   :  { %4340 = vrot.lane.b32.xlu1 %v11851_v55, %s8476_s28 }
0x126f   :  { %4342 = vrot.lane.b32.xlu0 %v11857_v30, %s8476_s28 }
0x1270   :  { %4318 = vrot.lane.b32.xlu1 %v11849_v63, %s8477_s29 }
0x1273   :  { %4320 = vrot.lane.b32.xlu0 %v11851_v55, %s8477_s29 }
0x1274   :  { %4322 = vrot.lane.b32.xlu1 %v11857_v30, %s8477_s29 }
0x1277   :  { %4300 = vrot.lane.b32.xlu0 %v11849_v63, %s8478_s30 }
0x1278   :  { %4302 = vrot.lane.b32.xlu1 %v11851_v55, %s8478_s30 }
0x127b   :  { %4304 = vrot.lane.b32.xlu0 %v11857_v30, %s8478_s30 }
0x127c   :  { %4298 = vrot.lane.b32.xlu1 %v8212_v6, %s8478_s30 }
0x127f   :  { %4280 = vrot.lane.b32.xlu0 %v11849_v63, %s8479_s6 }
0x1280   :  { %4282 = vrot.lane.b32.xlu1 %v11851_v55, %s8479_s6 }
0x1283   :  { %4284 = vrot.lane.b32.xlu0 %v11857_v30, %s8479_s6 }
0x1284   :  { %4278 = vrot.lane.b32.xlu1 %v8212_v6, %s8479_s6 }
0x1287   :  { %4260 = vrot.lane.b32.xlu0 %v11849_v63, %s8480_s7 }
0x1288   :  { %4262 = vrot.lane.b32.xlu1 %v11851_v55, %s8480_s7 }
0x128b   :  { %4264 = vrot.lane.b32.xlu0 %v11857_v30, %s8480_s7 }
0x128c   :  { %4258 = vrot.lane.b32.xlu1 %v8212_v6, %s8480_s7 }
0x128f   :  { %4384 = vrot.lane.b32.xlu0 %v8216_v38, %s8474_s26 }
0x1290   :  { %4386 = vrot.lane.b32.xlu1 %v8217_v21, %s8474_s26 }
0x1293   :  { %4398 = vrot.lane.b32.xlu0 %v11849_v63, %s8481_s12 }
0x1294   :  { %4400 = vrot.lane.b32.xlu1 %v11851_v55, %s8481_s12 }
0x1297   :  { %4402 = vrot.lane.b32.xlu0 %v11857_v30, %s8481_s12 }
0x1298   :  { %4364 = vrot.lane.b32.xlu1 %v8216_v38, %s8475_s27 }
0x129b   :  { %4366 = vrot.lane.b32.xlu0 %v8217_v21, %s8475_s27 }
0x129c   :  { %4388 = vrot.lane.b32.xlu1 %v11909_v16, %s8474_s26 }
0x129f   :  { %4390 = vrot.lane.b32.xlu0 %v8219_v25, %s8474_s26 }
0x12a0   :  { %4344 = vrot.lane.b32.xlu1 %v8216_v38, %s8476_s28 }
0x12a3   :  { %4346 = vrot.lane.b32.xlu0 %v8217_v21, %s8476_s28 }
0x12a4   :  { %4368 = vrot.lane.b32.xlu1 %v11909_v16, %s8475_s27 }
0x12a7   :  { %4370 = vrot.lane.b32.xlu0 %v8219_v25, %s8475_s27 }
0x12a8   :  { %4324 = vrot.lane.b32.xlu1 %v8216_v38, %s8477_s29 }
0x12ab   :  { %4326 = vrot.lane.b32.xlu0 %v8217_v21, %s8477_s29 }
0x12ac   :  { %4348 = vrot.lane.b32.xlu1 %v11909_v16, %s8476_s28 }
0x12af   :  { %4350 = vrot.lane.b32.xlu0 %v8219_v25, %s8476_s28 }
0x12b0   :  { %4306 = vrot.lane.b32.xlu1 %v8216_v38, %s8478_s30 }
0x12b3   :  { %4308 = vrot.lane.b32.xlu0 %v8217_v21, %s8478_s30 }
0x12b4   :  { %4328 = vrot.lane.b32.xlu1 %v11909_v16, %s8477_s29 }
0x12b7   :  { %4286 = vrot.lane.b32.xlu0 %v8216_v38, %s8479_s6 }
0x12b8   :  { %4288 = vrot.lane.b32.xlu1 %v8217_v21, %s8479_s6 }
0x12bb   :  { %4310 = vrot.lane.b32.xlu0 %v11909_v16, %s8478_s30 }
0x12bc   :  { %4266 = vrot.lane.b32.xlu1 %v8216_v38, %s8480_s7 }
0x12bf   :  { %4268 = vrot.lane.b32.xlu0 %v8217_v21, %s8480_s7 }
0x12c0   :  { %4290 = vrot.lane.b32.xlu1 %v11909_v16, %s8479_s6 }
0x12c3   :  { %4270 = vrot.lane.b32.xlu0 %v11909_v16, %s8480_s7 }
0x12c4   :  { %4406 = vrot.lane.b32.xlu1 %v8217_v21, %s8481_s12 }
0x12c7   :  { %4404 = vrot.lane.b32.xlu0 %v8216_v38, %s8481_s12 }
0x12c8   :  { %4408 = vrot.lane.b32.xlu1 %v11909_v16, %s8481_s12 }
0x12cb   :  { %4410 = vrot.lane.b32.xlu0 %v8219_v25, %s8481_s12 }
0x12cc   :  { %4434 = vrot.lane.b32.xlu1 %v11851_v55, %s8482_s0 }
0x12cf   :  { %4432 = vrot.lane.b32.xlu0 %v11849_v63, %s8482_s0 }
0x12d0   :  { %4438 = vrot.lane.b32.xlu1 %v8216_v38, %s8482_s0 }
0x12d1   :  { %v4379_v15 = vpop.permute.xlu0 %4378 }
0x12d2   :  { %v11949_v22 = vpop.permute.xlu1 %4380 }
0x12d3   :  { %4430 = vrot.lane.b32.xlu0 %v8212_v6, %s8482_s0  ;;  %v4392_v19 = vsel %vm207_vm0, %v4379_v15, %v11949_v22 }
0x12d4   :  { %4528 = vrot.lane.b32.xlu1 %v4379_v15, %s8482_s0 }
0x12d5   :  { %v11953_v52 = vpop.permute.xlu0 %4382 }
0x12d6   :  { %v4359_v17 = vpop.permute.xlu1 %4358 }
0x12d7   :  { %4436 = vrot.lane.b32.xlu0 %v11857_v30, %s8482_s0 }
0x12d9   :  { %v11957_v50 = vpop.permute.xlu0 %4360 }
0x12da   :  { %v11959_v5 = vpop.permute.xlu1 %4362  ;;  %v4372_v40 = vsel %vm186_vm1, %v4359_v17, %v11957_v50 }
0x12db   :  { %4440 = vrot.lane.b32.xlu0 %v8217_v21, %s8482_s0 }
0x12dd   :  { %v11962_v60 = vpop.permute.xlu0 %4338 }
0x12de   :  { %v11964_v43 = vpop.permute.xlu1 %4340  ;;  %4500 = vrot.lane.b32.xlu1 %v11962_v60, %s8482_s0 }
0x12df   :  { %4514 = vrot.lane.b32.xlu0 %v4359_v17, %s8482_s0 }
0x12e1   :  { %v4343_v36 = vpop.permute.xlu0 %4342 }
0x12e2   :  { %v4319_v27 = vpop.permute.xlu1 %4318  ;;  %v4353_v28 = vsel %vm165_vm2, %v11964_v43, %v4343_v36 }
0x12e3   :  { %4486 = vrot.lane.b32.xlu0 %v4319_v27, %s8482_s0 }
0x12e5   :  { %v11970_v51 = vpop.permute.xlu0 %4320 }
0x12e6   :  { %v11972_v46 = vpop.permute.xlu1 %4322  ;;  %v4330_v11 = vsel %vm142_vm3, %v4319_v27, %v11970_v51 }
0x12e7   :  { %4530 = vrot.lane.b32.xlu0 %v4392_v19, %s8482_s0 }
0x12e9   :  { %v11977_v12 = vpop.permute.xlu0 %4300 }
0x12ea   :  { %v11979_v33 = vpop.permute.xlu1 %4302 }
0x12eb   :  { %4516 = vrot.lane.b32.xlu0 %v4372_v40, %s8482_s0 }
0x12ed   :  { %v4305_v59 = vpop.permute.xlu0 %4304 }
0x12ee   :  { %v11984_v57 = vpop.permute.xlu1 %4298  ;;  %v4314_v30 = vsel %vm123_vm4, %v11979_v33, %v4305_v59 }
0x12ef   :  { %4504 = vrot.lane.b32.xlu0 %v4353_v28, %s8482_s0 }
0x12f1   :  { %v4281_v37 = vpop.permute.xlu0 %4280 }
0x12f2   :  { %v11989_v34 = vpop.permute.xlu1 %4282 }
0x12f3   :  { %4488 = vrot.lane.b32.xlu0 %v4330_v11, %s8482_s0  ;;  %v4293_v31 = vsel %vm102_vm5, %v4281_v37, %v11989_v34 }
0x12f5   :  { %v11994_v63 = vpop.permute.xlu0 %4284 }
0x12f6   :  { %v4279_v55 = vpop.permute.xlu1 %4278 }
0x12f7   :  { %4476 = vrot.lane.b32.xlu0 %v4314_v30, %s8482_s0  ;;  %v4292_v21 = vsel %vm102_vm5, %v4279_v55, %v4281_v37 }
0x12f9   :  { %v11999_v6 = vpop.permute.xlu0 %4260 }
0x12fa   :  { %v12001_v4 = vpop.permute.xlu1 %4262 }
0x12fb   :  { %4460 = vrot.lane.b32.xlu0 %v4293_v31, %s8482_s0 }
0x12fd   :  { %v4265_v38 = vpop.permute.xlu0 %4264 }
0x12fe   :  { %v12007_v2 = vpop.permute.xlu1 %4258  ;;  %v4274_v15 = vsel %vm81_vm6, %v12001_v4, %v4265_v38 }
0x12ff   :  { %4458 = vrot.lane.b32.xlu0 %v4292_v21, %s8482_s0 }
0x1301   :  { %v12010_v53 = vpop.permute.xlu0 %4384 }
0x1302   :  { %v4387_v25 = vpop.permute.xlu1 %4386 }
0x1303   :  { %4448 = vrot.lane.b32.xlu0 %v4274_v15, %s8482_s0  ;;  %v4395_v19 = vsel %vm207_vm0, %v12010_v53, %v4387_v25 }
0x1305   :  { %v12015_v17 = vpop.permute.xlu0 %4398 }
0x1306   :  { %v12017_v27 = vpop.permute.xlu1 %4400  ;;  %4542 = vrot.lane.b32.xlu1 %v12015_v17, %s8482_s0 }
0x1307   :  { %4536 = vrot.lane.b32.xlu0 %v4395_v19, %s8482_s0 }
0x1309   :  { %v12024_v40 = vpop.permute.xlu0 %4402 }
0x130a   :  { %v12026_v28 = vpop.permute.xlu1 %4364  ;;  %v4413_v37 = vsel %vm228_vm7, %v12017_v27, %v12024_v40 }
0x130b   :  { %4546 = vrot.lane.b32.xlu0 %v4413_v37, %s8482_s0  ;;  %v4374_v30 = vsel %vm186_vm1, %v11959_v5, %v12026_v28 }
0x130d   :  { %v12032_v11 = vpop.permute.xlu0 %4366 }
0x130e   :  { %v12034_v55 = vpop.permute.xlu1 %4388 }
0x130f   :  { %4520 = vrot.lane.b32.xlu0 %v4374_v30, %s8482_s0  ;;  %v4396_v15 = vsel %vm207_vm0, %v4387_v25, %v12034_v55 }
0x1311   :  { %v12040_v31 = vpop.permute.xlu0 %4390 }
0x1312   :  { %v12042_v21 = vpop.permute.xlu1 %4344 }
0x1313   :  { %4538 = vrot.lane.b32.xlu0 %v4396_v15, %s8482_s0  ;;  %v4354_v24 = vsel %vm165_vm2, %v4343_v36, %v12042_v21 }
0x1315   :  { %v12047_v19 = vpop.permute.xlu0 %4346 }
0x1316   :  { %v12049_v37 = vpop.permute.xlu1 %4368 }
0x1317   :  { %4506 = vrot.lane.b32.xlu0 %v4354_v24, %s8482_s0  ;;  %v4376_v61 = vsel %vm186_vm1, %v12032_v11, %v12049_v37 }
0x1319   :  { %v12054_v1 = vpop.permute.xlu0 %4370 }
0x131a   :  { %v12056_v30 = vpop.permute.xlu1 %4324 }
0x131b   :  { %4524 = vrot.lane.b32.xlu0 %v4376_v61, %s8482_s0  ;;  %v4332_v36 = vsel %vm142_vm3, %v11972_v46, %v12056_v30 }
0x131d   :  { %v12062_v25 = vpop.permute.xlu0 %4326 }
0x131e   :  { %v12064_v15 = vpop.permute.xlu1 %4348 }
0x131f   :  { %4492 = vrot.lane.b32.xlu0 %v4332_v36, %s8482_s0  ;;  %v4356_v58 = vsel %vm165_vm2, %v12047_v19, %v12064_v15 }
0x1321   :  { %v12070_v24 = vpop.permute.xlu0 %4350 }
0x1322   :  { %v12072_v32 = vpop.permute.xlu1 %4306 }
0x1323   :  { %4510 = vrot.lane.b32.xlu0 %v4356_v58, %s8482_s0  ;;  %v4315_v62 = vsel %vm123_vm4, %v4305_v59, %v12072_v32 }
0x1325   :  { %v12078_v61 = vpop.permute.xlu0 %4308 }
0x1326   :  { %v4329_v8 = vpop.permute.xlu1 %4328 }
0x1327   :  { %4498 = vrot.lane.b32.xlu1 %v4329_v8, %s8482_s0  ;;  %4478 = vrot.lane.b32.xlu0 %v4315_v62, %s8482_s0  ;;  %v4334_v44 = vsel %vm142_vm3, %v12062_v25, %v4329_v8 }
0x1329   :  { %v12084_v36 = vpop.permute.xlu0 %4286 }
0x132a   :  { %v12086_v35 = vpop.permute.xlu1 %4288  ;;  %v4295_v59 = vsel %vm102_vm5, %v11994_v63, %v12084_v36 }
0x132b   :  { %4496 = vrot.lane.b32.xlu0 %v4334_v44, %s8482_s0 }
0x132d   :  { %v4311_v58 = vpop.permute.xlu0 %4310 }
0x132e   :  { %v12091_v0 = vpop.permute.xlu1 %4266  ;;  %4484 = vrot.lane.b32.xlu1 %v4311_v58, %s8482_s0  ;;  %v4317_v7 = vsel %vm123_vm4, %v12078_v61, %v4311_v58 }
0x132f   :  { %4464 = vrot.lane.b32.xlu0 %v4295_v59, %s8482_s0  ;;  %v4275_v8 = vsel %vm81_vm6, %v4265_v38, %v12091_v0  ;;  %v4393_v59 = vsel %vm207_vm0, %v11949_v22, %v11953_v52  ;;  %v4373_v38 = vsel %vm186_vm1, %v11957_v50, %v11959_v5  ;;  %v4331_v50 = vsel %vm142_vm3, %v11970_v51, %v11972_v46 }
0x1330   :  { %v4294_v46 = vsel %vm102_vm5, %v11989_v34, %v11994_v63  ;;  %v12170_v34 = vld [vmem:[%s15063_s1 + $0x64] ss:$8 sps:$4 sm:$0xff]   ;;  %v4394_v63 = vsel %vm207_vm0, %v11953_v52, %v12010_v53  ;;  %v4375_v52 = vsel %vm186_vm1, %v12026_v28, %v12032_v11  ;;  %v4397_v53 = vsel %vm207_vm0, %v12034_v55, %v12040_v31 }
0x1331   :  { %v12098_v62 = vpop.permute.xlu0 %4268  ;;  %8224 = vmatprep.mubr.msk.bf16.mxu0 %vm481_vm8, %v12170_v34  ;;  %8225 = vmatprep.mubr.msk.bf16.mxu1 %vm481_vm8, %v12170_v34  ;;  %v4377_v28 = vsel %vm186_vm1, %v12049_v37, %v12054_v1  ;;  %v4333_v55 = vsel %vm142_vm3, %v12056_v30, %v12062_v25  ;;  %v4357_v31 = vsel %vm165_vm2, %v12064_v15, %v12070_v24 }
0x1332   :  { %v4291_v54 = vpop.permute.xlu1 %4290  ;;  %v4316_v1 = vsel %vm123_vm4, %v12072_v32, %v12078_v61  ;;  %v4296_v37 = vsel %vm102_vm5, %v12084_v36, %v12086_v35  ;;  %v4276_v25 = vsel %vm81_vm6, %v12091_v0, %v12098_v62 }
0x1333   :  { %4470 = vrot.lane.b32.xlu1 %v4291_v54, %s8482_s0  ;;  %4482 = vrot.lane.b32.xlu0 %v4317_v7, %s8482_s0  ;;  %v4297_v42 = vsel %vm102_vm5, %v12086_v35, %v4291_v54  ;;  %v4352_v54 = vsel %vm165_vm2, %v11962_v60, %v11964_v43  ;;  %v4313_v60 = vsel %vm123_vm4, %v11977_v12, %v11979_v33 }
0x1334   :  { %v4273_v33 = vsel %vm81_vm6, %v11999_v6, %v12001_v4 }
0x1335   :  { %v4271_v44 = vpop.permute.xlu0 %4270 }
0x1336   :  { %v12115_v7 = vpop.permute.xlu1 %4406  ;;  %v4277_v58 = vsel %vm81_vm6, %v12098_v62, %v4271_v44 }
0x1337   :  { %4456 = vrot.lane.b32.xlu1 %v4271_v44, %s8482_s0  ;;  %4450 = vrot.lane.b32.xlu0 %v4275_v8, %s8482_s0 }
0x1339   :  { %v12122_v8 = vpop.permute.xlu0 %4404 }
0x133a   :  { %v4409_v22 = vpop.permute.xlu1 %4408  ;;  %v4415_v35 = vsel %vm228_vm7, %v12122_v8, %v12115_v7 }
0x133b   :  { %4532 = vrot.lane.b32.xlu1 %v4393_v59, %s8482_s0  ;;  %4468 = vrot.lane.b32.xlu0 %v4297_v42, %s8482_s0  ;;  %v4414_v42 = vsel %vm228_vm7, %v12024_v40, %v12122_v8  ;;  %v4416_v5 = vsel %vm228_vm7, %v12115_v7, %v4409_v22  ;;  %v4312_v40 = vsel %vm123_vm4, %v11984_v57, %v11977_v12 }
0x133c   :  { %v4272_v12 = vsel %vm81_vm6, %v12007_v2, %v11999_v6  ;;  %v4412_v6 = vsel %vm228_vm7, %v12015_v17, %v12017_v27  ;;  %v4355_v17 = vsel %vm165_vm2, %v12042_v21, %v12047_v19 }
0x133d   :  { %v4411_v43 = vpop.permute.xlu0 %4410 }
0x133e   :  { %v12220_v30 = vpop.permute.xlu1 %4434  ;;  %v4417_v36 = vsel %vm228_vm7, %v4409_v22, %v4411_v43 }
0x133f   :  { %4518 = vrot.lane.b32.xlu1 %v4373_v38, %s8482_s0  ;;  %4454 = vrot.lane.b32.xlu0 %v4277_v58, %s8482_s0 }
0x1341   :  { %v12149_v51 = vpop.permute.xlu0 %4432 }
0x1342   :  { %v12226_v32 = vpop.permute.xlu1 %4438 }
0x1343   :  { %4502 = vrot.lane.b32.xlu1 %v4352_v54, %s8482_s0  ;;  %4548 = vrot.lane.b32.xlu0 %v4414_v42, %s8482_s0 }
0x1345   :  { %v12158_v44 = vpop.permute.xlu0 %4430 }
0x1346   :  { %v4529_v61 = vpop.permute.xlu1 %4528 }
0x1347   :  { %4490 = vrot.lane.b32.xlu1 %v4331_v50, %s8482_s0  ;;  %4552 = vrot.lane.b32.xlu0 %v4416_v5, %s8482_s0 }
0x1349   :  { %v12165_v57 = vpop.permute.xlu0 %4436 }
0x134b   :  { %4474 = vrot.lane.b32.xlu1 %v4313_v60, %s8482_s0 }
0x134d   :  { %v12183_v4 = vpop.permute.xlu0 %4440 }
0x134f   :  { %4472 = vrot.lane.b32.xlu1 %v4312_v40, %s8482_s0 }
0x1350   :  { %v4501_v62 = vpop.permute.xlu1 %4500 }
0x1351   :  { %v4515_v2 = vpop.permute.xlu0 %4514 }
0x1353   :  { %4462 = vrot.lane.b32.xlu1 %v4294_v46, %s8482_s0 }
0x1355   :  { %v4487_v27 = vpop.permute.xlu0 %4486 }
0x1357   :  { %4446 = vrot.lane.b32.xlu1 %v4273_v33, %s8482_s0 }
0x1359   :  { %v4531_v11 = vpop.permute.xlu0 %4530 }
0x135a   :  { %v4598_v60 = vsel %vm372_vm9, %v4529_v61, %v4531_v11 }
0x135b   :  { %4444 = vrot.lane.b32.xlu1 %v4272_v12, %s8482_s0 }
0x135d   :  { %v4517_v21 = vpop.permute.xlu0 %4516 }
0x135e   :  { %v4592_v33 = vsel %vm372_vm9, %v4515_v2, %v4517_v21 }
0x135f   :  { %4534 = vrot.lane.b32.xlu1 %v4394_v63, %s8482_s0 }
0x1361   :  { %v12214_v19 = vpop.permute.xlu0 %4504 }
0x1363   :  { %4544 = vrot.lane.b32.xlu1 %v4412_v6, %s8482_s0 }
0x1365   :  { %v4489_v15 = vpop.permute.xlu0 %4488 }
0x1367   :  { %4522 = vrot.lane.b32.xlu1 %v4375_v52, %s8482_s0 }
0x1369   :  { %v12230_v24 = vpop.permute.xlu0 %4476 }
0x136b   :  { %4540 = vrot.lane.b32.xlu1 %v4397_v53, %s8482_s0 }
0x136d   :  { %v4461_v0 = vpop.permute.xlu0 %4460 }
0x136f   :  { %4508 = vrot.lane.b32.xlu1 %v4355_v17, %s8482_s0 }
0x1371   :  { %v4459_v38 = vpop.permute.xlu0 %4458 }
0x1373   :  { %4526 = vrot.lane.b32.xlu1 %v4377_v28, %s8482_s0  ;;  %v4580_v28 = vsel %vm372_vm9, %v4487_v27, %v4489_v15 }
0x1377   :  { %4494 = vrot.lane.b32.xlu1 %v4333_v55, %s8482_s0 }
0x1378   :  { %v12238_v59 = vpop.permute.xlu1 %4542 }
0x137b   :  { %4512 = vrot.lane.b32.xlu1 %v4357_v31, %s8482_s0 }
0x137f   :  { %4480 = vrot.lane.b32.xlu1 %v4316_v1, %s8482_s0 }
0x1383   :  { %4466 = vrot.lane.b32.xlu1 %v4296_v37, %s8482_s0 }
0x1387   :  { %4452 = vrot.lane.b32.xlu1 %v4276_v25, %s8482_s0 }
0x138b   :  { %4442 = vrot.lane.b32.xlu1 %v11909_v16, %s8482_s0  ;;  %v12242_v16 = vpop.permute.xlu0 %4448 }
0x138f   :  { %4550 = vrot.lane.b32.xlu1 %v4415_v35, %s8482_s0  ;;  %v12246_v42 = vpop.permute.xlu0 %4536  ;;  %v4568_v35 = vsel %vm372_vm9, %v4459_v38, %v4461_v0 }
0x1393   :  { %4554 = vrot.lane.b32.xlu1 %v4417_v36, %s8482_s0  ;;  %v12252_v22 = vpop.permute.xlu0 %4546 }
0x1397   :  { %v4521_v43 = vpop.permute.xlu0 %4520 }
0x1399   :  { %v12240_v58 = vpop.permute.xlu1 %4498 }
0x139b   :  { %v4539_v52 = vpop.permute.xlu0 %4538 }
0x139f   :  { %v4507_v2 = vpop.permute.xlu0 %4506 }
0x13a0   :  { %v12244_v54 = vpop.permute.xlu1 %4484 }
0x13a3   :  { %v4525_v1 = vpop.permute.xlu0 %4524 }
0x13a5   :  { %v12248_v7 = vpop.permute.xlu1 %4470 }
0x13a7   :  { %v4493_v27 = vpop.permute.xlu0 %4492 }
0x13a9   :  { %v12250_v8 = vpop.permute.xlu1 %4456 }
0x13ad   :  { %v4533_v50 = vpop.permute.xlu1 %4532 }
0x13ae   :  { %v4599_v5 = vsel %vm372_vm9, %v4531_v11, %v4533_v50 }
0x13af   :  { %4667 = vmatprep.subr.bf16.mxu0 %v4599_v5  ;;  %v4511_v5 = vpop.permute.xlu0 %4510 }
0x13b0   :  { %4668 = vmatpush1.bf16.msra.mxu0 %v4598_v60  ;;  %v4557_v60 = vsel %vm372_vm9, %v12149_v51, %v12220_v30 }
0x13b1   :  { %v4519_v40 = vpop.permute.xlu1 %4518 }
0x13b2   :  { %v4593_v46 = vsel %vm372_vm9, %v4517_v21, %v4519_v40 }
0x13b3   :  { %4669 = vmatprep.subr.bf16.mxu0 %v4593_v46 }
0x13b4   :  { %4670 = vmatpush1.bf16.msra.mxu0 %v4592_v33 }
0x13b5   :  { %v4503_v12 = vpop.permute.xlu1 %4502 }
0x13b6   :  { %v4587_v63 = vsel %vm372_vm9, %v4503_v12, %v12214_v19  ;;  %v4586_v6 = vsel %vm372_vm9, %v4501_v62, %v4503_v12  ;;  %v4479_v12 = vpop.permute.xlu0 %4478 }
0x13b7   :  { %4671 = vmatprep.subr.bf16.mxu0 %v4587_v63 }
0x13b8   :  { %4672 = vmatpush1.bf16.msra.mxu0 %v4586_v6 }
0x13b9   :  { %v12261_v53 = vpop.permute.xlu1 %4490 }
0x13ba   :  { %v4581_v17 = vsel %vm372_vm9, %v4489_v15, %v12261_v53 }
0x13bb   :  { %4673 = vmatprep.subr.bf16.mxu0 %v4581_v17 }
0x13bc   :  { %4674 = vmatpush1.bf16.msra.mxu0 %v4580_v28  ;;  %v4497_v28 = vpop.permute.xlu0 %4496 }
0x13bd   :  { %v4475_v11 = vpop.permute.xlu1 %4474 }
0x13be   :  { %v4575_v55 = vsel %vm372_vm9, %v4475_v11, %v12230_v24 }
0x13bf   :  { %4675 = vmatprep.subr.bf16.mxu0 %v4575_v55 }
0x13c1   :  { %v4473_v31 = vpop.permute.xlu1 %4472 }
0x13c2   :  { %v4574_v21 = vsel %vm372_vm9, %v4473_v31, %v4475_v11  ;;  %v4594_v11 = vsel %vm372_vm9, %v4519_v40, %v4521_v43  ;;  %v4602_v31 = vsel %vm372_vm9, %v12246_v42, %v4539_v52 }
0x13c3   :  { %4676 = vmatpush1.bf16.msra.mxu0 %v4574_v21  ;;  %v4465_v21 = vpop.permute.xlu0 %4464 }
0x13c5   :  { %v12269_v37 = vpop.permute.xlu1 %4462 }
0x13c6   :  { %v4569_v25 = vsel %vm372_vm9, %v4461_v0, %v12269_v37  ;;  %v4556_v0 = vsel %vm372_vm9, %v12158_v44, %v12149_v51  ;;  %v12293_v51 = vld [vmem:[%s15063_s1 + $0x60] ss:$8 sps:$4 sm:$0xff]  }
0x13c7   :  { %4677 = vmatprep.subr.bf16.mxu0 %v4569_v25 }
0x13c8   :  { %4678 = vmatpush1.bf16.msra.mxu0 %v4568_v35 }
0x13c9   :  { %v4447_v15 = vpop.permute.xlu1 %4446 }
0x13ca   :  { %v4563_v61 = vsel %vm372_vm9, %v4447_v15, %v12242_v16 }
0x13cb   :  { %4679 = vmatprep.subr.bf16.mxu0 %v4563_v61 }
0x13cd   :  { %v4445_v36 = vpop.permute.xlu1 %4444 }
0x13ce   :  { %v4562_v62 = vsel %vm372_vm9, %v4445_v36, %v4447_v15  ;;  %v4483_v15 = vpop.permute.xlu0 %4482 }
0x13cf   :  { %4680 = vmatpush1.bf16.msra.mxu0 %v4562_v62 }
0x13d0   :  { %4681 = vmatprep.subr.bf16.mxu0 %v4557_v60 }
0x13d1   :  { %v4535_v46 = vpop.permute.xlu1 %4534 }
0x13d2   :  { %v4601_v38 = vsel %vm372_vm9, %v4535_v46, %v12246_v42  ;;  %v4600_v33 = vsel %vm372_vm9, %v4533_v50, %v4535_v46  ;;  %v4451_v62 = vpop.permute.xlu0 %4450 }
0x13d3   :  { %4682 = vmatpush1.bf16.msra.mxu0 %v4556_v0  ;;  %4710 = vmatprep.subr.bf16.mxu1 %v4601_v38 }
0x13d4   :  { %4711 = vmatpush1.bf16.msra.mxu1 %v4600_v33 }
0x13d5   :  { %v4545_v63 = vpop.permute.xlu1 %4544 }
0x13d6   :  { %v4605_v6 = vsel %vm372_vm9, %v4545_v63, %v12252_v22  ;;  %v4604_v17 = vsel %vm372_vm9, %v12238_v59, %v4545_v63  ;;  %v4469_v38 = vpop.permute.xlu0 %4468  ;;  %v4570_v63 = vsel %vm372_vm9, %v12269_v37, %v4465_v21  ;;  %v4559_v37 = vsel %vm372_vm9, %v12165_v57, %v12226_v32 }
0x13d7   :  { %4697 = vmatprep.subr.bf16.mxu0 %v4605_v6 }
0x13d8   :  { %4698 = vmatpush2.bf16.msra.mxu0 %v4604_v17 }
0x13d9   :  { %v4523_v44 = vpop.permute.xlu1 %4522 }
0x13da   :  { %v4595_v50 = vsel %vm372_vm9, %v4521_v43, %v4523_v44  ;;  %v4588_v43 = vsel %vm372_vm9, %v12214_v19, %v4507_v2  ;;  %v4596_v61 = vsel %vm372_vm9, %v4523_v44, %v4525_v1  ;;  %v4564_v44 = vsel %vm372_vm9, %v12242_v16, %v4451_v62 }
0x13db   :  { %4712 = vmatprep.subr.bf16.mxu1 %v4595_v50  ;;  %4700 = vmatmul.mubr.bf16.vlgmr.msra.gmra.mxu0 %v12293_v51 }
0x13dc   :  { %4713 = vmatpush1.bf16.msra.mxu1 %v4594_v11  ;;  %8226 = vmatprep.mubr.msk.bf16.mxu0 %vm481_vm8, %v12170_v34 }
0x13dd   :  { %v4541_v59 = vpop.permute.xlu1 %4540 }
0x13de   :  { %v4603_v55 = vsel %vm372_vm9, %v4539_v52, %v4541_v59  ;;  %v4582_v52 = vsel %vm372_vm9, %v12261_v53, %v4493_v27  ;;  %v4576_v53 = vsel %vm372_vm9, %v12230_v24, %v4479_v12  ;;  %v4573_v24 = vsel %vm372_vm9, %v4469_v38, %v12248_v7 }
0x13df   :  { %4753 = vmatprep.subr.bf16.mxu0 %v4603_v55  ;;  %v4558_v59 = vsel %vm372_vm9, %v12220_v30, %v12165_v57 }
0x13e0   :  { %4754 = vmatpush1.bf16.msra.mxu0 %v4602_v31 }
0x13e1   :  { %v4509_v25 = vpop.permute.xlu1 %4508 }
0x13e2   :  { %v4589_v35 = vsel %vm372_vm9, %v4507_v2, %v4509_v25  ;;  %v4590_v2 = vsel %vm372_vm9, %v4509_v25, %v4511_v5  ;;  %v4560_v25 = vsel %vm372_vm9, %v12226_v32, %v12183_v4 }
0x13e3   :  { %4714 = vmatprep.subr.bf16.mxu1 %v4589_v35 }
0x13e4   :  { %4715 = vmatpush1.bf16.msra.mxu1 %v4588_v43 }
0x13e5   :  { %v4527_v40 = vpop.permute.xlu1 %4526 }
0x13e6   :  { %v4597_v34 = vsel %vm372_vm9, %v4525_v1, %v4527_v40  ;;  %v4585_v1 = vsel %vm372_vm9, %v4497_v28, %v12240_v58 }
0x13e7   :  { %4755 = vmatprep.subr.bf16.mxu0 %v4597_v34 }
0x13e8   :  { %4756 = vmatpush1.bf16.msra.mxu0 %v4596_v61 }
0x13e9   :  { %v4495_v36 = vpop.permute.xlu1 %4494 }
0x13ea   :  { %v4583_v42 = vsel %vm372_vm9, %v4493_v27, %v4495_v36  ;;  %v4584_v27 = vsel %vm372_vm9, %v4495_v36, %v4497_v28 }
0x13eb   :  { %4716 = vmatprep.subr.bf16.mxu1 %v4583_v42 }
0x13ec   :  { %4717 = vmatpush1.bf16.msra.mxu1 %v4582_v52 }
0x13ed   :  { %v4513_v60 = vpop.permute.xlu1 %4512 }
0x13ee   :  { %v4591_v19 = vsel %vm372_vm9, %v4511_v5, %v4513_v60  ;;  %v4579_v5 = vsel %vm372_vm9, %v4483_v15, %v12244_v54 }
0x13ef   :  { %4757 = vmatprep.subr.bf16.mxu0 %v4591_v19 }
0x13f0   :  { %4758 = vmatpush1.bf16.msra.mxu0 %v4590_v2 }
0x13f1   :  { %4759 = vmatprep.subr.bf16.mxu0 %v4585_v1  ;;  %v4481_v46 = vpop.permute.xlu1 %4480 }
0x13f2   :  { %v4577_v0 = vsel %vm372_vm9, %v4479_v12, %v4481_v46  ;;  %v4578_v6 = vsel %vm372_vm9, %v4481_v46, %v4483_v15  ;;  %v4455_v12 = vpop.permute.xlu0 %4454 }
0x13f3   :  { %4718 = vmatprep.subr.bf16.mxu1 %v4577_v0  ;;  %v4567_v7 = vsel %vm372_vm9, %v4455_v12, %v12250_v8 }
0x13f4   :  { %4719 = vmatpush1.bf16.msra.mxu1 %v4576_v53  ;;  %4760 = vmatpush1.bf16.msra.mxu0 %v4584_v27 }
0x13f5   :  { %4761 = vmatprep.subr.bf16.mxu0 %v4579_v5  ;;  %v4467_v33 = vpop.permute.xlu1 %4466 }
0x13f6   :  { %v4571_v58 = vsel %vm372_vm9, %v4465_v21, %v4467_v33  ;;  %v4572_v50 = vsel %vm372_vm9, %v4467_v33, %v4469_v38  ;;  %v4549_v11 = vpop.permute.xlu0 %4548 }
0x13f7   :  { %4720 = vmatprep.subr.bf16.mxu1 %v4571_v58  ;;  %v4606_v8 = vsel %vm372_vm9, %v12252_v22, %v4549_v11 }
0x13f8   :  { %4721 = vmatpush1.bf16.msra.mxu1 %v4570_v63  ;;  %4762 = vmatpush1.bf16.msra.mxu0 %v4578_v6 }
0x13f9   :  { %4763 = vmatprep.subr.bf16.mxu0 %v4573_v24  ;;  %v4453_v17 = vpop.permute.xlu1 %4452 }
0x13fa   :  { %v4565_v54 = vsel %vm372_vm9, %v4451_v62, %v4453_v17  ;;  %v4566_v16 = vsel %vm372_vm9, %v4453_v17, %v4455_v12  ;;  %v4553_v57 = vpop.permute.xlu0 %4552 }
0x13fb   :  { %4722 = vmatprep.subr.bf16.mxu1 %v4565_v54 }
0x13fc   :  { %4723 = vmatpush1.bf16.msra.mxu1 %v4564_v44  ;;  %4764 = vmatpush1.bf16.msra.mxu0 %v4572_v50 }
0x13fd   :  { %4724 = vmatprep.subr.bf16.mxu1 %v4559_v37  ;;  %4765 = vmatprep.subr.bf16.mxu0 %v4567_v7  ;;  %v4443_v28 = vpop.permute.xlu1 %4442 }
0x13fe   :  { %v4561_v55 = vsel %vm372_vm9, %v12183_v4, %v4443_v28 }
0x1400   :  { %4725 = vmatpush1.bf16.msra.mxu1 %v4558_v59  ;;  %4766 = vmatpush1.bf16.msra.mxu0 %v4566_v16 }
0x1401   :  { %4767 = vmatprep.subr.bf16.mxu0 %v4561_v55  ;;  %v4551_v31 = vpop.permute.xlu1 %4550 }
0x1402   :  { %v4607_v21 = vsel %vm372_vm9, %v4549_v11, %v4551_v31  ;;  %v4608_v43 = vsel %vm372_vm9, %v4551_v31, %v4553_v57 }
0x1403   :  { %4740 = vmatprep.subr.bf16.mxu1 %v4607_v21 }
0x1404   :  { %4741 = vmatpush2.bf16.msra.mxu1 %v4606_v8  ;;  %4768 = vmatpush1.bf16.msra.mxu0 %v4560_v25 }
0x1405   :  { %v4555_v30 = vpop.permute.xlu1 %4554 }
0x1406   :  { %v4609_v35 = vsel %vm372_vm9, %v4553_v57, %v4555_v30 }
0x1407   :  { %4743 = vmatmul.mubr.bf16.vlgmr.msra.gmra.mxu1 %v12293_v51  ;;  %4783 = vmatprep.subr.bf16.mxu0 %v4609_v35 }
0x1408   :  { %4784 = vmatpush2.bf16.msra.mxu0 %v4608_v43 }
0x140b   :  { %4786 = vmatmul.mubr.bf16.vlgmr.msra.gmra.mxu0 %v12293_v51 }
0x149b   :  { %v12352_v40 = vpop.f32.mrf.mxu0 }
0x149c   :  { %v4796_v4 = vmul.f32 %v12352_v40, %v9132_v20 }
0x149d   :  { %v12354_v22 = vpop.f32.mrf.mxu0 }
0x149e   :  { %v4797_v32 = vmul.f32 %v12354_v22, %v9134_v23  ;;  %v4824_v36 = vmul.f32 %v4796_v4, %v12352_v40 }
0x149f   :  { %v12356_v34 = vpop.f32.mrf.mxu0 }
0x14a0   :  { %v4802_v61 = vmul.f32 %v12356_v34, %v9132_v20  ;;  %v4825_v42 = vmul.f32 %v4797_v32, %v12354_v22  ;;  %v4808_v62 = vadd.f32 %v4797_v32, %v4796_v4 }
0x14a1   :  { %v12362_v15 = vpop.f32.mrf.mxu0 }
0x14a2   :  { %v4803_v51 = vmul.f32 %v12362_v15, %v9134_v23  ;;  %v4830_v19 = vmul.f32 %v4802_v61, %v12356_v34  ;;  %v4836_v46 = vadd.f32 %v4825_v42, %v4824_v36 }
0x14a4   :  { %v4831_v2 = vmul.f32 %v4803_v51, %v12362_v15  ;;  %v4815_v27 = vadd.f32 %v4803_v51, %v4802_v61 }
0x14a6   :  { %v4843_v12 = vadd.f32 %v4831_v2, %v4830_v19 }
0x14c7   :  { %v12370_v52 = vpop.f32.mrf.mxu1 }
0x14c8   :  { %v4798_v60 = vmul.f32 %v12370_v52, %v9138_v29 }
0x14c9   :  { %v12376_v1 = vpop.f32.mrf.mxu1 }
0x14ca   :  { %v4809_v0 = vadd.f32 %v4808_v62, %v4798_v60  ;;  %v4826_v38 = vmul.f32 %v4798_v60, %v12370_v52  ;;  %v4799_v53 = vmul.f32 %v12376_v1, %v9152_v45 }
0x14cb   :  { %v12381_v5 = vpop.f32.mrf.mxu1  ;;  %v12383_v33 = vpop.f32.mrf.mxu0 }
0x14cc   :  { %v4837_v58 = vadd.f32 %v4836_v46, %v4826_v38  ;;  %v4810_v63 = vadd.f32 %v4809_v0, %v4799_v53  ;;  %v4827_v6 = vmul.f32 %v4799_v53, %v12376_v1  ;;  %v4804_v24 = vmul.f32 %v12381_v5, %v9138_v29 }
0x14cd   :  { %v4800_v17 = vmul.f32 %v12383_v33, %v9171_v18  ;;  %v12390_v54 = vpop.f32.mrf.mxu1  ;;  %v12392_v44 = vpop.f32.mrf.mxu0 }
0x14ce   :  { %v4838_v50 = vadd.f32 %v4837_v58, %v4827_v6  ;;  %v4816_v37 = vadd.f32 %v4815_v27, %v4804_v24  ;;  %v4832_v7 = vmul.f32 %v4804_v24, %v12381_v5  ;;  %v4805_v28 = vmul.f32 %v12390_v54, %v9152_v45 }
0x14cf   :  { %v4811_v11 = vadd.f32 %v4810_v63, %v4800_v17  ;;  %v4828_v59 = vmul.f32 %v4800_v17, %v12383_v33  ;;  %v4801_v16 = vmul.f32 %v12392_v44, %v9177_v3  ;;  %v12400_v55 = vpop.f32.mrf.mxu0 }
0x14d0   :  { %v4844_v31 = vadd.f32 %v4843_v12, %v4832_v7  ;;  %v4817_v21 = vadd.f32 %v4816_v37, %v4805_v28  ;;  %v4833_v8 = vmul.f32 %v4805_v28, %v12390_v54  ;;  %v4806_v25 = vmul.f32 %v12400_v55, %v9171_v18 }
0x14d1   :  { %v4839_v57 = vadd.f32 %v4838_v50, %v4828_v59  ;;  %v4829_v30 = vmul.f32 %v4801_v16, %v12392_v44  ;;  %v12406_v35 = vpop.f32.mrf.mxu0  ;;  %v4812_v43 = vadd.f32 %v4811_v11, %v4801_v16  ;;  %v8227_v11 = vld [vmem:[%s15065_s2 + $0x60] sm:$0xff] }
0x14d2   :  { %v4845_v4 = vadd.f32 %v4844_v31, %v4833_v8  ;;  %v4818_v32 = vadd.f32 %v4817_v21, %v4806_v25  ;;  %v4834_v61 = vmul.f32 %v4806_v25, %v12400_v55  ;;  %v4807_v51 = vmul.f32 %v12406_v35, %v9177_v3  ;;  %v8229_v31 = vld [vmem:[%s15066_s3 + $0x60] sm:$0xff]  ;;  %v8228_v21 = vld [vmem:[%s15065_s2 + $0x68] sm:$0xff] }
0x14d3   :  { %4813 = vadd.xlane.f32.xlu0 %v4812_v43  ;;  %v4840_v60 = vadd.f32 %v4839_v57, %v4829_v30  ;;  %v8230_v43 = vld [vmem:[%s15066_s3 + $0x68] sm:$0xff] }
0x14d4   :  { %v4819_v36 = vadd.f32 %v4818_v32, %v4807_v51  ;;  %v4846_v42 = vadd.f32 %v4845_v4, %v4834_v61  ;;  %v4835_v62 = vmul.f32 %v4807_v51, %v12406_v35 }
0x14d6   :  { %4820 = vadd.xlane.f32.xlu1 %v4819_v36  ;;  %v4847_v19 = vadd.f32 %v4846_v42, %v4835_v62 }
0x14d7   :  { %4841 = vadd.xlane.f32.xlu0 %v4840_v60 }
0x14db   :  { %4848 = vadd.xlane.f32.xlu0 %v4847_v19 }
0x155c   :  { %v4814_v2 = vpop.xlane.xlu0 %4813 }
0x155d   :  { %v4822_v46 = vmul.f32 0.001953125, %v4814_v2 }
0x155f   :  { %v4821_v0 = vpop.xlane.xlu1 %4820  ;;  %v4852_v53 = vmul.f32 %v4822_v46, %v4822_v46 }
0x1560   :  { %v4842_v38 = vpop.xlane.xlu0 %4841  ;;  %v4823_v58 = vmul.f32 0.001953125, %v4821_v0 }
0x1561   :  { %v4850_v27 = vmul.f32 0.001953125, %v4842_v38 }
0x1562   :  { %v4853_v12 = vmul.f32 %v4823_v58, %v4823_v58 }
0x1563   :  { %v4854_v63 = vsub.f32 %v4850_v27, %v4852_v53 }
0x1564   :  { %v4849_v6 = vpop.xlane.xlu0 %4848 }
0x1565   :  { %v4856_v24 = vmax.f32 %v4854_v63, 0.0  ;;  %v4851_v17 = vmul.f32 0.001953125, %v4849_v6 }
0x1567   :  { %v4861_v50 = vadd.f32 1e-05, %v4856_v24  ;;  %v4855_v37 = vsub.f32 %v4851_v17, %v4853_v12 }
0x1569   :  { %8450 = vrsqrt.f32 %v4861_v50  ;;  %v4857_v7 = vmax.f32 %v4855_v37, 0.0 }
0x156b   :  { %v4862_v28 = vadd.f32 1e-05, %v4857_v7 }
0x156d   :  { %8452 = vrsqrt.f32 %v4862_v28 }
0x1576   :  { %v8451_v59 = vpop.eup %8450 }
0x1577   :  { %v4865_v16 = vmul.f32 %v8451_v59, %v8227_v11 }
0x1579   :  { %4876 = vperm.xlu1 %8395, %v4865_v16   ;;  %v4870_v8 = vmul.f32 %v4865_v16, %v4822_v46 }
0x157a   :  { %v8453_v25 = vpop.eup %8452 }
0x157b   :  { %v4872_v57 = vsub.f32 %v8229_v31, %v4870_v8  ;;  %v4866_v30 = vmul.f32 %v8453_v25, %v8228_v21 }
0x157d   :  { %4898 = vperm.xlu1 %8395, %v4872_v57   ;;  %4881 = vperm.xlu0 %8396, %v4866_v30   ;;  %v4871_v4 = vmul.f32 %v4866_v30, %v4823_v58 }
0x157f   :  { %v4873_v32 = vsub.f32 %v8230_v43, %v4871_v4 }
0x1581   :  { %4903 = vperm.xlu1 %8395, %v4873_v32  }
0x15f4   :  { %v4877_v61 = vpop.permute.xlu1 %4876 }
0x15f5   :  { %v4884_v51 = vmul.f32 %v4877_v61, %v12352_v40  ;;  %v4885_v36 = vmul.f32 %v4877_v61, %v12354_v22  ;;  %v4886_v42 = vmul.f32 %v4877_v61, %v12370_v52  ;;  %v4887_v62 = vmul.f32 %v4877_v61, %v12376_v1 }
0x15f6   :  { %v4888_v2 = vmul.f32 %v4877_v61, %v12383_v33  ;;  %v4889_v46 = vmul.f32 %v4877_v61, %v12392_v44 }
0x15f8   :  { %v4882_v60 = vpop.permute.xlu0 %4881  ;;  %v4899_v19 = vpop.permute.xlu1 %4898 }
0x15f9   :  { %v4890_v0 = vmul.f32 %v4882_v60, %v12356_v34  ;;  %v4891_v38 = vmul.f32 %v4882_v60, %v12362_v15  ;;  %v4892_v53 = vmul.f32 %v4882_v60, %v12381_v5  ;;  %v4893_v40 = vmul.f32 %v4882_v60, %v12390_v54 }
0x15fa   :  { %v4906_v27 = vadd.f32 %v4899_v19, %v4884_v51  ;;  %v4907_v22 = vadd.f32 %v4899_v19, %v4885_v36  ;;  %v4908_v58 = vadd.f32 %v4899_v19, %v4886_v42  ;;  %v4909_v52 = vadd.f32 %v4899_v19, %v4887_v62 }
0x15fb   :  { %v4910_v63 = vadd.f32 %v4899_v19, %v4888_v2  ;;  %v4911_v1 = vadd.f32 %v4899_v19, %v4889_v46  ;;  %v4894_v6 = vmul.f32 %v4882_v60, %v12400_v55  ;;  %v4895_v33 = vmul.f32 %v4882_v60, %v12406_v35 }
0x15fc   :  { %v4918_v24 = vmax.f32 %v4906_v27, 0.0  ;;  %v4919_v44 = vmax.f32 %v4907_v22, 0.0  ;;  %v4904_v12 = vpop.permute.xlu1 %4903  ;;  %v4920_v34 = vmax.f32 %v4908_v58, 0.0  ;;  %v4921_v17 = vmax.f32 %v4909_v52, 0.0 }
0x15fd   :  { %v4922_v15 = vmax.f32 %v4910_v63, 0.0  ;;  %v4923_v50 = vmax.f32 %v4911_v1, 0.0  ;;  %v4912_v37 = vadd.f32 %v4904_v12, %v4890_v0  ;;  %v4913_v7 = vadd.f32 %v4904_v12, %v4891_v38 }
0x15fe   :  { %v4930_v5 = vmul.f32 %v4918_v24, %v9132_v20  ;;  %v4931_v54 = vmul.f32 %v4919_v44, %v9134_v23  ;;  %v4932_v28 = vmul.f32 %v4920_v34, %v9138_v29  ;;  %v4933_v11 = vmul.f32 %v4921_v17, %v9152_v45 }
0x15ff   :  { %v4934_v55 = vmul.f32 %v4922_v15, %v9171_v18  ;;  %v4935_v35 = vmul.f32 %v4923_v50, %v9177_v3  ;;  %v4914_v16 = vadd.f32 %v4904_v12, %v4892_v53  ;;  %v4915_v31 = vadd.f32 %v4904_v12, %v4893_v40 }
0x1600   :  { %v8361_v59 = vpack.c.bf16 %v4931_v54, %v4930_v5  ;;  %v4916_v21 = vadd.f32 %v4904_v12, %v4894_v6  ;;  %v8362_v8 = vpack.c.bf16 %v4933_v11, %v4932_v28  ;;  %v4917_v57 = vadd.f32 %v4904_v12, %v4895_v33 }
0x1601   :  { %v8363_v25 = vpack.c.bf16 %v4935_v35, %v4934_v55  ;;  %v4924_v30 = vmax.f32 %v4912_v37, 0.0  ;;  %v4925_v43 = vmax.f32 %v4913_v7, 0.0  ;;  %v4926_v4 = vmax.f32 %v4914_v16, 0.0 }
0x1602   :  { %4978 = vst [vmem:[#allocation2 + $0x4] sm:$0xff] %v8361_v59  ;;  %v4927_v32 = vmax.f32 %v4915_v31, 0.0  ;;  %v4928_v61 = vmax.f32 %v4916_v21, 0.0  ;;  %4979 = vst [vmem:[#allocation2 + $0xc] sm:$0xff] %v8362_v8  ;;  %v4929_v51 = vmax.f32 %v4917_v57, 0.0 }
0x1603   :  { %4980 = vst [vmem:[#allocation2 + $0x14] sm:$0xff] %v8363_v25  ;;  %v4936_v36 = vmul.f32 %v4924_v30, %v9132_v20  ;;  %v4937_v42 = vmul.f32 %v4925_v43, %v9134_v23  ;;  %v4938_v62 = vmul.f32 %v4926_v4, %v9138_v29 }
0x1604   :  { %v4939_v60 = vmul.f32 %v4927_v32, %v9152_v45  ;;  %v4940_v19 = vmul.f32 %v4928_v61, %v9171_v18  ;;  %v4941_v2 = vmul.f32 %v4929_v51, %v9177_v3 }
0x1605   :  { %v8364_v46 = vpack.c.bf16 %v4937_v42, %v4936_v36 }
0x1606   :  { %v8365_v0 = vpack.c.bf16 %v4939_v60, %v4938_v62  ;;  %v8366_v38 = vpack.c.bf16 %v4941_v2, %v4940_v19 }
0x1607   :  { %4981 = vst [vmem:[#allocation2 + $0x24] sm:$0xff] %v8364_v46 }
0x1608   :  { %4982 = vst [vmem:[#allocation2 + $0x2c] sm:$0xff] %v8365_v0  ;;  %4983 = vst [vmem:[#allocation2 + $0x34] sm:$0xff] %v8366_v38 }
0x1609   :  { %v4984_v53 = vld [vmem:[#allocation2] sm:$0xff]  ;;  %v4985_v40 = vld [vmem:[#allocation2 + $0x8] sm:$0xff] }
0x160a   :  { %v4986_v33 = vld [vmem:[#allocation2 + $0x10] sm:$0xff]  ;;  %v4987_v34 = vld [vmem:[#allocation2 + $0x18] sm:$0xff] }
0x160e   :  { %v4988_v22 = vld [vmem:[#allocation2 + $0x20] sm:$0xff] }
0x160f   :  { %v4989_v27 = vld [vmem:[#allocation2 + $0x28] sm:$0xff]  ;;  %v12450_v52 = vcombine.high %v4984_v53, %v4988_v22  ;;  %v8237_v1 = vcombine.low %v4984_v53, %v4988_v22  ;;  %v4990_v6 = vld [vmem:[#allocation2 + $0x30] sm:$0xff]  ;;  %v4991_v12 = vld [vmem:[#allocation2 + $0x38] sm:$0xff] }
0x1610   :  { %v12448_v58 = vcombine.low %v4985_v40, %v4989_v27  ;;  %v12456_v63 = vcombine.high %v4985_v40, %v4989_v27  ;;  %v8241_v24 = vcombine.low %v4986_v33, %v4990_v6  ;;  %v8242_v44 = vcombine.high %v4986_v33, %v4990_v6 }
0x1611   :  { %5141 = vrot.lane.b32.xlu0 %v12450_v52, %s8474_s26  ;;  %v12508_v17 = vcombine.low %v4987_v34, %v4991_v12  ;;  %v8244_v15 = vcombine.high %v4987_v34, %v4991_v12 }
0x1612   :  { %5143 = vrot.lane.b32.xlu1 %v12448_v58, %s8474_s26 }
0x1615   :  { %5145 = vrot.lane.b32.xlu0 %v12456_v63, %s8474_s26 }
0x1616   :  { %5121 = vrot.lane.b32.xlu1 %v12450_v52, %s8475_s27 }
0x1619   :  { %5123 = vrot.lane.b32.xlu0 %v12448_v58, %s8475_s27 }
0x161a   :  { %5125 = vrot.lane.b32.xlu1 %v12456_v63, %s8475_s27 }
0x161d   :  { %5101 = vrot.lane.b32.xlu0 %v12450_v52, %s8476_s28 }
0x161e   :  { %5103 = vrot.lane.b32.xlu1 %v12448_v58, %s8476_s28 }
0x1621   :  { %5105 = vrot.lane.b32.xlu0 %v12456_v63, %s8476_s28 }
0x1622   :  { %5081 = vrot.lane.b32.xlu1 %v12450_v52, %s8477_s29 }
0x1625   :  { %5083 = vrot.lane.b32.xlu0 %v12448_v58, %s8477_s29 }
0x1626   :  { %5085 = vrot.lane.b32.xlu1 %v12456_v63, %s8477_s29 }
0x1629   :  { %5063 = vrot.lane.b32.xlu0 %v12450_v52, %s8478_s30 }
0x162a   :  { %5065 = vrot.lane.b32.xlu1 %v12448_v58, %s8478_s30 }
0x162d   :  { %5067 = vrot.lane.b32.xlu0 %v12456_v63, %s8478_s30 }
0x162e   :  { %5061 = vrot.lane.b32.xlu1 %v8237_v1, %s8478_s30 }
0x1631   :  { %5043 = vrot.lane.b32.xlu0 %v12450_v52, %s8479_s6 }
0x1632   :  { %5045 = vrot.lane.b32.xlu1 %v12448_v58, %s8479_s6 }
0x1635   :  { %5047 = vrot.lane.b32.xlu0 %v12456_v63, %s8479_s6 }
0x1636   :  { %5041 = vrot.lane.b32.xlu1 %v8237_v1, %s8479_s6 }
0x1639   :  { %5023 = vrot.lane.b32.xlu0 %v12450_v52, %s8480_s7 }
0x163a   :  { %5025 = vrot.lane.b32.xlu1 %v12448_v58, %s8480_s7 }
0x163d   :  { %5027 = vrot.lane.b32.xlu0 %v12456_v63, %s8480_s7 }
0x163e   :  { %5021 = vrot.lane.b32.xlu1 %v8237_v1, %s8480_s7 }
0x1641   :  { %5147 = vrot.lane.b32.xlu0 %v8241_v24, %s8474_s26 }
0x1642   :  { %5149 = vrot.lane.b32.xlu1 %v8242_v44, %s8474_s26 }
0x1645   :  { %5161 = vrot.lane.b32.xlu0 %v12450_v52, %s8481_s12 }
0x1646   :  { %5163 = vrot.lane.b32.xlu1 %v12448_v58, %s8481_s12 }
0x1649   :  { %5165 = vrot.lane.b32.xlu0 %v12456_v63, %s8481_s12 }
0x164a   :  { %5127 = vrot.lane.b32.xlu1 %v8241_v24, %s8475_s27 }
0x164d   :  { %5129 = vrot.lane.b32.xlu0 %v8242_v44, %s8475_s27 }
0x164e   :  { %5151 = vrot.lane.b32.xlu1 %v12508_v17, %s8474_s26 }
0x1651   :  { %5153 = vrot.lane.b32.xlu0 %v8244_v15, %s8474_s26 }
0x1652   :  { %5107 = vrot.lane.b32.xlu1 %v8241_v24, %s8476_s28 }
0x1655   :  { %5109 = vrot.lane.b32.xlu0 %v8242_v44, %s8476_s28 }
0x1656   :  { %5131 = vrot.lane.b32.xlu1 %v12508_v17, %s8475_s27 }
0x1659   :  { %5133 = vrot.lane.b32.xlu0 %v8244_v15, %s8475_s27 }
0x165a   :  { %5087 = vrot.lane.b32.xlu1 %v8241_v24, %s8477_s29 }
0x165d   :  { %5089 = vrot.lane.b32.xlu0 %v8242_v44, %s8477_s29 }
0x165e   :  { %5111 = vrot.lane.b32.xlu1 %v12508_v17, %s8476_s28 }
0x1661   :  { %5113 = vrot.lane.b32.xlu0 %v8244_v15, %s8476_s28 }
0x1662   :  { %5069 = vrot.lane.b32.xlu1 %v8241_v24, %s8478_s30 }
0x1665   :  { %5071 = vrot.lane.b32.xlu0 %v8242_v44, %s8478_s30 }
0x1666   :  { %5091 = vrot.lane.b32.xlu1 %v12508_v17, %s8477_s29 }
0x1669   :  { %5049 = vrot.lane.b32.xlu0 %v8241_v24, %s8479_s6 }
0x166a   :  { %5051 = vrot.lane.b32.xlu1 %v8242_v44, %s8479_s6 }
0x166d   :  { %5073 = vrot.lane.b32.xlu0 %v12508_v17, %s8478_s30 }
0x166e   :  { %5029 = vrot.lane.b32.xlu1 %v8241_v24, %s8480_s7 }
0x1671   :  { %5031 = vrot.lane.b32.xlu0 %v8242_v44, %s8480_s7 }
0x1672   :  { %5053 = vrot.lane.b32.xlu1 %v12508_v17, %s8479_s6 }
0x1675   :  { %5033 = vrot.lane.b32.xlu0 %v12508_v17, %s8480_s7 }
0x1676   :  { %5169 = vrot.lane.b32.xlu1 %v8242_v44, %s8481_s12 }
0x1679   :  { %5167 = vrot.lane.b32.xlu0 %v8241_v24, %s8481_s12 }
0x167a   :  { %5171 = vrot.lane.b32.xlu1 %v12508_v17, %s8481_s12 }
0x167d   :  { %5173 = vrot.lane.b32.xlu0 %v8244_v15, %s8481_s12 }
0x167e   :  { %5197 = vrot.lane.b32.xlu1 %v12448_v58, %s8482_s0 }
0x1681   :  { %5195 = vrot.lane.b32.xlu0 %v12450_v52, %s8482_s0 }
0x1682   :  { %5201 = vrot.lane.b32.xlu1 %v8241_v24, %s8482_s0 }
0x1683   :  { %v5142_v5 = vpop.permute.xlu0 %5141 }
0x1684   :  { %v12548_v50 = vpop.permute.xlu1 %5143 }
0x1685   :  { %5193 = vrot.lane.b32.xlu0 %v8237_v1, %s8482_s0  ;;  %v5155_v21 = vsel %vm207_vm0, %v5142_v5, %v12548_v50 }
0x1686   :  { %5291 = vrot.lane.b32.xlu1 %v5142_v5, %s8482_s0 }
0x1687   :  { %v12552_v37 = vpop.permute.xlu0 %5145 }
0x1688   :  { %v5122_v54 = vpop.permute.xlu1 %5121 }
0x1689   :  { %5199 = vrot.lane.b32.xlu0 %v12456_v63, %s8482_s0 }
0x168b   :  { %v12558_v28 = vpop.permute.xlu0 %5123 }
0x168c   :  { %v12556_v7 = vpop.permute.xlu1 %5125  ;;  %v5135_v57 = vsel %vm186_vm1, %v5122_v54, %v12558_v28 }
0x168d   :  { %5203 = vrot.lane.b32.xlu0 %v8242_v44, %s8482_s0 }
0x168f   :  { %v12563_v55 = vpop.permute.xlu0 %5101 }
0x1690   :  { %v12561_v11 = vpop.permute.xlu1 %5103  ;;  %5263 = vrot.lane.b32.xlu1 %v12563_v55, %s8482_s0 }
0x1691   :  { %5277 = vrot.lane.b32.xlu0 %v5122_v54, %s8482_s0 }
0x1693   :  { %v5106_v59 = vpop.permute.xlu0 %5105 }
0x1694   :  { %v5082_v35 = vpop.permute.xlu1 %5081  ;;  %v5116_v4 = vsel %vm165_vm2, %v12561_v11, %v5106_v59 }
0x1695   :  { %5249 = vrot.lane.b32.xlu0 %v5082_v35, %s8482_s0 }
0x1697   :  { %v12571_v31 = vpop.permute.xlu0 %5083 }
0x1698   :  { %v12569_v16 = vpop.permute.xlu1 %5085  ;;  %v5093_v51 = vsel %vm142_vm3, %v5082_v35, %v12571_v31 }
0x1699   :  { %5293 = vrot.lane.b32.xlu0 %v5155_v21, %s8482_s0 }
0x169b   :  { %v12578_v25 = vpop.permute.xlu0 %5063 }
0x169c   :  { %v12576_v8 = vpop.permute.xlu1 %5065 }
0x169d   :  { %5279 = vrot.lane.b32.xlu0 %v5135_v57, %s8482_s0 }
0x169f   :  { %v5068_v30 = vpop.permute.xlu0 %5067 }
0x16a0   :  { %v12583_v43 = vpop.permute.xlu1 %5061  ;;  %v5077_v62 = vsel %vm123_vm4, %v12576_v8, %v5068_v30 }
0x16a1   :  { %5267 = vrot.lane.b32.xlu0 %v5116_v4, %s8482_s0 }
0x16a3   :  { %v5044_v32 = vpop.permute.xlu0 %5043 }
0x16a4   :  { %v12588_v61 = vpop.permute.xlu1 %5045 }
0x16a5   :  { %5251 = vrot.lane.b32.xlu0 %v5093_v51, %s8482_s0  ;;  %v5056_v2 = vsel %vm102_vm5, %v5044_v32, %v12588_v61 }
0x16a7   :  { %v12593_v36 = vpop.permute.xlu0 %5047 }
0x16a8   :  { %v5042_v42 = vpop.permute.xlu1 %5041 }
0x16a9   :  { %5239 = vrot.lane.b32.xlu0 %v5077_v62, %s8482_s0  ;;  %v5055_v38 = vsel %vm102_vm5, %v5042_v42, %v5044_v32 }
0x16ab   :  { %v12598_v60 = vpop.permute.xlu0 %5023 }
0x16ac   :  { %v12600_v19 = vpop.permute.xlu1 %5025 }
0x16ad   :  { %5223 = vrot.lane.b32.xlu0 %v5056_v2, %s8482_s0 }
0x16af   :  { %v12605_v46 = vpop.permute.xlu0 %5027 }
0x16b0   :  { %v12607_v0 = vpop.permute.xlu1 %5021  ;;  %v5037_v27 = vsel %vm81_vm6, %v12600_v19, %v12605_v46 }
0x16b1   :  { %5221 = vrot.lane.b32.xlu0 %v5055_v38, %s8482_s0 }
0x16b3   :  { %v12611_v53 = vpop.permute.xlu0 %5147 }
0x16b4   :  { %v5150_v40 = vpop.permute.xlu1 %5149 }
0x16b5   :  { %5211 = vrot.lane.b32.xlu0 %v5037_v27, %s8482_s0  ;;  %v5158_v52 = vsel %vm207_vm0, %v12611_v53, %v5150_v40 }
0x16b7   :  { %v12617_v22 = vpop.permute.xlu0 %5161 }
0x16b8   :  { %v12619_v58 = vpop.permute.xlu1 %5163  ;;  %5305 = vrot.lane.b32.xlu1 %v12617_v22, %s8482_s0 }
0x16b9   :  { %5299 = vrot.lane.b32.xlu0 %v5158_v52, %s8482_s0 }
0x16bb   :  { %v12626_v63 = vpop.permute.xlu0 %5165 }
0x16bc   :  { %v12628_v1 = vpop.permute.xlu1 %5127  ;;  %v5176_v6 = vsel %vm228_vm7, %v12619_v58, %v12626_v63 }
0x16bd   :  { %5309 = vrot.lane.b32.xlu0 %v5176_v6, %s8482_s0  ;;  %v5137_v44 = vsel %vm186_vm1, %v12556_v7, %v12628_v1 }
0x16bf   :  { %v12634_v33 = vpop.permute.xlu0 %5129 }
0x16c0   :  { %v12636_v24 = vpop.permute.xlu1 %5151 }
0x16c1   :  { %5283 = vrot.lane.b32.xlu0 %v5137_v44, %s8482_s0  ;;  %v5159_v15 = vsel %vm207_vm0, %v5150_v40, %v12636_v24 }
0x16c3   :  { %v12642_v12 = vpop.permute.xlu0 %5153 }
0x16c4   :  { %v12644_v34 = vpop.permute.xlu1 %5107 }
0x16c5   :  { %5301 = vrot.lane.b32.xlu0 %v5159_v15, %s8482_s0  ;;  %v5117_v35 = vsel %vm165_vm2, %v5106_v59, %v12644_v34 }
0x16c7   :  { %v12649_v5 = vpop.permute.xlu0 %5109 }
0x16c8   :  { %v12651_v54 = vpop.permute.xlu1 %5131 }
0x16c9   :  { %5269 = vrot.lane.b32.xlu0 %v5117_v35, %s8482_s0  ;;  %v5139_v4 = vsel %vm186_vm1, %v12634_v33, %v12651_v54 }
0x16cb   :  { %v12656_v21 = vpop.permute.xlu0 %5133 }
0x16cc   :  { %v12658_v57 = vpop.permute.xlu1 %5087 }
0x16cd   :  { %5287 = vrot.lane.b32.xlu0 %v5139_v4, %s8482_s0  ;;  %v5095_v59 = vsel %vm142_vm3, %v12569_v16, %v12658_v57 }
0x16cf   :  { %v12664_v32 = vpop.permute.xlu0 %5089 }
0x16d0   :  { %v12666_v51 = vpop.permute.xlu1 %5111 }
0x16d1   :  { %5255 = vrot.lane.b32.xlu0 %v5095_v59, %s8482_s0  ;;  %v5119_v2 = vsel %vm165_vm2, %v12649_v5, %v12666_v51 }
0x16d3   :  { %v12672_v42 = vpop.permute.xlu0 %5113 }
0x16d4   :  { %v12674_v62 = vpop.permute.xlu1 %5069 }
0x16d5   :  { %5273 = vrot.lane.b32.xlu0 %v5119_v2, %s8482_s0  ;;  %v5078_v27 = vsel %vm123_vm4, %v5068_v30, %v12674_v62 }
0x16d7   :  { %v12680_v38 = vpop.permute.xlu0 %5071 }
0x16d8   :  { %v5092_v40 = vpop.permute.xlu1 %5091 }
0x16d9   :  { %5261 = vrot.lane.b32.xlu1 %v5092_v40, %s8482_s0  ;;  %5241 = vrot.lane.b32.xlu0 %v5078_v27, %s8482_s0  ;;  %v5097_v44 = vsel %vm142_vm3, %v12664_v32, %v5092_v40 }
0x16db   :  { %v12686_v52 = vpop.permute.xlu0 %5049 }
0x16dc   :  { %v12688_v6 = vpop.permute.xlu1 %5051  ;;  %v5058_v30 = vsel %vm102_vm5, %v12593_v36, %v12686_v52 }
0x16dd   :  { %5259 = vrot.lane.b32.xlu0 %v5097_v44, %s8482_s0  ;;  %v5156_v44 = vsel %vm207_vm0, %v12548_v50, %v12552_v37  ;;  %v5115_v50 = vsel %vm165_vm2, %v12563_v55, %v12561_v11  ;;  %v5076_v11 = vsel %vm123_vm4, %v12578_v25, %v12576_v8  ;;  %v5036_v8 = vsel %vm81_vm6, %v12598_v60, %v12600_v19 }
0x16df   :  { %v5074_v15 = vpop.permute.xlu0 %5073 }
0x16e0   :  { %v12693_v35 = vpop.permute.xlu1 %5029  ;;  %5247 = vrot.lane.b32.xlu1 %v5074_v15, %s8482_s0  ;;  %v5080_v2 = vsel %vm123_vm4, %v12680_v38, %v5074_v15 }
0x16e1   :  { %5227 = vrot.lane.b32.xlu0 %v5058_v30, %s8482_s0  ;;  %v5038_v27 = vsel %vm81_vm6, %v12605_v46, %v12693_v35 }
0x16e3   :  { %v12700_v4 = vpop.permute.xlu0 %5031 }
0x16e4   :  { %v5054_v59 = vpop.permute.xlu1 %5053 }
0x16e5   :  { %5233 = vrot.lane.b32.xlu1 %v5054_v59, %s8482_s0  ;;  %5245 = vrot.lane.b32.xlu0 %v5080_v2, %s8482_s0  ;;  %v5060_v15 = vsel %vm102_vm5, %v12688_v6, %v5054_v59  ;;  %v5136_v2 = vsel %vm186_vm1, %v12558_v28, %v12556_v7  ;;  %v5094_v7 = vsel %vm142_vm3, %v12571_v31, %v12569_v16 }
0x16e6   :  { %v5057_v31 = vsel %vm102_vm5, %v12588_v61, %v12593_v36  ;;  %v12770_v61 = vld [vmem:[%s15063_s1 + $0x74] ss:$8 sps:$4 sm:$0xff]   ;;  %v5157_v36 = vsel %vm207_vm0, %v12552_v37, %v12611_v53  ;;  %v5138_v37 = vsel %vm186_vm1, %v12628_v1, %v12634_v33  ;;  %v5160_v53 = vsel %vm207_vm0, %v12636_v24, %v12642_v12 }
0x16e7   :  { %v5034_v40 = vpop.permute.xlu0 %5033  ;;  %8249 = vmatprep.mubr.msk.bf16.mxu1 %vm481_vm8, %v12770_v61  ;;  %8250 = vmatprep.mubr.msk.bf16.mxu0 %vm481_vm8, %v12770_v61  ;;  %v5140_v1 = vsel %vm186_vm1, %v12651_v54, %v12656_v21  ;;  %v5096_v24 = vsel %vm142_vm3, %v12658_v57, %v12664_v32  ;;  %v5120_v12 = vsel %vm165_vm2, %v12666_v51, %v12672_v42 }
0x16e8   :  { %v12718_v30 = vpop.permute.xlu1 %5169  ;;  %v5040_v46 = vsel %vm81_vm6, %v12700_v4, %v5034_v40  ;;  %v5059_v21 = vsel %vm102_vm5, %v12686_v52, %v12688_v6  ;;  %v5039_v32 = vsel %vm81_vm6, %v12693_v35, %v12700_v4 }
0x16e9   :  { %5219 = vrot.lane.b32.xlu1 %v5034_v40, %s8482_s0  ;;  %5213 = vrot.lane.b32.xlu0 %v5038_v27, %s8482_s0 }
0x16eb   :  { %v5168_v27 = vpop.permute.xlu0 %5167 }
0x16ec   :  { %v5177_v59 = vsel %vm228_vm7, %v12626_v63, %v5168_v27  ;;  %v5075_v63 = vsel %vm123_vm4, %v12583_v43, %v12578_v25  ;;  %v5035_v25 = vsel %vm81_vm6, %v12607_v0, %v12598_v60  ;;  %v5175_v60 = vsel %vm228_vm7, %v12617_v22, %v12619_v58 }
0x16ed   :  { %5295 = vrot.lane.b32.xlu1 %v5156_v44, %s8482_s0  ;;  %5231 = vrot.lane.b32.xlu0 %v5060_v15, %s8482_s0  ;;  %v5172_v44 = vpop.permute.xlu1 %5171  ;;  %v5118_v22 = vsel %vm165_vm2, %v12644_v34, %v12649_v5  ;;  %v5079_v5 = vsel %vm123_vm4, %v12674_v62, %v12680_v38  ;;  %v5178_v38 = vsel %vm228_vm7, %v5168_v27, %v12718_v30 }
0x16ee   :  { %v5179_v28 = vsel %vm228_vm7, %v12718_v30, %v5172_v44 }
0x16ef   :  { %v5174_v55 = vpop.permute.xlu0 %5173 }
0x16f0   :  { %v5180_v6 = vsel %vm228_vm7, %v5172_v44, %v5174_v55 }
0x16f1   :  { %5281 = vrot.lane.b32.xlu1 %v5136_v2, %s8482_s0  ;;  %5217 = vrot.lane.b32.xlu0 %v5040_v46, %s8482_s0  ;;  %v12820_v57 = vpop.permute.xlu1 %5197 }
0x16f3   :  { %v12749_v16 = vpop.permute.xlu0 %5195 }
0x16f5   :  { %5265 = vrot.lane.b32.xlu1 %v5115_v50, %s8482_s0  ;;  %5311 = vrot.lane.b32.xlu0 %v5177_v59, %s8482_s0  ;;  %v12826_v42 = vpop.permute.xlu1 %5201 }
0x16f7   :  { %v12758_v40 = vpop.permute.xlu0 %5193 }
0x16f9   :  { %5253 = vrot.lane.b32.xlu1 %v5094_v7, %s8482_s0  ;;  %5315 = vrot.lane.b32.xlu0 %v5179_v28, %s8482_s0  ;;  %v5292_v52 = vpop.permute.xlu1 %5291 }
0x16fb   :  { %v12765_v43 = vpop.permute.xlu0 %5199 }
0x16fd   :  { %5237 = vrot.lane.b32.xlu1 %v5076_v11, %s8482_s0 }
0x16ff   :  { %v12783_v19 = vpop.permute.xlu0 %5203 }
0x1701   :  { %5235 = vrot.lane.b32.xlu1 %v5075_v63, %s8482_s0 }
0x1702   :  { %v5264_v35 = vpop.permute.xlu1 %5263 }
0x1703   :  { %v5278_v0 = vpop.permute.xlu0 %5277 }
0x1705   :  { %5225 = vrot.lane.b32.xlu1 %v5057_v31, %s8482_s0 }
0x1707   :  { %v5250_v58 = vpop.permute.xlu0 %5249 }
0x1709   :  { %5209 = vrot.lane.b32.xlu1 %v5036_v8, %s8482_s0 }
0x170b   :  { %v5294_v33 = vpop.permute.xlu0 %5293 }
0x170c   :  { %v5361_v11 = vsel %vm372_vm9, %v5292_v52, %v5294_v33 }
0x170d   :  { %5207 = vrot.lane.b32.xlu1 %v5035_v25, %s8482_s0 }
0x170f   :  { %v5280_v34 = vpop.permute.xlu0 %5279 }
0x1710   :  { %v5355_v8 = vsel %vm372_vm9, %v5278_v0, %v5280_v34 }
0x1711   :  { %5297 = vrot.lane.b32.xlu1 %v5157_v36, %s8482_s0 }
0x1713   :  { %v12814_v54 = vpop.permute.xlu0 %5267 }
0x1715   :  { %5307 = vrot.lane.b32.xlu1 %v5175_v60, %s8482_s0 }
0x1717   :  { %v5252_v51 = vpop.permute.xlu0 %5251 }
0x1719   :  { %5285 = vrot.lane.b32.xlu1 %v5138_v37, %s8482_s0 }
0x171b   :  { %v12830_v62 = vpop.permute.xlu0 %5239 }
0x171d   :  { %5303 = vrot.lane.b32.xlu1 %v5160_v53, %s8482_s0 }
0x171f   :  { %v5224_v15 = vpop.permute.xlu0 %5223 }
0x1721   :  { %5271 = vrot.lane.b32.xlu1 %v5118_v22, %s8482_s0 }
0x1723   :  { %v5222_v4 = vpop.permute.xlu0 %5221 }
0x1725   :  { %5289 = vrot.lane.b32.xlu1 %v5140_v1, %s8482_s0  ;;  %v5343_v1 = vsel %vm372_vm9, %v5250_v58, %v5252_v51 }
0x1729   :  { %5257 = vrot.lane.b32.xlu1 %v5096_v24, %s8482_s0 }
0x172a   :  { %v12837_v2 = vpop.permute.xlu1 %5305 }
0x172d   :  { %5275 = vrot.lane.b32.xlu1 %v5120_v12, %s8482_s0 }
0x1731   :  { %5243 = vrot.lane.b32.xlu1 %v5079_v5, %s8482_s0 }
0x1735   :  { %5229 = vrot.lane.b32.xlu1 %v5059_v21, %s8482_s0 }
0x1739   :  { %5215 = vrot.lane.b32.xlu1 %v5039_v32, %s8482_s0 }
0x173d   :  { %5205 = vrot.lane.b32.xlu1 %v12508_v17, %s8482_s0  ;;  %v12841_v17 = vpop.permute.xlu0 %5211 }
0x1741   :  { %5313 = vrot.lane.b32.xlu1 %v5178_v38, %s8482_s0  ;;  %v12845_v59 = vpop.permute.xlu0 %5299  ;;  %v5331_v38 = vsel %vm372_vm9, %v5222_v4, %v5224_v15 }
0x1745   :  { %5317 = vrot.lane.b32.xlu1 %v5180_v6, %s8482_s0  ;;  %v12851_v44 = vpop.permute.xlu0 %5309 }
0x1749   :  { %v5284_v55 = vpop.permute.xlu0 %5283 }
0x174b   :  { %v12839_v46 = vpop.permute.xlu1 %5261 }
0x174d   :  { %v5302_v37 = vpop.permute.xlu0 %5301 }
0x1751   :  { %v5270_v0 = vpop.permute.xlu0 %5269 }
0x1752   :  { %v12843_v50 = vpop.permute.xlu1 %5247 }
0x1755   :  { %v5288_v5 = vpop.permute.xlu0 %5287 }
0x1757   :  { %v12847_v30 = vpop.permute.xlu1 %5233 }
0x1759   :  { %v5256_v58 = vpop.permute.xlu0 %5255 }
0x175b   :  { %v12849_v27 = vpop.permute.xlu1 %5219 }
0x175f   :  { %v5296_v7 = vpop.permute.xlu1 %5295 }
0x1760   :  { %v5362_v28 = vsel %vm372_vm9, %v5294_v33, %v5296_v7 }
0x1761   :  { %5430 = vmatprep.subr.bf16.mxu1 %v5362_v28  ;;  %v5274_v28 = vpop.permute.xlu0 %5273 }
0x1762   :  { %5431 = vmatpush1.bf16.msra.mxu1 %v5361_v11  ;;  %v5320_v11 = vsel %vm372_vm9, %v12749_v16, %v12820_v57 }
0x1763   :  { %v5282_v63 = vpop.permute.xlu1 %5281 }
0x1764   :  { %v5356_v31 = vsel %vm372_vm9, %v5280_v34, %v5282_v63 }
0x1765   :  { %5432 = vmatprep.subr.bf16.mxu1 %v5356_v31 }
0x1766   :  { %5433 = vmatpush1.bf16.msra.mxu1 %v5355_v8 }
0x1767   :  { %v5266_v25 = vpop.permute.xlu1 %5265 }
0x1768   :  { %v5350_v36 = vsel %vm372_vm9, %v5266_v25, %v12814_v54  ;;  %v5349_v60 = vsel %vm372_vm9, %v5264_v35, %v5266_v25  ;;  %v5242_v25 = vpop.permute.xlu0 %5241 }
0x1769   :  { %5434 = vmatprep.subr.bf16.mxu1 %v5350_v36 }
0x176a   :  { %5435 = vmatpush1.bf16.msra.mxu1 %v5349_v60 }
0x176b   :  { %v12860_v53 = vpop.permute.xlu1 %5253 }
0x176c   :  { %v5344_v22 = vsel %vm372_vm9, %v5252_v51, %v12860_v53 }
0x176d   :  { %5436 = vmatprep.subr.bf16.mxu1 %v5344_v22 }
0x176e   :  { %5437 = vmatpush1.bf16.msra.mxu1 %v5343_v1  ;;  %v5260_v1 = vpop.permute.xlu0 %5259 }
0x176f   :  { %v5238_v33 = vpop.permute.xlu1 %5237 }
0x1770   :  { %v5338_v24 = vsel %vm372_vm9, %v5238_v33, %v12830_v62 }
0x1771   :  { %5438 = vmatprep.subr.bf16.mxu1 %v5338_v24 }
0x1773   :  { %v5236_v12 = vpop.permute.xlu1 %5235 }
0x1774   :  { %v5337_v34 = vsel %vm372_vm9, %v5236_v12, %v5238_v33  ;;  %v5357_v33 = vsel %vm372_vm9, %v5282_v63, %v5284_v55  ;;  %v5365_v12 = vsel %vm372_vm9, %v12845_v59, %v5302_v37 }
0x1775   :  { %5439 = vmatpush1.bf16.msra.mxu1 %v5337_v34  ;;  %v5228_v34 = vpop.permute.xlu0 %5227 }
0x1777   :  { %v12868_v21 = vpop.permute.xlu1 %5225 }
0x1778   :  { %v5332_v32 = vsel %vm372_vm9, %v5224_v15, %v12868_v21  ;;  %v5319_v15 = vsel %vm372_vm9, %v12758_v40, %v12749_v16  ;;  %v12892_v16 = vld [vmem:[%s15063_s1 + $0x70] ss:$8 sps:$4 sm:$0xff]  }
0x1779   :  { %5440 = vmatprep.subr.bf16.mxu1 %v5332_v32 }
0x177a   :  { %5441 = vmatpush1.bf16.msra.mxu1 %v5331_v38 }
0x177b   :  { %v5210_v51 = vpop.permute.xlu1 %5209 }
0x177c   :  { %v5326_v52 = vsel %vm372_vm9, %v5210_v51, %v12841_v17 }
0x177d   :  { %5442 = vmatprep.subr.bf16.mxu1 %v5326_v52 }
0x177f   :  { %v5208_v6 = vpop.permute.xlu1 %5207 }
0x1780   :  { %v5325_v35 = vsel %vm372_vm9, %v5208_v6, %v5210_v51  ;;  %v5246_v51 = vpop.permute.xlu0 %5245 }
0x1781   :  { %5443 = vmatpush1.bf16.msra.mxu1 %v5325_v35 }
0x1782   :  { %5444 = vmatprep.subr.bf16.mxu1 %v5320_v11 }
0x1783   :  { %v5298_v31 = vpop.permute.xlu1 %5297 }
0x1784   :  { %v5364_v4 = vsel %vm372_vm9, %v5298_v31, %v12845_v59  ;;  %v5363_v8 = vsel %vm372_vm9, %v5296_v7, %v5298_v31  ;;  %v5214_v35 = vpop.permute.xlu0 %5213 }
0x1785   :  { %5445 = vmatpush1.bf16.msra.mxu1 %v5319_v15  ;;  %5473 = vmatprep.subr.bf16.mxu0 %v5364_v4 }
0x1786   :  { %5474 = vmatpush1.bf16.msra.mxu0 %v5363_v8 }
0x1787   :  { %v5308_v36 = vpop.permute.xlu1 %5307 }
0x1788   :  { %v5368_v60 = vsel %vm372_vm9, %v5308_v36, %v12851_v44  ;;  %v5367_v22 = vsel %vm372_vm9, %v12837_v2, %v5308_v36  ;;  %v5232_v4 = vpop.permute.xlu0 %5231  ;;  %v5333_v36 = vsel %vm372_vm9, %v12868_v21, %v5228_v34  ;;  %v5322_v21 = vsel %vm372_vm9, %v12765_v43, %v12826_v42 }
0x1789   :  { %5460 = vmatprep.subr.bf16.mxu1 %v5368_v60 }
0x178a   :  { %5461 = vmatpush2.bf16.msra.mxu1 %v5367_v22 }
0x178b   :  { %v5286_v40 = vpop.permute.xlu1 %5285 }
0x178c   :  { %v5358_v7 = vsel %vm372_vm9, %v5284_v55, %v5286_v40  ;;  %v5351_v55 = vsel %vm372_vm9, %v12814_v54, %v5270_v0  ;;  %v5359_v52 = vsel %vm372_vm9, %v5286_v40, %v5288_v5  ;;  %v5327_v40 = vsel %vm372_vm9, %v12841_v17, %v5214_v35 }
0x178d   :  { %5475 = vmatprep.subr.bf16.mxu0 %v5358_v7  ;;  %5463 = vmatmul.mubr.bf16.vlgmr.msra.gmra.mxu1 %v12892_v16 }
0x178e   :  { %5476 = vmatpush1.bf16.msra.mxu0 %v5357_v33  ;;  %8251 = vmatprep.mubr.msk.bf16.mxu1 %vm481_vm8, %v12770_v61 }
0x178f   :  { %v5304_v2 = vpop.permute.xlu1 %5303 }
0x1790   :  { %v5366_v24 = vsel %vm372_vm9, %v5302_v37, %v5304_v2  ;;  %v5345_v37 = vsel %vm372_vm9, %v12860_v53, %v5256_v58  ;;  %v5339_v53 = vsel %vm372_vm9, %v12830_v62, %v5242_v25  ;;  %v5336_v62 = vsel %vm372_vm9, %v5232_v4, %v12847_v30 }
0x1791   :  { %5516 = vmatprep.subr.bf16.mxu1 %v5366_v24  ;;  %v5321_v2 = vsel %vm372_vm9, %v12820_v57, %v12765_v43 }
0x1792   :  { %5517 = vmatpush1.bf16.msra.mxu1 %v5365_v12 }
0x1793   :  { %v5272_v32 = vpop.permute.xlu1 %5271 }
0x1794   :  { %v5352_v38 = vsel %vm372_vm9, %v5270_v0, %v5272_v32  ;;  %v5353_v0 = vsel %vm372_vm9, %v5272_v32, %v5274_v28  ;;  %v5323_v32 = vsel %vm372_vm9, %v12826_v42, %v12783_v19 }
0x1795   :  { %5477 = vmatprep.subr.bf16.mxu0 %v5352_v38 }
0x1796   :  { %5478 = vmatpush1.bf16.msra.mxu0 %v5351_v55 }
0x1797   :  { %v5290_v63 = vpop.permute.xlu1 %5289 }
0x1798   :  { %v5360_v61 = vsel %vm372_vm9, %v5288_v5, %v5290_v63  ;;  %v5348_v5 = vsel %vm372_vm9, %v5260_v1, %v12839_v46 }
0x1799   :  { %5518 = vmatprep.subr.bf16.mxu1 %v5360_v61 }
0x179a   :  { %5519 = vmatpush1.bf16.msra.mxu1 %v5359_v52 }
0x179b   :  { %v5258_v6 = vpop.permute.xlu1 %5257 }
0x179c   :  { %v5346_v59 = vsel %vm372_vm9, %v5256_v58, %v5258_v6  ;;  %v5347_v58 = vsel %vm372_vm9, %v5258_v6, %v5260_v1 }
0x179d   :  { %5479 = vmatprep.subr.bf16.mxu0 %v5346_v59 }
0x179e   :  { %5480 = vmatpush1.bf16.msra.mxu0 %v5345_v37 }
0x179f   :  { %v5276_v11 = vpop.permute.xlu1 %5275 }
0x17a0   :  { %v5354_v54 = vsel %vm372_vm9, %v5274_v28, %v5276_v11  ;;  %v5342_v28 = vsel %vm372_vm9, %v5246_v51, %v12843_v50 }
0x17a1   :  { %5520 = vmatprep.subr.bf16.mxu1 %v5354_v54 }
0x17a2   :  { %5521 = vmatpush1.bf16.msra.mxu1 %v5353_v0 }
0x17a3   :  { %5522 = vmatprep.subr.bf16.mxu1 %v5348_v5  ;;  %v5244_v31 = vpop.permute.xlu1 %5243 }
0x17a4   :  { %v5340_v15 = vsel %vm372_vm9, %v5242_v25, %v5244_v31  ;;  %v5341_v60 = vsel %vm372_vm9, %v5244_v31, %v5246_v51  ;;  %v5218_v25 = vpop.permute.xlu0 %5217 }
0x17a5   :  { %5481 = vmatprep.subr.bf16.mxu0 %v5340_v15  ;;  %v5330_v30 = vsel %vm372_vm9, %v5218_v25, %v12849_v27 }
0x17a6   :  { %5482 = vmatpush1.bf16.msra.mxu0 %v5339_v53  ;;  %5523 = vmatpush1.bf16.msra.mxu1 %v5347_v58 }
0x17a7   :  { %5524 = vmatprep.subr.bf16.mxu1 %v5342_v28  ;;  %v5230_v8 = vpop.permute.xlu1 %5229 }
0x17a8   :  { %v5334_v46 = vsel %vm372_vm9, %v5228_v34, %v5230_v8  ;;  %v5335_v7 = vsel %vm372_vm9, %v5230_v8, %v5232_v4  ;;  %v5312_v33 = vpop.permute.xlu0 %5311 }
0x17a9   :  { %5483 = vmatprep.subr.bf16.mxu0 %v5334_v46  ;;  %v5369_v27 = vsel %vm372_vm9, %v12851_v44, %v5312_v33 }
0x17aa   :  { %5484 = vmatpush1.bf16.msra.mxu0 %v5333_v36  ;;  %5525 = vmatpush1.bf16.msra.mxu1 %v5341_v60 }
0x17ab   :  { %5526 = vmatprep.subr.bf16.mxu1 %v5336_v62  ;;  %v5216_v22 = vpop.permute.xlu1 %5215 }
0x17ac   :  { %v5328_v50 = vsel %vm372_vm9, %v5214_v35, %v5216_v22  ;;  %v5329_v17 = vsel %vm372_vm9, %v5216_v22, %v5218_v25  ;;  %v5316_v43 = vpop.permute.xlu0 %5315 }
0x17ad   :  { %5485 = vmatprep.subr.bf16.mxu0 %v5328_v50 }
0x17ae   :  { %5486 = vmatpush1.bf16.msra.mxu0 %v5327_v40  ;;  %5527 = vmatpush1.bf16.msra.mxu1 %v5335_v7 }
0x17af   :  { %5487 = vmatprep.subr.bf16.mxu0 %v5322_v21  ;;  %5528 = vmatprep.subr.bf16.mxu1 %v5330_v30  ;;  %v5206_v1 = vpop.permute.xlu1 %5205 }
0x17b0   :  { %v5324_v24 = vsel %vm372_vm9, %v12783_v19, %v5206_v1 }
0x17b2   :  { %5488 = vmatpush1.bf16.msra.mxu0 %v5321_v2  ;;  %5529 = vmatpush1.bf16.msra.mxu1 %v5329_v17 }
0x17b3   :  { %5530 = vmatprep.subr.bf16.mxu1 %v5324_v24  ;;  %v5314_v12 = vpop.permute.xlu1 %5313 }
0x17b4   :  { %v5370_v34 = vsel %vm372_vm9, %v5312_v33, %v5314_v12  ;;  %v5371_v55 = vsel %vm372_vm9, %v5314_v12, %v5316_v43 }
0x17b5   :  { %5503 = vmatprep.subr.bf16.mxu0 %v5370_v34 }
0x17b6   :  { %5504 = vmatpush2.bf16.msra.mxu0 %v5369_v27  ;;  %5531 = vmatpush1.bf16.msra.mxu1 %v5323_v32 }
0x17b7   :  { %v5318_v57 = vpop.permute.xlu1 %5317 }
0x17b8   :  { %v5372_v38 = vsel %vm372_vm9, %v5316_v43, %v5318_v57 }
0x17b9   :  { %5506 = vmatmul.mubr.bf16.vlgmr.msra.gmra.mxu0 %v12892_v16  ;;  %5546 = vmatprep.subr.bf16.mxu1 %v5372_v38 }
0x17ba   :  { %5547 = vmatpush2.bf16.msra.mxu1 %v5371_v55 }
0x17bd   :  { %5549 = vmatmul.mubr.bf16.vlgmr.msra.gmra.mxu1 %v12892_v16 }
0x184d   :  { %v12951_v63 = vpop.f32.mrf.mxu1 }
0x184e   :  { %v5559_v19 = vmul.f32 %v12951_v63, %v9132_v20 }
0x184f   :  { %v12953_v44 = vpop.f32.mrf.mxu1 }
0x1850   :  { %v5560_v42 = vmul.f32 %v12953_v44, %v9134_v23  ;;  %v5587_v6 = vmul.f32 %v5559_v19, %v12951_v63 }
0x1851   :  { %v12955_v61 = vpop.f32.mrf.mxu1 }
0x1852   :  { %v5565_v52 = vmul.f32 %v12955_v61, %v9132_v20  ;;  %v5588_v59 = vmul.f32 %v5560_v42, %v12953_v44  ;;  %v5571_v35 = vadd.f32 %v5560_v42, %v5559_v19 }
0x1853   :  { %v12961_v51 = vpop.f32.mrf.mxu1 }
0x1854   :  { %v5566_v16 = vmul.f32 %v12961_v51, %v9134_v23  ;;  %v5593_v54 = vmul.f32 %v5565_v52, %v12955_v61  ;;  %v5599_v31 = vadd.f32 %v5588_v59, %v5587_v6 }
0x1856   :  { %v5594_v0 = vmul.f32 %v5566_v16, %v12961_v51  ;;  %v5578_v58 = vadd.f32 %v5566_v16, %v5565_v52 }
0x1858   :  { %v5606_v25 = vadd.f32 %v5594_v0, %v5593_v54 }
0x1879   :  { %v12969_v37 = vpop.f32.mrf.mxu0 }
0x187a   :  { %v5561_v11 = vmul.f32 %v12969_v37, %v9138_v29 }
0x187b   :  { %v12975_v5 = vpop.f32.mrf.mxu0 }
0x187c   :  { %v5572_v15 = vadd.f32 %v5571_v35, %v5561_v11  ;;  %v5589_v4 = vmul.f32 %v5561_v11, %v12969_v37  ;;  %v5562_v53 = vmul.f32 %v12975_v5, %v9152_v45 }
0x187d   :  { %v12980_v28 = vpop.f32.mrf.mxu0  ;;  %v12982_v8 = vpop.f32.mrf.mxu1 }
0x187e   :  { %v5600_v46 = vadd.f32 %v5599_v31, %v5589_v4  ;;  %v5573_v36 = vadd.f32 %v5572_v15, %v5562_v53  ;;  %v5590_v60 = vmul.f32 %v5562_v53, %v12975_v5  ;;  %v5567_v62 = vmul.f32 %v12980_v28, %v9138_v29 }
0x187f   :  { %v5563_v22 = vmul.f32 %v12982_v8, %v9171_v18  ;;  %v12989_v50 = vpop.f32.mrf.mxu0  ;;  %v12991_v40 = vpop.f32.mrf.mxu1 }
0x1880   :  { %v5601_v7 = vadd.f32 %v5600_v46, %v5590_v60  ;;  %v5579_v21 = vadd.f32 %v5578_v58, %v5567_v62  ;;  %v5595_v30 = vmul.f32 %v5567_v62, %v12980_v28  ;;  %v5568_v1 = vmul.f32 %v12989_v50, %v9152_v45 }
0x1881   :  { %v5574_v33 = vadd.f32 %v5573_v36, %v5563_v22  ;;  %v5591_v2 = vmul.f32 %v5563_v22, %v12982_v8  ;;  %v5564_v17 = vmul.f32 %v12991_v40, %v9177_v3  ;;  %v12999_v24 = vpop.f32.mrf.mxu1 }
0x1882   :  { %v5607_v12 = vadd.f32 %v5606_v25, %v5595_v30  ;;  %v5580_v34 = vadd.f32 %v5579_v21, %v5568_v1  ;;  %v5596_v27 = vmul.f32 %v5568_v1, %v12989_v50  ;;  %v5569_v32 = vmul.f32 %v12999_v24, %v9171_v18 }
0x1883   :  { %v5602_v43 = vadd.f32 %v5601_v7, %v5591_v2  ;;  %v5592_v57 = vmul.f32 %v5564_v17, %v12991_v40  ;;  %v13005_v38 = vpop.f32.mrf.mxu1  ;;  %v5575_v55 = vadd.f32 %v5574_v33, %v5564_v17  ;;  %v8252_v33 = vld [vmem:[%s15065_s2 + $0x70] sm:$0xff] }
0x1884   :  { %v5608_v19 = vadd.f32 %v5607_v12, %v5596_v27  ;;  %v5581_v42 = vadd.f32 %v5580_v34, %v5569_v32  ;;  %v5597_v52 = vmul.f32 %v5569_v32, %v12999_v24  ;;  %v5570_v16 = vmul.f32 %v13005_v38, %v9177_v3  ;;  %v8254_v12 = vld [vmem:[%s15066_s3 + $0x70] sm:$0xff]  ;;  %v8253_v34 = vld [vmem:[%s15065_s2 + $0x78] sm:$0xff] }
0x1885   :  { %5576 = vadd.xlane.f32.xlu0 %v5575_v55  ;;  %v5603_v11 = vadd.f32 %v5602_v43, %v5592_v57  ;;  %v8255_v55 = vld [vmem:[%s15066_s3 + $0x78] sm:$0xff] }
0x1886   :  { %v5582_v6 = vadd.f32 %v5581_v42, %v5570_v16  ;;  %v5609_v59 = vadd.f32 %v5608_v19, %v5597_v52  ;;  %v5598_v35 = vmul.f32 %v5570_v16, %v13005_v38 }
0x1888   :  { %5583 = vadd.xlane.f32.xlu1 %v5582_v6  ;;  %v5610_v54 = vadd.f32 %v5609_v59, %v5598_v35 }
0x1889   :  { %5604 = vadd.xlane.f32.xlu0 %v5603_v11 }
0x188d   :  { %5611 = vadd.xlane.f32.xlu0 %v5610_v54 }
0x190e   :  { %v5577_v0 = vpop.xlane.xlu0 %5576 }
0x190f   :  { %v5585_v31 = vmul.f32 0.001953125, %v5577_v0 }
0x1911   :  { %v5584_v15 = vpop.xlane.xlu1 %5583  ;;  %v5615_v53 = vmul.f32 %v5585_v31, %v5585_v31 }
0x1912   :  { %v5605_v4 = vpop.xlane.xlu0 %5604  ;;  %v5586_v46 = vmul.f32 0.001953125, %v5584_v15 }
0x1913   :  { %v5613_v58 = vmul.f32 0.001953125, %v5605_v4 }
0x1914   :  { %v5616_v25 = vmul.f32 %v5586_v46, %v5586_v46 }
0x1915   :  { %v5617_v36 = vsub.f32 %v5613_v58, %v5615_v53 }
0x1916   :  { %v5612_v60 = vpop.xlane.xlu0 %5611 }
0x1917   :  { %v5619_v62 = vmax.f32 %v5617_v36, 0.0  ;;  %v5614_v22 = vmul.f32 0.001953125, %v5612_v60 }
0x1919   :  { %v5624_v7 = vadd.f32 1e-05, %v5619_v62  ;;  %v5618_v21 = vsub.f32 %v5614_v22, %v5616_v25 }
0x191b   :  { %8454 = vrsqrt.f32 %v5624_v7  ;;  %v5620_v30 = vmax.f32 %v5618_v21, 0.0 }
0x191d   :  { %v5625_v1 = vadd.f32 1e-05, %v5620_v30 }
0x191f   :  { %8456 = vrsqrt.f32 %v5625_v1 }
0x1928   :  { %v8455_v2 = vpop.eup %8454 }
0x1929   :  { %v5628_v17 = vmul.f32 %v8455_v2, %v8252_v33  ;;  %v15155_v2 = vmax.f32 %v11761_v41, 0.0  ;;  %v15160_v41 = vmax.f32 %v11781_v47, 0.0 }
0x192b   :  { %5639 = vperm.xlu1 %8395, %v5628_v17   ;;  %v5633_v27 = vmul.f32 %v5628_v17, %v5585_v31 }
0x192c   :  { %v8457_v32 = vpop.eup %8456 }
0x192d   :  { %v5635_v43 = vsub.f32 %v8254_v12, %v5633_v27  ;;  %v5629_v57 = vmul.f32 %v8457_v32, %v8253_v34  ;;  %v15156_v12 = vmax.f32 %v11765_v26, 0.0 }
0x192f   :  { %5661 = vperm.xlu1 %8395, %v5635_v43   ;;  %5644 = vperm.xlu0 %8396, %v5629_v57   ;;  %v5634_v19 = vmul.f32 %v5629_v57, %v5586_v46  ;;  %v15157_v43 = vmax.f32 %v11769_v39, 0.0 }
0x1931   :  { %v5636_v42 = vsub.f32 %v8255_v55, %v5634_v19  ;;  %v15158_v55 = vmax.f32 %v11773_v10, 0.0 }
0x1933   :  { %5666 = vperm.xlu1 %8395, %v5636_v42   ;;  %v15159_v42 = vmax.f32 %v11777_v13, 0.0 }
0x19a6   :  { %v5640_v52 = vpop.permute.xlu1 %5639 }
0x19a7   :  { %v5647_v16 = vmul.f32 %v5640_v52, %v12951_v63  ;;  %v5648_v6 = vmul.f32 %v5640_v52, %v12953_v44  ;;  %v5649_v59 = vmul.f32 %v5640_v52, %v12969_v37  ;;  %v5650_v35 = vmul.f32 %v5640_v52, %v12975_v5 }
0x19a8   :  { %v5651_v0 = vmul.f32 %v5640_v52, %v12982_v8  ;;  %v5652_v31 = vmul.f32 %v5640_v52, %v12991_v40 }
0x19aa   :  { %v5645_v11 = vpop.permute.xlu0 %5644  ;;  %v5662_v54 = vpop.permute.xlu1 %5661 }
0x19ab   :  { %v5653_v15 = vmul.f32 %v5645_v11, %v12955_v61  ;;  %v5654_v4 = vmul.f32 %v5645_v11, %v12961_v51  ;;  %v5655_v53 = vmul.f32 %v5645_v11, %v12980_v28  ;;  %v5656_v63 = vmul.f32 %v5645_v11, %v12989_v50 }
0x19ac   :  { %v5669_v58 = vadd.f32 %v5662_v54, %v5647_v16  ;;  %v5670_v44 = vadd.f32 %v5662_v54, %v5648_v6  ;;  %v5671_v46 = vadd.f32 %v5662_v54, %v5649_v59  ;;  %v5672_v37 = vadd.f32 %v5662_v54, %v5650_v35 }
0x19ad   :  { %v5673_v36 = vadd.f32 %v5662_v54, %v5651_v0  ;;  %v5674_v5 = vadd.f32 %v5662_v54, %v5652_v31  ;;  %v5657_v60 = vmul.f32 %v5645_v11, %v12999_v24  ;;  %v5658_v8 = vmul.f32 %v5645_v11, %v13005_v38 }
0x19ae   :  { %v5681_v62 = vmax.f32 %v5669_v58, 0.0  ;;  %v5682_v40 = vmax.f32 %v5670_v44, 0.0  ;;  %v5667_v25 = vpop.permute.xlu1 %5666  ;;  %v5683_v61 = vmax.f32 %v5671_v46, 0.0  ;;  %v5684_v22 = vmax.f32 %v5672_v37, 0.0 }
0x19af   :  { %v5685_v51 = vmax.f32 %v5673_v36, 0.0  ;;  %v5686_v7 = vmax.f32 %v5674_v5, 0.0  ;;  %v5675_v21 = vadd.f32 %v5667_v25, %v5653_v15  ;;  %v5676_v30 = vadd.f32 %v5667_v25, %v5654_v4 }
0x19b0   :  { %v5693_v28 = vmul.f32 %v5681_v62, %v9132_v20  ;;  %v5694_v50 = vmul.f32 %v5682_v40, %v9134_v23  ;;  %v5695_v1 = vmul.f32 %v5683_v61, %v9138_v29  ;;  %v5696_v33 = vmul.f32 %v5684_v22, %v9152_v45 }
0x19b1   :  { %v5697_v24 = vmul.f32 %v5685_v51, %v9171_v18  ;;  %v5698_v38 = vmul.f32 %v5686_v7, %v9177_v3  ;;  %v5677_v27 = vadd.f32 %v5667_v25, %v5655_v53  ;;  %v5678_v32 = vadd.f32 %v5667_v25, %v5656_v63 }
0x19b2   :  { %v13043_v17 = vadd.f32 %v5693_v28, %v15155_v2  ;;  %v13047_v34 = vadd.f32 %v5694_v50, %v15156_v12  ;;  %v13051_v57 = vadd.f32 %v5695_v1, %v15157_v43  ;;  %v13055_v19 = vadd.f32 %v5696_v33, %v15158_v55 }
0x19b3   :  { %v13059_v52 = vadd.f32 %v5697_v24, %v15159_v42  ;;  %v13063_v16 = vadd.f32 %v5698_v38, %v15160_v41  ;;  %v5679_v59 = vadd.f32 %v5667_v25, %v5657_v60  ;;  %v5680_v39 = vadd.f32 %v5667_v25, %v5658_v8 }
0x19b4   :  { %v15118_v26 = vmax.f32 %v13043_v17, 0.0  ;;  %v15117_v6 = vmax.f32 %v13047_v34, 0.0  ;;  %v15116_v35 = vmax.f32 %v13051_v57, 0.0  ;;  %v15115_v10 = vmax.f32 %v13055_v19, 0.0 }
0x19b5   :  { %15161 = vst [vmem:[#allocation16_spill] sm:$0xff] %v13063_v16  ;;  %v15114_v11 = vmax.f32 %v13059_v52, 0.0  ;;  %v15113_v13 = vmax.f32 %v13063_v16, 0.0  ;;  %v5687_v54 = vmax.f32 %v5675_v21, 0.0  ;;  %v5688_v0 = vmax.f32 %v5676_v30, 0.0  ;;  %v15172_v21 = vld [vmem:[#allocation3_spill] sm:$0xff] }
0x19b6   :  { %v8367_v47 = vpack.c.bf16 %v15117_v6, %v15118_v26  ;;  %v5689_v31 = vmax.f32 %v5677_v27, 0.0  ;;  %v8368_v15 = vpack.c.bf16 %v15115_v10, %v15116_v35  ;;  %v5690_v53 = vmax.f32 %v5678_v32, 0.0 }
0x19b7   :  { %v8369_v4 = vpack.c.bf16 %v15113_v13, %v15114_v11  ;;  %v5691_v63 = vmax.f32 %v5679_v59, 0.0  ;;  %v5692_v58 = vmax.f32 %v5680_v39, 0.0  ;;  %v5699_v44 = vmul.f32 %v5687_v54, %v9132_v20 }
0x19b8   :  { %5765 = vst [vmem:[#allocation2 + $0x4] sm:$0xff] %v8367_v47  ;;  %v5700_v46 = vmul.f32 %v5688_v0, %v9134_v23  ;;  %v5701_v37 = vmul.f32 %v5689_v31, %v9138_v29  ;;  %5766 = vst [vmem:[#allocation2 + $0xc] sm:$0xff] %v8368_v15  ;;  %v5702_v36 = vmul.f32 %v5690_v53, %v9152_v45  ;;  %v15162_v8 = vmax.f32 %v11809_v48, 0.0 }
0x19b9   :  { %5767 = vst [vmem:[#allocation2 + $0x14] sm:$0xff] %v8369_v4  ;;  %v5703_v5 = vmul.f32 %v5691_v63, %v9171_v18  ;;  %v5704_v60 = vmul.f32 %v5692_v58, %v9177_v3  ;;  %v15164_v40 = vmax.f32 %v11813_v14, 0.0  ;;  %v15166_v61 = vmax.f32 %v11817_v9, 0.0 }
0x19ba   :  { %v13091_v62 = vadd.f32 %v5699_v44, %v15162_v8  ;;  %v15168_v51 = vmax.f32 %v11821_v56, 0.0  ;;  %v15170_v28 = vmax.f32 %v11825_v49, 0.0  ;;  %v15173_v48 = vmax.f32 %v15172_v21, 0.0 }
0x19bb   :  { %v13095_v25 = vadd.f32 %v5700_v46, %v15164_v40  ;;  %v13099_v22 = vadd.f32 %v5701_v37, %v15166_v61 }
0x19bc   :  { %15163 = vst [vmem:[#allocation17_spill] sm:$0xff] %v13091_v62  ;;  %v13103_v7 = vadd.f32 %v5702_v36, %v15168_v51  ;;  %v13107_v50 = vadd.f32 %v5703_v5, %v15170_v28  ;;  %v13111_v30 = vadd.f32 %v5704_v60, %v15173_v48  ;;  %v15112_v14 = vmax.f32 %v13091_v62, 0.0 }
0x19bd   :  { %15165 = vst [vmem:[#allocation18_spill] sm:$0xff] %v13095_v25  ;;  %15167 = vst [vmem:[#allocation19_spill] sm:$0xff] %v13099_v22  ;;  %v15111_v1 = vmax.f32 %v13095_v25, 0.0  ;;  %v15110_v9 = vmax.f32 %v13099_v22, 0.0 }
0x19be   :  { %15169 = vst [vmem:[#allocation20_spill] sm:$0xff] %v13103_v7  ;;  %15171 = vst [vmem:[#allocation21_spill] sm:$0xff] %v13107_v50  ;;  %v15109_v33 = vmax.f32 %v13103_v7, 0.0  ;;  %v15108_v56 = vmax.f32 %v13107_v50, 0.0  ;;  %v15107_v24 = vmax.f32 %v13111_v30, 0.0 }
0x19bf   :  { %15174 = vst [vmem:[#allocation3_spill] sm:$0xff] %v13111_v30  ;;  %v8370_v49 = vpack.c.bf16 %v15111_v1, %v15112_v14  ;;  %v5771_v12 = vld [vmem:[#allocation2] sm:$0xff]  ;;  %v5772_v32 = vld [vmem:[#allocation2 + $0x8] sm:$0xff] }
0x19c0   :  { %v8371_v38 = vpack.c.bf16 %v15109_v33, %v15110_v9  ;;  %v8372_v2 = vpack.c.bf16 %v15107_v24, %v15108_v56  ;;  %v5773_v47 = vld [vmem:[#allocation2 + $0x10] sm:$0xff]  ;;  %v5774_v15 = vld [vmem:[#allocation2 + $0x18] sm:$0xff] }
0x19c1   :  { %5768 = vst [vmem:[#allocation2 + $0x24] sm:$0xff] %v8370_v49 }
0x19c2   :  { %5769 = vst [vmem:[#allocation2 + $0x2c] sm:$0xff] %v8371_v38  ;;  %5770 = vst [vmem:[#allocation2 + $0x34] sm:$0xff] %v8372_v2 }
0x19c8   :  { %v5775_v27 = vld [vmem:[#allocation2 + $0x20] sm:$0xff] }
0x19c9   :  { %v5776_v43 = vld [vmem:[#allocation2 + $0x28] sm:$0xff]  ;;  %v13131_v55 = vcombine.high %v5771_v12, %v5775_v27  ;;  %v8262_v59 = vcombine.low %v5771_v12, %v5775_v27  ;;  %v5777_v39 = vld [vmem:[#allocation2 + $0x30] sm:$0xff]  ;;  %v5778_v31 = vld [vmem:[#allocation2 + $0x38] sm:$0xff] }
0x19ca   :  { %v13133_v42 = vcombine.low %v5772_v32, %v5776_v43  ;;  %v13139_v41 = vcombine.high %v5772_v32, %v5776_v43  ;;  %v8266_v54 = vcombine.low %v5773_v47, %v5777_v39  ;;  %v8267_v0 = vcombine.high %v5773_v47, %v5777_v39 }
0x19cb   :  { %5928 = vrot.lane.b32.xlu0 %v13131_v55, %s8474_s26  ;;  %v13191_v4 = vcombine.low %v5774_v15, %v5778_v31  ;;  %v8269_v53 = vcombine.high %v5774_v15, %v5778_v31 }
0x19cc   :  { %5930 = vrot.lane.b32.xlu1 %v13133_v42, %s8474_s26 }
0x19cf   :  { %5932 = vrot.lane.b32.xlu0 %v13139_v41, %s8474_s26 }
0x19d0   :  { %5908 = vrot.lane.b32.xlu1 %v13131_v55, %s8475_s27 }
0x19d3   :  { %5910 = vrot.lane.b32.xlu0 %v13133_v42, %s8475_s27 }
0x19d4   :  { %5912 = vrot.lane.b32.xlu1 %v13139_v41, %s8475_s27 }
0x19d7   :  { %5888 = vrot.lane.b32.xlu0 %v13131_v55, %s8476_s28 }
0x19d8   :  { %5890 = vrot.lane.b32.xlu1 %v13133_v42, %s8476_s28 }
0x19db   :  { %5892 = vrot.lane.b32.xlu0 %v13139_v41, %s8476_s28 }
0x19dc   :  { %5868 = vrot.lane.b32.xlu1 %v13131_v55, %s8477_s29 }
0x19df   :  { %5870 = vrot.lane.b32.xlu0 %v13133_v42, %s8477_s29 }
0x19e0   :  { %5872 = vrot.lane.b32.xlu1 %v13139_v41, %s8477_s29 }
0x19e3   :  { %5850 = vrot.lane.b32.xlu0 %v13131_v55, %s8478_s30 }
0x19e4   :  { %5852 = vrot.lane.b32.xlu1 %v13133_v42, %s8478_s30 }
0x19e7   :  { %5854 = vrot.lane.b32.xlu0 %v13139_v41, %s8478_s30 }
0x19e8   :  { %5848 = vrot.lane.b32.xlu1 %v8262_v59, %s8478_s30 }
0x19eb   :  { %5830 = vrot.lane.b32.xlu0 %v13131_v55, %s8479_s6 }
0x19ec   :  { %5832 = vrot.lane.b32.xlu1 %v13133_v42, %s8479_s6 }
0x19ef   :  { %5834 = vrot.lane.b32.xlu0 %v13139_v41, %s8479_s6 }
0x19f0   :  { %5828 = vrot.lane.b32.xlu1 %v8262_v59, %s8479_s6 }
0x19f3   :  { %5810 = vrot.lane.b32.xlu0 %v13131_v55, %s8480_s7 }
0x19f4   :  { %5812 = vrot.lane.b32.xlu1 %v13133_v42, %s8480_s7 }
0x19f7   :  { %5814 = vrot.lane.b32.xlu0 %v13139_v41, %s8480_s7 }
0x19f8   :  { %5808 = vrot.lane.b32.xlu1 %v8262_v59, %s8480_s7 }
0x19fb   :  { %5934 = vrot.lane.b32.xlu0 %v8266_v54, %s8474_s26 }
0x19fc   :  { %5936 = vrot.lane.b32.xlu1 %v8267_v0, %s8474_s26 }
0x19ff   :  { %5948 = vrot.lane.b32.xlu0 %v13131_v55, %s8481_s12 }
0x1a00   :  { %5950 = vrot.lane.b32.xlu1 %v13133_v42, %s8481_s12 }
0x1a03   :  { %5952 = vrot.lane.b32.xlu0 %v13139_v41, %s8481_s12 }
0x1a04   :  { %5914 = vrot.lane.b32.xlu1 %v8266_v54, %s8475_s27 }
0x1a07   :  { %5916 = vrot.lane.b32.xlu0 %v8267_v0, %s8475_s27 }
0x1a08   :  { %5938 = vrot.lane.b32.xlu1 %v13191_v4, %s8474_s26 }
0x1a0b   :  { %5940 = vrot.lane.b32.xlu0 %v8269_v53, %s8474_s26 }
0x1a0c   :  { %5894 = vrot.lane.b32.xlu1 %v8266_v54, %s8476_s28 }
0x1a0f   :  { %5896 = vrot.lane.b32.xlu0 %v8267_v0, %s8476_s28 }
0x1a10   :  { %5918 = vrot.lane.b32.xlu1 %v13191_v4, %s8475_s27 }
0x1a13   :  { %5920 = vrot.lane.b32.xlu0 %v8269_v53, %s8475_s27 }
0x1a14   :  { %5874 = vrot.lane.b32.xlu1 %v8266_v54, %s8477_s29 }
0x1a17   :  { %5876 = vrot.lane.b32.xlu0 %v8267_v0, %s8477_s29 }
0x1a18   :  { %5898 = vrot.lane.b32.xlu1 %v13191_v4, %s8476_s28 }
0x1a1b   :  { %5900 = vrot.lane.b32.xlu0 %v8269_v53, %s8476_s28 }
0x1a1c   :  { %5856 = vrot.lane.b32.xlu1 %v8266_v54, %s8478_s30 }
0x1a1f   :  { %5858 = vrot.lane.b32.xlu0 %v8267_v0, %s8478_s30 }
0x1a20   :  { %5878 = vrot.lane.b32.xlu1 %v13191_v4, %s8477_s29 }
0x1a23   :  { %5836 = vrot.lane.b32.xlu0 %v8266_v54, %s8479_s6 }
0x1a24   :  { %5838 = vrot.lane.b32.xlu1 %v8267_v0, %s8479_s6 }
0x1a27   :  { %5860 = vrot.lane.b32.xlu0 %v13191_v4, %s8478_s30 }
0x1a28   :  { %5816 = vrot.lane.b32.xlu1 %v8266_v54, %s8480_s7 }
0x1a2b   :  { %5818 = vrot.lane.b32.xlu0 %v8267_v0, %s8480_s7 }
0x1a2c   :  { %5840 = vrot.lane.b32.xlu1 %v13191_v4, %s8479_s6 }
0x1a2f   :  { %5820 = vrot.lane.b32.xlu0 %v13191_v4, %s8480_s7 }
0x1a30   :  { %5956 = vrot.lane.b32.xlu1 %v8267_v0, %s8481_s12 }
0x1a33   :  { %5954 = vrot.lane.b32.xlu0 %v8266_v54, %s8481_s12 }
0x1a34   :  { %5958 = vrot.lane.b32.xlu1 %v13191_v4, %s8481_s12 }
0x1a37   :  { %5960 = vrot.lane.b32.xlu0 %v8269_v53, %s8481_s12 }
0x1a38   :  { %5984 = vrot.lane.b32.xlu1 %v13133_v42, %s8482_s0 }
0x1a3b   :  { %5982 = vrot.lane.b32.xlu0 %v13131_v55, %s8482_s0 }
0x1a3c   :  { %5988 = vrot.lane.b32.xlu1 %v8266_v54, %s8482_s0 }
0x1a3d   :  { %v5929_v63 = vpop.permute.xlu0 %5928 }
0x1a3e   :  { %v13231_v58 = vpop.permute.xlu1 %5930 }
0x1a3f   :  { %5980 = vrot.lane.b32.xlu0 %v8262_v59, %s8482_s0  ;;  %v5942_v28 = vsel %vm207_vm0, %v5929_v63, %v13231_v58 }
0x1a40   :  { %6078 = vrot.lane.b32.xlu1 %v5929_v63, %s8482_s0 }
0x1a41   :  { %v13235_v44 = vpop.permute.xlu0 %5932 }
0x1a42   :  { %v5909_v46 = vpop.permute.xlu1 %5908 }
0x1a43   :  { %5986 = vrot.lane.b32.xlu0 %v13139_v41, %s8482_s0 }
0x1a45   :  { %v13239_v37 = vpop.permute.xlu0 %5910 }
0x1a46   :  { %v13241_v36 = vpop.permute.xlu1 %5912  ;;  %v5922_v49 = vsel %vm186_vm1, %v5909_v46, %v13239_v37 }
0x1a47   :  { %5990 = vrot.lane.b32.xlu0 %v8267_v0, %s8482_s0 }
0x1a49   :  { %v13244_v5 = vpop.permute.xlu0 %5888 }
0x1a4a   :  { %v13246_v60 = vpop.permute.xlu1 %5890  ;;  %6050 = vrot.lane.b32.xlu1 %v13244_v5, %s8482_s0 }
0x1a4b   :  { %6064 = vrot.lane.b32.xlu0 %v5909_v46, %s8482_s0 }
0x1a4d   :  { %v5893_v8 = vpop.permute.xlu0 %5892 }
0x1a4e   :  { %v5869_v40 = vpop.permute.xlu1 %5868  ;;  %v5903_v12 = vsel %vm165_vm2, %v13246_v60, %v5893_v8 }
0x1a4f   :  { %6036 = vrot.lane.b32.xlu0 %v5869_v40, %s8482_s0 }
0x1a51   :  { %v13252_v61 = vpop.permute.xlu0 %5870 }
0x1a52   :  { %v13254_v51 = vpop.permute.xlu1 %5872  ;;  %v5880_v43 = vsel %vm142_vm3, %v5869_v40, %v13252_v61 }
0x1a53   :  { %6080 = vrot.lane.b32.xlu0 %v5942_v28, %s8482_s0 }
0x1a55   :  { %v13259_v21 = vpop.permute.xlu0 %5850 }
0x1a56   :  { %v13261_v48 = vpop.permute.xlu1 %5852 }
0x1a57   :  { %6066 = vrot.lane.b32.xlu0 %v5922_v49, %s8482_s0 }
0x1a59   :  { %v5855_v38 = vpop.permute.xlu0 %5854 }
0x1a5a   :  { %v13266_v2 = vpop.permute.xlu1 %5848  ;;  %v5864_v41 = vsel %vm123_vm4, %v13261_v48, %v5855_v38 }
0x1a5b   :  { %6054 = vrot.lane.b32.xlu0 %v5903_v12, %s8482_s0 }
0x1a5d   :  { %v5831_v27 = vpop.permute.xlu0 %5830 }
0x1a5e   :  { %v13271_v32 = vpop.permute.xlu1 %5832 }
0x1a5f   :  { %6038 = vrot.lane.b32.xlu0 %v5880_v43, %s8482_s0  ;;  %v5843_v47 = vsel %vm102_vm5, %v5831_v27, %v13271_v32 }
0x1a61   :  { %v13276_v55 = vpop.permute.xlu0 %5834 }
0x1a62   :  { %v5829_v42 = vpop.permute.xlu1 %5828 }
0x1a63   :  { %6026 = vrot.lane.b32.xlu0 %v5864_v41, %s8482_s0  ;;  %v5842_v0 = vsel %vm102_vm5, %v5829_v42, %v5831_v27 }
0x1a65   :  { %v13281_v59 = vpop.permute.xlu0 %5810 }
0x1a66   :  { %v13283_v39 = vpop.permute.xlu1 %5812 }
0x1a67   :  { %6010 = vrot.lane.b32.xlu0 %v5843_v47, %s8482_s0 }
0x1a69   :  { %v5815_v54 = vpop.permute.xlu0 %5814 }
0x1a6a   :  { %v13289_v31 = vpop.permute.xlu1 %5808  ;;  %v5824_v63 = vsel %vm81_vm6, %v13283_v39, %v5815_v54 }
0x1a6b   :  { %6008 = vrot.lane.b32.xlu0 %v5842_v0, %s8482_s0 }
0x1a6d   :  { %v13292_v15 = vpop.permute.xlu0 %5934 }
0x1a6e   :  { %v5937_v53 = vpop.permute.xlu1 %5936 }
0x1a6f   :  { %5998 = vrot.lane.b32.xlu0 %v5824_v63, %s8482_s0  ;;  %v5945_v28 = vsel %vm207_vm0, %v13292_v15, %v5937_v53 }
0x1a71   :  { %v13297_v46 = vpop.permute.xlu0 %5948 }
0x1a72   :  { %v13299_v40 = vpop.permute.xlu1 %5950  ;;  %6092 = vrot.lane.b32.xlu1 %v13297_v46, %s8482_s0 }
0x1a73   :  { %6086 = vrot.lane.b32.xlu0 %v5945_v28, %s8482_s0 }
0x1a75   :  { %v13306_v49 = vpop.permute.xlu0 %5952 }
0x1a76   :  { %v13308_v12 = vpop.permute.xlu1 %5914  ;;  %v5963_v27 = vsel %vm228_vm7, %v13299_v40, %v13306_v49 }
0x1a77   :  { %6096 = vrot.lane.b32.xlu0 %v5963_v27, %s8482_s0  ;;  %v5924_v41 = vsel %vm186_vm1, %v13241_v36, %v13308_v12 }
0x1a79   :  { %v13314_v43 = vpop.permute.xlu0 %5916 }
0x1a7a   :  { %v13316_v42 = vpop.permute.xlu1 %5938 }
0x1a7b   :  { %6070 = vrot.lane.b32.xlu0 %v5924_v41, %s8482_s0  ;;  %v5946_v63 = vsel %vm207_vm0, %v5937_v53, %v13316_v42 }
0x1a7d   :  { %v13322_v47 = vpop.permute.xlu0 %5940 }
0x1a7e   :  { %v13324_v0 = vpop.permute.xlu1 %5894 }
0x1a7f   :  { %6088 = vrot.lane.b32.xlu0 %v5946_v63, %s8482_s0  ;;  %v5904_v24 = vsel %vm165_vm2, %v5893_v8, %v13324_v0 }
0x1a81   :  { %v13329_v28 = vpop.permute.xlu0 %5896 }
0x1a82   :  { %v13331_v27 = vpop.permute.xlu1 %5918 }
0x1a83   :  { %6056 = vrot.lane.b32.xlu0 %v5904_v24, %s8482_s0  ;;  %v5926_v33 = vsel %vm186_vm1, %v13314_v43, %v13331_v27 }
0x1a85   :  { %v13336_v56 = vpop.permute.xlu0 %5920 }
0x1a86   :  { %v13338_v41 = vpop.permute.xlu1 %5874 }
0x1a87   :  { %6074 = vrot.lane.b32.xlu0 %v5926_v33, %s8482_s0  ;;  %v5882_v8 = vsel %vm142_vm3, %v13254_v51, %v13338_v41 }
0x1a89   :  { %v13344_v53 = vpop.permute.xlu0 %5876 }
0x1a8a   :  { %v13346_v63 = vpop.permute.xlu1 %5898 }
0x1a8b   :  { %6042 = vrot.lane.b32.xlu0 %v5882_v8, %s8482_s0  ;;  %v5906_v1 = vsel %vm165_vm2, %v13329_v28, %v13346_v63 }
0x1a8d   :  { %v13352_v24 = vpop.permute.xlu0 %5900 }
0x1a8e   :  { %v13354_v9 = vpop.permute.xlu1 %5856 }
0x1a8f   :  { %6060 = vrot.lane.b32.xlu0 %v5906_v1, %s8482_s0  ;;  %v5865_v13 = vsel %vm123_vm4, %v5855_v38, %v13354_v9 }
0x1a91   :  { %v13360_v33 = vpop.permute.xlu0 %5858 }
0x1a92   :  { %v5879_v14 = vpop.permute.xlu1 %5878 }
0x1a93   :  { %6048 = vrot.lane.b32.xlu1 %v5879_v14, %s8482_s0  ;;  %6028 = vrot.lane.b32.xlu0 %v5865_v13, %s8482_s0  ;;  %v5884_v10 = vsel %vm142_vm3, %v13344_v53, %v5879_v14 }
0x1a95   :  { %v13366_v8 = vpop.permute.xlu0 %5836 }
0x1a96   :  { %v13368_v11 = vpop.permute.xlu1 %5838  ;;  %v5845_v38 = vsel %vm102_vm5, %v13276_v55, %v13366_v8 }
0x1a97   :  { %6046 = vrot.lane.b32.xlu0 %v5884_v10, %s8482_s0 }
0x1a99   :  { %v5861_v1 = vpop.permute.xlu0 %5860 }
0x1a9a   :  { %v13373_v35 = vpop.permute.xlu1 %5816  ;;  %6034 = vrot.lane.b32.xlu1 %v5861_v1, %s8482_s0  ;;  %v5867_v26 = vsel %vm123_vm4, %v13360_v33, %v5861_v1 }
0x1a9b   :  { %6014 = vrot.lane.b32.xlu0 %v5845_v38, %s8482_s0  ;;  %v5825_v14 = vsel %vm81_vm6, %v5815_v54, %v13373_v35  ;;  %v5943_v38 = vsel %vm207_vm0, %v13231_v58, %v13235_v44  ;;  %v5923_v54 = vsel %vm186_vm1, %v13239_v37, %v13241_v36  ;;  %v5881_v37 = vsel %vm142_vm3, %v13252_v61, %v13254_v51 }
0x1a9c   :  { %v5844_v51 = vsel %vm102_vm5, %v13271_v32, %v13276_v55  ;;  %v13452_v32 = vld [vmem:[%s15063_s1 + $0x84] ss:$8 sps:$4 sm:$0xff]   ;;  %v5944_v55 = vsel %vm207_vm0, %v13235_v44, %v13292_v15  ;;  %v5925_v44 = vsel %vm186_vm1, %v13308_v12, %v13314_v43  ;;  %v5947_v15 = vsel %vm207_vm0, %v13316_v42, %v13322_v47 }
0x1a9d   :  { %v13380_v13 = vpop.permute.xlu0 %5818  ;;  %8274 = vmatprep.mubr.msk.bf16.mxu0 %vm481_vm8, %v13452_v32  ;;  %8275 = vmatprep.mubr.msk.bf16.mxu1 %vm481_vm8, %v13452_v32  ;;  %v5927_v12 = vsel %vm186_vm1, %v13331_v27, %v13336_v56  ;;  %v5883_v42 = vsel %vm142_vm3, %v13338_v41, %v13344_v53  ;;  %v5907_v47 = vsel %vm165_vm2, %v13346_v63, %v13352_v24 }
0x1a9e   :  { %v5841_v6 = vpop.permute.xlu1 %5840  ;;  %v5866_v56 = vsel %vm123_vm4, %v13354_v9, %v13360_v33  ;;  %v5846_v27 = vsel %vm102_vm5, %v13366_v8, %v13368_v11  ;;  %v5826_v53 = vsel %vm81_vm6, %v13373_v35, %v13380_v13 }
0x1a9f   :  { %6020 = vrot.lane.b32.xlu1 %v5841_v6, %s8482_s0  ;;  %6032 = vrot.lane.b32.xlu0 %v5867_v26, %s8482_s0  ;;  %v5847_v30 = vsel %vm102_vm5, %v13368_v11, %v5841_v6  ;;  %v5902_v6 = vsel %vm165_vm2, %v13244_v5, %v13246_v60  ;;  %v5863_v5 = vsel %vm123_vm4, %v13259_v21, %v13261_v48 }
0x1aa0   :  { %v5823_v48 = vsel %vm81_vm6, %v13281_v59, %v13283_v39 }
0x1aa1   :  { %v5821_v10 = vpop.permute.xlu0 %5820 }
0x1aa2   :  { %v13397_v26 = vpop.permute.xlu1 %5956  ;;  %v5827_v1 = vsel %vm81_vm6, %v13380_v13, %v5821_v10 }
0x1aa3   :  { %6006 = vrot.lane.b32.xlu1 %v5821_v10, %s8482_s0  ;;  %6000 = vrot.lane.b32.xlu0 %v5825_v14, %s8482_s0 }
0x1aa5   :  { %v13404_v14 = vpop.permute.xlu0 %5954 }
0x1aa6   :  { %v5959_v58 = vpop.permute.xlu1 %5958  ;;  %v5965_v11 = vsel %vm228_vm7, %v13404_v14, %v13397_v26 }
0x1aa7   :  { %6082 = vrot.lane.b32.xlu1 %v5943_v38, %s8482_s0  ;;  %6018 = vrot.lane.b32.xlu0 %v5847_v30, %s8482_s0  ;;  %v5964_v30 = vsel %vm228_vm7, %v13306_v49, %v13404_v14  ;;  %v5966_v36 = vsel %vm228_vm7, %v13397_v26, %v5959_v58  ;;  %v5862_v49 = vsel %vm123_vm4, %v13266_v2, %v13259_v21 }
0x1aa8   :  { %v5822_v21 = vsel %vm81_vm6, %v13289_v31, %v13281_v59  ;;  %v5962_v59 = vsel %vm228_vm7, %v13297_v46, %v13299_v40  ;;  %v5905_v46 = vsel %vm165_vm2, %v13324_v0, %v13329_v28 }
0x1aa9   :  { %v5961_v60 = vpop.permute.xlu0 %5960 }
0x1aaa   :  { %v13502_v41 = vpop.permute.xlu1 %5984  ;;  %v5967_v8 = vsel %vm228_vm7, %v5959_v58, %v5961_v60 }
0x1aab   :  { %6068 = vrot.lane.b32.xlu1 %v5923_v54, %s8482_s0  ;;  %6004 = vrot.lane.b32.xlu0 %v5827_v1, %s8482_s0 }
0x1aad   :  { %v13431_v61 = vpop.permute.xlu0 %5982 }
0x1aae   :  { %v13508_v9 = vpop.permute.xlu1 %5988 }
0x1aaf   :  { %6052 = vrot.lane.b32.xlu1 %v5902_v6, %s8482_s0  ;;  %6098 = vrot.lane.b32.xlu0 %v5964_v30, %s8482_s0 }
0x1ab1   :  { %v13440_v10 = vpop.permute.xlu0 %5980 }
0x1ab2   :  { %v6079_v33 = vpop.permute.xlu1 %6078 }
0x1ab3   :  { %6040 = vrot.lane.b32.xlu1 %v5881_v37, %s8482_s0  ;;  %6102 = vrot.lane.b32.xlu0 %v5966_v36, %s8482_s0 }
0x1ab5   :  { %v13447_v2 = vpop.permute.xlu0 %5986 }
0x1ab7   :  { %6024 = vrot.lane.b32.xlu1 %v5863_v5, %s8482_s0 }
0x1ab9   :  { %v13465_v39 = vpop.permute.xlu0 %5990 }
0x1abb   :  { %6022 = vrot.lane.b32.xlu1 %v5862_v49, %s8482_s0 }
0x1abc   :  { %v6051_v13 = vpop.permute.xlu1 %6050 }
0x1abd   :  { %v6065_v31 = vpop.permute.xlu0 %6064 }
0x1abf   :  { %6012 = vrot.lane.b32.xlu1 %v5844_v51, %s8482_s0 }
0x1ac1   :  { %v6037_v40 = vpop.permute.xlu0 %6036 }
0x1ac3   :  { %5996 = vrot.lane.b32.xlu1 %v5823_v48, %s8482_s0 }
0x1ac5   :  { %v6081_v43 = vpop.permute.xlu0 %6080 }
0x1ac6   :  { %v6148_v5 = vsel %vm372_vm9, %v6079_v33, %v6081_v43 }
0x1ac7   :  { %5994 = vrot.lane.b32.xlu1 %v5822_v21, %s8482_s0 }
0x1ac9   :  { %v6067_v0 = vpop.permute.xlu0 %6066 }
0x1aca   :  { %v6142_v48 = vsel %vm372_vm9, %v6065_v31, %v6067_v0 }
0x1acb   :  { %6084 = vrot.lane.b32.xlu1 %v5944_v55, %s8482_s0 }
0x1acd   :  { %v13496_v28 = vpop.permute.xlu0 %6054 }
0x1acf   :  { %6094 = vrot.lane.b32.xlu1 %v5962_v59, %s8482_s0 }
0x1ad1   :  { %v6039_v63 = vpop.permute.xlu0 %6038 }
0x1ad3   :  { %6072 = vrot.lane.b32.xlu1 %v5925_v44, %s8482_s0 }
0x1ad5   :  { %v13512_v24 = vpop.permute.xlu0 %6026 }
0x1ad7   :  { %6090 = vrot.lane.b32.xlu1 %v5947_v15, %s8482_s0 }
0x1ad9   :  { %v6011_v35 = vpop.permute.xlu0 %6010 }
0x1adb   :  { %6058 = vrot.lane.b32.xlu1 %v5905_v46, %s8482_s0 }
0x1add   :  { %v6009_v54 = vpop.permute.xlu0 %6008 }
0x1adf   :  { %6076 = vrot.lane.b32.xlu1 %v5927_v12, %s8482_s0  ;;  %v6130_v12 = vsel %vm372_vm9, %v6037_v40, %v6039_v63 }
0x1ae3   :  { %6044 = vrot.lane.b32.xlu1 %v5883_v42, %s8482_s0 }
0x1ae4   :  { %v13520_v38 = vpop.permute.xlu1 %6092 }
0x1ae7   :  { %6062 = vrot.lane.b32.xlu1 %v5907_v47, %s8482_s0 }
0x1aeb   :  { %6030 = vrot.lane.b32.xlu1 %v5866_v56, %s8482_s0 }
0x1aef   :  { %6016 = vrot.lane.b32.xlu1 %v5846_v27, %s8482_s0 }
0x1af3   :  { %6002 = vrot.lane.b32.xlu1 %v5826_v53, %s8482_s0 }
0x1af7   :  { %5992 = vrot.lane.b32.xlu1 %v13191_v4, %s8482_s0  ;;  %v13524_v4 = vpop.permute.xlu0 %5998 }
0x1afb   :  { %6100 = vrot.lane.b32.xlu1 %v5965_v11, %s8482_s0  ;;  %v13528_v30 = vpop.permute.xlu0 %6086  ;;  %v6118_v11 = vsel %vm372_vm9, %v6009_v54, %v6011_v35 }
0x1aff   :  { %6104 = vrot.lane.b32.xlu1 %v5967_v8, %s8482_s0  ;;  %v13534_v58 = vpop.permute.xlu0 %6096 }
0x1b03   :  { %v6071_v60 = vpop.permute.xlu0 %6070 }
0x1b05   :  { %v13522_v1 = vpop.permute.xlu1 %6048 }
0x1b07   :  { %v6089_v44 = vpop.permute.xlu0 %6088 }
0x1b0b   :  { %v6057_v31 = vpop.permute.xlu0 %6056 }
0x1b0c   :  { %v13526_v6 = vpop.permute.xlu1 %6034 }
0x1b0f   :  { %v6075_v56 = vpop.permute.xlu0 %6074 }
0x1b11   :  { %v13530_v26 = vpop.permute.xlu1 %6020 }
0x1b13   :  { %v6043_v40 = vpop.permute.xlu0 %6042 }
0x1b15   :  { %v13532_v14 = vpop.permute.xlu1 %6006 }
0x1b19   :  { %v6083_v37 = vpop.permute.xlu1 %6082 }
0x1b1a   :  { %v6149_v36 = vsel %vm372_vm9, %v6081_v43, %v6083_v37 }
0x1b1b   :  { %6217 = vmatprep.subr.bf16.mxu0 %v6149_v36  ;;  %v6061_v36 = vpop.permute.xlu0 %6060 }
0x1b1c   :  { %6218 = vmatpush1.bf16.msra.mxu0 %v6148_v5  ;;  %v6107_v5 = vsel %vm372_vm9, %v13431_v61, %v13502_v41 }
0x1b1d   :  { %v6069_v49 = vpop.permute.xlu1 %6068 }
0x1b1e   :  { %v6143_v51 = vsel %vm372_vm9, %v6067_v0, %v6069_v49 }
0x1b1f   :  { %6219 = vmatprep.subr.bf16.mxu0 %v6143_v51 }
0x1b20   :  { %6220 = vmatpush1.bf16.msra.mxu0 %v6142_v48 }
0x1b21   :  { %v6053_v21 = vpop.permute.xlu1 %6052 }
0x1b22   :  { %v6137_v55 = vsel %vm372_vm9, %v6053_v21, %v13496_v28  ;;  %v6136_v59 = vsel %vm372_vm9, %v6051_v13, %v6053_v21  ;;  %v6029_v21 = vpop.permute.xlu0 %6028 }
0x1b23   :  { %6221 = vmatprep.subr.bf16.mxu0 %v6137_v55 }
0x1b24   :  { %6222 = vmatpush1.bf16.msra.mxu0 %v6136_v59 }
0x1b25   :  { %v13543_v15 = vpop.permute.xlu1 %6040 }
0x1b26   :  { %v6131_v46 = vsel %vm372_vm9, %v6039_v63, %v13543_v15 }
0x1b27   :  { %6223 = vmatprep.subr.bf16.mxu0 %v6131_v46 }
0x1b28   :  { %6224 = vmatpush1.bf16.msra.mxu0 %v6130_v12  ;;  %v6047_v12 = vpop.permute.xlu0 %6046 }
0x1b29   :  { %v6025_v43 = vpop.permute.xlu1 %6024 }
0x1b2a   :  { %v6125_v42 = vsel %vm372_vm9, %v6025_v43, %v13512_v24 }
0x1b2b   :  { %6225 = vmatprep.subr.bf16.mxu0 %v6125_v42 }
0x1b2d   :  { %v6023_v47 = vpop.permute.xlu1 %6022 }
0x1b2e   :  { %v6124_v0 = vsel %vm372_vm9, %v6023_v47, %v6025_v43  ;;  %v6144_v43 = vsel %vm372_vm9, %v6069_v49, %v6071_v60  ;;  %v6152_v47 = vsel %vm372_vm9, %v13528_v30, %v6089_v44 }
0x1b2f   :  { %6226 = vmatpush1.bf16.msra.mxu0 %v6124_v0  ;;  %v6015_v0 = vpop.permute.xlu0 %6014 }
0x1b31   :  { %v13551_v27 = vpop.permute.xlu1 %6012 }
0x1b32   :  { %v6119_v53 = vsel %vm372_vm9, %v6011_v35, %v13551_v27  ;;  %v6106_v35 = vsel %vm372_vm9, %v13440_v10, %v13431_v61  ;;  %v13575_v61 = vld [vmem:[%s15063_s1 + $0x80] ss:$8 sps:$4 sm:$0xff]  }
0x1b33   :  { %6227 = vmatprep.subr.bf16.mxu0 %v6119_v53 }
0x1b34   :  { %6228 = vmatpush1.bf16.msra.mxu0 %v6118_v11 }
0x1b35   :  { %v5997_v63 = vpop.permute.xlu1 %5996 }
0x1b36   :  { %v6113_v33 = vsel %vm372_vm9, %v5997_v63, %v13524_v4 }
0x1b37   :  { %6229 = vmatprep.subr.bf16.mxu0 %v6113_v33 }
0x1b39   :  { %v5995_v8 = vpop.permute.xlu1 %5994 }
0x1b3a   :  { %v6112_v13 = vsel %vm372_vm9, %v5995_v8, %v5997_v63  ;;  %v6033_v63 = vpop.permute.xlu0 %6032 }
0x1b3b   :  { %6230 = vmatpush1.bf16.msra.mxu0 %v6112_v13 }
0x1b3c   :  { %6231 = vmatprep.subr.bf16.mxu0 %v6107_v5 }
0x1b3d   :  { %v6085_v51 = vpop.permute.xlu1 %6084 }
0x1b3e   :  { %v6151_v54 = vsel %vm372_vm9, %v6085_v51, %v13528_v30  ;;  %v6150_v48 = vsel %vm372_vm9, %v6083_v37, %v6085_v51  ;;  %v6001_v13 = vpop.permute.xlu0 %6000 }
0x1b3f   :  { %6232 = vmatpush1.bf16.msra.mxu0 %v6106_v35  ;;  %6260 = vmatprep.subr.bf16.mxu1 %v6151_v54 }
0x1b40   :  { %6261 = vmatpush1.bf16.msra.mxu1 %v6150_v48 }
0x1b41   :  { %v6095_v55 = vpop.permute.xlu1 %6094 }
0x1b42   :  { %v6155_v59 = vsel %vm372_vm9, %v6095_v55, %v13534_v58  ;;  %v6154_v46 = vsel %vm372_vm9, %v13520_v38, %v6095_v55  ;;  %v6019_v54 = vpop.permute.xlu0 %6018  ;;  %v6120_v55 = vsel %vm372_vm9, %v13551_v27, %v6015_v0  ;;  %v6109_v27 = vsel %vm372_vm9, %v13447_v2, %v13508_v9 }
0x1b43   :  { %6247 = vmatprep.subr.bf16.mxu0 %v6155_v59 }
0x1b44   :  { %6248 = vmatpush2.bf16.msra.mxu0 %v6154_v46 }
0x1b45   :  { %v6073_v10 = vpop.permute.xlu1 %6072 }
0x1b46   :  { %v6145_v37 = vsel %vm372_vm9, %v6071_v60, %v6073_v10  ;;  %v6138_v60 = vsel %vm372_vm9, %v13496_v28, %v6057_v31  ;;  %v6146_v33 = vsel %vm372_vm9, %v6073_v10, %v6075_v56  ;;  %v6114_v10 = vsel %vm372_vm9, %v13524_v4, %v6001_v13 }
0x1b47   :  { %6262 = vmatprep.subr.bf16.mxu1 %v6145_v37  ;;  %6250 = vmatmul.mubr.bf16.vlgmr.msra.gmra.mxu0 %v13575_v61 }
0x1b48   :  { %6263 = vmatpush1.bf16.msra.mxu1 %v6144_v43  ;;  %8276 = vmatprep.mubr.msk.bf16.mxu0 %vm481_vm8, %v13452_v32 }
0x1b49   :  { %v6091_v38 = vpop.permute.xlu1 %6090 }
0x1b4a   :  { %v6153_v42 = vsel %vm372_vm9, %v6089_v44, %v6091_v38  ;;  %v6132_v44 = vsel %vm372_vm9, %v13543_v15, %v6043_v40  ;;  %v6126_v15 = vsel %vm372_vm9, %v13512_v24, %v6029_v21  ;;  %v6123_v24 = vsel %vm372_vm9, %v6019_v54, %v13530_v26 }
0x1b4b   :  { %6303 = vmatprep.subr.bf16.mxu0 %v6153_v42  ;;  %v6108_v38 = vsel %vm372_vm9, %v13502_v41, %v13447_v2 }
0x1b4c   :  { %6304 = vmatpush1.bf16.msra.mxu0 %v6152_v47 }
0x1b4d   :  { %v6059_v53 = vpop.permute.xlu1 %6058 }
0x1b4e   :  { %v6139_v11 = vsel %vm372_vm9, %v6057_v31, %v6059_v53  ;;  %v6140_v31 = vsel %vm372_vm9, %v6059_v53, %v6061_v36  ;;  %v6110_v53 = vsel %vm372_vm9, %v13508_v9, %v13465_v39 }
0x1b4f   :  { %6264 = vmatprep.subr.bf16.mxu1 %v6139_v11 }
0x1b50   :  { %6265 = vmatpush1.bf16.msra.mxu1 %v6138_v60 }
0x1b51   :  { %v6077_v49 = vpop.permute.xlu1 %6076 }
0x1b52   :  { %v6147_v32 = vsel %vm372_vm9, %v6075_v56, %v6077_v49  ;;  %v6135_v56 = vsel %vm372_vm9, %v6047_v12, %v13522_v1 }
0x1b53   :  { %6305 = vmatprep.subr.bf16.mxu0 %v6147_v32 }
0x1b54   :  { %6306 = vmatpush1.bf16.msra.mxu0 %v6146_v33 }
0x1b55   :  { %v6045_v8 = vpop.permute.xlu1 %6044 }
0x1b56   :  { %v6133_v30 = vsel %vm372_vm9, %v6043_v40, %v6045_v8  ;;  %v6134_v40 = vsel %vm372_vm9, %v6045_v8, %v6047_v12 }
0x1b57   :  { %6266 = vmatprep.subr.bf16.mxu1 %v6133_v30 }
0x1b58   :  { %6267 = vmatpush1.bf16.msra.mxu1 %v6132_v44 }
0x1b59   :  { %v6063_v5 = vpop.permute.xlu1 %6062 }
0x1b5a   :  { %v6141_v28 = vsel %vm372_vm9, %v6061_v36, %v6063_v5  ;;  %v6129_v36 = vsel %vm372_vm9, %v6033_v63, %v13526_v6 }
0x1b5b   :  { %6307 = vmatprep.subr.bf16.mxu0 %v6141_v28 }
0x1b5c   :  { %6308 = vmatpush1.bf16.msra.mxu0 %v6140_v31 }
0x1b5d   :  { %6309 = vmatprep.subr.bf16.mxu0 %v6135_v56  ;;  %v6031_v51 = vpop.permute.xlu1 %6030 }
0x1b5e   :  { %v6127_v35 = vsel %vm372_vm9, %v6029_v21, %v6031_v51  ;;  %v6128_v59 = vsel %vm372_vm9, %v6031_v51, %v6033_v63  ;;  %v6005_v21 = vpop.permute.xlu0 %6004 }
0x1b5f   :  { %6268 = vmatprep.subr.bf16.mxu1 %v6127_v35  ;;  %v6117_v26 = vsel %vm372_vm9, %v6005_v21, %v13532_v14 }
0x1b60   :  { %6269 = vmatpush1.bf16.msra.mxu1 %v6126_v15  ;;  %6310 = vmatpush1.bf16.msra.mxu0 %v6134_v40 }
0x1b61   :  { %6311 = vmatprep.subr.bf16.mxu0 %v6129_v36  ;;  %v6017_v48 = vpop.permute.xlu1 %6016 }
0x1b62   :  { %v6121_v1 = vsel %vm372_vm9, %v6015_v0, %v6017_v48  ;;  %v6122_v37 = vsel %vm372_vm9, %v6017_v48, %v6019_v54  ;;  %v6099_v43 = vpop.permute.xlu0 %6098 }
0x1b63   :  { %6270 = vmatprep.subr.bf16.mxu1 %v6121_v1  ;;  %v6156_v14 = vsel %vm372_vm9, %v13534_v58, %v6099_v43 }
0x1b64   :  { %6271 = vmatpush1.bf16.msra.mxu1 %v6120_v55  ;;  %6312 = vmatpush1.bf16.msra.mxu0 %v6128_v59 }
0x1b65   :  { %6313 = vmatprep.subr.bf16.mxu0 %v6123_v24  ;;  %v6003_v46 = vpop.permute.xlu1 %6002 }
0x1b66   :  { %v6115_v6 = vsel %vm372_vm9, %v6001_v13, %v6003_v46  ;;  %v6116_v4 = vsel %vm372_vm9, %v6003_v46, %v6005_v21  ;;  %v6103_v2 = vpop.permute.xlu0 %6102 }
0x1b67   :  { %6272 = vmatprep.subr.bf16.mxu1 %v6115_v6 }
0x1b68   :  { %6273 = vmatpush1.bf16.msra.mxu1 %v6114_v10  ;;  %6314 = vmatpush1.bf16.msra.mxu0 %v6122_v37 }
0x1b69   :  { %6274 = vmatprep.subr.bf16.mxu1 %v6109_v27  ;;  %6315 = vmatprep.subr.bf16.mxu0 %v6117_v26  ;;  %v5993_v12 = vpop.permute.xlu1 %5992 }
0x1b6a   :  { %v6111_v42 = vsel %vm372_vm9, %v13465_v39, %v5993_v12 }
0x1b6c   :  { %6275 = vmatpush1.bf16.msra.mxu1 %v6108_v38  ;;  %6316 = vmatpush1.bf16.msra.mxu0 %v6116_v4 }
0x1b6d   :  { %6317 = vmatprep.subr.bf16.mxu0 %v6111_v42  ;;  %v6101_v47 = vpop.permute.xlu1 %6100 }
0x1b6e   :  { %v6157_v0 = vsel %vm372_vm9, %v6099_v43, %v6101_v47  ;;  %v6158_v60 = vsel %vm372_vm9, %v6101_v47, %v6103_v2 }
0x1b6f   :  { %6290 = vmatprep.subr.bf16.mxu1 %v6157_v0 }
0x1b70   :  { %6291 = vmatpush2.bf16.msra.mxu1 %v6156_v14  ;;  %6318 = vmatpush1.bf16.msra.mxu0 %v6110_v53 }
0x1b71   :  { %v6105_v41 = vpop.permute.xlu1 %6104 }
0x1b72   :  { %v6159_v11 = vsel %vm372_vm9, %v6103_v2, %v6105_v41 }
0x1b73   :  { %6293 = vmatmul.mubr.bf16.vlgmr.msra.gmra.mxu1 %v13575_v61  ;;  %6333 = vmatprep.subr.bf16.mxu0 %v6159_v11 }
0x1b74   :  { %6334 = vmatpush2.bf16.msra.mxu0 %v6158_v60 }
0x1b77   :  { %6336 = vmatmul.mubr.bf16.vlgmr.msra.gmra.mxu0 %v13575_v61 }
0x1c07   :  { %v13634_v49 = vpop.f32.mrf.mxu0 }
0x1c08   :  { %v6346_v39 = vmul.f32 %v13634_v49, %v9132_v20 }
0x1c09   :  { %v13636_v58 = vpop.f32.mrf.mxu0 }
0x1c0a   :  { %v6347_v9 = vmul.f32 %v13636_v58, %v9134_v23  ;;  %v6374_v8 = vmul.f32 %v6346_v39, %v13634_v49 }
0x1c0b   :  { %v13638_v32 = vpop.f32.mrf.mxu0 }
0x1c0c   :  { %v6352_v33 = vmul.f32 %v13638_v32, %v9132_v20  ;;  %v6375_v30 = vmul.f32 %v6347_v9, %v13636_v58  ;;  %v6358_v13 = vadd.f32 %v6347_v9, %v6346_v39 }
0x1c0d   :  { %v13644_v63 = vpop.f32.mrf.mxu0 }
0x1c0e   :  { %v6353_v61 = vmul.f32 %v13644_v63, %v9134_v23  ;;  %v6380_v28 = vmul.f32 %v6352_v33, %v13638_v32  ;;  %v6386_v51 = vadd.f32 %v6375_v30, %v6374_v8 }
0x1c10   :  { %v6381_v31 = vmul.f32 %v6353_v61, %v13644_v63  ;;  %v6365_v40 = vadd.f32 %v6353_v61, %v6352_v33 }
0x1c12   :  { %v6393_v21 = vadd.f32 %v6381_v31, %v6380_v28 }
0x1c33   :  { %v13652_v44 = vpop.f32.mrf.mxu1 }
0x1c34   :  { %v6348_v5 = vmul.f32 %v13652_v44, %v9138_v29 }
0x1c35   :  { %v13658_v56 = vpop.f32.mrf.mxu1 }
0x1c36   :  { %v6359_v35 = vadd.f32 %v6358_v13, %v6348_v5  ;;  %v6376_v54 = vmul.f32 %v6348_v5, %v13652_v44  ;;  %v6349_v15 = vmul.f32 %v13658_v56, %v9152_v45 }
0x1c37   :  { %v13663_v36 = vpop.f32.mrf.mxu1  ;;  %v13665_v48 = vpop.f32.mrf.mxu0 }
0x1c38   :  { %v6387_v1 = vadd.f32 %v6386_v51, %v6376_v54  ;;  %v6360_v55 = vadd.f32 %v6359_v35, %v6349_v15  ;;  %v6377_v59 = vmul.f32 %v6349_v15, %v13658_v56  ;;  %v6354_v24 = vmul.f32 %v13663_v36, %v9138_v29 }
0x1c39   :  { %v6350_v46 = vmul.f32 %v13665_v48, %v9171_v18  ;;  %v13672_v6 = vpop.f32.mrf.mxu1  ;;  %v13674_v10 = vpop.f32.mrf.mxu0 }
0x1c3a   :  { %v6388_v37 = vadd.f32 %v6387_v1, %v6377_v59  ;;  %v6366_v27 = vadd.f32 %v6365_v40, %v6354_v24  ;;  %v6382_v26 = vmul.f32 %v6354_v24, %v13663_v36  ;;  %v6355_v12 = vmul.f32 %v13672_v6, %v9152_v45 }
0x1c3b   :  { %v6361_v43 = vadd.f32 %v6360_v55, %v6350_v46  ;;  %v6378_v38 = vmul.f32 %v6350_v46, %v13665_v48  ;;  %v6351_v4 = vmul.f32 %v13674_v10, %v9177_v3  ;;  %v13682_v42 = vpop.f32.mrf.mxu0 }
0x1c3c   :  { %v6394_v47 = vadd.f32 %v6393_v21, %v6382_v26  ;;  %v6367_v0 = vadd.f32 %v6366_v27, %v6355_v12  ;;  %v6383_v14 = vmul.f32 %v6355_v12, %v13672_v6  ;;  %v6356_v53 = vmul.f32 %v13682_v42, %v9171_v18 }
0x1c3d   :  { %v6389_v2 = vadd.f32 %v6388_v37, %v6378_v38  ;;  %v6379_v41 = vmul.f32 %v6351_v4, %v13674_v10  ;;  %v13688_v11 = vpop.f32.mrf.mxu0  ;;  %v6362_v60 = vadd.f32 %v6361_v43, %v6351_v4  ;;  %v8277_v43 = vld [vmem:[%s15065_s2 + $0x80] sm:$0xff] }
0x1c3e   :  { %v6395_v39 = vadd.f32 %v6394_v47, %v6383_v14  ;;  %v6368_v9 = vadd.f32 %v6367_v0, %v6356_v53  ;;  %v6384_v33 = vmul.f32 %v6356_v53, %v13682_v42  ;;  %v6357_v61 = vmul.f32 %v13688_v11, %v9177_v3  ;;  %v8279_v47 = vld [vmem:[%s15066_s3 + $0x80] sm:$0xff]  ;;  %v8278_v0 = vld [vmem:[%s15065_s2 + $0x88] sm:$0xff] }
0x1c3f   :  { %6363 = vadd.xlane.f32.xlu0 %v6362_v60  ;;  %v6390_v5 = vadd.f32 %v6389_v2, %v6379_v41  ;;  %v8280_v60 = vld [vmem:[%s15066_s3 + $0x88] sm:$0xff] }
0x1c40   :  { %v6369_v8 = vadd.f32 %v6368_v9, %v6357_v61  ;;  %v6396_v30 = vadd.f32 %v6395_v39, %v6384_v33  ;;  %v6385_v13 = vmul.f32 %v6357_v61, %v13688_v11 }
0x1c42   :  { %6370 = vadd.xlane.f32.xlu1 %v6369_v8  ;;  %v6397_v28 = vadd.f32 %v6396_v30, %v6385_v13 }
0x1c43   :  { %6391 = vadd.xlane.f32.xlu0 %v6390_v5 }
0x1c47   :  { %6398 = vadd.xlane.f32.xlu0 %v6397_v28 }
0x1cc8   :  { %v6364_v31 = vpop.xlane.xlu0 %6363 }
0x1cc9   :  { %v6372_v51 = vmul.f32 0.001953125, %v6364_v31 }
0x1ccb   :  { %v6371_v35 = vpop.xlane.xlu1 %6370  ;;  %v6402_v15 = vmul.f32 %v6372_v51, %v6372_v51 }
0x1ccc   :  { %v6392_v54 = vpop.xlane.xlu0 %6391  ;;  %v6373_v1 = vmul.f32 0.001953125, %v6371_v35 }
0x1ccd   :  { %v6400_v40 = vmul.f32 0.001953125, %v6392_v54 }
0x1cce   :  { %v6403_v21 = vmul.f32 %v6373_v1, %v6373_v1 }
0x1ccf   :  { %v6404_v55 = vsub.f32 %v6400_v40, %v6402_v15 }
0x1cd0   :  { %v6399_v59 = vpop.xlane.xlu0 %6398 }
0x1cd1   :  { %v6406_v24 = vmax.f32 %v6404_v55, 0.0  ;;  %v6401_v46 = vmul.f32 0.001953125, %v6399_v59 }
0x1cd3   :  { %v6411_v37 = vadd.f32 1e-05, %v6406_v24  ;;  %v6405_v27 = vsub.f32 %v6401_v46, %v6403_v21 }
0x1cd5   :  { %8458 = vrsqrt.f32 %v6411_v37  ;;  %v6407_v26 = vmax.f32 %v6405_v27, 0.0 }
0x1cd7   :  { %v6412_v12 = vadd.f32 1e-05, %v6407_v26 }
0x1cd9   :  { %8460 = vrsqrt.f32 %v6412_v12 }
0x1ce2   :  { %v8459_v38 = vpop.eup %8458 }
0x1ce3   :  { %v6415_v4 = vmul.f32 %v8459_v38, %v8277_v43 }
0x1ce5   :  { %6426 = vperm.xlu1 %8395, %v6415_v4   ;;  %v6420_v14 = vmul.f32 %v6415_v4, %v6372_v51 }
0x1ce6   :  { %v8461_v53 = vpop.eup %8460 }
0x1ce7   :  { %v6422_v2 = vsub.f32 %v8279_v47, %v6420_v14  ;;  %v6416_v41 = vmul.f32 %v8461_v53, %v8278_v0 }
0x1ce9   :  { %6448 = vperm.xlu1 %8395, %v6422_v2   ;;  %6431 = vperm.xlu0 %8396, %v6416_v41   ;;  %v6421_v39 = vmul.f32 %v6416_v41, %v6373_v1 }
0x1ceb   :  { %v6423_v9 = vsub.f32 %v8280_v60, %v6421_v39 }
0x1ced   :  { %6453 = vperm.xlu1 %8395, %v6423_v9  }
0x1d60   :  { %v6427_v33 = vpop.permute.xlu1 %6426 }
0x1d61   :  { %v6434_v61 = vmul.f32 %v6427_v33, %v13634_v49  ;;  %v6435_v8 = vmul.f32 %v6427_v33, %v13636_v58  ;;  %v6436_v30 = vmul.f32 %v6427_v33, %v13652_v44  ;;  %v6437_v13 = vmul.f32 %v6427_v33, %v13658_v56 }
0x1d62   :  { %v6438_v31 = vmul.f32 %v6427_v33, %v13665_v48  ;;  %v6439_v51 = vmul.f32 %v6427_v33, %v13674_v10 }
0x1d64   :  { %v6432_v5 = vpop.permute.xlu0 %6431  ;;  %v6449_v28 = vpop.permute.xlu1 %6448 }
0x1d65   :  { %v6440_v35 = vmul.f32 %v6432_v5, %v13638_v32  ;;  %v6441_v54 = vmul.f32 %v6432_v5, %v13644_v63  ;;  %v6442_v15 = vmul.f32 %v6432_v5, %v13663_v36  ;;  %v6443_v49 = vmul.f32 %v6432_v5, %v13672_v6 }
0x1d66   :  { %v6456_v40 = vadd.f32 %v6449_v28, %v6434_v61  ;;  %v6457_v58 = vadd.f32 %v6449_v28, %v6435_v8  ;;  %v6458_v1 = vadd.f32 %v6449_v28, %v6436_v30  ;;  %v6459_v44 = vadd.f32 %v6449_v28, %v6437_v13 }
0x1d67   :  { %v6460_v55 = vadd.f32 %v6449_v28, %v6438_v31  ;;  %v6461_v56 = vadd.f32 %v6449_v28, %v6439_v51  ;;  %v6444_v59 = vmul.f32 %v6432_v5, %v13682_v42  ;;  %v6445_v48 = vmul.f32 %v6432_v5, %v13688_v11 }
0x1d68   :  { %v6468_v24 = vmax.f32 %v6456_v40, 0.0  ;;  %v6469_v10 = vmax.f32 %v6457_v58, 0.0  ;;  %v6454_v21 = vpop.permute.xlu1 %6453  ;;  %v6470_v32 = vmax.f32 %v6458_v1, 0.0  ;;  %v6471_v46 = vmax.f32 %v6459_v44, 0.0 }
0x1d69   :  { %v6472_v63 = vmax.f32 %v6460_v55, 0.0  ;;  %v6473_v37 = vmax.f32 %v6461_v56, 0.0  ;;  %v6462_v27 = vadd.f32 %v6454_v21, %v6440_v35  ;;  %v6463_v26 = vadd.f32 %v6454_v21, %v6441_v54 }
0x1d6a   :  { %v6480_v36 = vmul.f32 %v6468_v24, %v9132_v20  ;;  %v6481_v6 = vmul.f32 %v6469_v10, %v9134_v23  ;;  %v6482_v12 = vmul.f32 %v6470_v32, %v9138_v29  ;;  %v6483_v43 = vmul.f32 %v6471_v46, %v9152_v45 }
0x1d6b   :  { %v6484_v42 = vmul.f32 %v6472_v63, %v9171_v18  ;;  %v6485_v11 = vmul.f32 %v6473_v37, %v9177_v3  ;;  %v6464_v4 = vadd.f32 %v6454_v21, %v6442_v15  ;;  %v6465_v47 = vadd.f32 %v6454_v21, %v6443_v49 }
0x1d6c   :  { %v8373_v38 = vpack.c.bf16 %v6481_v6, %v6480_v36  ;;  %v6466_v0 = vadd.f32 %v6454_v21, %v6444_v59  ;;  %v8374_v14 = vpack.c.bf16 %v6483_v43, %v6482_v12  ;;  %v6467_v2 = vadd.f32 %v6454_v21, %v6445_v48 }
0x1d6d   :  { %v8375_v53 = vpack.c.bf16 %v6485_v11, %v6484_v42  ;;  %v6474_v41 = vmax.f32 %v6462_v27, 0.0  ;;  %v6475_v60 = vmax.f32 %v6463_v26, 0.0  ;;  %v6476_v39 = vmax.f32 %v6464_v4, 0.0 }
0x1d6e   :  { %6528 = vst [vmem:[#allocation2 + $0x4] sm:$0xff] %v8373_v38  ;;  %v6477_v9 = vmax.f32 %v6465_v47, 0.0  ;;  %v6478_v33 = vmax.f32 %v6466_v0, 0.0  ;;  %6529 = vst [vmem:[#allocation2 + $0xc] sm:$0xff] %v8374_v14  ;;  %v6479_v61 = vmax.f32 %v6467_v2, 0.0 }
0x1d6f   :  { %6530 = vst [vmem:[#allocation2 + $0x14] sm:$0xff] %v8375_v53  ;;  %v6486_v8 = vmul.f32 %v6474_v41, %v9132_v20  ;;  %v6487_v30 = vmul.f32 %v6475_v60, %v9134_v23  ;;  %v6488_v13 = vmul.f32 %v6476_v39, %v9138_v29 }
0x1d70   :  { %v6489_v5 = vmul.f32 %v6477_v9, %v9152_v45  ;;  %v6490_v28 = vmul.f32 %v6478_v33, %v9171_v18  ;;  %v6491_v31 = vmul.f32 %v6479_v61, %v9177_v3 }
0x1d71   :  { %v8376_v51 = vpack.c.bf16 %v6487_v30, %v6486_v8 }
0x1d72   :  { %v8377_v35 = vpack.c.bf16 %v6489_v5, %v6488_v13  ;;  %v8378_v54 = vpack.c.bf16 %v6491_v31, %v6490_v28 }
0x1d73   :  { %6531 = vst [vmem:[#allocation2 + $0x24] sm:$0xff] %v8376_v51 }
0x1d74   :  { %6532 = vst [vmem:[#allocation2 + $0x2c] sm:$0xff] %v8377_v35  ;;  %6533 = vst [vmem:[#allocation2 + $0x34] sm:$0xff] %v8378_v54 }
0x1d75   :  { %v6534_v15 = vld [vmem:[#allocation2] sm:$0xff]  ;;  %v6535_v49 = vld [vmem:[#allocation2 + $0x8] sm:$0xff] }
0x1d76   :  { %v6536_v48 = vld [vmem:[#allocation2 + $0x10] sm:$0xff]  ;;  %v6537_v32 = vld [vmem:[#allocation2 + $0x18] sm:$0xff] }
0x1d7a   :  { %v6538_v58 = vld [vmem:[#allocation2 + $0x20] sm:$0xff] }
0x1d7b   :  { %v6539_v40 = vld [vmem:[#allocation2 + $0x28] sm:$0xff]  ;;  %v13732_v44 = vcombine.high %v6534_v15, %v6538_v58  ;;  %v8287_v56 = vcombine.low %v6534_v15, %v6538_v58  ;;  %v6540_v59 = vld [vmem:[#allocation2 + $0x30] sm:$0xff]  ;;  %v6541_v21 = vld [vmem:[#allocation2 + $0x38] sm:$0xff] }
0x1d7c   :  { %v13730_v1 = vcombine.low %v6535_v49, %v6539_v40  ;;  %v13738_v55 = vcombine.high %v6535_v49, %v6539_v40  ;;  %v8291_v24 = vcombine.low %v6536_v48, %v6540_v59  ;;  %v8292_v10 = vcombine.high %v6536_v48, %v6540_v59 }
0x1d7d   :  { %6691 = vrot.lane.b32.xlu0 %v13732_v44, %s8474_s26  ;;  %v13790_v46 = vcombine.low %v6537_v32, %v6541_v21  ;;  %v8294_v63 = vcombine.high %v6537_v32, %v6541_v21 }
0x1d7e   :  { %6693 = vrot.lane.b32.xlu1 %v13730_v1, %s8474_s26 }
0x1d81   :  { %6695 = vrot.lane.b32.xlu0 %v13738_v55, %s8474_s26 }
0x1d82   :  { %6671 = vrot.lane.b32.xlu1 %v13732_v44, %s8475_s27 }
0x1d85   :  { %6673 = vrot.lane.b32.xlu0 %v13730_v1, %s8475_s27 }
0x1d86   :  { %6675 = vrot.lane.b32.xlu1 %v13738_v55, %s8475_s27 }
0x1d89   :  { %6651 = vrot.lane.b32.xlu0 %v13732_v44, %s8476_s28 }
0x1d8a   :  { %6653 = vrot.lane.b32.xlu1 %v13730_v1, %s8476_s28 }
0x1d8d   :  { %6655 = vrot.lane.b32.xlu0 %v13738_v55, %s8476_s28 }
0x1d8e   :  { %6631 = vrot.lane.b32.xlu1 %v13732_v44, %s8477_s29 }
0x1d91   :  { %6633 = vrot.lane.b32.xlu0 %v13730_v1, %s8477_s29 }
0x1d92   :  { %6635 = vrot.lane.b32.xlu1 %v13738_v55, %s8477_s29 }
0x1d95   :  { %6613 = vrot.lane.b32.xlu0 %v13732_v44, %s8478_s30 }
0x1d96   :  { %6615 = vrot.lane.b32.xlu1 %v13730_v1, %s8478_s30 }
0x1d99   :  { %6617 = vrot.lane.b32.xlu0 %v13738_v55, %s8478_s30 }
0x1d9a   :  { %6611 = vrot.lane.b32.xlu1 %v8287_v56, %s8478_s30 }
0x1d9d   :  { %6593 = vrot.lane.b32.xlu0 %v13732_v44, %s8479_s6 }
0x1d9e   :  { %6595 = vrot.lane.b32.xlu1 %v13730_v1, %s8479_s6 }
0x1da1   :  { %6597 = vrot.lane.b32.xlu0 %v13738_v55, %s8479_s6 }
0x1da2   :  { %6591 = vrot.lane.b32.xlu1 %v8287_v56, %s8479_s6 }
0x1da5   :  { %6573 = vrot.lane.b32.xlu0 %v13732_v44, %s8480_s7 }
0x1da6   :  { %6575 = vrot.lane.b32.xlu1 %v13730_v1, %s8480_s7 }
0x1da9   :  { %6577 = vrot.lane.b32.xlu0 %v13738_v55, %s8480_s7 }
0x1daa   :  { %6571 = vrot.lane.b32.xlu1 %v8287_v56, %s8480_s7 }
0x1dad   :  { %6697 = vrot.lane.b32.xlu0 %v8291_v24, %s8474_s26 }
0x1dae   :  { %6699 = vrot.lane.b32.xlu1 %v8292_v10, %s8474_s26 }
0x1db1   :  { %6711 = vrot.lane.b32.xlu0 %v13732_v44, %s8481_s12 }
0x1db2   :  { %6713 = vrot.lane.b32.xlu1 %v13730_v1, %s8481_s12 }
0x1db5   :  { %6715 = vrot.lane.b32.xlu0 %v13738_v55, %s8481_s12 }
0x1db6   :  { %6677 = vrot.lane.b32.xlu1 %v8291_v24, %s8475_s27 }
0x1db9   :  { %6679 = vrot.lane.b32.xlu0 %v8292_v10, %s8475_s27 }
0x1dba   :  { %6701 = vrot.lane.b32.xlu1 %v13790_v46, %s8474_s26 }
0x1dbd   :  { %6703 = vrot.lane.b32.xlu0 %v8294_v63, %s8474_s26 }
0x1dbe   :  { %6657 = vrot.lane.b32.xlu1 %v8291_v24, %s8476_s28 }
0x1dc1   :  { %6659 = vrot.lane.b32.xlu0 %v8292_v10, %s8476_s28 }
0x1dc2   :  { %6681 = vrot.lane.b32.xlu1 %v13790_v46, %s8475_s27 }
0x1dc5   :  { %6683 = vrot.lane.b32.xlu0 %v8294_v63, %s8475_s27 }
0x1dc6   :  { %6637 = vrot.lane.b32.xlu1 %v8291_v24, %s8477_s29 }
0x1dc9   :  { %6639 = vrot.lane.b32.xlu0 %v8292_v10, %s8477_s29 }
0x1dca   :  { %6661 = vrot.lane.b32.xlu1 %v13790_v46, %s8476_s28 }
0x1dcd   :  { %6663 = vrot.lane.b32.xlu0 %v8294_v63, %s8476_s28 }
0x1dce   :  { %6619 = vrot.lane.b32.xlu1 %v8291_v24, %s8478_s30 }
0x1dd1   :  { %6621 = vrot.lane.b32.xlu0 %v8292_v10, %s8478_s30 }
0x1dd2   :  { %6641 = vrot.lane.b32.xlu1 %v13790_v46, %s8477_s29 }
0x1dd5   :  { %6599 = vrot.lane.b32.xlu0 %v8291_v24, %s8479_s6 }
0x1dd6   :  { %6601 = vrot.lane.b32.xlu1 %v8292_v10, %s8479_s6 }
0x1dd9   :  { %6623 = vrot.lane.b32.xlu0 %v13790_v46, %s8478_s30 }
0x1dda   :  { %6579 = vrot.lane.b32.xlu1 %v8291_v24, %s8480_s7 }
0x1ddd   :  { %6581 = vrot.lane.b32.xlu0 %v8292_v10, %s8480_s7 }
0x1dde   :  { %6603 = vrot.lane.b32.xlu1 %v13790_v46, %s8479_s6 }
0x1de1   :  { %6583 = vrot.lane.b32.xlu0 %v13790_v46, %s8480_s7 }
0x1de2   :  { %6719 = vrot.lane.b32.xlu1 %v8292_v10, %s8481_s12 }
0x1de5   :  { %6717 = vrot.lane.b32.xlu0 %v8291_v24, %s8481_s12 }
0x1de6   :  { %6721 = vrot.lane.b32.xlu1 %v13790_v46, %s8481_s12 }
0x1de9   :  { %6723 = vrot.lane.b32.xlu0 %v8294_v63, %s8481_s12 }
0x1dea   :  { %6747 = vrot.lane.b32.xlu1 %v13730_v1, %s8482_s0 }
0x1ded   :  { %6745 = vrot.lane.b32.xlu0 %v13732_v44, %s8482_s0 }
0x1dee   :  { %6751 = vrot.lane.b32.xlu1 %v8291_v24, %s8482_s0 }
0x1def   :  { %v6692_v36 = vpop.permute.xlu0 %6691 }
0x1df0   :  { %v13830_v37 = vpop.permute.xlu1 %6693 }
0x1df1   :  { %6743 = vrot.lane.b32.xlu0 %v8287_v56, %s8482_s0  ;;  %v6705_v0 = vsel %vm207_vm0, %v6692_v36, %v13830_v37 }
0x1df2   :  { %6841 = vrot.lane.b32.xlu1 %v6692_v36, %s8482_s0 }
0x1df3   :  { %v13834_v27 = vpop.permute.xlu0 %6695 }
0x1df4   :  { %v6672_v6 = vpop.permute.xlu1 %6671 }
0x1df5   :  { %6749 = vrot.lane.b32.xlu0 %v13738_v55, %s8482_s0 }
0x1df7   :  { %v13840_v12 = vpop.permute.xlu0 %6673 }
0x1df8   :  { %v13838_v26 = vpop.permute.xlu1 %6675  ;;  %v6685_v2 = vsel %vm186_vm1, %v6672_v6, %v13840_v12 }
0x1df9   :  { %6753 = vrot.lane.b32.xlu0 %v8292_v10, %s8482_s0 }
0x1dfb   :  { %v13845_v42 = vpop.permute.xlu0 %6651 }
0x1dfc   :  { %v13843_v43 = vpop.permute.xlu1 %6653  ;;  %6813 = vrot.lane.b32.xlu1 %v13845_v42, %s8482_s0 }
0x1dfd   :  { %6827 = vrot.lane.b32.xlu0 %v6672_v6, %s8482_s0 }
0x1dff   :  { %v6656_v38 = vpop.permute.xlu0 %6655 }
0x1e00   :  { %v6632_v11 = vpop.permute.xlu1 %6631  ;;  %v6666_v39 = vsel %vm165_vm2, %v13843_v43, %v6656_v38 }
0x1e01   :  { %6799 = vrot.lane.b32.xlu0 %v6632_v11, %s8482_s0 }
0x1e03   :  { %v13853_v47 = vpop.permute.xlu0 %6633 }
0x1e04   :  { %v13851_v4 = vpop.permute.xlu1 %6635  ;;  %v6643_v61 = vsel %vm142_vm3, %v6632_v11, %v13853_v47 }
0x1e05   :  { %6843 = vrot.lane.b32.xlu0 %v6705_v0, %s8482_s0 }
0x1e07   :  { %v13860_v53 = vpop.permute.xlu0 %6613 }
0x1e08   :  { %v13858_v14 = vpop.permute.xlu1 %6615 }
0x1e09   :  { %6829 = vrot.lane.b32.xlu0 %v6685_v2, %s8482_s0 }
0x1e0b   :  { %v6618_v41 = vpop.permute.xlu0 %6617 }
0x1e0c   :  { %v13865_v60 = vpop.permute.xlu1 %6611  ;;  %v6627_v13 = vsel %vm123_vm4, %v13858_v14, %v6618_v41 }
0x1e0d   :  { %6817 = vrot.lane.b32.xlu0 %v6666_v39, %s8482_s0 }
0x1e0f   :  { %v6594_v9 = vpop.permute.xlu0 %6593 }
0x1e10   :  { %v13870_v33 = vpop.permute.xlu1 %6595 }
0x1e11   :  { %6801 = vrot.lane.b32.xlu0 %v6643_v61, %s8482_s0  ;;  %v6606_v31 = vsel %vm102_vm5, %v6594_v9, %v13870_v33 }
0x1e13   :  { %v13875_v8 = vpop.permute.xlu0 %6597 }
0x1e14   :  { %v6592_v30 = vpop.permute.xlu1 %6591 }
0x1e15   :  { %6789 = vrot.lane.b32.xlu0 %v6627_v13, %s8482_s0  ;;  %v6605_v54 = vsel %vm102_vm5, %v6592_v30, %v6594_v9 }
0x1e17   :  { %v13880_v5 = vpop.permute.xlu0 %6573 }
0x1e18   :  { %v13882_v28 = vpop.permute.xlu1 %6575 }
0x1e19   :  { %6773 = vrot.lane.b32.xlu0 %v6606_v31, %s8482_s0 }
0x1e1b   :  { %v13887_v51 = vpop.permute.xlu0 %6577 }
0x1e1c   :  { %v13889_v35 = vpop.permute.xlu1 %6571  ;;  %v6587_v40 = vsel %vm81_vm6, %v13882_v28, %v13887_v51 }
0x1e1d   :  { %6771 = vrot.lane.b32.xlu0 %v6605_v54, %s8482_s0 }
0x1e1f   :  { %v13893_v15 = vpop.permute.xlu0 %6697 }
0x1e20   :  { %v6700_v49 = vpop.permute.xlu1 %6699 }
0x1e21   :  { %6761 = vrot.lane.b32.xlu0 %v6587_v40, %s8482_s0  ;;  %v6708_v44 = vsel %vm207_vm0, %v13893_v15, %v6700_v49 }
0x1e23   :  { %v13899_v58 = vpop.permute.xlu0 %6711 }
0x1e24   :  { %v13901_v1 = vpop.permute.xlu1 %6713  ;;  %6855 = vrot.lane.b32.xlu1 %v13899_v58, %s8482_s0 }
0x1e25   :  { %6849 = vrot.lane.b32.xlu0 %v6708_v44, %s8482_s0 }
0x1e27   :  { %v13908_v55 = vpop.permute.xlu0 %6715 }
0x1e28   :  { %v13910_v56 = vpop.permute.xlu1 %6677  ;;  %v6726_v59 = vsel %vm228_vm7, %v13901_v1, %v13908_v55 }
0x1e29   :  { %6859 = vrot.lane.b32.xlu0 %v6726_v59, %s8482_s0  ;;  %v6687_v10 = vsel %vm186_vm1, %v13838_v26, %v13910_v56 }
0x1e2b   :  { %v13916_v48 = vpop.permute.xlu0 %6679 }
0x1e2c   :  { %v13918_v24 = vpop.permute.xlu1 %6701 }
0x1e2d   :  { %6833 = vrot.lane.b32.xlu0 %v6687_v10, %s8482_s0  ;;  %v6709_v63 = vsel %vm207_vm0, %v6700_v49, %v13918_v24 }
0x1e2f   :  { %v13924_v21 = vpop.permute.xlu0 %6703 }
0x1e30   :  { %v13926_v32 = vpop.permute.xlu1 %6657 }
0x1e31   :  { %6851 = vrot.lane.b32.xlu0 %v6709_v63, %s8482_s0  ;;  %v6667_v11 = vsel %vm165_vm2, %v6656_v38, %v13926_v32 }
0x1e33   :  { %v13931_v36 = vpop.permute.xlu0 %6659 }
0x1e34   :  { %v13933_v6 = vpop.permute.xlu1 %6681 }
0x1e35   :  { %6819 = vrot.lane.b32.xlu0 %v6667_v11, %s8482_s0  ;;  %v6689_v39 = vsel %vm186_vm1, %v13916_v48, %v13933_v6 }
0x1e37   :  { %v13938_v0 = vpop.permute.xlu0 %6683 }
0x1e38   :  { %v13940_v2 = vpop.permute.xlu1 %6637 }
0x1e39   :  { %6837 = vrot.lane.b32.xlu0 %v6689_v39, %s8482_s0  ;;  %v6645_v38 = vsel %vm142_vm3, %v13851_v4, %v13940_v2 }
0x1e3b   :  { %v13946_v9 = vpop.permute.xlu0 %6639 }
0x1e3c   :  { %v13948_v61 = vpop.permute.xlu1 %6661 }
0x1e3d   :  { %6805 = vrot.lane.b32.xlu0 %v6645_v38, %s8482_s0  ;;  %v6669_v31 = vsel %vm165_vm2, %v13931_v36, %v13948_v61 }
0x1e3f   :  { %v13954_v30 = vpop.permute.xlu0 %6663 }
0x1e40   :  { %v13956_v13 = vpop.permute.xlu1 %6619 }
0x1e41   :  { %6823 = vrot.lane.b32.xlu0 %v6669_v31, %s8482_s0  ;;  %v6628_v40 = vsel %vm123_vm4, %v6618_v41, %v13956_v13 }
0x1e43   :  { %v13962_v54 = vpop.permute.xlu0 %6621 }
0x1e44   :  { %v6642_v49 = vpop.permute.xlu1 %6641 }
0x1e45   :  { %6811 = vrot.lane.b32.xlu1 %v6642_v49, %s8482_s0  ;;  %6791 = vrot.lane.b32.xlu0 %v6628_v40, %s8482_s0  ;;  %v6647_v10 = vsel %vm142_vm3, %v13946_v9, %v6642_v49 }
0x1e47   :  { %v13968_v44 = vpop.permute.xlu0 %6599 }
0x1e48   :  { %v13970_v59 = vpop.permute.xlu1 %6601  ;;  %v6608_v41 = vsel %vm102_vm5, %v13875_v8, %v13968_v44 }
0x1e49   :  { %6809 = vrot.lane.b32.xlu0 %v6647_v10, %s8482_s0  ;;  %v6706_v10 = vsel %vm207_vm0, %v13830_v37, %v13834_v27  ;;  %v6665_v37 = vsel %vm165_vm2, %v13845_v42, %v13843_v43  ;;  %v6626_v43 = vsel %vm123_vm4, %v13860_v53, %v13858_v14  ;;  %v6586_v14 = vsel %vm81_vm6, %v13880_v5, %v13882_v28 }
0x1e4b   :  { %v6624_v63 = vpop.permute.xlu0 %6623 }
0x1e4c   :  { %v13975_v11 = vpop.permute.xlu1 %6579  ;;  %6797 = vrot.lane.b32.xlu1 %v6624_v63, %s8482_s0  ;;  %v6630_v31 = vsel %vm123_vm4, %v13962_v54, %v6624_v63 }
0x1e4d   :  { %6777 = vrot.lane.b32.xlu0 %v6608_v41, %s8482_s0  ;;  %v6588_v40 = vsel %vm81_vm6, %v13887_v51, %v13975_v11 }
0x1e4f   :  { %v13982_v39 = vpop.permute.xlu0 %6581 }
0x1e50   :  { %v6604_v38 = vpop.permute.xlu1 %6603 }
0x1e51   :  { %6783 = vrot.lane.b32.xlu1 %v6604_v38, %s8482_s0  ;;  %6795 = vrot.lane.b32.xlu0 %v6630_v31, %s8482_s0  ;;  %v6610_v63 = vsel %vm102_vm5, %v13970_v59, %v6604_v38  ;;  %v6686_v31 = vsel %vm186_vm1, %v13840_v12, %v13838_v26  ;;  %v6644_v26 = vsel %vm142_vm3, %v13853_v47, %v13851_v4 }
0x1e52   :  { %v6607_v47 = vsel %vm102_vm5, %v13870_v33, %v13875_v8  ;;  %v14052_v33 = vld [vmem:[%s15063_s1 + $0x94] ss:$8 sps:$4 sm:$0xff]   ;;  %v6707_v8 = vsel %vm207_vm0, %v13834_v27, %v13893_v15  ;;  %v6688_v27 = vsel %vm186_vm1, %v13910_v56, %v13916_v48  ;;  %v6710_v15 = vsel %vm207_vm0, %v13918_v24, %v13924_v21 }
0x1e53   :  { %v6584_v49 = vpop.permute.xlu0 %6583  ;;  %8299 = vmatprep.mubr.msk.bf16.mxu1 %vm481_vm8, %v14052_v33  ;;  %8300 = vmatprep.mubr.msk.bf16.mxu0 %vm481_vm8, %v14052_v33  ;;  %v6690_v56 = vsel %vm186_vm1, %v13933_v6, %v13938_v0  ;;  %v6646_v24 = vsel %vm142_vm3, %v13940_v2, %v13946_v9  ;;  %v6670_v21 = vsel %vm165_vm2, %v13948_v61, %v13954_v30 }
0x1e54   :  { %v14000_v41 = vpop.permute.xlu1 %6719  ;;  %v6590_v51 = vsel %vm81_vm6, %v13982_v39, %v6584_v49  ;;  %v6609_v0 = vsel %vm102_vm5, %v13968_v44, %v13970_v59  ;;  %v6589_v9 = vsel %vm81_vm6, %v13975_v11, %v13982_v39 }
0x1e55   :  { %6769 = vrot.lane.b32.xlu1 %v6584_v49, %s8482_s0  ;;  %6763 = vrot.lane.b32.xlu0 %v6588_v40, %s8482_s0 }
0x1e57   :  { %v6718_v40 = vpop.permute.xlu0 %6717 }
0x1e58   :  { %v6727_v38 = vsel %vm228_vm7, %v13908_v55, %v6718_v40  ;;  %v6625_v55 = vsel %vm123_vm4, %v13865_v60, %v13860_v53  ;;  %v6585_v53 = vsel %vm81_vm6, %v13889_v35, %v13880_v5  ;;  %v6725_v5 = vsel %vm228_vm7, %v13899_v58, %v13901_v1 }
0x1e59   :  { %6845 = vrot.lane.b32.xlu1 %v6706_v10, %s8482_s0  ;;  %6781 = vrot.lane.b32.xlu0 %v6610_v63, %s8482_s0  ;;  %v6722_v10 = vpop.permute.xlu1 %6721  ;;  %v6668_v58 = vsel %vm165_vm2, %v13926_v32, %v13931_v36  ;;  %v6629_v36 = vsel %vm123_vm4, %v13956_v13, %v13962_v54  ;;  %v6728_v54 = vsel %vm228_vm7, %v6718_v40, %v14000_v41 }
0x1e5a   :  { %v6729_v12 = vsel %vm228_vm7, %v14000_v41, %v6722_v10 }
0x1e5b   :  { %v6724_v42 = vpop.permute.xlu0 %6723 }
0x1e5c   :  { %v6730_v59 = vsel %vm228_vm7, %v6722_v10, %v6724_v42 }
0x1e5d   :  { %6831 = vrot.lane.b32.xlu1 %v6686_v31, %s8482_s0  ;;  %6767 = vrot.lane.b32.xlu0 %v6590_v51, %s8482_s0  ;;  %v14102_v2 = vpop.permute.xlu1 %6747 }
0x1e5f   :  { %v14031_v4 = vpop.permute.xlu0 %6745 }
0x1e61   :  { %6815 = vrot.lane.b32.xlu1 %v6665_v37, %s8482_s0  ;;  %6861 = vrot.lane.b32.xlu0 %v6727_v38, %s8482_s0  ;;  %v14108_v30 = vpop.permute.xlu1 %6751 }
0x1e63   :  { %v14040_v49 = vpop.permute.xlu0 %6743 }
0x1e65   :  { %6803 = vrot.lane.b32.xlu1 %v6644_v26, %s8482_s0  ;;  %6865 = vrot.lane.b32.xlu0 %v6729_v12, %s8482_s0  ;;  %v6842_v44 = vpop.permute.xlu1 %6841 }
0x1e67   :  { %v14047_v60 = vpop.permute.xlu0 %6749 }
0x1e69   :  { %6787 = vrot.lane.b32.xlu1 %v6626_v43, %s8482_s0 }
0x1e6b   :  { %v14065_v28 = vpop.permute.xlu0 %6753 }
0x1e6d   :  { %6785 = vrot.lane.b32.xlu1 %v6625_v55, %s8482_s0 }
0x1e6e   :  { %v6814_v11 = vpop.permute.xlu1 %6813 }
0x1e6f   :  { %v6828_v35 = vpop.permute.xlu0 %6827 }
0x1e71   :  { %6775 = vrot.lane.b32.xlu1 %v6607_v47, %s8482_s0 }
0x1e73   :  { %v6800_v1 = vpop.permute.xlu0 %6799 }
0x1e75   :  { %6759 = vrot.lane.b32.xlu1 %v6586_v14, %s8482_s0 }
0x1e77   :  { %v6844_v48 = vpop.permute.xlu0 %6843 }
0x1e78   :  { %v6911_v43 = vsel %vm372_vm9, %v6842_v44, %v6844_v48 }
0x1e79   :  { %6757 = vrot.lane.b32.xlu1 %v6585_v53, %s8482_s0 }
0x1e7b   :  { %v6830_v32 = vpop.permute.xlu0 %6829 }
0x1e7c   :  { %v6905_v14 = vsel %vm372_vm9, %v6828_v35, %v6830_v32 }
0x1e7d   :  { %6847 = vrot.lane.b32.xlu1 %v6707_v8, %s8482_s0 }
0x1e7f   :  { %v14096_v6 = vpop.permute.xlu0 %6817 }
0x1e81   :  { %6857 = vrot.lane.b32.xlu1 %v6725_v5, %s8482_s0 }
0x1e83   :  { %v6802_v61 = vpop.permute.xlu0 %6801 }
0x1e85   :  { %6835 = vrot.lane.b32.xlu1 %v6688_v27, %s8482_s0 }
0x1e87   :  { %v14112_v13 = vpop.permute.xlu0 %6789 }
0x1e89   :  { %6853 = vrot.lane.b32.xlu1 %v6710_v15, %s8482_s0 }
0x1e8b   :  { %v6774_v63 = vpop.permute.xlu0 %6773 }
0x1e8d   :  { %6821 = vrot.lane.b32.xlu1 %v6668_v58, %s8482_s0 }
0x1e8f   :  { %v6772_v39 = vpop.permute.xlu0 %6771 }
0x1e91   :  { %6839 = vrot.lane.b32.xlu1 %v6690_v56, %s8482_s0  ;;  %v6893_v56 = vsel %vm372_vm9, %v6800_v1, %v6802_v61 }
0x1e95   :  { %6807 = vrot.lane.b32.xlu1 %v6646_v24, %s8482_s0 }
0x1e96   :  { %v14119_v31 = vpop.permute.xlu1 %6855 }
0x1e99   :  { %6825 = vrot.lane.b32.xlu1 %v6670_v21, %s8482_s0 }
0x1e9d   :  { %6793 = vrot.lane.b32.xlu1 %v6629_v36, %s8482_s0 }
0x1ea1   :  { %6779 = vrot.lane.b32.xlu1 %v6609_v0, %s8482_s0 }
0x1ea5   :  { %6765 = vrot.lane.b32.xlu1 %v6589_v9, %s8482_s0 }
0x1ea9   :  { %6755 = vrot.lane.b32.xlu1 %v13790_v46, %s8482_s0  ;;  %v14123_v46 = vpop.permute.xlu0 %6761 }
0x1ead   :  { %6863 = vrot.lane.b32.xlu1 %v6728_v54, %s8482_s0  ;;  %v14127_v38 = vpop.permute.xlu0 %6849  ;;  %v6881_v54 = vsel %vm372_vm9, %v6772_v39, %v6774_v63 }
0x1eb1   :  { %6867 = vrot.lane.b32.xlu1 %v6730_v59, %s8482_s0  ;;  %v14133_v10 = vpop.permute.xlu0 %6859 }
0x1eb5   :  { %v6834_v42 = vpop.permute.xlu0 %6833 }
0x1eb7   :  { %v14121_v51 = vpop.permute.xlu1 %6811 }
0x1eb9   :  { %v6852_v27 = vpop.permute.xlu0 %6851 }
0x1ebd   :  { %v6820_v35 = vpop.permute.xlu0 %6819 }
0x1ebe   :  { %v14125_v37 = vpop.permute.xlu1 %6797 }
0x1ec1   :  { %v6838_v36 = vpop.permute.xlu0 %6837 }
0x1ec3   :  { %v14129_v41 = vpop.permute.xlu1 %6783 }
0x1ec5   :  { %v6806_v1 = vpop.permute.xlu0 %6805 }
0x1ec7   :  { %v14131_v40 = vpop.permute.xlu1 %6769 }
0x1ecb   :  { %v6846_v26 = vpop.permute.xlu1 %6845 }
0x1ecc   :  { %v6912_v12 = vsel %vm372_vm9, %v6844_v48, %v6846_v26 }
0x1ecd   :  { %6980 = vmatprep.subr.bf16.mxu1 %v6912_v12  ;;  %v6824_v12 = vpop.permute.xlu0 %6823 }
0x1ece   :  { %6981 = vmatpush1.bf16.msra.mxu1 %v6911_v43  ;;  %v6870_v43 = vsel %vm372_vm9, %v14031_v4, %v14102_v2 }
0x1ecf   :  { %v6832_v55 = vpop.permute.xlu1 %6831 }
0x1ed0   :  { %v6906_v47 = vsel %vm372_vm9, %v6830_v32, %v6832_v55 }
0x1ed1   :  { %6982 = vmatprep.subr.bf16.mxu1 %v6906_v47 }
0x1ed2   :  { %6983 = vmatpush1.bf16.msra.mxu1 %v6905_v14 }
0x1ed3   :  { %v6816_v53 = vpop.permute.xlu1 %6815 }
0x1ed4   :  { %v6900_v8 = vsel %vm372_vm9, %v6816_v53, %v14096_v6  ;;  %v6899_v5 = vsel %vm372_vm9, %v6814_v11, %v6816_v53  ;;  %v6792_v53 = vpop.permute.xlu0 %6791 }
0x1ed5   :  { %6984 = vmatprep.subr.bf16.mxu1 %v6900_v8 }
0x1ed6   :  { %6985 = vmatpush1.bf16.msra.mxu1 %v6899_v5 }
0x1ed7   :  { %v14142_v15 = vpop.permute.xlu1 %6803 }
0x1ed8   :  { %v6894_v58 = vsel %vm372_vm9, %v6802_v61, %v14142_v15 }
0x1ed9   :  { %6986 = vmatprep.subr.bf16.mxu1 %v6894_v58 }
0x1eda   :  { %6987 = vmatpush1.bf16.msra.mxu1 %v6893_v56  ;;  %v6810_v56 = vpop.permute.xlu0 %6809 }
0x1edb   :  { %v6788_v48 = vpop.permute.xlu1 %6787 }
0x1edc   :  { %v6888_v24 = vsel %vm372_vm9, %v6788_v48, %v14112_v13 }
0x1edd   :  { %6988 = vmatprep.subr.bf16.mxu1 %v6888_v24 }
0x1edf   :  { %v6786_v21 = vpop.permute.xlu1 %6785 }
0x1ee0   :  { %v6887_v32 = vsel %vm372_vm9, %v6786_v21, %v6788_v48  ;;  %v6907_v48 = vsel %vm372_vm9, %v6832_v55, %v6834_v42  ;;  %v6915_v21 = vsel %vm372_vm9, %v14127_v38, %v6852_v27 }
0x1ee1   :  { %6989 = vmatpush1.bf16.msra.mxu1 %v6887_v32  ;;  %v6778_v32 = vpop.permute.xlu0 %6777 }
0x1ee3   :  { %v14150_v0 = vpop.permute.xlu1 %6775 }
0x1ee4   :  { %v6882_v9 = vsel %vm372_vm9, %v6774_v63, %v14150_v0  ;;  %v6869_v63 = vsel %vm372_vm9, %v14040_v49, %v14031_v4  ;;  %v14174_v4 = vld [vmem:[%s15063_s1 + $0x90] ss:$8 sps:$4 sm:$0xff]  }
0x1ee5   :  { %6990 = vmatprep.subr.bf16.mxu1 %v6882_v9 }
0x1ee6   :  { %6991 = vmatpush1.bf16.msra.mxu1 %v6881_v54 }
0x1ee7   :  { %v6760_v61 = vpop.permute.xlu1 %6759 }
0x1ee8   :  { %v6876_v44 = vsel %vm372_vm9, %v6760_v61, %v14123_v46 }
0x1ee9   :  { %6992 = vmatprep.subr.bf16.mxu1 %v6876_v44 }
0x1eeb   :  { %v6758_v59 = vpop.permute.xlu1 %6757 }
0x1eec   :  { %v6875_v11 = vsel %vm372_vm9, %v6758_v59, %v6760_v61  ;;  %v6796_v61 = vpop.permute.xlu0 %6795 }
0x1eed   :  { %6993 = vmatpush1.bf16.msra.mxu1 %v6875_v11 }
0x1eee   :  { %6994 = vmatprep.subr.bf16.mxu1 %v6870_v43 }
0x1eef   :  { %v6848_v47 = vpop.permute.xlu1 %6847 }
0x1ef0   :  { %v6914_v39 = vsel %vm372_vm9, %v6848_v47, %v14127_v38  ;;  %v6913_v14 = vsel %vm372_vm9, %v6846_v26, %v6848_v47  ;;  %v6764_v11 = vpop.permute.xlu0 %6763 }
0x1ef1   :  { %6995 = vmatpush1.bf16.msra.mxu1 %v6869_v63  ;;  %7023 = vmatprep.subr.bf16.mxu0 %v6914_v39 }
0x1ef2   :  { %7024 = vmatpush1.bf16.msra.mxu0 %v6913_v14 }
0x1ef3   :  { %v6858_v8 = vpop.permute.xlu1 %6857 }
0x1ef4   :  { %v6918_v5 = vsel %vm372_vm9, %v6858_v8, %v14133_v10  ;;  %v6917_v58 = vsel %vm372_vm9, %v14119_v31, %v6858_v8  ;;  %v6782_v39 = vpop.permute.xlu0 %6781  ;;  %v6883_v8 = vsel %vm372_vm9, %v14150_v0, %v6778_v32  ;;  %v6872_v0 = vsel %vm372_vm9, %v14047_v60, %v14108_v30 }
0x1ef5   :  { %7010 = vmatprep.subr.bf16.mxu1 %v6918_v5 }
0x1ef6   :  { %7011 = vmatpush2.bf16.msra.mxu1 %v6917_v58 }
0x1ef7   :  { %v6836_v49 = vpop.permute.xlu1 %6835 }
0x1ef8   :  { %v6908_v26 = vsel %vm372_vm9, %v6834_v42, %v6836_v49  ;;  %v6901_v42 = vsel %vm372_vm9, %v14096_v6, %v6820_v35  ;;  %v6909_v44 = vsel %vm372_vm9, %v6836_v49, %v6838_v36  ;;  %v6877_v49 = vsel %vm372_vm9, %v14123_v46, %v6764_v11 }
0x1ef9   :  { %7025 = vmatprep.subr.bf16.mxu0 %v6908_v26  ;;  %7013 = vmatmul.mubr.bf16.vlgmr.msra.gmra.mxu1 %v14174_v4 }
0x1efa   :  { %7026 = vmatpush1.bf16.msra.mxu0 %v6907_v48  ;;  %8301 = vmatprep.mubr.msk.bf16.mxu1 %vm481_vm8, %v14052_v33 }
0x1efb   :  { %v6854_v31 = vpop.permute.xlu1 %6853 }
0x1efc   :  { %v6916_v24 = vsel %vm372_vm9, %v6852_v27, %v6854_v31  ;;  %v6895_v27 = vsel %vm372_vm9, %v14142_v15, %v6806_v1  ;;  %v6889_v15 = vsel %vm372_vm9, %v14112_v13, %v6792_v53  ;;  %v6886_v13 = vsel %vm372_vm9, %v6782_v39, %v14129_v41 }
0x1efd   :  { %7066 = vmatprep.subr.bf16.mxu1 %v6916_v24  ;;  %v6871_v31 = vsel %vm372_vm9, %v14102_v2, %v14047_v60 }
0x1efe   :  { %7067 = vmatpush1.bf16.msra.mxu1 %v6915_v21 }
0x1eff   :  { %v6822_v9 = vpop.permute.xlu1 %6821 }
0x1f00   :  { %v6902_v54 = vsel %vm372_vm9, %v6820_v35, %v6822_v9  ;;  %v6903_v35 = vsel %vm372_vm9, %v6822_v9, %v6824_v12  ;;  %v6873_v9 = vsel %vm372_vm9, %v14108_v30, %v14065_v28 }
0x1f01   :  { %7027 = vmatprep.subr.bf16.mxu0 %v6902_v54 }
0x1f02   :  { %7028 = vmatpush1.bf16.msra.mxu0 %v6901_v42 }
0x1f03   :  { %v6840_v55 = vpop.permute.xlu1 %6839 }
0x1f04   :  { %v6910_v33 = vsel %vm372_vm9, %v6838_v36, %v6840_v55  ;;  %v6898_v36 = vsel %vm372_vm9, %v6810_v56, %v14121_v51 }
0x1f05   :  { %7068 = vmatprep.subr.bf16.mxu1 %v6910_v33 }
0x1f06   :  { %7069 = vmatpush1.bf16.msra.mxu1 %v6909_v44 }
0x1f07   :  { %v6808_v59 = vpop.permute.xlu1 %6807 }
0x1f08   :  { %v6896_v38 = vsel %vm372_vm9, %v6806_v1, %v6808_v59  ;;  %v6897_v1 = vsel %vm372_vm9, %v6808_v59, %v6810_v56 }
0x1f09   :  { %7029 = vmatprep.subr.bf16.mxu0 %v6896_v38 }
0x1f0a   :  { %7030 = vmatpush1.bf16.msra.mxu0 %v6895_v27 }
0x1f0b   :  { %v6826_v43 = vpop.permute.xlu1 %6825 }
0x1f0c   :  { %v6904_v6 = vsel %vm372_vm9, %v6824_v12, %v6826_v43  ;;  %v6892_v12 = vsel %vm372_vm9, %v6796_v61, %v14125_v37  ;;  %v15177_v43 = vld [vmem:[#allocation4_spill] sm:$0xff] }
0x1f0d   :  { %7070 = vmatprep.subr.bf16.mxu1 %v6904_v6  ;;  %v935_v6 = vmul.f32 %v15177_v43, %v9138_v29 }
0x1f0e   :  { %7071 = vmatpush1.bf16.msra.mxu1 %v6903_v35  ;;  %v15178_v35 = vld [vmem:[#allocation6_spill] sm:$0xff] }
0x1f0f   :  { %7072 = vmatprep.subr.bf16.mxu1 %v6898_v36  ;;  %v6794_v47 = vpop.permute.xlu1 %6793  ;;  %v936_v36 = vmul.f32 %v15178_v35, %v9152_v45 }
0x1f10   :  { %v6890_v63 = vsel %vm372_vm9, %v6792_v53, %v6794_v47  ;;  %v6891_v5 = vsel %vm372_vm9, %v6794_v47, %v6796_v61  ;;  %v6768_v53 = vpop.permute.xlu0 %6767  ;;  %v15176_v61 = vld [vmem:[#allocation7_spill] sm:$0xff] }
0x1f11   :  { %7031 = vmatprep.subr.bf16.mxu0 %v6890_v63  ;;  %v6880_v41 = vsel %vm372_vm9, %v6768_v53, %v14131_v40  ;;  %v934_v44 = vmul.f32 %v15176_v61, %v9134_v23  ;;  %v15179_v63 = vld [vmem:[#allocation9_spill] sm:$0xff] }
0x1f12   :  { %7032 = vmatpush1.bf16.msra.mxu0 %v6889_v15  ;;  %7073 = vmatpush1.bf16.msra.mxu1 %v6897_v1  ;;  %v15180_v15 = vld [vmem:[#allocation11_spill] sm:$0xff] }
0x1f13   :  { %7074 = vmatprep.subr.bf16.mxu1 %v6892_v12  ;;  %v6780_v14 = vpop.permute.xlu1 %6779  ;;  %v940_v1 = vmul.f32 %v15180_v15, %v9134_v23  ;;  %v15181_v12 = vld [vmem:[#allocation8_spill] sm:$0xff] }
0x1f14   :  { %v6884_v51 = vsel %vm372_vm9, %v6778_v32, %v6780_v14  ;;  %v6885_v26 = vsel %vm372_vm9, %v6780_v14, %v6782_v39  ;;  %v6862_v48 = vpop.permute.xlu0 %6861  ;;  %v939_v39 = vmul.f32 %v15179_v63, %v9132_v20  ;;  %v941_v14 = vmul.f32 %v15181_v12, %v9138_v29 }
0x1f15   :  { %7033 = vmatprep.subr.bf16.mxu0 %v6884_v51  ;;  %v6919_v40 = vsel %vm372_vm9, %v14133_v10, %v6862_v48 }
0x1f16   :  { %7034 = vmatpush1.bf16.msra.mxu0 %v6883_v8  ;;  %7075 = vmatpush1.bf16.msra.mxu1 %v6891_v5 }
0x1f17   :  { %7076 = vmatprep.subr.bf16.mxu1 %v6886_v13  ;;  %v6766_v58 = vpop.permute.xlu1 %6765 }
0x1f18   :  { %v6878_v37 = vsel %vm372_vm9, %v6764_v11, %v6766_v58  ;;  %v6879_v46 = vsel %vm372_vm9, %v6766_v58, %v6768_v53  ;;  %v6866_v60 = vpop.permute.xlu0 %6865  ;;  %v962_v11 = vmul.f32 %v934_v44, %v15176_v61  ;;  %v963_v58 = vmul.f32 %v935_v6, %v15177_v43 }
0x1f19   :  { %7035 = vmatprep.subr.bf16.mxu0 %v6878_v37  ;;  %v952_v37 = vadd.f32 %v940_v1, %v939_v39 }
0x1f1a   :  { %7036 = vmatpush1.bf16.msra.mxu0 %v6877_v49  ;;  %7077 = vmatpush1.bf16.msra.mxu1 %v6885_v26  ;;  %v964_v49 = vmul.f32 %v936_v36, %v15178_v35 }
0x1f1b   :  { %7037 = vmatprep.subr.bf16.mxu0 %v6872_v0  ;;  %7078 = vmatprep.subr.bf16.mxu1 %v6880_v41  ;;  %v6756_v56 = vpop.permute.xlu1 %6755  ;;  %v967_v0 = vmul.f32 %v939_v39, %v15179_v63 }
0x1f1c   :  { %v6874_v24 = vsel %vm372_vm9, %v14065_v28, %v6756_v56  ;;  %v15175_v28 = vld [vmem:[#allocation5_spill] sm:$0xff] }
0x1f1d   :  { %v933_v30 = vmul.f32 %v15175_v28, %v9132_v20 }
0x1f1e   :  { %7038 = vmatpush1.bf16.msra.mxu0 %v6871_v31  ;;  %7079 = vmatpush1.bf16.msra.mxu1 %v6879_v46  ;;  %v969_v31 = vmul.f32 %v941_v14, %v15181_v12  ;;  %v15182_v46 = vld [vmem:[#allocation10_spill] sm:$0xff] }
0x1f1f   :  { %7080 = vmatprep.subr.bf16.mxu1 %v6874_v24  ;;  %v6864_v21 = vpop.permute.xlu1 %6863  ;;  %v945_v47 = vadd.f32 %v934_v44, %v933_v30  ;;  %v942_v24 = vmul.f32 %v15182_v46, %v9152_v45  ;;  %v953_v44 = vadd.f32 %v952_v37, %v941_v14 }
0x1f20   :  { %v6920_v32 = vsel %vm372_vm9, %v6862_v48, %v6864_v21  ;;  %v6921_v42 = vsel %vm372_vm9, %v6864_v21, %v6866_v60 }
0x1f21   :  { %7053 = vmatprep.subr.bf16.mxu0 %v6920_v32  ;;  %v946_v41 = vadd.f32 %v945_v47, %v935_v6 }
0x1f22   :  { %7054 = vmatpush2.bf16.msra.mxu0 %v6919_v40  ;;  %7081 = vmatpush1.bf16.msra.mxu1 %v6873_v9 }
0x1f23   :  { %v6868_v2 = vpop.permute.xlu1 %6867 }
0x1f24   :  { %v6922_v54 = vsel %vm372_vm9, %v6866_v60, %v6868_v2 }
0x1f25   :  { %7056 = vmatmul.mubr.bf16.vlgmr.msra.gmra.mxu0 %v14174_v4  ;;  %7096 = vmatprep.subr.bf16.mxu1 %v6922_v54 }
0x1f26   :  { %7097 = vmatpush2.bf16.msra.mxu1 %v6921_v42 }
0x1f29   :  { %7099 = vmatmul.mubr.bf16.vlgmr.msra.gmra.mxu1 %v14174_v4  ;;  %v961_v4 = vmul.f32 %v933_v30, %v15175_v28  ;;  %v968_v30 = vmul.f32 %v940_v1, %v15180_v15 }
0x1f2b   :  { %v973_v53 = vadd.f32 %v962_v11, %v961_v4 }
0x1f2d   :  { %v974_v42 = vadd.f32 %v973_v53, %v963_v58 }
0x1f2f   :  { %v975_v50 = vadd.f32 %v974_v42, %v964_v49  ;;  %v15186_v49 = vld [vmem:[#allocation15_spill] sm:$0xff] }
0x1fb9   :  { %v14233_v55 = vpop.f32.mrf.mxu1 }
0x1fba   :  { %v7109_v59 = vmul.f32 %v14233_v55, %v9132_v20 }
0x1fbb   :  { %v14235_v10 = vpop.f32.mrf.mxu1 }
0x1fbc   :  { %v7110_v38 = vmul.f32 %v14235_v10, %v9134_v23  ;;  %v7137_v5 = vmul.f32 %v7109_v59, %v14233_v55 }
0x1fbd   :  { %v14237_v33 = vpop.f32.mrf.mxu1 }
0x1fbe   :  { %v7115_v51 = vmul.f32 %v14237_v33, %v9132_v20  ;;  %v7138_v13 = vmul.f32 %v7110_v38, %v14235_v10  ;;  %v7121_v56 = vadd.f32 %v7110_v38, %v7109_v59 }
0x1fbf   :  { %v14247_v27 = vpop.f32.mrf.mxu1 }
0x1fc0   :  { %v7116_v8 = vmul.f32 %v14247_v27, %v9134_v23  ;;  %v7143_v21 = vmul.f32 %v7115_v51, %v14237_v33  ;;  %v7149_v9 = vadd.f32 %v7138_v13, %v7137_v5  ;;  %v947_v5 = vadd.f32 %v946_v41, %v936_v36  ;;  %v15183_v13 = vld [vmem:[#allocation12_spill] sm:$0xff] }
0x1fc2   :  { %v7144_v32 = vmul.f32 %v7116_v8, %v14247_v27  ;;  %v7128_v59 = vadd.f32 %v7116_v8, %v7115_v51 }
0x1fc4   :  { %v7156_v53 = vadd.f32 %v7144_v32, %v7143_v21 }
0x1fe5   :  { %v14269_v26 = vpop.f32.mrf.mxu0 }
0x1fe6   :  { %v7111_v48 = vmul.f32 %v14269_v26, %v9138_v29 }
0x1fe7   :  { %v14279_v40 = vpop.f32.mrf.mxu0 }
0x1fe8   :  { %v7122_v60 = vadd.f32 %v7121_v56, %v7111_v48  ;;  %v7139_v2 = vmul.f32 %v7111_v48, %v14269_v26  ;;  %v7112_v54 = vmul.f32 %v14279_v40, %v9152_v45  ;;  %v937_v56 = vmul.f32 %v15183_v13, %v9171_v18 }
0x1fe9   :  { %v14285_v38 = vpop.f32.mrf.mxu0  ;;  %v14287_v4 = vpop.f32.mrf.mxu1 }
0x1fea   :  { %v7150_v11 = vadd.f32 %v7149_v9, %v7139_v2  ;;  %v7123_v6 = vadd.f32 %v7122_v60, %v7112_v54  ;;  %v7140_v47 = vmul.f32 %v7112_v54, %v14279_v40  ;;  %v7117_v39 = vmul.f32 %v14285_v38, %v9138_v29 }
0x1feb   :  { %v7113_v1 = vmul.f32 %v14287_v4, %v9171_v18  ;;  %v14296_v14 = vpop.f32.mrf.mxu0  ;;  %v14298_v51 = vpop.f32.mrf.mxu1  ;;  %v980_v9 = vadd.f32 %v968_v30, %v967_v0  ;;  %v954_v60 = vadd.f32 %v953_v44, %v942_v24  ;;  %v970_v44 = vmul.f32 %v942_v24, %v15182_v46 }
0x1fec   :  { %v7151_v8 = vadd.f32 %v7150_v11, %v7140_v47  ;;  %v7129_v58 = vadd.f32 %v7128_v59, %v7117_v39  ;;  %v7145_v37 = vmul.f32 %v7117_v39, %v14285_v38  ;;  %v7118_v48 = vmul.f32 %v14296_v14, %v9152_v45 }
0x1fed   :  { %v7124_v36 = vadd.f32 %v7123_v6, %v7113_v1  ;;  %v7141_v41 = vmul.f32 %v7113_v1, %v14287_v4  ;;  %v7114_v21 = vmul.f32 %v14298_v51, %v9177_v3  ;;  %v14306_v32 = vpop.f32.mrf.mxu1  ;;  %v965_v7 = vmul.f32 %v937_v56, %v15183_v13 }
0x1fee   :  { %v7157_v2 = vadd.f32 %v7156_v53, %v7145_v37  ;;  %v7130_v54 = vadd.f32 %v7129_v58, %v7118_v48  ;;  %v7119_v59 = vmul.f32 %v14306_v32, %v9171_v18  ;;  %v7146_v47 = vmul.f32 %v7118_v48, %v14296_v14  ;;  %v15184_v53 = vld [vmem:[#allocation13_spill] sm:$0xff]  ;;  %v15185_v37 = vld [vmem:[#allocation14_spill] sm:$0xff] }
0x1fef   :  { %v7152_v11 = vadd.f32 %v7151_v8, %v7141_v41  ;;  %v7142_v39 = vmul.f32 %v7114_v21, %v14298_v51  ;;  %v14312_v0 = vpop.f32.mrf.mxu1  ;;  %v7125_v30 = vadd.f32 %v7124_v36, %v7114_v21  ;;  %v938_v58 = vmul.f32 %v15184_v53, %v9177_v3 }
0x1ff0   :  { %v7131_v6 = vadd.f32 %v7130_v54, %v7119_v59  ;;  %v7120_v1 = vmul.f32 %v14312_v0, %v9177_v3  ;;  %v943_v8 = vmul.f32 %v15185_v37, %v9171_v18  ;;  %v981_v48 = vadd.f32 %v980_v9, %v969_v31 }
0x1ff1   :  { %7126 = vadd.xlane.f32.xlu0 %v7125_v30  ;;  %v948_v41 = vadd.f32 %v947_v5, %v937_v56  ;;  %v7158_v21 = vadd.f32 %v7157_v2, %v7146_v47  ;;  %v7147_v54 = vmul.f32 %v7119_v59, %v14306_v32  ;;  %v7153_v25 = vadd.f32 %v7152_v11, %v7142_v39 }
0x1ff2   :  { %v7132_v22 = vadd.f32 %v7131_v6, %v7120_v1  ;;  %v955_v36 = vadd.f32 %v954_v60, %v943_v8  ;;  %v944_v24 = vmul.f32 %v15186_v49, %v9177_v3  ;;  %v976_v42 = vadd.f32 %v975_v50, %v965_v7 }
0x1ff3   :  { %v982_v62 = vadd.f32 %v981_v48, %v970_v44  ;;  %v966_v16 = vmul.f32 %v938_v58, %v15184_v53  ;;  %v949_v30 = vadd.f32 %v948_v41, %v938_v58  ;;  %v971_v31 = vmul.f32 %v943_v8, %v15185_v37 }
0x1ff4   :  { %7133 = vadd.xlane.f32.xlu1 %v7132_v22  ;;  %v7159_v5 = vadd.f32 %v7158_v21, %v7147_v54  ;;  %v7148_v56 = vmul.f32 %v7120_v1, %v14312_v0  ;;  %v956_v9 = vadd.f32 %v955_v36, %v944_v24  ;;  %v972_v22 = vmul.f32 %v944_v24, %v15186_v49 }
0x1ff5   :  { %7154 = vadd.xlane.f32.xlu0 %v7153_v25  ;;  %v977_v60 = vadd.f32 %v976_v42, %v966_v16  ;;  %v983_v2 = vadd.f32 %v982_v62, %v971_v31 }
0x1ff6   :  { %v7160_v59 = vadd.f32 %v7159_v5, %v7148_v56 }
0x1ff7   :  { %v984_v25 = vadd.f32 %v983_v2, %v972_v22 }
0x1ff8   :  { %950 = vadd.xlane.f32.xlu1 %v949_v30 }
0x1ff9   :  { %957 = vadd.xlane.f32.xlu0 %v956_v9 }
0x1ffc   :  { %978 = vadd.xlane.f32.xlu1 %v977_v60 }
0x1ffd   :  { %7161 = vadd.xlane.f32.xlu0 %v7160_v59 }
0x2001   :  { %985 = vadd.xlane.f32.xlu0 %v984_v25 }
0x207a   :  { %v7127_v7 = vpop.xlane.xlu0 %7126 }
0x207b   :  { %v7135_v44 = vmul.f32 0.001953125, %v7127_v7 }
0x207d   :  { %v7134_v50 = vpop.xlane.xlu1 %7133  ;;  %v7165_v41 = vmul.f32 %v7135_v44, %v7135_v44 }
0x207e   :  { %v7155_v11 = vpop.xlane.xlu0 %7154  ;;  %v7136_v1 = vmul.f32 0.001953125, %v7134_v50 }
0x207f   :  { %v7163_v58 = vmul.f32 0.001953125, %v7155_v11 }
0x2080   :  { %v7166_v36 = vmul.f32 %v7136_v1, %v7136_v1 }
0x2081   :  { %v951_v47 = vpop.xlane.xlu1 %950  ;;  %v7167_v42 = vsub.f32 %v7163_v58, %v7165_v41 }
0x2082   :  { %v958_v39 = vpop.xlane.xlu0 %957  ;;  %v959_v6 = vmul.f32 0.001953125, %v951_v47  ;;  %v8102_v47 = vld [vmem:[%s15065_s2 + $0x10] sm:$0xff] }
0x2083   :  { %v960_v21 = vmul.f32 0.001953125, %v958_v39  ;;  %v7169_v22 = vmax.f32 %v7167_v42, 0.0 }
0x2084   :  { %v989_v48 = vmul.f32 %v959_v6, %v959_v6 }
0x2085   :  { %v979_v8 = vpop.xlane.xlu1 %978  ;;  %v990_v56 = vmul.f32 %v960_v21, %v960_v21  ;;  %v7174_v50 = vadd.f32 1e-05, %v7169_v22 }
0x2086   :  { %v7162_v16 = vpop.xlane.xlu0 %7161  ;;  %v987_v62 = vmul.f32 0.001953125, %v979_v8  ;;  %v8104_v8 = vld [vmem:[%s15066_s3 + $0x10] sm:$0xff] }
0x2087   :  { %v7164_v54 = vmul.f32 0.001953125, %v7162_v16 }
0x2088   :  { %v991_v24 = vsub.f32 %v987_v62, %v989_v48  ;;  %v8103_v48 = vld [vmem:[%s15065_s2 + $0x18] sm:$0xff] }
0x2089   :  { %v7168_v30 = vsub.f32 %v7164_v54, %v7166_v36 }
0x208a   :  { %v993_v31 = vmax.f32 %v991_v24, 0.0  ;;  %v986_v5 = vpop.xlane.xlu0 %985  ;;  %v8303_v24 = vld [vmem:[%s15065_s2 + $0x98] sm:$0xff] }
0x208b   :  { %v988_v9 = vmul.f32 0.001953125, %v986_v5  ;;  %v7170_v60 = vmax.f32 %v7168_v30, 0.0  ;;  %v8105_v30 = vld [vmem:[%s15066_s3 + $0x18] sm:$0xff] }
0x208c   :  { %v998_v2 = vadd.f32 1e-05, %v993_v31  ;;  %v8302_v31 = vld [vmem:[%s15065_s2 + $0x90] sm:$0xff] }
0x208d   :  { %v992_v59 = vsub.f32 %v988_v9, %v990_v56  ;;  %v7175_v7 = vadd.f32 1e-05, %v7170_v60 }
0x208e   :  { %8462 = vrsqrt.f32 %v998_v2  ;;  %v8304_v2 = vld [vmem:[%s15066_s3 + $0x90] sm:$0xff] }
0x208f   :  { %v994_v25 = vmax.f32 %v992_v59, 0.0 }
0x2091   :  { %v999_v11 = vadd.f32 1e-05, %v994_v25  ;;  %v8305_v25 = vld [vmem:[%s15066_s3 + $0x98] sm:$0xff] }
0x2093   :  { %8464 = vrsqrt.f32 %v999_v11 }
0x2094   :  { %8466 = vrsqrt.f32 %v7175_v7 }
0x2095   :  { %8468 = vrsqrt.f32 %v7174_v50 }
0x209b   :  { %v8463_v39 = vpop.eup %8462 }
0x209c   :  { %v1002_v58 = vmul.f32 %v8463_v39, %v8102_v47 }
0x209e   :  { %1013 = vperm.xlu0 %8396, %v1002_v58   ;;  %v1007_v16 = vmul.f32 %v1002_v58, %v959_v6 }
0x20a0   :  { %v8465_v62 = vpop.eup %8464  ;;  %v1009_v41 = vsub.f32 %v8104_v8, %v1007_v16 }
0x20a1   :  { %v8467_v36 = vpop.eup %8466  ;;  %v1003_v54 = vmul.f32 %v8465_v62, %v8103_v48 }
0x20a2   :  { %v8469_v42 = vpop.eup %8468  ;;  %1035 = vperm.xlu0 %8396, %v1009_v41   ;;  %v7179_v5 = vmul.f32 %v8467_v36, %v8303_v24 }
0x20a3   :  { %1018 = vperm.xlu1 %8395, %v1003_v54   ;;  %v1008_v6 = vmul.f32 %v1003_v54, %v960_v21  ;;  %v7178_v9 = vmul.f32 %v8469_v42, %v8302_v31 }
0x20a4   :  { %v7184_v59 = vmul.f32 %v7179_v5, %v7136_v1 }
0x20a5   :  { %v1010_v56 = vsub.f32 %v8105_v30, %v1008_v6  ;;  %v7183_v60 = vmul.f32 %v7178_v9, %v7135_v44 }
0x20a6   :  { %7194 = vperm.xlu0 %8396, %v7179_v5   ;;  %v7186_v7 = vsub.f32 %v8305_v25, %v7184_v59 }
0x20a7   :  { %1040 = vperm.xlu1 %8395, %v1010_v56   ;;  %v7185_v22 = vsub.f32 %v8304_v2, %v7183_v60 }
0x20ab   :  { %7189 = vperm.xlu1 %8395, %v7178_v9  }
0x20af   :  { %7211 = vperm.xlu1 %8395, %v7185_v22  }
0x20b3   :  { %7216 = vperm.xlu1 %8395, %v7186_v7  }
0x2119   :  { %v1014_v21 = vpop.permute.xlu0 %1013 }
0x211a   :  { %v1021_v50 = vmul.f32 %v1014_v21, %v15175_v28  ;;  %v1022_v11 = vmul.f32 %v1014_v21, %v15176_v61  ;;  %v1023_v44 = vmul.f32 %v1014_v21, %v15177_v43  ;;  %v1024_v47 = vmul.f32 %v1014_v21, %v15178_v35 }
0x211b   :  { %v1025_v39 = vmul.f32 %v1014_v21, %v15183_v13  ;;  %v1026_v1 = vmul.f32 %v1014_v21, %v15184_v53 }
0x211d   :  { %v1036_v58 = vpop.permute.xlu0 %1035 }
0x211e   :  { %v1043_v8 = vadd.f32 %v1036_v58, %v1021_v50  ;;  %v1044_v48 = vadd.f32 %v1036_v58, %v1022_v11  ;;  %v1045_v16 = vadd.f32 %v1036_v58, %v1023_v44  ;;  %v1046_v62 = vadd.f32 %v1036_v58, %v1024_v47  ;;  %v1019_v41 = vpop.permute.xlu1 %1018 }
0x211f   :  { %v1047_v36 = vadd.f32 %v1036_v58, %v1025_v39  ;;  %v1048_v54 = vadd.f32 %v1036_v58, %v1026_v1  ;;  %v1027_v35 = vmul.f32 %v1019_v41, %v15179_v63  ;;  %v1028_v13 = vmul.f32 %v1019_v41, %v15180_v15 }
0x2120   :  { %v1055_v24 = vmax.f32 %v1043_v8, 0.0  ;;  %v1056_v28 = vmax.f32 %v1044_v48, 0.0  ;;  %v1057_v42 = vmax.f32 %v1045_v16, 0.0  ;;  %v1058_v61 = vmax.f32 %v1046_v62, 0.0 }
0x2121   :  { %v1059_v30 = vmax.f32 %v1047_v36, 0.0  ;;  %v1060_v43 = vmax.f32 %v1048_v54, 0.0  ;;  %v1029_v53 = vmul.f32 %v1019_v41, %v15181_v12  ;;  %v1030_v9 = vmul.f32 %v1019_v41, %v15182_v46  ;;  %v7195_v60 = vpop.permute.xlu0 %7194 }
0x2122   :  { %v1041_v31 = vpop.permute.xlu1 %1040  ;;  %v14363_v6 = vmul.f32 %v1055_v24, %v9132_v20  ;;  %v14366_v5 = vmul.f32 %v1056_v28, %v9134_v23  ;;  %v14369_v56 = vmul.f32 %v1057_v42, %v9138_v29  ;;  %v14373_v2 = vmul.f32 %v1058_v61, %v9152_v45 }
0x2123   :  { %v14376_v63 = vmul.f32 %v1059_v30, %v9171_v18  ;;  %v14379_v15 = vmul.f32 %v1060_v43, %v9177_v3  ;;  %v1049_v12 = vadd.f32 %v1041_v31, %v1027_v35  ;;  %v1031_v22 = vmul.f32 %v1019_v41, %v15185_v37 }
0x2124   :  { %v1032_v59 = vmul.f32 %v1019_v41, %v15186_v49  ;;  %v14383_v25 = vadd.f32 %v1041_v31, %v1028_v13  ;;  %v14385_v7 = vadd.f32 %v1041_v31, %v1029_v53  ;;  %v7203_v21 = vmul.f32 %v7195_v60, %v14237_v33 }
0x2125   :  { %v7204_v50 = vmul.f32 %v7195_v60, %v14247_v27  ;;  %v7205_v11 = vmul.f32 %v7195_v60, %v14285_v38  ;;  %v7206_v44 = vmul.f32 %v7195_v60, %v14296_v14  ;;  %v7207_v47 = vmul.f32 %v7195_v60, %v14306_v32 }
0x2126   :  { %v7190_v46 = vpop.permute.xlu1 %7189  ;;  %v7208_v39 = vmul.f32 %v7195_v60, %v14312_v0  ;;  %v14393_v37 = vadd.f32 %v1041_v31, %v1030_v9  ;;  %v14395_v49 = vadd.f32 %v1041_v31, %v1031_v22  ;;  %v14397_v1 = vadd.f32 %v1041_v31, %v1032_v59 }
0x2127   :  { %v1061_v58 = vmax.f32 %v1049_v12, 0.0  ;;  %v7197_v8 = vmul.f32 %v7190_v46, %v14233_v55  ;;  %v7198_v33 = vmul.f32 %v7190_v46, %v14235_v10  ;;  %v1062_v27 = vmax.f32 %v14383_v25, 0.0 }
0x2128   :  { %v1063_v38 = vmax.f32 %v14385_v7, 0.0  ;;  %v7199_v14 = vmul.f32 %v7190_v46, %v14269_v26  ;;  %v7200_v32 = vmul.f32 %v7190_v46, %v14279_v40  ;;  %v7201_v48 = vmul.f32 %v7190_v46, %v14287_v4 }
0x2129   :  { %v7202_v16 = vmul.f32 %v7190_v46, %v14298_v51  ;;  %v1064_v36 = vmax.f32 %v14393_v37, 0.0  ;;  %v1065_v55 = vmax.f32 %v14395_v49, 0.0  ;;  %v1066_v26 = vmax.f32 %v14397_v1, 0.0 }
0x212a   :  { %v7212_v0 = vpop.permute.xlu1 %7211  ;;  %v14411_v40 = vmul.f32 %v1061_v58, %v9132_v20  ;;  %v15187_v46 = vmax.f32 %v13043_v17, 0.0 }
0x212b   :  { %v7219_v62 = vadd.f32 %v7212_v0, %v7197_v8  ;;  %v7220_v41 = vadd.f32 %v7212_v0, %v7198_v33  ;;  %v7221_v10 = vadd.f32 %v7212_v0, %v7199_v14  ;;  %v7222_v54 = vadd.f32 %v7212_v0, %v7200_v32 }
0x212c   :  { %v7223_v24 = vadd.f32 %v7212_v0, %v7201_v48  ;;  %v7224_v28 = vadd.f32 %v7212_v0, %v7202_v16  ;;  %v15188_v8 = vmax.f32 %v13047_v34, 0.0  ;;  %v15189_v14 = vmax.f32 %v13051_v57, 0.0 }
0x212d   :  { %v7231_v42 = vmax.f32 %v7219_v62, 0.0  ;;  %v7232_v61 = vmax.f32 %v7220_v41, 0.0  ;;  %v7233_v4 = vmax.f32 %v7221_v10, 0.0  ;;  %v7234_v30 = vmax.f32 %v7222_v54, 0.0  ;;  %v15192_v41 = vld [vmem:[#allocation16_spill] sm:$0xff] }
0x212e   :  { %v7217_v51 = vpop.permute.xlu1 %7216  ;;  %v7235_v43 = vmax.f32 %v7223_v24, 0.0  ;;  %v7236_v31 = vmax.f32 %v7224_v28, 0.0  ;;  %v15190_v0 = vmax.f32 %v13055_v19, 0.0  ;;  %v15193_v10 = vmax.f32 %v15192_v41, 0.0 }
0x212f   :  { %v7243_v35 = vmul.f32 %v7231_v42, %v9132_v20  ;;  %v7244_v13 = vmul.f32 %v7232_v61, %v9134_v23  ;;  %v7245_v53 = vmul.f32 %v7233_v4, %v9138_v29  ;;  %v7246_v9 = vmul.f32 %v7234_v30, %v9152_v45 }
0x2130   :  { %v7225_v60 = vadd.f32 %v7217_v51, %v7203_v21  ;;  %v7226_v12 = vadd.f32 %v7217_v51, %v7204_v50  ;;  %v7247_v22 = vmul.f32 %v7235_v43, %v9171_v18  ;;  %v7248_v59 = vmul.f32 %v7236_v31, %v9177_v3 }
0x2131   :  { %v7255_v58 = vadd.f32 %v7243_v35, %v15187_v46  ;;  %v7256_v33 = vadd.f32 %v7244_v13, %v15188_v8  ;;  %v7257_v32 = vadd.f32 %v7245_v53, %v15189_v14  ;;  %v7258_v48 = vadd.f32 %v7246_v9, %v15190_v0  ;;  %v15194_v14 = vld [vmem:[#allocation17_spill] sm:$0xff] }
0x2132   :  { %v7227_v16 = vadd.f32 %v7217_v51, %v7205_v11  ;;  %v7228_v62 = vadd.f32 %v7217_v51, %v7206_v44  ;;  %v15191_v21 = vmax.f32 %v13059_v52, 0.0  ;;  %v7260_v54 = vadd.f32 %v7248_v59, %v15193_v10 }
0x2133   :  { %v7267_v24 = vmax.f32 %v7255_v58, 0.0  ;;  %v7268_v17 = vmax.f32 %v7256_v33, 0.0  ;;  %v7269_v28 = vmax.f32 %v7257_v32, 0.0  ;;  %v7270_v42 = vmax.f32 %v7258_v48, 0.0  ;;  %v15196_v48 = vld [vmem:[#allocation18_spill] sm:$0xff] }
0x2134   :  { %v7259_v50 = vadd.f32 %v7247_v22, %v15191_v21  ;;  %v7229_v34 = vadd.f32 %v7217_v51, %v7207_v47  ;;  %v7230_v61 = vadd.f32 %v7217_v51, %v7208_v39  ;;  %v7272_v57 = vmax.f32 %v7260_v54, 0.0  ;;  %v15200_v54 = vld [vmem:[#allocation20_spill] sm:$0xff] }
0x2135   :  { %v7279_v30 = vadd.f32 %v7267_v24, %v14363_v6  ;;  %v7280_v19 = vadd.f32 %v7268_v17, %v14366_v5  ;;  %v7281_v11 = vadd.f32 %v7269_v28, %v14369_v56  ;;  %v7282_v52 = vadd.f32 %v7270_v42, %v14373_v2  ;;  %v15202_v24 = vld [vmem:[#allocation21_spill] sm:$0xff] }
0x2136   :  { %v7271_v4 = vmax.f32 %v7259_v50, 0.0  ;;  %v7237_v44 = vmax.f32 %v7225_v60, 0.0  ;;  %v7238_v43 = vmax.f32 %v7226_v12, 0.0  ;;  %v7284_v35 = vadd.f32 %v7272_v57, %v14379_v15  ;;  %v15198_v50 = vld [vmem:[#allocation19_spill] sm:$0xff] }
0x2137   :  { %v7291_v13 = vmax.f32 %v7279_v30, 0.0  ;;  %v7292_v53 = vmax.f32 %v7280_v19, 0.0  ;;  %v7293_v47 = vmax.f32 %v7281_v11, 0.0  ;;  %v7294_v39 = vmax.f32 %v7282_v52, 0.0 }
0x2138   :  { %v7283_v31 = vadd.f32 %v7271_v4, %v14376_v63  ;;  %v7239_v51 = vmax.f32 %v7227_v16, 0.0  ;;  %v7240_v9 = vmax.f32 %v7228_v62, 0.0  ;;  %v7296_v6 = vmax.f32 %v7284_v35, 0.0 }
0x2139   :  { %v8379_v59 = vpack.c.bf16 %v7292_v53, %v7291_v13  ;;  %v7241_v5 = vmax.f32 %v7229_v34, 0.0  ;;  %v8380_v46 = vpack.c.bf16 %v7294_v39, %v7293_v47  ;;  %v7242_v56 = vmax.f32 %v7230_v61, 0.0  ;;  %v15204_v34 = vld [vmem:[#allocation3_spill] sm:$0xff] }
0x213a   :  { %v7295_v22 = vmax.f32 %v7283_v31, 0.0  ;;  %v7249_v2 = vmul.f32 %v7237_v44, %v9132_v20  ;;  %v7250_v60 = vmul.f32 %v7238_v43, %v9134_v23  ;;  %v7251_v63 = vmul.f32 %v7239_v51, %v9138_v29 }
0x213b   :  { %7339 = vst [vmem:[#allocation2 + $0x4] sm:$0xff] %v8379_v59  ;;  %v7252_v15 = vmul.f32 %v7240_v9, %v9152_v45  ;;  %v7253_v58 = vmul.f32 %v7241_v5, %v9171_v18  ;;  %v1074_v8 = vmul.f32 %v1062_v27, %v9134_v23  ;;  %7340 = vst [vmem:[#allocation2 + $0xc] sm:$0xff] %v8380_v46  ;;  %v15195_v32 = vmax.f32 %v15194_v14, 0.0 }
0x213c   :  { %v8381_v12 = vpack.c.bf16 %v7296_v6, %v7295_v22  ;;  %v7254_v33 = vmul.f32 %v7242_v56, %v9177_v3  ;;  %v15197_v16 = vmax.f32 %v15196_v48, 0.0  ;;  %v1075_v21 = vmul.f32 %v1063_v38, %v9138_v29 }
0x213d   :  { %v7261_v0 = vadd.f32 %v7249_v2, %v15195_v32  ;;  %v15199_v41 = vmax.f32 %v15198_v50, 0.0  ;;  %v15201_v25 = vmax.f32 %v15200_v54, 0.0  ;;  %v15203_v17 = vmax.f32 %v15202_v24, 0.0 }
0x213e   :  { %v7262_v62 = vadd.f32 %v7250_v60, %v15197_v16  ;;  %7341 = vst [vmem:[#allocation2 + $0x14] sm:$0xff] %v8381_v12  ;;  %v1076_v42 = vmul.f32 %v1064_v36, %v9152_v45  ;;  %v15205_v61 = vmax.f32 %v15204_v34, 0.0  ;;  %v1077_v38 = vmul.f32 %v1065_v55, %v9171_v18 }
0x213f   :  { %v7263_v10 = vadd.f32 %v7251_v63, %v15199_v41  ;;  %v7264_v27 = vadd.f32 %v7252_v15, %v15201_v25  ;;  %v7265_v28 = vadd.f32 %v7253_v58, %v15203_v17  ;;  %v7273_v57 = vmax.f32 %v7261_v0, 0.0 }
0x2140   :  { %v7266_v4 = vadd.f32 %v7254_v33, %v15205_v61  ;;  %v7274_v7 = vmax.f32 %v7262_v62, 0.0  ;;  %v1078_v52 = vmul.f32 %v1066_v26, %v9177_v3 }
0x2141   :  { %v7275_v30 = vmax.f32 %v7263_v10, 0.0  ;;  %v7276_v19 = vmax.f32 %v7264_v27, 0.0  ;;  %v7277_v11 = vmax.f32 %v7265_v28, 0.0  ;;  %v7285_v37 = vadd.f32 %v7273_v57, %v14411_v40 }
0x2142   :  { %v7278_v44 = vmax.f32 %v7266_v4, 0.0  ;;  %v7286_v36 = vadd.f32 %v7274_v7, %v1074_v8  ;;  %v7345_v1 = vld [vmem:[#allocation2] sm:$0xff]  ;;  %v7346_v40 = vld [vmem:[#allocation2 + $0x8] sm:$0xff] }
0x2143   :  { %v7287_v43 = vadd.f32 %v7275_v30, %v1075_v21  ;;  %v7288_v31 = vadd.f32 %v7276_v19, %v1076_v42  ;;  %v7289_v35 = vadd.f32 %v7277_v11, %v1077_v38  ;;  %v7297_v53 = vmax.f32 %v7285_v37, 0.0 }
0x2144   :  { %v7290_v13 = vadd.f32 %v7278_v44, %v1078_v52  ;;  %v7298_v47 = vmax.f32 %v7286_v36, 0.0 }
0x2145   :  { %v7299_v39 = vmax.f32 %v7287_v43, 0.0  ;;  %v7300_v49 = vmax.f32 %v7288_v31, 0.0  ;;  %v7301_v55 = vmax.f32 %v7289_v35, 0.0  ;;  %v7347_v12 = vld [vmem:[#allocation2 + $0x10] sm:$0xff]  ;;  %v7348_v8 = vld [vmem:[#allocation2 + $0x18] sm:$0xff] }
0x2146   :  { %v7302_v51 = vmax.f32 %v7290_v13, 0.0  ;;  %v8382_v9 = vpack.c.bf16 %v7298_v47, %v7297_v53 }
0x2147   :  { %v8383_v22 = vpack.c.bf16 %v7300_v49, %v7299_v39 }
0x2148   :  { %v8384_v6 = vpack.c.bf16 %v7302_v51, %v7301_v55  ;;  %7342 = vst [vmem:[#allocation2 + $0x24] sm:$0xff] %v8382_v9 }
0x2149   :  { %7343 = vst [vmem:[#allocation2 + $0x2c] sm:$0xff] %v8383_v22 }
0x214a   :  { %7344 = vst [vmem:[#allocation2 + $0x34] sm:$0xff] %v8384_v6 }
0x214f   :  { %v7349_v26 = vld [vmem:[#allocation2 + $0x20] sm:$0xff] }
0x2150   :  { %v7350_v59 = vld [vmem:[#allocation2 + $0x28] sm:$0xff]  ;;  %v14471_v5 = vcombine.high %v7345_v1, %v7349_v26  ;;  %v8312_v2 = vcombine.low %v7345_v1, %v7349_v26 }
0x2151   :  { %v14473_v46 = vcombine.low %v7346_v40, %v7350_v59  ;;  %v14479_v56 = vcombine.high %v7346_v40, %v7350_v59  ;;  %v7351_v60 = vld [vmem:[#allocation2 + $0x30] sm:$0xff]  ;;  %v7352_v58 = vld [vmem:[#allocation2 + $0x38] sm:$0xff] }
0x2152   :  { %7502 = vrot.lane.b32.xlu0 %v14471_v5, %s8474_s26  ;;  %v8316_v63 = vcombine.low %v7347_v12, %v7351_v60  ;;  %v8317_v15 = vcombine.high %v7347_v12, %v7351_v60  ;;  %v14531_v33 = vcombine.low %v7348_v8, %v7352_v58  ;;  %v8319_v14 = vcombine.high %v7348_v8, %v7352_v58 }
0x2153   :  { %7504 = vrot.lane.b32.xlu1 %v14473_v46, %s8474_s26 }
0x2156   :  { %7506 = vrot.lane.b32.xlu0 %v14479_v56, %s8474_s26 }
0x2157   :  { %7482 = vrot.lane.b32.xlu1 %v14471_v5, %s8475_s27 }
0x215a   :  { %7484 = vrot.lane.b32.xlu0 %v14473_v46, %s8475_s27 }
0x215b   :  { %7486 = vrot.lane.b32.xlu1 %v14479_v56, %s8475_s27 }
0x215e   :  { %7462 = vrot.lane.b32.xlu0 %v14471_v5, %s8476_s28 }
0x215f   :  { %7464 = vrot.lane.b32.xlu1 %v14473_v46, %s8476_s28 }
0x2162   :  { %7466 = vrot.lane.b32.xlu0 %v14479_v56, %s8476_s28 }
0x2163   :  { %7442 = vrot.lane.b32.xlu1 %v14471_v5, %s8477_s29 }
0x2166   :  { %7444 = vrot.lane.b32.xlu0 %v14473_v46, %s8477_s29 }
0x2167   :  { %7446 = vrot.lane.b32.xlu1 %v14479_v56, %s8477_s29 }
0x216a   :  { %7424 = vrot.lane.b32.xlu0 %v14471_v5, %s8478_s30 }
0x216b   :  { %7426 = vrot.lane.b32.xlu1 %v14473_v46, %s8478_s30 }
0x216e   :  { %7428 = vrot.lane.b32.xlu0 %v14479_v56, %s8478_s30 }
0x216f   :  { %7422 = vrot.lane.b32.xlu1 %v8312_v2, %s8478_s30 }
0x2172   :  { %7404 = vrot.lane.b32.xlu0 %v14471_v5, %s8479_s6 }
0x2173   :  { %7406 = vrot.lane.b32.xlu1 %v14473_v46, %s8479_s6 }
0x2176   :  { %7408 = vrot.lane.b32.xlu0 %v14479_v56, %s8479_s6 }
0x2177   :  { %7402 = vrot.lane.b32.xlu1 %v8312_v2, %s8479_s6 }
0x217a   :  { %7384 = vrot.lane.b32.xlu0 %v14471_v5, %s8480_s7 }
0x217b   :  { %7386 = vrot.lane.b32.xlu1 %v14473_v46, %s8480_s7 }
0x217e   :  { %7388 = vrot.lane.b32.xlu0 %v14479_v56, %s8480_s7 }
0x217f   :  { %7382 = vrot.lane.b32.xlu1 %v8312_v2, %s8480_s7 }
0x2182   :  { %7508 = vrot.lane.b32.xlu0 %v8316_v63, %s8474_s26 }
0x2183   :  { %7510 = vrot.lane.b32.xlu1 %v8317_v15, %s8474_s26 }
0x2186   :  { %7522 = vrot.lane.b32.xlu0 %v14471_v5, %s8481_s12 }
0x2187   :  { %7524 = vrot.lane.b32.xlu1 %v14473_v46, %s8481_s12 }
0x218a   :  { %7526 = vrot.lane.b32.xlu0 %v14479_v56, %s8481_s12 }
0x218b   :  { %7488 = vrot.lane.b32.xlu1 %v8316_v63, %s8475_s27 }
0x218e   :  { %7490 = vrot.lane.b32.xlu0 %v8317_v15, %s8475_s27 }
0x218f   :  { %7512 = vrot.lane.b32.xlu1 %v14531_v33, %s8474_s26 }
0x2192   :  { %7514 = vrot.lane.b32.xlu0 %v8319_v14, %s8474_s26 }
0x2193   :  { %7468 = vrot.lane.b32.xlu1 %v8316_v63, %s8476_s28 }
0x2196   :  { %7470 = vrot.lane.b32.xlu0 %v8317_v15, %s8476_s28 }
0x2197   :  { %7492 = vrot.lane.b32.xlu1 %v14531_v33, %s8475_s27 }
0x219a   :  { %7494 = vrot.lane.b32.xlu0 %v8319_v14, %s8475_s27 }
0x219b   :  { %7448 = vrot.lane.b32.xlu1 %v8316_v63, %s8477_s29 }
0x219e   :  { %7450 = vrot.lane.b32.xlu0 %v8317_v15, %s8477_s29 }
0x219f   :  { %7472 = vrot.lane.b32.xlu1 %v14531_v33, %s8476_s28 }
0x21a2   :  { %7474 = vrot.lane.b32.xlu0 %v8319_v14, %s8476_s28 }
0x21a3   :  { %7430 = vrot.lane.b32.xlu1 %v8316_v63, %s8478_s30 }
0x21a6   :  { %7432 = vrot.lane.b32.xlu0 %v8317_v15, %s8478_s30 }
0x21a7   :  { %7452 = vrot.lane.b32.xlu1 %v14531_v33, %s8477_s29 }
0x21aa   :  { %7410 = vrot.lane.b32.xlu0 %v8316_v63, %s8479_s6 }
0x21ab   :  { %7412 = vrot.lane.b32.xlu1 %v8317_v15, %s8479_s6 }
0x21ae   :  { %7434 = vrot.lane.b32.xlu0 %v14531_v33, %s8478_s30 }
0x21af   :  { %7390 = vrot.lane.b32.xlu1 %v8316_v63, %s8480_s7 }
0x21b2   :  { %7392 = vrot.lane.b32.xlu0 %v8317_v15, %s8480_s7 }
0x21b3   :  { %7414 = vrot.lane.b32.xlu1 %v14531_v33, %s8479_s6 }
0x21b6   :  { %7394 = vrot.lane.b32.xlu0 %v14531_v33, %s8480_s7 }
0x21b7   :  { %7530 = vrot.lane.b32.xlu1 %v8317_v15, %s8481_s12 }
0x21ba   :  { %7528 = vrot.lane.b32.xlu0 %v8316_v63, %s8481_s12 }
0x21bb   :  { %7532 = vrot.lane.b32.xlu1 %v14531_v33, %s8481_s12 }
0x21be   :  { %7534 = vrot.lane.b32.xlu0 %v8319_v14, %s8481_s12 }
0x21bf   :  { %7558 = vrot.lane.b32.xlu1 %v14473_v46, %s8482_s0 }
0x21c2   :  { %7556 = vrot.lane.b32.xlu0 %v14471_v5, %s8482_s0 }
0x21c3   :  { %7562 = vrot.lane.b32.xlu1 %v8316_v63, %s8482_s0 }
0x21c4   :  { %v7503_v32 = vpop.permute.xlu0 %7502 }
0x21c5   :  { %v14571_v0 = vpop.permute.xlu1 %7504 }
0x21c6   :  { %7554 = vrot.lane.b32.xlu0 %v8312_v2, %s8482_s0  ;;  %v7516_v24 = vsel %vm207_vm0, %v7503_v32, %v14571_v0 }
0x21c7   :  { %7652 = vrot.lane.b32.xlu1 %v7503_v32, %s8482_s0 }
0x21c8   :  { %v14575_v48 = vpop.permute.xlu0 %7506 }
0x21c9   :  { %v7483_v16 = vpop.permute.xlu1 %7482 }
0x21ca   :  { %7560 = vrot.lane.b32.xlu0 %v14479_v56, %s8482_s0 }
0x21cc   :  { %v14579_v62 = vpop.permute.xlu0 %7484 }
0x21cd   :  { %v14581_v21 = vpop.permute.xlu1 %7486  ;;  %v7496_v42 = vsel %vm186_vm1, %v7483_v16, %v14579_v62 }
0x21ce   :  { %7564 = vrot.lane.b32.xlu0 %v8317_v15, %s8482_s0 }
0x21d0   :  { %v14584_v50 = vpop.permute.xlu0 %7462 }
0x21d1   :  { %v14586_v41 = vpop.permute.xlu1 %7464  ;;  %7624 = vrot.lane.b32.xlu1 %v14584_v50, %s8482_s0 }
0x21d2   :  { %7638 = vrot.lane.b32.xlu0 %v7483_v16, %s8482_s0 }
0x21d4   :  { %v7467_v10 = vpop.permute.xlu0 %7466 }
0x21d5   :  { %v7443_v54 = vpop.permute.xlu1 %7442  ;;  %v7477_v4 = vsel %vm165_vm2, %v14586_v41, %v7467_v10 }
0x21d6   :  { %7610 = vrot.lane.b32.xlu0 %v7443_v54, %s8482_s0 }
0x21d8   :  { %v14592_v25 = vpop.permute.xlu0 %7444 }
0x21d9   :  { %v14594_v27 = vpop.permute.xlu1 %7446  ;;  %v7454_v38 = vsel %vm142_vm3, %v7443_v54, %v14592_v25 }
0x21da   :  { %7654 = vrot.lane.b32.xlu0 %v7516_v24, %s8482_s0 }
0x21dc   :  { %v14599_v17 = vpop.permute.xlu0 %7424 }
0x21dd   :  { %v14601_v28 = vpop.permute.xlu1 %7426 }
0x21de   :  { %7640 = vrot.lane.b32.xlu0 %v7496_v42, %s8482_s0 }
0x21e0   :  { %v14606_v34 = vpop.permute.xlu0 %7428 }
0x21e1   :  { %v14608_v61 = vpop.permute.xlu1 %7422  ;;  %v7438_v11 = vsel %vm123_vm4, %v14601_v28, %v14606_v34 }
0x21e2   :  { %7628 = vrot.lane.b32.xlu0 %v7477_v4, %s8482_s0 }
0x21e4   :  { %v7405_v57 = vpop.permute.xlu0 %7404 }
0x21e5   :  { %v14613_v7 = vpop.permute.xlu1 %7406 }
0x21e6   :  { %7612 = vrot.lane.b32.xlu0 %v7454_v38, %s8482_s0  ;;  %v7417_v37 = vsel %vm102_vm5, %v7405_v57, %v14613_v7 }
0x21e8   :  { %v14618_v30 = vpop.permute.xlu0 %7408 }
0x21e9   :  { %v7403_v19 = vpop.permute.xlu1 %7402 }
0x21ea   :  { %7600 = vrot.lane.b32.xlu0 %v7438_v11, %s8482_s0  ;;  %v7416_v43 = vsel %vm102_vm5, %v7403_v19, %v7405_v57 }
0x21ec   :  { %v14624_v52 = vpop.permute.xlu0 %7384 }
0x21ed   :  { %v14626_v44 = vpop.permute.xlu1 %7386 }
0x21ee   :  { %7584 = vrot.lane.b32.xlu0 %v7417_v37, %s8482_s0 }
0x21f0   :  { %v14631_v36 = vpop.permute.xlu0 %7388 }
0x21f1   :  { %v14634_v31 = vpop.permute.xlu1 %7382  ;;  %v7398_v53 = vsel %vm81_vm6, %v14626_v44, %v14631_v36 }
0x21f2   :  { %7582 = vrot.lane.b32.xlu0 %v7416_v43, %s8482_s0 }
0x21f4   :  { %v14637_v35 = vpop.permute.xlu0 %7508 }
0x21f5   :  { %v7511_v13 = vpop.permute.xlu1 %7510 }
0x21f6   :  { %7572 = vrot.lane.b32.xlu0 %v7398_v53, %s8482_s0  ;;  %v7519_v49 = vsel %vm207_vm0, %v14637_v35, %v7511_v13 }
0x21f8   :  { %v14643_v47 = vpop.permute.xlu0 %7522 }
0x21f9   :  { %v14645_v39 = vpop.permute.xlu1 %7524  ;;  %7666 = vrot.lane.b32.xlu1 %v14643_v47, %s8482_s0 }
0x21fa   :  { %7660 = vrot.lane.b32.xlu0 %v7519_v49, %s8482_s0 }
0x21fc   :  { %v14652_v55 = vpop.permute.xlu0 %7526 }
0x21fd   :  { %v7537_v51 = vsel %vm228_vm7, %v14645_v39, %v14652_v55  ;;  %v7489_v9 = vpop.permute.xlu1 %7488 }
0x21fe   :  { %7670 = vrot.lane.b32.xlu0 %v7537_v51, %s8482_s0  ;;  %v7498_v6 = vsel %vm186_vm1, %v14581_v21, %v7489_v9 }
0x2200   :  { %v7491_v22 = vpop.permute.xlu0 %7490 }
0x2201   :  { %v14661_v1 = vsel %vm186_vm1, %v7489_v9, %v7491_v22  ;;  %v7513_v26 = vpop.permute.xlu1 %7512 }
0x2202   :  { %7644 = vrot.lane.b32.xlu0 %v7498_v6, %s8482_s0  ;;  %v7520_v59 = vsel %vm207_vm0, %v7511_v13, %v7513_v26 }
0x2204   :  { %v7515_v40 = vpop.permute.xlu0 %7514 }
0x2205   :  { %v14666_v5 = vsel %vm207_vm0, %v7513_v26, %v7515_v40  ;;  %v7469_v46 = vpop.permute.xlu1 %7468 }
0x2206   :  { %7662 = vrot.lane.b32.xlu0 %v7520_v59, %s8482_s0  ;;  %v7478_v2 = vsel %vm165_vm2, %v7467_v10, %v7469_v46 }
0x2208   :  { %v7471_v56 = vpop.permute.xlu0 %7470 }
0x2209   :  { %v14671_v60 = vsel %vm165_vm2, %v7469_v46, %v7471_v56  ;;  %v7493_v12 = vpop.permute.xlu1 %7492 }
0x220a   :  { %7630 = vrot.lane.b32.xlu0 %v7478_v2, %s8482_s0  ;;  %v7500_v15 = vsel %vm186_vm1, %v7491_v22, %v7493_v12 }
0x220c   :  { %v7495_v63 = vpop.permute.xlu0 %7494 }
0x220d   :  { %v14676_v58 = vsel %vm186_vm1, %v7493_v12, %v7495_v63  ;;  %v7449_v8 = vpop.permute.xlu1 %7448  ;;  %v7517_v63 = vsel %vm207_vm0, %v14571_v0, %v14575_v48 }
0x220e   :  { %7648 = vrot.lane.b32.xlu0 %v7500_v15, %s8482_s0  ;;  %v7456_v32 = vsel %vm142_vm3, %v14594_v27, %v7449_v8 }
0x2210   :  { %v7451_v14 = vpop.permute.xlu0 %7450 }
0x2211   :  { %v14682_v16 = vsel %vm142_vm3, %v7449_v8, %v7451_v14  ;;  %v7473_v10 = vpop.permute.xlu1 %7472 }
0x2212   :  { %7616 = vrot.lane.b32.xlu0 %v7456_v32, %s8482_s0  ;;  %v7480_v24 = vsel %vm165_vm2, %v7471_v56, %v7473_v10 }
0x2214   :  { %v7475_v54 = vpop.permute.xlu0 %7474 }
0x2215   :  { %v14687_v42 = vsel %vm165_vm2, %v7473_v10, %v7475_v54  ;;  %v7431_v4 = vpop.permute.xlu1 %7430  ;;  %v7476_v54 = vsel %vm165_vm2, %v14584_v50, %v14586_v41 }
0x2216   :  { %7634 = vrot.lane.b32.xlu0 %v7480_v24, %s8482_s0  ;;  %v7439_v38 = vsel %vm123_vm4, %v14606_v34, %v7431_v4 }
0x2218   :  { %v7433_v57 = vpop.permute.xlu0 %7432 }
0x2219   :  { %v14693_v19 = vsel %vm123_vm4, %v7431_v4, %v7433_v57  ;;  %v7453_v11 = vpop.permute.xlu1 %7452 }
0x221a   :  { %7622 = vrot.lane.b32.xlu1 %v7453_v11, %s8482_s0  ;;  %7602 = vrot.lane.b32.xlu0 %v7439_v38, %s8482_s0  ;;  %v7458_v43 = vsel %vm142_vm3, %v7451_v14, %v7453_v11  ;;  %v7497_v14 = vsel %vm186_vm1, %v14579_v62, %v14581_v21  ;;  %v7437_v38 = vsel %vm123_vm4, %v14599_v17, %v14601_v28 }
0x221b   :  { %v7397_v28 = vsel %vm81_vm6, %v14624_v52, %v14626_v44 }
0x221c   :  { %v7411_v37 = vpop.permute.xlu0 %7410 }
0x221d   :  { %v7413_v13 = vpop.permute.xlu1 %7412  ;;  %v7419_v34 = vsel %vm102_vm5, %v14618_v30, %v7411_v37 }
0x221e   :  { %v14699_v53 = vsel %vm102_vm5, %v7411_v37, %v7413_v13  ;;  %7620 = vrot.lane.b32.xlu0 %v7458_v43, %s8482_s0  ;;  %v7396_v37 = vsel %vm81_vm6, %v14634_v31, %v14624_v52 }
0x2220   :  { %v7435_v49 = vpop.permute.xlu0 %7434 }
0x2221   :  { %v7391_v51 = vpop.permute.xlu1 %7390  ;;  %7608 = vrot.lane.b32.xlu1 %v7435_v49, %s8482_s0  ;;  %v7441_v22 = vsel %vm123_vm4, %v7433_v57, %v7435_v49 }
0x2222   :  { %7588 = vrot.lane.b32.xlu0 %v7419_v34, %s8482_s0  ;;  %v7399_v59 = vsel %vm81_vm6, %v14631_v36, %v7391_v51 }
0x2224   :  { %v7393_v9 = vpop.permute.xlu0 %7392 }
0x2225   :  { %v14708_v6 = vsel %vm81_vm6, %v7391_v51, %v7393_v9  ;;  %v7415_v26 = vpop.permute.xlu1 %7414 }
0x2226   :  { %7594 = vrot.lane.b32.xlu1 %v7415_v26, %s8482_s0  ;;  %7606 = vrot.lane.b32.xlu0 %v7441_v22, %s8482_s0  ;;  %v7421_v2 = vsel %vm102_vm5, %v7413_v13, %v7415_v26 }
0x2228   :  { %v7395_v40 = vpop.permute.xlu0 %7394 }
0x2229   :  { %v7531_v46 = vpop.permute.xlu1 %7530  ;;  %v7401_v8 = vsel %vm81_vm6, %v7393_v9, %v7395_v40 }
0x222a   :  { %7580 = vrot.lane.b32.xlu1 %v7395_v40, %s8482_s0  ;;  %7574 = vrot.lane.b32.xlu0 %v7399_v59, %s8482_s0 }
0x222c   :  { %v7529_v56 = vpop.permute.xlu0 %7528 }
0x222d   :  { %v7539_v12 = vsel %vm228_vm7, %v7529_v56, %v7531_v46  ;;  %v14721_v15 = vpop.permute.xlu1 %7532  ;;  %v7538_v0 = vsel %vm228_vm7, %v14652_v55, %v7529_v56  ;;  %v7455_v55 = vsel %vm142_vm3, %v14592_v25, %v14594_v27  ;;  %v7436_v25 = vsel %vm123_vm4, %v14608_v61, %v14599_v17  ;;  %v14783_v17 = vld [vmem:[%s15063_s1 + $0xa4] ss:$8 sps:$4 sm:$0xff]  }
0x222e   :  { %7656 = vrot.lane.b32.xlu1 %v7517_v63, %s8482_s0  ;;  %7592 = vrot.lane.b32.xlu0 %v7421_v2, %s8482_s0  ;;  %v7540_v21 = vsel %vm228_vm7, %v7531_v46, %v14721_v15  ;;  %v7418_v27 = vsel %vm102_vm5, %v14613_v7, %v14618_v30  ;;  %v7518_v61 = vsel %vm207_vm0, %v14575_v48, %v14637_v35 }
0x222f   :  { %8324 = vmatprep.mubr.msk.bf16.mxu0 %vm481_vm8, %v14783_v17  ;;  %8325 = vmatprep.mubr.msk.bf16.mxu1 %vm481_vm8, %v14783_v17  ;;  %v7536_v7 = vsel %vm228_vm7, %v14643_v47, %v14645_v39 }
0x2230   :  { %v7535_v36 = vpop.permute.xlu0 %7534 }
0x2231   :  { %v7559_v32 = vpop.permute.xlu1 %7558 }
0x2232   :  { %7642 = vrot.lane.b32.xlu1 %v7497_v14, %s8482_s0  ;;  %7578 = vrot.lane.b32.xlu0 %v7401_v8, %s8482_s0 }
0x2234   :  { %v7557_v10 = vpop.permute.xlu0 %7556 }
0x2235   :  { %v14737_v24 = vsel %vm372_vm9, %v7557_v10, %v7559_v32  ;;  %v14751_v50 = vpop.permute.xlu1 %7562 }
0x2236   :  { %7626 = vrot.lane.b32.xlu1 %v7476_v54, %s8482_s0  ;;  %7672 = vrot.lane.b32.xlu0 %v7538_v0, %s8482_s0 }
0x2238   :  { %v7555_v62 = vpop.permute.xlu0 %7554 }
0x2239   :  { %v14744_v4 = vsel %vm372_vm9, %v7555_v62, %v7557_v10 }
0x223a   :  { %7614 = vrot.lane.b32.xlu1 %v7455_v55, %s8482_s0  ;;  %7676 = vrot.lane.b32.xlu0 %v7540_v21, %s8482_s0 }
0x223c   :  { %v7561_v41 = vpop.permute.xlu0 %7560 }
0x223d   :  { %v14754_v57 = vsel %vm372_vm9, %v7559_v32, %v7561_v41  ;;  %v14761_v11 = vsel %vm372_vm9, %v7561_v41, %v14751_v50 }
0x223e   :  { %7598 = vrot.lane.b32.xlu1 %v7437_v38, %s8482_s0 }
0x2240   :  { %v14796_v30 = vpop.permute.xlu0 %7564 }
0x2242   :  { %7596 = vrot.lane.b32.xlu1 %v7436_v25, %s8482_s0 }
0x2244   :  { %v7639_v48 = vpop.permute.xlu0 %7638 }
0x2246   :  { %7586 = vrot.lane.b32.xlu1 %v7418_v27, %s8482_s0 }
0x2248   :  { %v7611_v52 = vpop.permute.xlu0 %7610 }
0x224a   :  { %7570 = vrot.lane.b32.xlu1 %v7397_v28, %s8482_s0 }
0x224c   :  { %v7655_v44 = vpop.permute.xlu0 %7654 }
0x224e   :  { %7568 = vrot.lane.b32.xlu1 %v7396_v37, %s8482_s0 }
0x2250   :  { %v7641_v31 = vpop.permute.xlu0 %7640 }
0x2251   :  { %v7716_v59 = vsel %vm372_vm9, %v7639_v48, %v7641_v31 }
0x2252   :  { %7658 = vrot.lane.b32.xlu1 %v7518_v61, %s8482_s0 }
0x2254   :  { %v14813_v35 = vpop.permute.xlu0 %7628 }
0x2256   :  { %7668 = vrot.lane.b32.xlu1 %v7536_v7, %s8482_s0 }
0x2258   :  { %v7613_v47 = vpop.permute.xlu0 %7612 }
0x225a   :  { %7646 = vrot.lane.b32.xlu1 %v14661_v1, %s8482_s0  ;;  %v7653_v1 = vpop.permute.xlu1 %7652 }
0x225b   :  { %v7722_v22 = vsel %vm372_vm9, %v7653_v1, %v7655_v44 }
0x225c   :  { %v14821_v39 = vpop.permute.xlu0 %7600 }
0x225e   :  { %7664 = vrot.lane.b32.xlu1 %v14666_v5, %s8482_s0  ;;  %v7541_v5 = vsel %vm228_vm7, %v14721_v15, %v7535_v36  ;;  %v7704_v36 = vsel %vm372_vm9, %v7611_v52, %v7613_v47 }
0x2262   :  { %7632 = vrot.lane.b32.xlu1 %v14671_v60, %s8482_s0  ;;  %v7585_v60 = vpop.permute.xlu0 %7584 }
0x2266   :  { %7650 = vrot.lane.b32.xlu1 %v14676_v58, %s8482_s0  ;;  %v7625_v58 = vpop.permute.xlu1 %7624 }
0x226a   :  { %7618 = vrot.lane.b32.xlu1 %v14682_v16, %s8482_s0 }
0x226b   :  { %v7667_v16 = vpop.permute.xlu1 %7666 }
0x226e   :  { %7636 = vrot.lane.b32.xlu1 %v14687_v42, %s8482_s0  ;;  %v7583_v42 = vpop.permute.xlu0 %7582 }
0x226f   :  { %v7692_v55 = vsel %vm372_vm9, %v7583_v42, %v7585_v60 }
0x2272   :  { %7604 = vrot.lane.b32.xlu1 %v14693_v19, %s8482_s0  ;;  %v14829_v43 = vpop.permute.xlu0 %7572 }
0x2276   :  { %7590 = vrot.lane.b32.xlu1 %v14699_v53, %s8482_s0 }
0x227a   :  { %7576 = vrot.lane.b32.xlu1 %v14708_v6, %s8482_s0 }
0x227e   :  { %7566 = vrot.lane.b32.xlu1 %v14531_v33, %s8482_s0  ;;  %v14833_v33 = vpop.permute.xlu0 %7660 }
0x2282   :  { %7674 = vrot.lane.b32.xlu1 %v7539_v12, %s8482_s0  ;;  %v14839_v34 = vpop.permute.xlu0 %7670 }
0x2286   :  { %7678 = vrot.lane.b32.xlu1 %v7541_v5, %s8482_s0  ;;  %v7645_v6 = vpop.permute.xlu0 %7644 }
0x228a   :  { %v7663_v12 = vpop.permute.xlu0 %7662 }
0x228b   :  { %v7726_v42 = vsel %vm372_vm9, %v14833_v33, %v7663_v12 }
0x228c   :  { %v14827_v19 = vpop.permute.xlu1 %7622 }
0x228e   :  { %v7631_v8 = vpop.permute.xlu0 %7630 }
0x2292   :  { %v7649_v54 = vpop.permute.xlu0 %7648 }
0x2293   :  { %v14831_v13 = vpop.permute.xlu1 %7608 }
0x2296   :  { %v7617_v41 = vpop.permute.xlu0 %7616 }
0x2298   :  { %v14835_v53 = vpop.permute.xlu1 %7594 }
0x229a   :  { %v7635_v37 = vpop.permute.xlu0 %7634 }
0x229c   :  { %v14837_v49 = vpop.permute.xlu1 %7580 }
0x229e   :  { %v7603_v52 = vpop.permute.xlu0 %7602 }
0x22a0   :  { %v7657_v51 = vpop.permute.xlu1 %7656 }
0x22a1   :  { %v7723_v9 = vsel %vm372_vm9, %v7655_v44, %v7657_v51 }
0x22a2   :  { %7791 = vmatprep.subr.bf16.mxu0 %v7723_v9 }
0x22a3   :  { %7792 = vmatpush1.bf16.msra.mxu0 %v7722_v22 }
0x22a4   :  { %v7643_v26 = vpop.permute.xlu1 %7642 }
0x22a5   :  { %v7717_v40 = vsel %vm372_vm9, %v7641_v31, %v7643_v26 }
0x22a6   :  { %7793 = vmatprep.subr.bf16.mxu0 %v7717_v40 }
0x22a7   :  { %7794 = vmatpush1.bf16.msra.mxu0 %v7716_v59 }
0x22a8   :  { %v7627_v46 = vpop.permute.xlu1 %7626 }
0x22a9   :  { %v7710_v56 = vsel %vm372_vm9, %v7625_v58, %v7627_v46  ;;  %v7711_v2 = vsel %vm372_vm9, %v7627_v46, %v14813_v35 }
0x22aa   :  { %7795 = vmatprep.subr.bf16.mxu0 %v7711_v2 }
0x22ab   :  { %7796 = vmatpush1.bf16.msra.mxu0 %v7710_v56 }
0x22ac   :  { %v14848_v63 = vpop.permute.xlu1 %7614 }
0x22ad   :  { %v7705_v15 = vsel %vm372_vm9, %v7613_v47, %v14848_v63  ;;  %v7706_v56 = vsel %vm372_vm9, %v14848_v63, %v7617_v41  ;;  %v7700_v63 = vsel %vm372_vm9, %v14821_v39, %v7603_v52 }
0x22ae   :  { %7797 = vmatprep.subr.bf16.mxu0 %v7705_v15 }
0x22af   :  { %7798 = vmatpush1.bf16.msra.mxu0 %v7704_v36 }
0x22b0   :  { %v7599_v14 = vpop.permute.xlu1 %7598 }
0x22b1   :  { %v7699_v32 = vsel %vm372_vm9, %v7599_v14, %v14821_v39 }
0x22b2   :  { %7799 = vmatprep.subr.bf16.mxu0 %v7699_v32 }
0x22b4   :  { %v7597_v10 = vpop.permute.xlu1 %7596 }
0x22b5   :  { %v7698_v0 = vsel %vm372_vm9, %v7597_v10, %v7599_v14 }
0x22b6   :  { %7800 = vmatpush1.bf16.msra.mxu0 %v7698_v0 }
0x22b8   :  { %v14856_v62 = vpop.permute.xlu1 %7586 }
0x22b9   :  { %v7693_v21 = vsel %vm372_vm9, %v7585_v60, %v14856_v62  ;;  %v7718_v60 = vsel %vm372_vm9, %v7643_v26, %v7645_v6 }
0x22ba   :  { %7801 = vmatprep.subr.bf16.mxu0 %v7693_v21 }
0x22bb   :  { %7802 = vmatpush1.bf16.msra.mxu0 %v7692_v55 }
0x22bc   :  { %v7571_v38 = vpop.permute.xlu1 %7570 }
0x22bd   :  { %v7687_v25 = vsel %vm372_vm9, %v7571_v38, %v14829_v43 }
0x22be   :  { %7803 = vmatprep.subr.bf16.mxu0 %v7687_v25 }
0x22c0   :  { %v7569_v27 = vpop.permute.xlu1 %7568 }
0x22c1   :  { %v7686_v28 = vsel %vm372_vm9, %v7569_v27, %v7571_v38 }
0x22c2   :  { %7804 = vmatpush1.bf16.msra.mxu0 %v7686_v28 }
0x22c3   :  { %7805 = vmatprep.subr.bf16.mxu0 %v14737_v24  ;;  %v14875_v24 = vld [vmem:[%s15063_s1 + $0xa0] ss:$8 sps:$4 sm:$0xff]  }
0x22c4   :  { %v7659_v61 = vpop.permute.xlu1 %7658 }
0x22c5   :  { %v7724_v7 = vsel %vm372_vm9, %v7657_v51, %v7659_v61  ;;  %v7725_v48 = vsel %vm372_vm9, %v7659_v61, %v14833_v33 }
0x22c6   :  { %7806 = vmatpush1.bf16.msra.mxu0 %v14744_v4  ;;  %7834 = vmatprep.subr.bf16.mxu1 %v7725_v48  ;;  %v7621_v4 = vpop.permute.xlu0 %7620 }
0x22c7   :  { %7835 = vmatpush1.bf16.msra.mxu1 %v7724_v7  ;;  %v7709_v36 = vsel %vm372_vm9, %v7621_v4, %v14827_v19 }
0x22c8   :  { %v7669_v44 = vpop.permute.xlu1 %7668 }
0x22c9   :  { %v7728_v31 = vsel %vm372_vm9, %v7667_v16, %v7669_v44  ;;  %v7729_v47 = vsel %vm372_vm9, %v7669_v44, %v14839_v34 }
0x22ca   :  { %7821 = vmatprep.subr.bf16.mxu0 %v7729_v47  ;;  %v7589_v51 = vpop.permute.xlu0 %7588 }
0x22cb   :  { %7822 = vmatpush2.bf16.msra.mxu0 %v7728_v31  ;;  %v7694_v21 = vsel %vm372_vm9, %v14856_v62, %v7589_v51 }
0x22cc   :  { %v7647_v1 = vpop.permute.xlu1 %7646 }
0x22cd   :  { %v7719_v5 = vsel %vm372_vm9, %v7645_v6, %v7647_v1  ;;  %v7712_v6 = vsel %vm372_vm9, %v14813_v35, %v7631_v8  ;;  %v7720_v59 = vsel %vm372_vm9, %v7647_v1, %v7649_v54 }
0x22ce   :  { %7836 = vmatprep.subr.bf16.mxu1 %v7719_v5  ;;  %7824 = vmatmul.mubr.bf16.vlgmr.msra.gmra.mxu0 %v14875_v24  ;;  %v7607_v40 = vpop.permute.xlu0 %7606 }
0x22cf   :  { %7837 = vmatpush1.bf16.msra.mxu1 %v7718_v60  ;;  %8326 = vmatprep.mubr.msk.bf16.mxu0 %vm481_vm8, %v14783_v17  ;;  %v7703_v0 = vsel %vm372_vm9, %v7607_v40, %v14831_v13 }
0x22d0   :  { %v7665_v58 = vpop.permute.xlu1 %7664 }
0x22d1   :  { %v7727_v16 = vsel %vm372_vm9, %v7663_v12, %v7665_v58 }
0x22d2   :  { %7877 = vmatprep.subr.bf16.mxu0 %v7727_v16  ;;  %v7575_v2 = vpop.permute.xlu0 %7574 }
0x22d3   :  { %7878 = vmatpush1.bf16.msra.mxu0 %v7726_v42  ;;  %v7688_v25 = vsel %vm372_vm9, %v14829_v43, %v7575_v2 }
0x22d4   :  { %v7633_v9 = vpop.permute.xlu1 %7632 }
0x22d5   :  { %v7713_v22 = vsel %vm372_vm9, %v7631_v8, %v7633_v9  ;;  %v7714_v15 = vsel %vm372_vm9, %v7633_v9, %v7635_v37 }
0x22d6   :  { %7838 = vmatprep.subr.bf16.mxu1 %v7713_v22  ;;  %v7593_v32 = vpop.permute.xlu0 %7592 }
0x22d7   :  { %7839 = vmatpush1.bf16.msra.mxu1 %v7712_v6  ;;  %v7697_v39 = vsel %vm372_vm9, %v7593_v32, %v14835_v53 }
0x22d8   :  { %v7651_v26 = vpop.permute.xlu1 %7650 }
0x22d9   :  { %v7721_v17 = vsel %vm372_vm9, %v7649_v54, %v7651_v26 }
0x22da   :  { %7879 = vmatprep.subr.bf16.mxu0 %v7721_v17 }
0x22db   :  { %7880 = vmatpush1.bf16.msra.mxu0 %v7720_v59 }
0x22dc   :  { %v7619_v33 = vpop.permute.xlu1 %7618 }
0x22dd   :  { %v7707_v46 = vsel %vm372_vm9, %v7617_v41, %v7619_v33  ;;  %v7708_v10 = vsel %vm372_vm9, %v7619_v33, %v7621_v4  ;;  %v7579_v41 = vpop.permute.xlu0 %7578 }
0x22de   :  { %7840 = vmatprep.subr.bf16.mxu1 %v7707_v46  ;;  %v7691_v62 = vsel %vm372_vm9, %v7579_v41, %v14837_v49  ;;  %v7684_v49 = vsel %vm372_vm9, %v14751_v50, %v14796_v30 }
0x22df   :  { %7841 = vmatpush1.bf16.msra.mxu1 %v7706_v56 }
0x22e0   :  { %v7637_v35 = vpop.permute.xlu1 %7636 }
0x22e1   :  { %v7715_v12 = vsel %vm372_vm9, %v7635_v37, %v7637_v35  ;;  %v7673_v28 = vpop.permute.xlu0 %7672 }
0x22e2   :  { %7881 = vmatprep.subr.bf16.mxu0 %v7715_v12 }
0x22e3   :  { %7882 = vmatpush1.bf16.msra.mxu0 %v7714_v15 }
0x22e4   :  { %7883 = vmatprep.subr.bf16.mxu0 %v7709_v36  ;;  %v7605_v8 = vpop.permute.xlu1 %7604 }
0x22e5   :  { %v7701_v14 = vsel %vm372_vm9, %v7603_v52, %v7605_v8  ;;  %v7702_v55 = vsel %vm372_vm9, %v7605_v8, %v7607_v40  ;;  %v7677_v48 = vpop.permute.xlu0 %7676 }
0x22e6   :  { %7842 = vmatprep.subr.bf16.mxu1 %v7701_v14 }
0x22e7   :  { %7843 = vmatpush1.bf16.msra.mxu1 %v7700_v63  ;;  %7884 = vmatpush1.bf16.msra.mxu0 %v7708_v10 }
0x22e8   :  { %7885 = vmatprep.subr.bf16.mxu0 %v7703_v0  ;;  %v7591_v54 = vpop.permute.xlu1 %7590 }
0x22e9   :  { %v7695_v19 = vsel %vm372_vm9, %v7589_v51, %v7591_v54  ;;  %v7696_v27 = vsel %vm372_vm9, %v7591_v54, %v7593_v32 }
0x22ea   :  { %7844 = vmatprep.subr.bf16.mxu1 %v7695_v19 }
0x22eb   :  { %7845 = vmatpush1.bf16.msra.mxu1 %v7694_v21  ;;  %7886 = vmatpush1.bf16.msra.mxu0 %v7702_v55 }
0x22ec   :  { %7887 = vmatprep.subr.bf16.mxu0 %v7697_v39  ;;  %v7577_v38 = vpop.permute.xlu1 %7576 }
0x22ed   :  { %v7689_v13 = vsel %vm372_vm9, %v7575_v2, %v7577_v38  ;;  %v7690_v37 = vsel %vm372_vm9, %v7577_v38, %v7579_v41 }
0x22ee   :  { %7846 = vmatprep.subr.bf16.mxu1 %v7689_v13 }
0x22ef   :  { %7847 = vmatpush1.bf16.msra.mxu1 %v7688_v25  ;;  %7888 = vmatpush1.bf16.msra.mxu0 %v7696_v27 }
0x22f0   :  { %7848 = vmatprep.subr.bf16.mxu1 %v14761_v11  ;;  %7889 = vmatprep.subr.bf16.mxu0 %v7691_v62  ;;  %v7567_v53 = vpop.permute.xlu1 %7566  ;;  %v7730_v11 = vsel %vm372_vm9, %v14839_v34, %v7673_v28 }
0x22f1   :  { %v7685_v43 = vsel %vm372_vm9, %v14796_v30, %v7567_v53 }
0x22f3   :  { %7849 = vmatpush1.bf16.msra.mxu1 %v14754_v57  ;;  %7890 = vmatpush1.bf16.msra.mxu0 %v7690_v37 }
0x22f4   :  { %7891 = vmatprep.subr.bf16.mxu0 %v7685_v43  ;;  %v7675_v61 = vpop.permute.xlu1 %7674 }
0x22f5   :  { %v7731_v7 = vsel %vm372_vm9, %v7673_v28, %v7675_v61  ;;  %v7732_v44 = vsel %vm372_vm9, %v7675_v61, %v7677_v48 }
0x22f6   :  { %7864 = vmatprep.subr.bf16.mxu1 %v7731_v7 }
0x22f7   :  { %7865 = vmatpush2.bf16.msra.mxu1 %v7730_v11  ;;  %7892 = vmatpush1.bf16.msra.mxu0 %v7684_v49 }
0x22f8   :  { %v7679_v57 = vpop.permute.xlu1 %7678 }
0x22f9   :  { %v7733_v52 = vsel %vm372_vm9, %v7677_v48, %v7679_v57 }
0x22fa   :  { %7867 = vmatmul.mubr.bf16.vlgmr.msra.gmra.mxu1 %v14875_v24  ;;  %7907 = vmatprep.subr.bf16.mxu0 %v7733_v52 }
0x22fb   :  { %7908 = vmatpush2.bf16.msra.mxu0 %v7732_v44 }
0x22fe   :  { %7910 = vmatmul.mubr.bf16.vlgmr.msra.gmra.mxu0 %v14875_v24 }
0x238e   :  { %v14930_v31 = vpop.f32.mrf.mxu0 }
0x238f   :  { %v7920_v34 = vmul.f32 %v14930_v31, %v9132_v20 }
0x2390   :  { %v14932_v50 = vpop.f32.mrf.mxu0 }
0x2391   :  { %v7921_v47 = vmul.f32 %v14932_v50, %v9134_v23  ;;  %v7948_v4 = vmul.f32 %v7920_v34, %v14930_v31 }
0x2392   :  { %v14934_v30 = vpop.f32.mrf.mxu0 }
0x2393   :  { %v7926_v5 = vmul.f32 %v14934_v30, %v9132_v20  ;;  %v7949_v60 = vmul.f32 %v7921_v47, %v14932_v50  ;;  %v7932_v16 = vadd.f32 %v7921_v47, %v7920_v34 }
0x2394   :  { %v14940_v1 = vpop.f32.mrf.mxu0 }
0x2395   :  { %v7927_v24 = vmul.f32 %v14940_v1, %v9134_v23  ;;  %v7954_v51 = vmul.f32 %v7926_v5, %v14934_v30  ;;  %v7960_v6 = vadd.f32 %v7949_v60, %v7948_v4 }
0x2397   :  { %v7955_v9 = vmul.f32 %v7927_v24, %v14940_v1  ;;  %v7939_v59 = vadd.f32 %v7927_v24, %v7926_v5 }
0x2399   :  { %v7967_v15 = vadd.f32 %v7955_v9, %v7954_v51 }
0x23ba   :  { %v14948_v58 = vpop.f32.mrf.mxu1 }
0x23bb   :  { %v7922_v42 = vmul.f32 %v14948_v58, %v9138_v29 }
0x23bc   :  { %v14954_v22 = vpop.f32.mrf.mxu1 }
0x23bd   :  { %v7933_v26 = vadd.f32 %v7932_v16, %v7922_v42  ;;  %v7950_v17 = vmul.f32 %v7922_v42, %v14948_v58  ;;  %v7923_v40 = vmul.f32 %v14954_v22, %v9152_v45 }
0x23be   :  { %v14959_v33 = vpop.f32.mrf.mxu1  ;;  %v14961_v46 = vpop.f32.mrf.mxu0 }
0x23bf   :  { %v7961_v56 = vadd.f32 %v7960_v6, %v7950_v17  ;;  %v7934_v2 = vadd.f32 %v7933_v26, %v7923_v40  ;;  %v7951_v35 = vmul.f32 %v7923_v40, %v14954_v22  ;;  %v7928_v12 = vmul.f32 %v14959_v33, %v9138_v29 }
0x23c0   :  { %v7924_v36 = vmul.f32 %v14961_v46, %v9171_v18  ;;  %v14968_v8 = vpop.f32.mrf.mxu1  ;;  %v14970_v14 = vpop.f32.mrf.mxu0 }
0x23c1   :  { %v7962_v63 = vadd.f32 %v7961_v56, %v7951_v35  ;;  %v7940_v32 = vadd.f32 %v7939_v59, %v7928_v12  ;;  %v7956_v10 = vmul.f32 %v7928_v12, %v14959_v33  ;;  %v7929_v0 = vmul.f32 %v14968_v8, %v9152_v45  ;;  %v8327_v59 = vld [vmem:[%s15065_s2 + $0xa0] sm:$0xff]  ;;  %v8328_v12 = vld [vmem:[%s15065_s2 + $0xa8] sm:$0xff] }
0x23c2   :  { %v7935_v54 = vadd.f32 %v7934_v2, %v7924_v36  ;;  %v7952_v19 = vmul.f32 %v7924_v36, %v14961_v46  ;;  %v7925_v21 = vmul.f32 %v14970_v14, %v9177_v3  ;;  %v14978_v55 = vpop.f32.mrf.mxu0  ;;  %v8329_v35 = vld [vmem:[%s15066_s3 + $0xa0] sm:$0xff] }
0x23c3   :  { %v7968_v39 = vadd.f32 %v7967_v15, %v7956_v10  ;;  %v7941_v41 = vadd.f32 %v7940_v32, %v7929_v0  ;;  %v7957_v38 = vmul.f32 %v7929_v0, %v14968_v8  ;;  %v7930_v13 = vmul.f32 %v14978_v55, %v9171_v18  ;;  %v8330_v10 = vld [vmem:[%s15066_s3 + $0xa8] sm:$0xff] }
0x23c4   :  { %v7963_v25 = vadd.f32 %v7962_v63, %v7952_v19  ;;  %v7953_v27 = vmul.f32 %v7925_v21, %v14970_v14  ;;  %v14984_v62 = vpop.f32.mrf.mxu0  ;;  %v7936_v53 = vadd.f32 %v7935_v54, %v7925_v21 }
0x23c5   :  { %v7969_v28 = vadd.f32 %v7968_v39, %v7957_v38  ;;  %v7942_v37 = vadd.f32 %v7941_v41, %v7930_v13  ;;  %v7958_v43 = vmul.f32 %v7930_v13, %v14978_v55  ;;  %v7931_v61 = vmul.f32 %v14984_v62, %v9177_v3 }
0x23c6   :  { %7937 = vadd.xlane.f32.xlu0 %v7936_v53  ;;  %v7964_v48 = vadd.f32 %v7963_v25, %v7953_v27 }
0x23c7   :  { %v7943_v7 = vadd.f32 %v7942_v37, %v7931_v61  ;;  %v7970_v49 = vadd.f32 %v7969_v28, %v7958_v43  ;;  %v7959_v11 = vmul.f32 %v7931_v61, %v14984_v62 }
0x23c9   :  { %7944 = vadd.xlane.f32.xlu1 %v7943_v7  ;;  %v7971_v57 = vadd.f32 %v7970_v49, %v7959_v11 }
0x23ca   :  { %7965 = vadd.xlane.f32.xlu0 %v7964_v48 }
0x23ce   :  { %7972 = vadd.xlane.f32.xlu0 %v7971_v57 }
0x244f   :  { %v7938_v52 = vpop.xlane.xlu0 %7937 }
0x2450   :  { %v7946_v44 = vmul.f32 0.001953125, %v7938_v52 }
0x2452   :  { %v7945_v34 = vpop.xlane.xlu1 %7944  ;;  %v7976_v5 = vmul.f32 %v7946_v44, %v7946_v44 }
0x2453   :  { %v7966_v47 = vpop.xlane.xlu0 %7965  ;;  %v7947_v4 = vmul.f32 0.001953125, %v7945_v34 }
0x2454   :  { %v7974_v24 = vmul.f32 0.001953125, %v7966_v47 }
0x2455   :  { %v7977_v51 = vmul.f32 %v7947_v4, %v7947_v4 }
0x2456   :  { %v7978_v60 = vsub.f32 %v7974_v24, %v7976_v5 }
0x2457   :  { %v7973_v16 = vpop.xlane.xlu0 %7972 }
0x2458   :  { %v7980_v42 = vmax.f32 %v7978_v60, 0.0  ;;  %v7975_v9 = vmul.f32 0.001953125, %v7973_v16 }
0x245a   :  { %v7985_v6 = vadd.f32 1e-05, %v7980_v42  ;;  %v7979_v26 = vsub.f32 %v7975_v9, %v7977_v51 }
0x245c   :  { %8470 = vrsqrt.f32 %v7985_v6  ;;  %v7981_v17 = vmax.f32 %v7979_v26, 0.0 }
0x245e   :  { %v7986_v40 = vadd.f32 1e-05, %v7981_v17 }
0x2460   :  { %8472 = vrsqrt.f32 %v7986_v40 }
0x2469   :  { %v8471_v56 = vpop.eup %8470 }
0x246a   :  { %v7989_v2 = vmul.f32 %v8471_v56, %v8327_v59 }
0x246c   :  { %8000 = vperm.xlu1 %8395, %v7989_v2   ;;  %v7994_v15 = vmul.f32 %v7989_v2, %v7946_v44 }
0x246d   :  { %v8473_v36 = vpop.eup %8472 }
0x246e   :  { %v7996_v63 = vsub.f32 %v8329_v35, %v7994_v15  ;;  %v7990_v32 = vmul.f32 %v8473_v36, %v8328_v12 }
0x2470   :  { %8022 = vperm.xlu1 %8395, %v7996_v63   ;;  %8005 = vperm.xlu0 %8396, %v7990_v32   ;;  %v7995_v0 = vmul.f32 %v7990_v32, %v7947_v4 }
0x2472   :  { %v7997_v54 = vsub.f32 %v8330_v10, %v7995_v0 }
0x2474   :  { %8027 = vperm.xlu1 %8395, %v7997_v54  }
0x24e7   :  { %v8001_v19 = vpop.permute.xlu1 %8000 }
0x24e8   :  { %v8008_v21 = vmul.f32 %v8001_v19, %v14930_v31  ;;  %v8009_v39 = vmul.f32 %v8001_v19, %v14932_v50  ;;  %v8010_v41 = vmul.f32 %v8001_v19, %v14948_v58  ;;  %v8011_v38 = vmul.f32 %v8001_v19, %v14954_v22 }
0x24e9   :  { %v8012_v27 = vmul.f32 %v8001_v19, %v14961_v46  ;;  %v8013_v53 = vmul.f32 %v8001_v19, %v14970_v14 }
0x24eb   :  { %v8006_v13 = vpop.permute.xlu0 %8005  ;;  %v8023_v25 = vpop.permute.xlu1 %8022 }
0x24ec   :  { %v8014_v28 = vmul.f32 %v8006_v13, %v14934_v30  ;;  %v8015_v37 = vmul.f32 %v8006_v13, %v14940_v1  ;;  %v8016_v43 = vmul.f32 %v8006_v13, %v14959_v33  ;;  %v8017_v31 = vmul.f32 %v8006_v13, %v14968_v8 }
0x24ed   :  { %v8030_v61 = vadd.f32 %v8023_v25, %v8008_v21  ;;  %v8031_v50 = vadd.f32 %v8023_v25, %v8009_v39  ;;  %v8032_v7 = vadd.f32 %v8023_v25, %v8010_v41  ;;  %v8033_v58 = vadd.f32 %v8023_v25, %v8011_v38 }
0x24ee   :  { %v8034_v49 = vadd.f32 %v8023_v25, %v8012_v27  ;;  %v8035_v22 = vadd.f32 %v8023_v25, %v8013_v53  ;;  %v8018_v11 = vmul.f32 %v8006_v13, %v14978_v55  ;;  %v8019_v46 = vmul.f32 %v8006_v13, %v14984_v62 }
0x24ef   :  { %v8042_v48 = vmax.f32 %v8030_v61, 0.0  ;;  %v8043_v14 = vmax.f32 %v8031_v50, 0.0  ;;  %v8028_v57 = vpop.permute.xlu1 %8027  ;;  %v8044_v30 = vmax.f32 %v8032_v7, 0.0  ;;  %v8045_v52 = vmax.f32 %v8033_v58, 0.0 }
0x24f0   :  { %v8046_v1 = vmax.f32 %v8034_v49, 0.0  ;;  %v8047_v44 = vmax.f32 %v8035_v22, 0.0  ;;  %v8036_v34 = vadd.f32 %v8028_v57, %v8014_v28  ;;  %v8037_v47 = vadd.f32 %v8028_v57, %v8015_v37 }
0x24f1   :  { %v8054_v33 = vmul.f32 %v8042_v48, %v9132_v20  ;;  %v8055_v8 = vmul.f32 %v8043_v14, %v9134_v23  ;;  %v8056_v5 = vmul.f32 %v8044_v30, %v9138_v29  ;;  %v8057_v24 = vmul.f32 %v8045_v52, %v9152_v45 }
0x24f2   :  { %v8058_v55 = vmul.f32 %v8046_v1, %v9171_v18  ;;  %v8059_v62 = vmul.f32 %v8047_v44, %v9177_v3  ;;  %v8038_v4 = vadd.f32 %v8028_v57, %v8016_v43  ;;  %v8039_v60 = vadd.f32 %v8028_v57, %v8017_v31 }
0x24f3   :  { %8066 = vst [vmem:[%s15067_s5] sm:$0xff] %v8054_v33  ;;  %8067 = vst [vmem:[%s15067_s5 + $0x8] sm:$0xff] %v8055_v8  ;;  %v8040_v16 = vadd.f32 %v8028_v57, %v8018_v11  ;;  %v8041_v42 = vadd.f32 %v8028_v57, %v8019_v46  ;;  %v8048_v51 = vmax.f32 %v8036_v34, 0.0  ;;  %v8049_v9 = vmax.f32 %v8037_v47, 0.0 }
0x24f4   :  { %8068 = vst [vmem:[%s15067_s5 + $0x10] sm:$0xff] %v8056_v5  ;;  %8069 = vst [vmem:[%s15067_s5 + $0x18] sm:$0xff] %v8057_v24  ;;  %v8050_v6 = vmax.f32 %v8038_v4, 0.0  ;;  %v8051_v26 = vmax.f32 %v8039_v60, 0.0 }
0x24f5   :  { %8070 = vst [vmem:[%s15067_s5 + $0x20] sm:$0xff] %v8058_v55  ;;  %8071 = vst [vmem:[%s15067_s5 + $0x28] sm:$0xff] %v8059_v62  ;;  %v8052_v17 = vmax.f32 %v8040_v16, 0.0  ;;  %v8053_v40 = vmax.f32 %v8041_v42, 0.0  ;;  %v8060_v59 = vmul.f32 %v8048_v51, %v9132_v20  ;;  %v8061_v56 = vmul.f32 %v8049_v9, %v9134_v23 }
0x24f6   :  { %v8062_v2 = vmul.f32 %v8050_v6, %v9138_v29  ;;  %v8063_v35 = vmul.f32 %v8051_v26, %v9152_v45 }
0x24f7   :  { %v8064_v12 = vmul.f32 %v8052_v17, %v9171_v18  ;;  %v8065_v15 = vmul.f32 %v8053_v40, %v9177_v3  ;;  %8072 = vst [vmem:[%s15067_s5 + $0x30] sm:$0xff] %v8060_v59  ;;  %8073 = vst [vmem:[%s15067_s5 + $0x38] sm:$0xff] %v8061_v56 }
0x24f8   :  { %8074 = vst [vmem:[%s15067_s5 + $0x40] sm:$0xff] %v8062_v2  ;;  %8075 = vst [vmem:[%s15067_s5 + $0x48] sm:$0xff] %v8063_v35 }
0x24f9   :  { %8076 = vst [vmem:[%s15067_s5 + $0x50] sm:$0xff] %v8064_v12  ;;  %8077 = vst [vmem:[%s15067_s5 + $0x58] sm:$0xff] %v8065_v15 }

</bundles_post_ra>
